<compile_context>
chip_gen: v6e
topology: v6e:2x2x1
jax: 0.10.0
libtpu: 0.0.40
codegen_flags: <defaults>
</compile_context>

<pallas_src>
import math
from functools import partial

import jax
import jax.numpy as jnp
from jax.experimental import pallas as pl
from jax.experimental.pallas import tpu as pltpu

F32 = jnp.float32


# ----------------------------- in-kernel math ------------------------------

def _erf_f32(x):
    # TODO(synk): exact-erf GELU uses the Abramowitz & Stegun 7.1.26 polynomial
    # (|err| <= 1.5e-7) instead of lax.erf to guarantee Mosaic lowering.
    a1, a2, a3 = 0.254829592, -0.284496736, 1.421413741
    a4, a5, p = -1.453152027, 1.061405429, 0.3275911
    ax = jnp.abs(x)
    t = 1.0 / (1.0 + p * ax)
    poly = ((((a5 * t + a4) * t + a3) * t + a2) * t + a1) * t
    y = 1.0 - poly * jnp.exp(-(ax * ax))
    return jnp.where(x >= 0, y, -y)


def _gelu_exact(x):
    # matches torch.nn.functional.gelu (erf form) to ~1.5e-7
    return 0.5 * x * (1.0 + _erf_f32(x * 0.7071067811865476))


def _layernorm(x, g, b, eps):
    mu = jnp.mean(x, axis=-1, keepdims=True)
    var = jnp.mean(jnp.square(x - mu), axis=-1, keepdims=True)
    return (x - mu) * jax.lax.rsqrt(var + eps) * g + b


# ------------------------------ fused kernel -------------------------------

def _vit_kernel(
    # per-program inputs / shared constants
    tok_ref,                      # (R, C*P*P) patch vectors (row 0 of each image = 0)
    pos_ref,                      # (R, d)  pos_embed with cls token & patch bias folded in
    bias_ref,                     # (R, R)  block-diagonal additive attention mask (0 / -1e30)
    sp_ref, sn_ref,               # (R, R)  block-diag shift matrices: prev / next token
    sel_ref,                      # (TB, R) one-hot cls-row selector
    # weights (per-layer weights stacked on a leading L axis)
    patch_w_ref,                  # (C*P*P, d)
    pre_w_ref, pre_b_ref,         # (L, d, d), (L, 1, d)
    n1_g_ref, n1_b_ref,           # (L, 1, d) x2
    qkv_w_ref, qkv_b_ref,         # (L, d_attn, 3*d_attn), (L, 1, 3*d_attn)
    out_w_ref, out_b_ref,         # (L, d_attn, d_attn), (L, 1, d_attn)
    c1_w_ref, c1_b_ref,           # (L, 3, d_conv, d_conv), (L, 1, d_conv)
    c2_w_ref, c2_b_ref,           # (L, 3, d_conv, d_conv), (L, 1, d_conv)
    post_w_ref, post_b_ref,       # (L, d, d), (L, 1, d)
    n2_g_ref, n2_b_ref,           # (L, 1, d) x2
    fc1_w_ref, fc1_b_ref,         # (L, d, 4d), (L, 1, 4d)
    fc2_w_ref, fc2_b_ref,         # (L, 4d, d), (L, 1, d)
    norm_g_ref, norm_b_ref,       # (1, d) x2
    head_w_ref, head_b_ref,       # (d, n_classes), (1, n_classes)
    # output
    o_ref,                        # (TB, n_classes)
    *, num_layers, num_heads, d_attn, eps,
):
    hd = d_attn // num_heads
    scale = 1.0 / math.sqrt(hd)

    def mm(a, b):
        return jnp.dot(a, b, preferred_element_type=F32)

    # Shared constants — loaded once, live in registers across all layers.
    bias = bias_ref[...]
    sp = sp_ref[...]
    sn = sn_ref[...]

    def conv1d_k3(xc, w_ref, b_ref, l):
        # PyTorch Conv1d(k=3, padding=1) over each image's token sequence:
        #   y[n] = x[n-1] @ W0 + x[n] @ W1 + x[n+1] @ W2 + b,  W_k = torch_w[:, :, k].T
        # The +-1 shifts (with per-image zero padding) come from the block-diag
        # shift matrices sp / sn.
        xp = mm(sp, xc)
        xq = mm(sn, xc)
        return (mm(xp, w_ref[l, 0]) + mm(xc, w_ref[l, 1])
                + mm(xq, w_ref[l, 2]) + b_ref[l])

    # ---- patch embedding (Conv2d k=P stride=P as matmul) + cls + pos ----
    # cls token and the Conv2d bias are pre-folded into pos_ref by the wrapper.
    x = mm(tok_ref[...], patch_w_ref[...]) + pos_ref[...]          # (R, d)
    # self.dropout -> identity (eval)

    # ---- transformer layers (static unroll; L is small here) ----
    for l in range(num_layers):
        x_pre = mm(x, pre_w_ref[l]) + pre_b_ref[l]
        xn = _layernorm(x_pre, n1_g_ref[l], n1_b_ref[l], eps)
        x_attn = xn[:, 0:d_attn]
        x_conv = xn[:, d_attn:]

        # -- attention branch (nn.MultiheadAttention, batch_first, eval) --
        qkv = mm(x_attn, qkv_w_ref[l]) + qkv_b_ref[l]              # (R, 3*d_attn)
        heads = []
        for h in range(num_heads):
            q = qkv[:, h * hd:(h + 1) * hd]
            k = qkv[:, d_attn + h * hd:d_attn + (h + 1) * hd]
            v = qkv[:, 2 * d_attn + h * hd:2 * d_attn + (h + 1) * hd]
            s = jax.lax.dot_general(
                q, k, (((1,), (1,)), ((), ())), preferred_element_type=F32
            ) * scale + bias                                        # (R, R), block-diag
            m = jnp.max(s, axis=-1, keepdims=True)
            e = jnp.exp(s - m)
            p = e / jnp.sum(e, axis=-1, keepdims=True)              # exact divide
            heads.append(mm(p, v))
        attn_cat = heads[0] if num_heads == 1 else jnp.concatenate(heads, axis=-1)
        attn_out = mm(attn_cat, out_w_ref[l]) + out_b_ref[l]

        # -- conv branch: Conv1d(k3) -> GELU -> Conv1d(k3) over the sequence --
        c = conv1d_k3(x_conv, c1_w_ref, c1_b_ref, l)
        c = _gelu_exact(c)
        c = conv1d_k3(c, c2_w_ref, c2_b_ref, l)

        # -- merge, residual, FFN (dropout1/dropout2/dropout_ffn = identity) --
        comb = jnp.concatenate([attn_out, c], axis=-1)
        x = x_pre + mm(comb, post_w_ref[l]) + post_b_ref[l]
        ff = _layernorm(x, n2_g_ref[l], n2_b_ref[l], eps)
        h1 = _gelu_exact(mm(ff, fc1_w_ref[l]) + fc1_b_ref[l])
        x = x + mm(h1, fc2_w_ref[l]) + fc2_b_ref[l]

    # ---- final norm + classifier head, cls rows only ----
    cls_x = mm(sel_ref[...], x)                                     # (TB, d)
    cls_n = _layernorm(cls_x, norm_g_ref[...], norm_b_ref[...], eps)
    # classifier_dropout -> identity (eval)
    o_ref[...] = (mm(cls_n, head_w_ref[...]) + head_b_ref[...]).astype(o_ref.dtype)


# ------------------------------ model wrapper -------------------------------

def vit_forward(params, x, *, batch_tile=None):
    # x: (B, 3, 64, 64) NCHW, like PyTorch
    B, C, H, W = x.shape
    P = params["patch_size"]
    d = params["d_model"]
    L = params["num_layers"]
    num_heads = params["num_heads"]
    d_attn = d // 2                      # split_ratio = 0.5
    nh, nw = H // P, W // P
    n_patches = nh * nw
    N = n_patches + 1
    CPP = C * P * P
    n_classes = params["fc_w"].shape[-1]

    # --- choose the batch tile: maximize rows per program (<=128) while
    # keeping >= 2 programs (both v7x TensorCores busy). ---
    if batch_tile is None:
        TB = 1
        for t in range(1, B + 1):
            if B % t != 0 or t * N > 128:
                continue
            if B >= 2 and B // t < 2:
                continue
            TB = t
    else:
        TB = batch_tile
    assert B % TB == 0
    G = B // TB
    R = TB * N

    # --- layout plumbing in the wrapper (constant / one-time tensors) ---
    # PatchEmbedding: Conv2d(k=P, stride=P) == per-patch linear projection.
    patches = (
        x.reshape(B, C, nh, P, nw, P)
        .transpose(0, 2, 4, 1, 3, 5)      # (B, nh, nw, C, P, P)
        .reshape(B, n_patches, CPP)
    )
    # Prepend a zero "patch" per image for the cls slot -> flat (B*N, CPP) rows.
    tok_in = jnp.concatenate(
        [jnp.zeros((B, 1, CPP), patches.dtype), patches], axis=1
    ).reshape(B * N, CPP)

    # Fold cls token and the Conv2d bias into a per-row positional tensor:
    #   row 0 of each image: pos[0] + cls ;  rows 1..: pos[n] + patch_bias
    pos_adj = jnp.concatenate(
        [params["pos_embed"][0:1] + params["cls_token"],
         params["pos_embed"][1:] + params["patch_b"]], axis=0)      # (N, d)
    pos_full = jnp.tile(pos_adj, (TB, 1)).astype(F32)               # (R, d)

    ids = jnp.arange(R, dtype=jnp.int32)
    img = ids // N
    seq = ids % N
    # Block-diagonal additive attention mask (keeps images independent).
    attn_bias = jnp.where(img[:, None] == img[None, :], 0.0, -1e30).astype(F32)
    # Block-diagonal sequence-shift matrices for Conv1d(k=3, padding=1):
    #   (s_prev @ x)[r] = x[r-1] within an image, 0 at each image's first row
    #   (s_next @ x)[r] = x[r+1] within an image, 0 at each image's last row
    s_prev = ((ids[:, None] == ids[None, :] + 1) & (seq != 0)[:, None]).astype(F32)
    s_next = ((ids[:, None] + 1 == ids[None, :]) & (seq != N - 1)[:, None]).astype(F32)
    # One-hot selector of the TB cls rows.
    sel = (ids[None, :] == (jnp.arange(TB, dtype=jnp.int32) * N)[:, None]).astype(F32)

    weight_names = [
        "patch_w",
        "pre_w", "pre_b", "n1_g", "n1_b",
        "qkv_w", "qkv_b", "out_w", "out_b",
        "conv1_w", "conv1_b", "conv2_w", "conv2_b",
        "post_w", "post_b", "n2_g", "n2_b",
        "fc1_w", "fc1_b", "fc2_w", "fc2_b",
        "norm_g", "norm_b", "fc_w", "fc_b",
    ]
    weights = [params[n] for n in weight_names]
    aux = [pos_full, attn_bias, s_prev, s_next, sel]

    def _full_spec(a):
        return pl.BlockSpec(a.shape, lambda g, nd=a.ndim: (0,) * nd)

    in_specs = [pl.BlockSpec((R, CPP), lambda g: (g, 0))]
    in_specs += [_full_spec(a) for a in aux]
    in_specs += [_full_spec(a) for a in weights]

    kernel = partial(
        _vit_kernel,
        num_layers=L, num_heads=num_heads, d_attn=d_attn,
        eps=1e-6,   # nn.LayerNorm(eps=1e-06) in the module
    )

    out = pl.pallas_call(
        kernel,
        out_shape=jax.ShapeDtypeStruct((B, n_classes), x.dtype),
        grid=(G,),
        in_specs=in_specs,
        out_specs=pl.BlockSpec((TB, n_classes), lambda g: (g, 0)),
        compiler_params=pltpu.CompilerParams(
            dimension_semantics=("parallel",),
            vmem_limit_bytes=32 * 1024 * 1024,
        ),
    )(tok_in, *aux, *weights)
    return out


# ------------------------- deterministic parameters ------------------------

def init_params(key, d_model, num_layers, num_heads, num_classes,
                patch_size=32, in_ch=3, img=64):
    d_attn = d_model // 2
    d_conv = d_model - d_attn
    std = 0.02
    n_patches = (img // patch_size) ** 2
    N = n_patches + 1
    L = num_layers

    keys = iter(jax.random.split(key, 32))

    def w(shape):
        # deterministic stand-in for trunc_normal_(std=0.02)
        return jax.random.normal(next(keys), shape, F32) * std

    zeros = lambda *s: jnp.zeros(s, F32)
    ones = lambda *s: jnp.ones(s, F32)

    return dict(
        d_model=d_model, num_heads=num_heads, num_layers=num_layers,
        patch_size=patch_size,
        # Conv2d(k=P, stride=P) weight (d,3,P,P) flattened/transposed to (3*P*P, d).
        patch_w=w((in_ch * patch_size * patch_size, d_model)),
        patch_b=zeros(1, d_model),
        cls_token=w((1, d_model)),
        pos_embed=w((N, d_model)),
        # --- per-layer weights, stacked on a leading num_layers axis ---
        pre_w=w((L, d_model, d_model)), pre_b=zeros(L, 1, d_model),
        n1_g=ones(L, 1, d_model), n1_b=zeros(L, 1, d_model),
        # MHA in_proj stored (in, out) = (d_attn, 3*d_attn) == torch in_proj_weight.T
        qkv_w=w((L, d_attn, 3 * d_attn)), qkv_b=zeros(L, 1, 3 * d_attn),
        out_w=w((L, d_attn, d_attn)), out_b=zeros(L, 1, d_attn),
        # Conv1d(k=3) weights stored per tap: conv_w[l, k] == torch_weight[:, :, k].T
        conv1_w=w((L, 3, d_conv, d_conv)), conv1_b=zeros(L, 1, d_conv),
        conv2_w=w((L, 3, d_conv, d_conv)), conv2_b=zeros(L, 1, d_conv),
        post_w=w((L, d_model, d_model)), post_b=zeros(L, 1, d_model),
        n2_g=ones(L, 1, d_model), n2_b=zeros(L, 1, d_model),
        fc1_w=w((L, d_model, 4 * d_model)), fc1_b=zeros(L, 1, 4 * d_model),
        fc2_w=w((L, 4 * d_model, d_model)), fc2_b=zeros(L, 1, d_model),
        norm_g=ones(1, d_model), norm_b=zeros(1, d_model),
        fc_w=w((d_model, num_classes)), fc_b=zeros(1, num_classes),
    )


# ---------------------------------- main -----------------------------------

if __name__ == "__main__":
    key = jax.random.PRNGKey(0)
    pkey, xkey = jax.random.split(key)

    d_model, num_layers, num_heads, num_classes, patch_size = 32, 2, 2, 10, 32
    params = init_params(pkey, d_model, num_layers, num_heads, num_classes,
                         patch_size=patch_size)

    # 64x64 inputs as implied by the module (height = width = 64, 3 channels).
    # B=16 -> batch tile TB=8 (40 token rows per program), grid of 2 programs.
    B = 16
    x = jax.random.normal(xkey, (B, 3, 64, 64), F32)
    out = vit_forward(params, x)
    out = jax.block_until_ready(out)
    assert out.shape == (B, num_classes), out.shape
    assert bool(jnp.all(jnp.isfinite(out)))
    print("KERNEL_OK")
</pallas_src>

<mosaic_0001>
module attributes {stable_mosaic.version = 11 : i64} {
  func.func @_vit_kernel(%arg0: i32, %arg1: memref<40x3072xf32, #tpu.memory_space<vmem>>, %arg2: memref<40x32xf32, #tpu.memory_space<vmem>>, %arg3: memref<40x40xf32, #tpu.memory_space<vmem>>, %arg4: memref<40x40xf32, #tpu.memory_space<vmem>>, %arg5: memref<40x40xf32, #tpu.memory_space<vmem>>, %arg6: memref<8x40xf32, #tpu.memory_space<vmem>>, %arg7: memref<3072x32xf32, #tpu.memory_space<vmem>>, %arg8: memref<2x32x32xf32, #tpu.memory_space<vmem>>, %arg9: memref<2x1x32xf32, #tpu.memory_space<vmem>>, %arg10: memref<2x1x32xf32, #tpu.memory_space<vmem>>, %arg11: memref<2x1x32xf32, #tpu.memory_space<vmem>>, %arg12: memref<2x16x48xf32, #tpu.memory_space<vmem>>, %arg13: memref<2x1x48xf32, #tpu.memory_space<vmem>>, %arg14: memref<2x16x16xf32, #tpu.memory_space<vmem>>, %arg15: memref<2x1x16xf32, #tpu.memory_space<vmem>>, %arg16: memref<2x3x16x16xf32, #tpu.memory_space<vmem>>, %arg17: memref<2x1x16xf32, #tpu.memory_space<vmem>>, %arg18: memref<2x3x16x16xf32, #tpu.memory_space<vmem>>, %arg19: memref<2x1x16xf32, #tpu.memory_space<vmem>>, %arg20: memref<2x32x32xf32, #tpu.memory_space<vmem>>, %arg21: memref<2x1x32xf32, #tpu.memory_space<vmem>>, %arg22: memref<2x1x32xf32, #tpu.memory_space<vmem>>, %arg23: memref<2x1x32xf32, #tpu.memory_space<vmem>>, %arg24: memref<2x32x128xf32, #tpu.memory_space<vmem>>, %arg25: memref<2x1x128xf32, #tpu.memory_space<vmem>>, %arg26: memref<2x128x32xf32, #tpu.memory_space<vmem>>, %arg27: memref<2x1x32xf32, #tpu.memory_space<vmem>>, %arg28: memref<1x32xf32, #tpu.memory_space<vmem>>, %arg29: memref<1x32xf32, #tpu.memory_space<vmem>>, %arg30: memref<32x10xf32, #tpu.memory_space<vmem>>, %arg31: memref<1x10xf32, #tpu.memory_space<vmem>>, %arg32: memref<8x10xf32, #tpu.memory_space<vmem>>) attributes {dimension_semantics = [#tpu.dimension_semantics<parallel>], iteration_bounds = array<i64: 2>, scalar_prefetch = 0 : i64, scratch_operands = 0 : i64, tpu.core_type = #tpu.core_type<tc>, window_params = [{transform_indices = @transform_0, window_bounds = array<i64: 40, 3072>}, {pipeline_mode = #tpu.pipeline_mode<synchronous>, transform_indices = @transform_1, window_bounds = array<i64: 40, 32>}, {pipeline_mode = #tpu.pipeline_mode<synchronous>, transform_indices = @transform_2, window_bounds = array<i64: 40, 40>}, {pipeline_mode = #tpu.pipeline_mode<synchronous>, transform_indices = @transform_3, window_bounds = array<i64: 40, 40>}, {pipeline_mode = #tpu.pipeline_mode<synchronous>, transform_indices = @transform_4, window_bounds = array<i64: 40, 40>}, {pipeline_mode = #tpu.pipeline_mode<synchronous>, transform_indices = @transform_5, window_bounds = array<i64: 8, 40>}, {pipeline_mode = #tpu.pipeline_mode<synchronous>, transform_indices = @transform_6, window_bounds = array<i64: 3072, 32>}, {pipeline_mode = #tpu.pipeline_mode<synchronous>, transform_indices = @transform_7, window_bounds = array<i64: 2, 32, 32>}, {pipeline_mode = #tpu.pipeline_mode<synchronous>, transform_indices = @transform_8, window_bounds = array<i64: 2, 1, 32>}, {pipeline_mode = #tpu.pipeline_mode<synchronous>, transform_indices = @transform_9, window_bounds = array<i64: 2, 1, 32>}, {pipeline_mode = #tpu.pipeline_mode<synchronous>, transform_indices = @transform_10, window_bounds = array<i64: 2, 1, 32>}, {pipeline_mode = #tpu.pipeline_mode<synchronous>, transform_indices = @transform_11, window_bounds = array<i64: 2, 16, 48>}, {pipeline_mode = #tpu.pipeline_mode<synchronous>, transform_indices = @transform_12, window_bounds = array<i64: 2, 1, 48>}, {pipeline_mode = #tpu.pipeline_mode<synchronous>, transform_indices = @transform_13, window_bounds = array<i64: 2, 16, 16>}, {pipeline_mode = #tpu.pipeline_mode<synchronous>, transform_indices = @transform_14, window_bounds = array<i64: 2, 1, 16>}, {pipeline_mode = #tpu.pipeline_mode<synchronous>, transform_indices = @transform_15, window_bounds = array<i64: 2, 3, 16, 16>}, {pipeline_mode = #tpu.pipeline_mode<synchronous>, transform_indices = @transform_16, window_bounds = array<i64: 2, 1, 16>}, {pipeline_mode = #tpu.pipeline_mode<synchronous>, transform_indices = @transform_17, window_bounds = array<i64: 2, 3, 16, 16>}, {pipeline_mode = #tpu.pipeline_mode<synchronous>, transform_indices = @transform_18, window_bounds = array<i64: 2, 1, 16>}, {pipeline_mode = #tpu.pipeline_mode<synchronous>, transform_indices = @transform_19, window_bounds = array<i64: 2, 32, 32>}, {pipeline_mode = #tpu.pipeline_mode<synchronous>, transform_indices = @transform_20, window_bounds = array<i64: 2, 1, 32>}, {pipeline_mode = #tpu.pipeline_mode<synchronous>, transform_indices = @transform_21, window_bounds = array<i64: 2, 1, 32>}, {pipeline_mode = #tpu.pipeline_mode<synchronous>, transform_indices = @transform_22, window_bounds = array<i64: 2, 1, 32>}, {pipeline_mode = #tpu.pipeline_mode<synchronous>, transform_indices = @transform_23, window_bounds = array<i64: 2, 32, 128>}, {pipeline_mode = #tpu.pipeline_mode<synchronous>, transform_indices = @transform_24, window_bounds = array<i64: 2, 1, 128>}, {pipeline_mode = #tpu.pipeline_mode<synchronous>, transform_indices = @transform_25, window_bounds = array<i64: 2, 128, 32>}, {pipeline_mode = #tpu.pipeline_mode<synchronous>, transform_indices = @transform_26, window_bounds = array<i64: 2, 1, 32>}, {pipeline_mode = #tpu.pipeline_mode<synchronous>, transform_indices = @transform_27, window_bounds = array<i64: 1, 32>}, {pipeline_mode = #tpu.pipeline_mode<synchronous>, transform_indices = @transform_28, window_bounds = array<i64: 1, 32>}, {pipeline_mode = #tpu.pipeline_mode<synchronous>, transform_indices = @transform_29, window_bounds = array<i64: 32, 10>}, {pipeline_mode = #tpu.pipeline_mode<synchronous>, transform_indices = @transform_30, window_bounds = array<i64: 1, 10>}, {transform_indices = @transform_31, window_bounds = array<i64: 8, 10>}]} {
    %c0 = arith.constant 0 : index
    %c0_0 = arith.constant 0 : index
    %0 = vector.load %arg3[%c0, %c0_0] : memref<40x40xf32, #tpu.memory_space<vmem>>, vector<40x40xf32>
    %c0_1 = arith.constant 0 : index
    %c0_2 = arith.constant 0 : index
    %1 = vector.load %arg4[%c0_1, %c0_2] : memref<40x40xf32, #tpu.memory_space<vmem>>, vector<40x40xf32>
    %c0_3 = arith.constant 0 : index
    %c0_4 = arith.constant 0 : index
    %2 = vector.load %arg5[%c0_3, %c0_4] : memref<40x40xf32, #tpu.memory_space<vmem>>, vector<40x40xf32>
    %c0_5 = arith.constant 0 : index
    %c0_6 = arith.constant 0 : index
    %3 = vector.load %arg1[%c0_5, %c0_6] : memref<40x3072xf32, #tpu.memory_space<vmem>>, vector<40x3072xf32>
    %c0_7 = arith.constant 0 : index
    %c0_8 = arith.constant 0 : index
    %4 = vector.load %arg7[%c0_7, %c0_8] : memref<3072x32xf32, #tpu.memory_space<vmem>>, vector<3072x32xf32>
    %cst = arith.constant dense<0.000000e+00> : vector<40x32xf32>
    %5 = tpu.matmul %3, %4, %cst {dimension_numbers = #tpu.dot_dimension_numbers<[1], [0], [0], [1], [0, 0, 1, 1], [], []>} : vector<40x3072xf32>, vector<3072x32xf32>, vector<40x32xf32> -> vector<40x32xf32>
    %c0_9 = arith.constant 0 : index
    %c0_10 = arith.constant 0 : index
    %6 = vector.load %arg2[%c0_9, %c0_10] : memref<40x32xf32, #tpu.memory_space<vmem>>, vector<40x32xf32>
    %7 = arith.addf %5, %6 : vector<40x32xf32>
    %c0_11 = arith.constant 0 : index
    %c0_12 = arith.constant 0 : index
    %c0_13 = arith.constant 0 : index
    %8 = vector.load %arg8[%c0_11, %c0_12, %c0_13] : memref<2x32x32xf32, #tpu.memory_space<vmem>>, vector<1x32x32xf32>
    %9 = vector.shape_cast %8 : vector<1x32x32xf32> to vector<32x32xf32>
    %cst_14 = arith.constant dense<0.000000e+00> : vector<40x32xf32>
    %10 = tpu.matmul %7, %9, %cst_14 {dimension_numbers = #tpu.dot_dimension_numbers<[1], [0], [0], [1], [0, 0, 1, 1], [], []>} : vector<40x32xf32>, vector<32x32xf32>, vector<40x32xf32> -> vector<40x32xf32>
    %c0_15 = arith.constant 0 : index
    %c0_16 = arith.constant 0 : index
    %c0_17 = arith.constant 0 : index
    %11 = vector.load %arg9[%c0_15, %c0_16, %c0_17] : memref<2x1x32xf32, #tpu.memory_space<vmem>>, vector<1x1x32xf32>
    %12 = vector.shape_cast %11 : vector<1x1x32xf32> to vector<1x32xf32>
    %13 = vector.broadcast %12 : vector<1x32xf32> to vector<40x32xf32>
    %14 = arith.addf %10, %13 : vector<40x32xf32>
    %c0_18 = arith.constant 0 : index
    %c0_19 = arith.constant 0 : index
    %c0_20 = arith.constant 0 : index
    %15 = vector.load %arg10[%c0_18, %c0_19, %c0_20] : memref<2x1x32xf32, #tpu.memory_space<vmem>>, vector<1x1x32xf32>
    %16 = vector.shape_cast %15 : vector<1x1x32xf32> to vector<1x32xf32>
    %c0_21 = arith.constant 0 : index
    %c0_22 = arith.constant 0 : index
    %c0_23 = arith.constant 0 : index
    %17 = vector.load %arg11[%c0_21, %c0_22, %c0_23] : memref<2x1x32xf32, #tpu.memory_space<vmem>>, vector<1x1x32xf32>
    %18 = vector.shape_cast %17 : vector<1x1x32xf32> to vector<1x32xf32>
    %cst_24 = arith.constant dense<0.000000e+00> : vector<40xf32>
    %19 = vector.multi_reduction <add>, %14, %cst_24 [1] : vector<40x32xf32> to vector<40xf32>
    %20 = vector.shape_cast %19 : vector<40xf32> to vector<40x1xf32>
    %cst_25 = arith.constant 3.200000e+01 : f32
    %21 = vector.broadcast %cst_25 : f32 to vector<40x1xf32>
    %22 = arith.divf %20, %21 : vector<40x1xf32>
    %23 = vector.broadcast %22 : vector<40x1xf32> to vector<40x32xf32>
    %24 = arith.subf %14, %23 : vector<40x32xf32>
    %25 = arith.mulf %24, %24 : vector<40x32xf32>
    %cst_26 = arith.constant dense<0.000000e+00> : vector<40xf32>
    %26 = vector.multi_reduction <add>, %25, %cst_26 [1] : vector<40x32xf32> to vector<40xf32>
    %27 = vector.shape_cast %26 : vector<40xf32> to vector<40x1xf32>
    %cst_27 = arith.constant 3.200000e+01 : f32
    %28 = vector.broadcast %cst_27 : f32 to vector<40x1xf32>
    %29 = arith.divf %27, %28 : vector<40x1xf32>
    %30 = vector.broadcast %22 : vector<40x1xf32> to vector<40x32xf32>
    %31 = arith.subf %14, %30 : vector<40x32xf32>
    %cst_28 = arith.constant 9.99999997E-7 : f32
    %32 = vector.broadcast %cst_28 : f32 to vector<40x1xf32>
    %33 = arith.addf %29, %32 : vector<40x1xf32>
    %34 = math.rsqrt %33 : vector<40x1xf32>
    %35 = vector.broadcast %34 : vector<40x1xf32> to vector<40x32xf32>
    %36 = arith.mulf %31, %35 : vector<40x32xf32>
    %37 = vector.broadcast %16 : vector<1x32xf32> to vector<40x32xf32>
    %38 = arith.mulf %36, %37 : vector<40x32xf32>
    %39 = vector.broadcast %18 : vector<1x32xf32> to vector<40x32xf32>
    %40 = arith.addf %38, %39 : vector<40x32xf32>
    %41 = vector.extract_strided_slice %40 {offsets = [0, 0], sizes = [40, 16], strides = [1, 1]} : vector<40x32xf32> to vector<40x16xf32>
    %42 = vector.extract_strided_slice %40 {offsets = [0, 16], sizes = [40, 16], strides = [1, 1]} : vector<40x32xf32> to vector<40x16xf32>
    %c0_29 = arith.constant 0 : index
    %c0_30 = arith.constant 0 : index
    %c0_31 = arith.constant 0 : index
    %43 = vector.load %arg12[%c0_29, %c0_30, %c0_31] : memref<2x16x48xf32, #tpu.memory_space<vmem>>, vector<1x16x48xf32>
    %44 = vector.shape_cast %43 : vector<1x16x48xf32> to vector<16x48xf32>
    %cst_32 = arith.constant dense<0.000000e+00> : vector<40x48xf32>
    %45 = tpu.matmul %41, %44, %cst_32 {dimension_numbers = #tpu.dot_dimension_numbers<[1], [0], [0], [1], [0, 0, 1, 1], [], []>} : vector<40x16xf32>, vector<16x48xf32>, vector<40x48xf32> -> vector<40x48xf32>
    %c0_33 = arith.constant 0 : index
    %c0_34 = arith.constant 0 : index
    %c0_35 = arith.constant 0 : index
    %46 = vector.load %arg13[%c0_33, %c0_34, %c0_35] : memref<2x1x48xf32, #tpu.memory_space<vmem>>, vector<1x1x48xf32>
    %47 = vector.shape_cast %46 : vector<1x1x48xf32> to vector<1x48xf32>
    %48 = vector.broadcast %47 : vector<1x48xf32> to vector<40x48xf32>
    %49 = arith.addf %45, %48 : vector<40x48xf32>
    %50 = vector.extract_strided_slice %49 {offsets = [0, 0], sizes = [40, 8], strides = [1, 1]} : vector<40x48xf32> to vector<40x8xf32>
    %51 = vector.extract_strided_slice %49 {offsets = [0, 16], sizes = [40, 8], strides = [1, 1]} : vector<40x48xf32> to vector<40x8xf32>
    %52 = vector.extract_strided_slice %49 {offsets = [0, 32], sizes = [40, 8], strides = [1, 1]} : vector<40x48xf32> to vector<40x8xf32>
    %cst_36 = arith.constant dense<0.000000e+00> : vector<40x40xf32>
    %53 = tpu.matmul %50, %51, %cst_36 {dimension_numbers = #tpu.dot_dimension_numbers<[1], [1], [0], [0], [0, 0, 1, 0], [], []>} : vector<40x8xf32>, vector<40x8xf32>, vector<40x40xf32> -> vector<40x40xf32>
    %cst_37 = arith.constant 0.353553385 : f32
    %54 = vector.broadcast %cst_37 : f32 to vector<40x40xf32>
    %55 = arith.mulf %53, %54 : vector<40x40xf32>
    %56 = arith.addf %55, %0 : vector<40x40xf32>
    %cst_38 = arith.constant dense<0xFF800000> : vector<40xf32>
    %57 = vector.multi_reduction <maximumf>, %56, %cst_38 [1] : vector<40x40xf32> to vector<40xf32>
    %58 = vector.shape_cast %57 : vector<40xf32> to vector<40x1xf32>
    %59 = vector.broadcast %58 : vector<40x1xf32> to vector<40x40xf32>
    %60 = arith.subf %56, %59 : vector<40x40xf32>
    %61 = math.exp %60 : vector<40x40xf32>
    %cst_39 = arith.constant dense<0.000000e+00> : vector<40xf32>
    %62 = vector.multi_reduction <add>, %61, %cst_39 [1] : vector<40x40xf32> to vector<40xf32>
    %63 = vector.shape_cast %62 : vector<40xf32> to vector<40x1xf32>
    %64 = vector.broadcast %63 : vector<40x1xf32> to vector<40x40xf32>
    %65 = arith.divf %61, %64 : vector<40x40xf32>
    %cst_40 = arith.constant dense<0.000000e+00> : vector<40x8xf32>
    %66 = tpu.matmul %65, %52, %cst_40 {dimension_numbers = #tpu.dot_dimension_numbers<[1], [0], [0], [1], [0, 0, 1, 1], [], []>} : vector<40x40xf32>, vector<40x8xf32>, vector<40x8xf32> -> vector<40x8xf32>
    %67 = vector.extract_strided_slice %49 {offsets = [0, 8], sizes = [40, 8], strides = [1, 1]} : vector<40x48xf32> to vector<40x8xf32>
    %68 = vector.extract_strided_slice %49 {offsets = [0, 24], sizes = [40, 8], strides = [1, 1]} : vector<40x48xf32> to vector<40x8xf32>
    %69 = vector.extract_strided_slice %49 {offsets = [0, 40], sizes = [40, 8], strides = [1, 1]} : vector<40x48xf32> to vector<40x8xf32>
    %cst_41 = arith.constant dense<0.000000e+00> : vector<40x40xf32>
    %70 = tpu.matmul %67, %68, %cst_41 {dimension_numbers = #tpu.dot_dimension_numbers<[1], [1], [0], [0], [0, 0, 1, 0], [], []>} : vector<40x8xf32>, vector<40x8xf32>, vector<40x40xf32> -> vector<40x40xf32>
    %cst_42 = arith.constant 0.353553385 : f32
    %71 = vector.broadcast %cst_42 : f32 to vector<40x40xf32>
    %72 = arith.mulf %70, %71 : vector<40x40xf32>
    %73 = arith.addf %72, %0 : vector<40x40xf32>
    %cst_43 = arith.constant dense<0xFF800000> : vector<40xf32>
    %74 = vector.multi_reduction <maximumf>, %73, %cst_43 [1] : vector<40x40xf32> to vector<40xf32>
    %75 = vector.shape_cast %74 : vector<40xf32> to vector<40x1xf32>
    %76 = vector.broadcast %75 : vector<40x1xf32> to vector<40x40xf32>
    %77 = arith.subf %73, %76 : vector<40x40xf32>
    %78 = math.exp %77 : vector<40x40xf32>
    %cst_44 = arith.constant dense<0.000000e+00> : vector<40xf32>
    %79 = vector.multi_reduction <add>, %78, %cst_44 [1] : vector<40x40xf32> to vector<40xf32>
    %80 = vector.shape_cast %79 : vector<40xf32> to vector<40x1xf32>
    %81 = vector.broadcast %80 : vector<40x1xf32> to vector<40x40xf32>
    %82 = arith.divf %78, %81 : vector<40x40xf32>
    %cst_45 = arith.constant dense<0.000000e+00> : vector<40x8xf32>
    %83 = tpu.matmul %82, %69, %cst_45 {dimension_numbers = #tpu.dot_dimension_numbers<[1], [0], [0], [1], [0, 0, 1, 1], [], []>} : vector<40x40xf32>, vector<40x8xf32>, vector<40x8xf32> -> vector<40x8xf32>
    %84 = tpu.concatenate %66, %83 in 1 : vector<40x8xf32>, vector<40x8xf32> -> vector<40x16xf32>
    %c0_46 = arith.constant 0 : index
    %c0_47 = arith.constant 0 : index
    %c0_48 = arith.constant 0 : index
    %85 = vector.load %arg14[%c0_46, %c0_47, %c0_48] : memref<2x16x16xf32, #tpu.memory_space<vmem>>, vector<1x16x16xf32>
    %86 = vector.shape_cast %85 : vector<1x16x16xf32> to vector<16x16xf32>
    %cst_49 = arith.constant dense<0.000000e+00> : vector<40x16xf32>
    %87 = tpu.matmul %84, %86, %cst_49 {dimension_numbers = #tpu.dot_dimension_numbers<[1], [0], [0], [1], [0, 0, 1, 1], [], []>} : vector<40x16xf32>, vector<16x16xf32>, vector<40x16xf32> -> vector<40x16xf32>
    %c0_50 = arith.constant 0 : index
    %c0_51 = arith.constant 0 : index
    %c0_52 = arith.constant 0 : index
    %88 = vector.load %arg15[%c0_50, %c0_51, %c0_52] : memref<2x1x16xf32, #tpu.memory_space<vmem>>, vector<1x1x16xf32>
    %89 = vector.shape_cast %88 : vector<1x1x16xf32> to vector<1x16xf32>
    %90 = vector.broadcast %89 : vector<1x16xf32> to vector<40x16xf32>
    %91 = arith.addf %87, %90 : vector<40x16xf32>
    %cst_53 = arith.constant dense<0.000000e+00> : vector<40x16xf32>
    %92 = tpu.matmul %1, %42, %cst_53 {dimension_numbers = #tpu.dot_dimension_numbers<[1], [0], [0], [1], [0, 0, 1, 1], [], []>} : vector<40x40xf32>, vector<40x16xf32>, vector<40x16xf32> -> vector<40x16xf32>
    %cst_54 = arith.constant dense<0.000000e+00> : vector<40x16xf32>
    %93 = tpu.matmul %2, %42, %cst_54 {dimension_numbers = #tpu.dot_dimension_numbers<[1], [0], [0], [1], [0, 0, 1, 1], [], []>} : vector<40x40xf32>, vector<40x16xf32>, vector<40x16xf32> -> vector<40x16xf32>
    %c0_55 = arith.constant 0 : index
    %c0_56 = arith.constant 0 : index
    %c0_57 = arith.constant 0 : index
    %c0_58 = arith.constant 0 : index
    %94 = vector.load %arg16[%c0_55, %c0_56, %c0_57, %c0_58] : memref<2x3x16x16xf32, #tpu.memory_space<vmem>>, vector<1x1x16x16xf32>
    %95 = vector.shape_cast %94 : vector<1x1x16x16xf32> to vector<16x16xf32>
    %cst_59 = arith.constant dense<0.000000e+00> : vector<40x16xf32>
    %96 = tpu.matmul %92, %95, %cst_59 {dimension_numbers = #tpu.dot_dimension_numbers<[1], [0], [0], [1], [0, 0, 1, 1], [], []>} : vector<40x16xf32>, vector<16x16xf32>, vector<40x16xf32> -> vector<40x16xf32>
    %c0_60 = arith.constant 0 : index
    %c1 = arith.constant 1 : index
    %c0_61 = arith.constant 0 : index
    %c0_62 = arith.constant 0 : index
    %97 = vector.load %arg16[%c0_60, %c1, %c0_61, %c0_62] : memref<2x3x16x16xf32, #tpu.memory_space<vmem>>, vector<1x1x16x16xf32>
    %98 = vector.shape_cast %97 : vector<1x1x16x16xf32> to vector<16x16xf32>
    %cst_63 = arith.constant dense<0.000000e+00> : vector<40x16xf32>
    %99 = tpu.matmul %42, %98, %cst_63 {dimension_numbers = #tpu.dot_dimension_numbers<[1], [0], [0], [1], [0, 0, 1, 1], [], []>} : vector<40x16xf32>, vector<16x16xf32>, vector<40x16xf32> -> vector<40x16xf32>
    %100 = arith.addf %96, %99 : vector<40x16xf32>
    %c0_64 = arith.constant 0 : index
    %c2 = arith.constant 2 : index
    %c0_65 = arith.constant 0 : index
    %c0_66 = arith.constant 0 : index
    %101 = vector.load %arg16[%c0_64, %c2, %c0_65, %c0_66] : memref<2x3x16x16xf32, #tpu.memory_space<vmem>>, vector<1x1x16x16xf32>
    %102 = vector.shape_cast %101 : vector<1x1x16x16xf32> to vector<16x16xf32>
    %cst_67 = arith.constant dense<0.000000e+00> : vector<40x16xf32>
    %103 = tpu.matmul %93, %102, %cst_67 {dimension_numbers = #tpu.dot_dimension_numbers<[1], [0], [0], [1], [0, 0, 1, 1], [], []>} : vector<40x16xf32>, vector<16x16xf32>, vector<40x16xf32> -> vector<40x16xf32>
    %104 = arith.addf %100, %103 : vector<40x16xf32>
    %c0_68 = arith.constant 0 : index
    %c0_69 = arith.constant 0 : index
    %c0_70 = arith.constant 0 : index
    %105 = vector.load %arg17[%c0_68, %c0_69, %c0_70] : memref<2x1x16xf32, #tpu.memory_space<vmem>>, vector<1x1x16xf32>
    %106 = vector.shape_cast %105 : vector<1x1x16xf32> to vector<1x16xf32>
    %107 = vector.broadcast %106 : vector<1x16xf32> to vector<40x16xf32>
    %108 = arith.addf %104, %107 : vector<40x16xf32>
    %cst_71 = arith.constant 5.000000e-01 : f32
    %109 = vector.broadcast %cst_71 : f32 to vector<40x16xf32>
    %110 = arith.mulf %109, %108 : vector<40x16xf32>
    %cst_72 = arith.constant 0.707106769 : f32
    %111 = vector.broadcast %cst_72 : f32 to vector<40x16xf32>
    %112 = arith.mulf %108, %111 : vector<40x16xf32>
    %113 = math.absf %112 : vector<40x16xf32>
    %cst_73 = arith.constant 0.327591091 : f32
    %114 = vector.broadcast %cst_73 : f32 to vector<40x16xf32>
    %115 = arith.mulf %114, %113 : vector<40x16xf32>
    %cst_74 = arith.constant 1.000000e+00 : f32
    %116 = vector.broadcast %cst_74 : f32 to vector<40x16xf32>
    %117 = arith.addf %116, %115 : vector<40x16xf32>
    %cst_75 = arith.constant 1.000000e+00 : f32
    %118 = vector.broadcast %cst_75 : f32 to vector<40x16xf32>
    %119 = arith.divf %118, %117 : vector<40x16xf32>
    %cst_76 = arith.constant 1.06140542 : f32
    %120 = vector.broadcast %cst_76 : f32 to vector<40x16xf32>
    %121 = arith.mulf %120, %119 : vector<40x16xf32>
    %cst_77 = arith.constant -1.45315206 : f32
    %122 = vector.broadcast %cst_77 : f32 to vector<40x16xf32>
    %123 = arith.addf %121, %122 : vector<40x16xf32>
    %124 = arith.mulf %123, %119 : vector<40x16xf32>
    %cst_78 = arith.constant 1.42141378 : f32
    %125 = vector.broadcast %cst_78 : f32 to vector<40x16xf32>
    %126 = arith.addf %124, %125 : vector<40x16xf32>
    %127 = arith.mulf %126, %119 : vector<40x16xf32>
    %cst_79 = arith.constant -0.284496725 : f32
    %128 = vector.broadcast %cst_79 : f32 to vector<40x16xf32>
    %129 = arith.addf %127, %128 : vector<40x16xf32>
    %130 = arith.mulf %129, %119 : vector<40x16xf32>
    %cst_80 = arith.constant 0.254829586 : f32
    %131 = vector.broadcast %cst_80 : f32 to vector<40x16xf32>
    %132 = arith.addf %130, %131 : vector<40x16xf32>
    %133 = arith.mulf %132, %119 : vector<40x16xf32>
    %134 = arith.mulf %113, %113 : vector<40x16xf32>
    %cst_81 = arith.constant 0.000000e+00 : f32
    %135 = vector.broadcast %cst_81 : f32 to vector<40x16xf32>
    %136 = arith.subf %135, %134 : vector<40x16xf32>
    %137 = math.exp %136 : vector<40x16xf32>
    %138 = arith.mulf %133, %137 : vector<40x16xf32>
    %cst_82 = arith.constant 1.000000e+00 : f32
    %139 = vector.broadcast %cst_82 : f32 to vector<40x16xf32>
    %140 = arith.subf %139, %138 : vector<40x16xf32>
    %cst_83 = arith.constant 0.000000e+00 : f32
    %141 = vector.broadcast %cst_83 : f32 to vector<40x16xf32>
    %142 = arith.cmpf oge, %112, %141 : vector<40x16xf32>
    %cst_84 = arith.constant 0.000000e+00 : f32
    %143 = vector.broadcast %cst_84 : f32 to vector<40x16xf32>
    %144 = arith.subf %143, %140 : vector<40x16xf32>
    %145 = arith.select %142, %140, %144 : vector<40x16xi1>, vector<40x16xf32>
    %cst_85 = arith.constant 1.000000e+00 : f32
    %146 = vector.broadcast %cst_85 : f32 to vector<40x16xf32>
    %147 = arith.addf %146, %145 : vector<40x16xf32>
    %148 = arith.mulf %110, %147 : vector<40x16xf32>
    %cst_86 = arith.constant dense<0.000000e+00> : vector<40x16xf32>
    %149 = tpu.matmul %1, %148, %cst_86 {dimension_numbers = #tpu.dot_dimension_numbers<[1], [0], [0], [1], [0, 0, 1, 1], [], []>} : vector<40x40xf32>, vector<40x16xf32>, vector<40x16xf32> -> vector<40x16xf32>
    %cst_87 = arith.constant dense<0.000000e+00> : vector<40x16xf32>
    %150 = tpu.matmul %2, %148, %cst_87 {dimension_numbers = #tpu.dot_dimension_numbers<[1], [0], [0], [1], [0, 0, 1, 1], [], []>} : vector<40x40xf32>, vector<40x16xf32>, vector<40x16xf32> -> vector<40x16xf32>
    %c0_88 = arith.constant 0 : index
    %c0_89 = arith.constant 0 : index
    %c0_90 = arith.constant 0 : index
    %c0_91 = arith.constant 0 : index
    %151 = vector.load %arg18[%c0_88, %c0_89, %c0_90, %c0_91] : memref<2x3x16x16xf32, #tpu.memory_space<vmem>>, vector<1x1x16x16xf32>
    %152 = vector.shape_cast %151 : vector<1x1x16x16xf32> to vector<16x16xf32>
    %cst_92 = arith.constant dense<0.000000e+00> : vector<40x16xf32>
    %153 = tpu.matmul %149, %152, %cst_92 {dimension_numbers = #tpu.dot_dimension_numbers<[1], [0], [0], [1], [0, 0, 1, 1], [], []>} : vector<40x16xf32>, vector<16x16xf32>, vector<40x16xf32> -> vector<40x16xf32>
    %c0_93 = arith.constant 0 : index
    %c1_94 = arith.constant 1 : index
    %c0_95 = arith.constant 0 : index
    %c0_96 = arith.constant 0 : index
    %154 = vector.load %arg18[%c0_93, %c1_94, %c0_95, %c0_96] : memref<2x3x16x16xf32, #tpu.memory_space<vmem>>, vector<1x1x16x16xf32>
    %155 = vector.shape_cast %154 : vector<1x1x16x16xf32> to vector<16x16xf32>
    %cst_97 = arith.constant dense<0.000000e+00> : vector<40x16xf32>
    %156 = tpu.matmul %148, %155, %cst_97 {dimension_numbers = #tpu.dot_dimension_numbers<[1], [0], [0], [1], [0, 0, 1, 1], [], []>} : vector<40x16xf32>, vector<16x16xf32>, vector<40x16xf32> -> vector<40x16xf32>
    %157 = arith.addf %153, %156 : vector<40x16xf32>
    %c0_98 = arith.constant 0 : index
    %c2_99 = arith.constant 2 : index
    %c0_100 = arith.constant 0 : index
    %c0_101 = arith.constant 0 : index
    %158 = vector.load %arg18[%c0_98, %c2_99, %c0_100, %c0_101] : memref<2x3x16x16xf32, #tpu.memory_space<vmem>>, vector<1x1x16x16xf32>
    %159 = vector.shape_cast %158 : vector<1x1x16x16xf32> to vector<16x16xf32>
    %cst_102 = arith.constant dense<0.000000e+00> : vector<40x16xf32>
    %160 = tpu.matmul %150, %159, %cst_102 {dimension_numbers = #tpu.dot_dimension_numbers<[1], [0], [0], [1], [0, 0, 1, 1], [], []>} : vector<40x16xf32>, vector<16x16xf32>, vector<40x16xf32> -> vector<40x16xf32>
    %161 = arith.addf %157, %160 : vector<40x16xf32>
    %c0_103 = arith.constant 0 : index
    %c0_104 = arith.constant 0 : index
    %c0_105 = arith.constant 0 : index
    %162 = vector.load %arg19[%c0_103, %c0_104, %c0_105] : memref<2x1x16xf32, #tpu.memory_space<vmem>>, vector<1x1x16xf32>
    %163 = vector.shape_cast %162 : vector<1x1x16xf32> to vector<1x16xf32>
    %164 = vector.broadcast %163 : vector<1x16xf32> to vector<40x16xf32>
    %165 = arith.addf %161, %164 : vector<40x16xf32>
    %166 = tpu.concatenate %91, %165 in 1 : vector<40x16xf32>, vector<40x16xf32> -> vector<40x32xf32>
    %c0_106 = arith.constant 0 : index
    %c0_107 = arith.constant 0 : index
    %c0_108 = arith.constant 0 : index
    %167 = vector.load %arg20[%c0_106, %c0_107, %c0_108] : memref<2x32x32xf32, #tpu.memory_space<vmem>>, vector<1x32x32xf32>
    %168 = vector.shape_cast %167 : vector<1x32x32xf32> to vector<32x32xf32>
    %cst_109 = arith.constant dense<0.000000e+00> : vector<40x32xf32>
    %169 = tpu.matmul %166, %168, %cst_109 {dimension_numbers = #tpu.dot_dimension_numbers<[1], [0], [0], [1], [0, 0, 1, 1], [], []>} : vector<40x32xf32>, vector<32x32xf32>, vector<40x32xf32> -> vector<40x32xf32>
    %170 = arith.addf %14, %169 : vector<40x32xf32>
    %c0_110 = arith.constant 0 : index
    %c0_111 = arith.constant 0 : index
    %c0_112 = arith.constant 0 : index
    %171 = vector.load %arg21[%c0_110, %c0_111, %c0_112] : memref<2x1x32xf32, #tpu.memory_space<vmem>>, vector<1x1x32xf32>
    %172 = vector.shape_cast %171 : vector<1x1x32xf32> to vector<1x32xf32>
    %173 = vector.broadcast %172 : vector<1x32xf32> to vector<40x32xf32>
    %174 = arith.addf %170, %173 : vector<40x32xf32>
    %c0_113 = arith.constant 0 : index
    %c0_114 = arith.constant 0 : index
    %c0_115 = arith.constant 0 : index
    %175 = vector.load %arg22[%c0_113, %c0_114, %c0_115] : memref<2x1x32xf32, #tpu.memory_space<vmem>>, vector<1x1x32xf32>
    %176 = vector.shape_cast %175 : vector<1x1x32xf32> to vector<1x32xf32>
    %c0_116 = arith.constant 0 : index
    %c0_117 = arith.constant 0 : index
    %c0_118 = arith.constant 0 : index
    %177 = vector.load %arg23[%c0_116, %c0_117, %c0_118] : memref<2x1x32xf32, #tpu.memory_space<vmem>>, vector<1x1x32xf32>
    %178 = vector.shape_cast %177 : vector<1x1x32xf32> to vector<1x32xf32>
    %cst_119 = arith.constant dense<0.000000e+00> : vector<40xf32>
    %179 = vector.multi_reduction <add>, %174, %cst_119 [1] : vector<40x32xf32> to vector<40xf32>
    %180 = vector.shape_cast %179 : vector<40xf32> to vector<40x1xf32>
    %cst_120 = arith.constant 3.200000e+01 : f32
    %181 = vector.broadcast %cst_120 : f32 to vector<40x1xf32>
    %182 = arith.divf %180, %181 : vector<40x1xf32>
    %183 = vector.broadcast %182 : vector<40x1xf32> to vector<40x32xf32>
    %184 = arith.subf %174, %183 : vector<40x32xf32>
    %185 = arith.mulf %184, %184 : vector<40x32xf32>
    %cst_121 = arith.constant dense<0.000000e+00> : vector<40xf32>
    %186 = vector.multi_reduction <add>, %185, %cst_121 [1] : vector<40x32xf32> to vector<40xf32>
    %187 = vector.shape_cast %186 : vector<40xf32> to vector<40x1xf32>
    %cst_122 = arith.constant 3.200000e+01 : f32
    %188 = vector.broadcast %cst_122 : f32 to vector<40x1xf32>
    %189 = arith.divf %187, %188 : vector<40x1xf32>
    %190 = vector.broadcast %182 : vector<40x1xf32> to vector<40x32xf32>
    %191 = arith.subf %174, %190 : vector<40x32xf32>
    %cst_123 = arith.constant 9.99999997E-7 : f32
    %192 = vector.broadcast %cst_123 : f32 to vector<40x1xf32>
    %193 = arith.addf %189, %192 : vector<40x1xf32>
    %194 = math.rsqrt %193 : vector<40x1xf32>
    %195 = vector.broadcast %194 : vector<40x1xf32> to vector<40x32xf32>
    %196 = arith.mulf %191, %195 : vector<40x32xf32>
    %197 = vector.broadcast %176 : vector<1x32xf32> to vector<40x32xf32>
    %198 = arith.mulf %196, %197 : vector<40x32xf32>
    %199 = vector.broadcast %178 : vector<1x32xf32> to vector<40x32xf32>
    %200 = arith.addf %198, %199 : vector<40x32xf32>
    %c0_124 = arith.constant 0 : index
    %c0_125 = arith.constant 0 : index
    %c0_126 = arith.constant 0 : index
    %201 = vector.load %arg24[%c0_124, %c0_125, %c0_126] : memref<2x32x128xf32, #tpu.memory_space<vmem>>, vector<1x32x128xf32>
    %202 = vector.shape_cast %201 : vector<1x32x128xf32> to vector<32x128xf32>
    %cst_127 = arith.constant dense<0.000000e+00> : vector<40x128xf32>
    %203 = tpu.matmul %200, %202, %cst_127 {dimension_numbers = #tpu.dot_dimension_numbers<[1], [0], [0], [1], [0, 0, 1, 1], [], []>} : vector<40x32xf32>, vector<32x128xf32>, vector<40x128xf32> -> vector<40x128xf32>
    %c0_128 = arith.constant 0 : index
    %c0_129 = arith.constant 0 : index
    %c0_130 = arith.constant 0 : index
    %204 = vector.load %arg25[%c0_128, %c0_129, %c0_130] : memref<2x1x128xf32, #tpu.memory_space<vmem>>, vector<1x1x128xf32>
    %205 = vector.shape_cast %204 : vector<1x1x128xf32> to vector<1x128xf32>
    %206 = vector.broadcast %205 : vector<1x128xf32> to vector<40x128xf32>
    %207 = arith.addf %203, %206 : vector<40x128xf32>
    %cst_131 = arith.constant 5.000000e-01 : f32
    %208 = vector.broadcast %cst_131 : f32 to vector<40x128xf32>
    %209 = arith.mulf %208, %207 : vector<40x128xf32>
    %cst_132 = arith.constant 0.707106769 : f32
    %210 = vector.broadcast %cst_132 : f32 to vector<40x128xf32>
    %211 = arith.mulf %207, %210 : vector<40x128xf32>
    %212 = math.absf %211 : vector<40x128xf32>
    %cst_133 = arith.constant 0.327591091 : f32
    %213 = vector.broadcast %cst_133 : f32 to vector<40x128xf32>
    %214 = arith.mulf %213, %212 : vector<40x128xf32>
    %cst_134 = arith.constant 1.000000e+00 : f32
    %215 = vector.broadcast %cst_134 : f32 to vector<40x128xf32>
    %216 = arith.addf %215, %214 : vector<40x128xf32>
    %cst_135 = arith.constant 1.000000e+00 : f32
    %217 = vector.broadcast %cst_135 : f32 to vector<40x128xf32>
    %218 = arith.divf %217, %216 : vector<40x128xf32>
    %cst_136 = arith.constant 1.06140542 : f32
    %219 = vector.broadcast %cst_136 : f32 to vector<40x128xf32>
    %220 = arith.mulf %219, %218 : vector<40x128xf32>
    %cst_137 = arith.constant -1.45315206 : f32
    %221 = vector.broadcast %cst_137 : f32 to vector<40x128xf32>
    %222 = arith.addf %220, %221 : vector<40x128xf32>
    %223 = arith.mulf %222, %218 : vector<40x128xf32>
    %cst_138 = arith.constant 1.42141378 : f32
    %224 = vector.broadcast %cst_138 : f32 to vector<40x128xf32>
    %225 = arith.addf %223, %224 : vector<40x128xf32>
    %226 = arith.mulf %225, %218 : vector<40x128xf32>
    %cst_139 = arith.constant -0.284496725 : f32
    %227 = vector.broadcast %cst_139 : f32 to vector<40x128xf32>
    %228 = arith.addf %226, %227 : vector<40x128xf32>
    %229 = arith.mulf %228, %218 : vector<40x128xf32>
    %cst_140 = arith.constant 0.254829586 : f32
    %230 = vector.broadcast %cst_140 : f32 to vector<40x128xf32>
    %231 = arith.addf %229, %230 : vector<40x128xf32>
    %232 = arith.mulf %231, %218 : vector<40x128xf32>
    %233 = arith.mulf %212, %212 : vector<40x128xf32>
    %cst_141 = arith.constant 0.000000e+00 : f32
    %234 = vector.broadcast %cst_141 : f32 to vector<40x128xf32>
    %235 = arith.subf %234, %233 : vector<40x128xf32>
    %236 = math.exp %235 : vector<40x128xf32>
    %237 = arith.mulf %232, %236 : vector<40x128xf32>
    %cst_142 = arith.constant 1.000000e+00 : f32
    %238 = vector.broadcast %cst_142 : f32 to vector<40x128xf32>
    %239 = arith.subf %238, %237 : vector<40x128xf32>
    %cst_143 = arith.constant 0.000000e+00 : f32
    %240 = vector.broadcast %cst_143 : f32 to vector<40x128xf32>
    %241 = arith.cmpf oge, %211, %240 : vector<40x128xf32>
    %cst_144 = arith.constant 0.000000e+00 : f32
    %242 = vector.broadcast %cst_144 : f32 to vector<40x128xf32>
    %243 = arith.subf %242, %239 : vector<40x128xf32>
    %244 = arith.select %241, %239, %243 : vector<40x128xi1>, vector<40x128xf32>
    %cst_145 = arith.constant 1.000000e+00 : f32
    %245 = vector.broadcast %cst_145 : f32 to vector<40x128xf32>
    %246 = arith.addf %245, %244 : vector<40x128xf32>
    %247 = arith.mulf %209, %246 : vector<40x128xf32>
    %c0_146 = arith.constant 0 : index
    %c0_147 = arith.constant 0 : index
    %c0_148 = arith.constant 0 : index
    %248 = vector.load %arg26[%c0_146, %c0_147, %c0_148] : memref<2x128x32xf32, #tpu.memory_space<vmem>>, vector<1x128x32xf32>
    %249 = vector.shape_cast %248 : vector<1x128x32xf32> to vector<128x32xf32>
    %cst_149 = arith.constant dense<0.000000e+00> : vector<40x32xf32>
    %250 = tpu.matmul %247, %249, %cst_149 {dimension_numbers = #tpu.dot_dimension_numbers<[1], [0], [0], [1], [0, 0, 1, 1], [], []>} : vector<40x128xf32>, vector<128x32xf32>, vector<40x32xf32> -> vector<40x32xf32>
    %251 = arith.addf %174, %250 : vector<40x32xf32>
    %c0_150 = arith.constant 0 : index
    %c0_151 = arith.constant 0 : index
    %c0_152 = arith.constant 0 : index
    %252 = vector.load %arg27[%c0_150, %c0_151, %c0_152] : memref<2x1x32xf32, #tpu.memory_space<vmem>>, vector<1x1x32xf32>
    %253 = vector.shape_cast %252 : vector<1x1x32xf32> to vector<1x32xf32>
    %254 = vector.broadcast %253 : vector<1x32xf32> to vector<40x32xf32>
    %255 = arith.addf %251, %254 : vector<40x32xf32>
    %c1_153 = arith.constant 1 : index
    %c0_154 = arith.constant 0 : index
    %c0_155 = arith.constant 0 : index
    %256 = vector.load %arg8[%c1_153, %c0_154, %c0_155] : memref<2x32x32xf32, #tpu.memory_space<vmem>>, vector<1x32x32xf32>
    %257 = vector.shape_cast %256 : vector<1x32x32xf32> to vector<32x32xf32>
    %cst_156 = arith.constant dense<0.000000e+00> : vector<40x32xf32>
    %258 = tpu.matmul %255, %257, %cst_156 {dimension_numbers = #tpu.dot_dimension_numbers<[1], [0], [0], [1], [0, 0, 1, 1], [], []>} : vector<40x32xf32>, vector<32x32xf32>, vector<40x32xf32> -> vector<40x32xf32>
    %c1_157 = arith.constant 1 : index
    %c0_158 = arith.constant 0 : index
    %c0_159 = arith.constant 0 : index
    %259 = vector.load %arg9[%c1_157, %c0_158, %c0_159] : memref<2x1x32xf32, #tpu.memory_space<vmem>>, vector<1x1x32xf32>
    %260 = vector.shape_cast %259 : vector<1x1x32xf32> to vector<1x32xf32>
    %261 = vector.broadcast %260 : vector<1x32xf32> to vector<40x32xf32>
    %262 = arith.addf %258, %261 : vector<40x32xf32>
    %c1_160 = arith.constant 1 : index
    %c0_161 = arith.constant 0 : index
    %c0_162 = arith.constant 0 : index
    %263 = vector.load %arg10[%c1_160, %c0_161, %c0_162] : memref<2x1x32xf32, #tpu.memory_space<vmem>>, vector<1x1x32xf32>
    %264 = vector.shape_cast %263 : vector<1x1x32xf32> to vector<1x32xf32>
    %c1_163 = arith.constant 1 : index
    %c0_164 = arith.constant 0 : index
    %c0_165 = arith.constant 0 : index
    %265 = vector.load %arg11[%c1_163, %c0_164, %c0_165] : memref<2x1x32xf32, #tpu.memory_space<vmem>>, vector<1x1x32xf32>
    %266 = vector.shape_cast %265 : vector<1x1x32xf32> to vector<1x32xf32>
    %cst_166 = arith.constant dense<0.000000e+00> : vector<40xf32>
    %267 = vector.multi_reduction <add>, %262, %cst_166 [1] : vector<40x32xf32> to vector<40xf32>
    %268 = vector.shape_cast %267 : vector<40xf32> to vector<40x1xf32>
    %cst_167 = arith.constant 3.200000e+01 : f32
    %269 = vector.broadcast %cst_167 : f32 to vector<40x1xf32>
    %270 = arith.divf %268, %269 : vector<40x1xf32>
    %271 = vector.broadcast %270 : vector<40x1xf32> to vector<40x32xf32>
    %272 = arith.subf %262, %271 : vector<40x32xf32>
    %273 = arith.mulf %272, %272 : vector<40x32xf32>
    %cst_168 = arith.constant dense<0.000000e+00> : vector<40xf32>
    %274 = vector.multi_reduction <add>, %273, %cst_168 [1] : vector<40x32xf32> to vector<40xf32>
    %275 = vector.shape_cast %274 : vector<40xf32> to vector<40x1xf32>
    %cst_169 = arith.constant 3.200000e+01 : f32
    %276 = vector.broadcast %cst_169 : f32 to vector<40x1xf32>
    %277 = arith.divf %275, %276 : vector<40x1xf32>
    %278 = vector.broadcast %270 : vector<40x1xf32> to vector<40x32xf32>
    %279 = arith.subf %262, %278 : vector<40x32xf32>
    %cst_170 = arith.constant 9.99999997E-7 : f32
    %280 = vector.broadcast %cst_170 : f32 to vector<40x1xf32>
    %281 = arith.addf %277, %280 : vector<40x1xf32>
    %282 = math.rsqrt %281 : vector<40x1xf32>
    %283 = vector.broadcast %282 : vector<40x1xf32> to vector<40x32xf32>
    %284 = arith.mulf %279, %283 : vector<40x32xf32>
    %285 = vector.broadcast %264 : vector<1x32xf32> to vector<40x32xf32>
    %286 = arith.mulf %284, %285 : vector<40x32xf32>
    %287 = vector.broadcast %266 : vector<1x32xf32> to vector<40x32xf32>
    %288 = arith.addf %286, %287 : vector<40x32xf32>
    %289 = vector.extract_strided_slice %288 {offsets = [0, 0], sizes = [40, 16], strides = [1, 1]} : vector<40x32xf32> to vector<40x16xf32>
    %290 = vector.extract_strided_slice %288 {offsets = [0, 16], sizes = [40, 16], strides = [1, 1]} : vector<40x32xf32> to vector<40x16xf32>
    %c1_171 = arith.constant 1 : index
    %c0_172 = arith.constant 0 : index
    %c0_173 = arith.constant 0 : index
    %291 = vector.load %arg12[%c1_171, %c0_172, %c0_173] : memref<2x16x48xf32, #tpu.memory_space<vmem>>, vector<1x16x48xf32>
    %292 = vector.shape_cast %291 : vector<1x16x48xf32> to vector<16x48xf32>
    %cst_174 = arith.constant dense<0.000000e+00> : vector<40x48xf32>
    %293 = tpu.matmul %289, %292, %cst_174 {dimension_numbers = #tpu.dot_dimension_numbers<[1], [0], [0], [1], [0, 0, 1, 1], [], []>} : vector<40x16xf32>, vector<16x48xf32>, vector<40x48xf32> -> vector<40x48xf32>
    %c1_175 = arith.constant 1 : index
    %c0_176 = arith.constant 0 : index
    %c0_177 = arith.constant 0 : index
    %294 = vector.load %arg13[%c1_175, %c0_176, %c0_177] : memref<2x1x48xf32, #tpu.memory_space<vmem>>, vector<1x1x48xf32>
    %295 = vector.shape_cast %294 : vector<1x1x48xf32> to vector<1x48xf32>
    %296 = vector.broadcast %295 : vector<1x48xf32> to vector<40x48xf32>
    %297 = arith.addf %293, %296 : vector<40x48xf32>
    %298 = vector.extract_strided_slice %297 {offsets = [0, 0], sizes = [40, 8], strides = [1, 1]} : vector<40x48xf32> to vector<40x8xf32>
    %299 = vector.extract_strided_slice %297 {offsets = [0, 16], sizes = [40, 8], strides = [1, 1]} : vector<40x48xf32> to vector<40x8xf32>
    %300 = vector.extract_strided_slice %297 {offsets = [0, 32], sizes = [40, 8], strides = [1, 1]} : vector<40x48xf32> to vector<40x8xf32>
    %cst_178 = arith.constant dense<0.000000e+00> : vector<40x40xf32>
    %301 = tpu.matmul %298, %299, %cst_178 {dimension_numbers = #tpu.dot_dimension_numbers<[1], [1], [0], [0], [0, 0, 1, 0], [], []>} : vector<40x8xf32>, vector<40x8xf32>, vector<40x40xf32> -> vector<40x40xf32>
    %cst_179 = arith.constant 0.353553385 : f32
    %302 = vector.broadcast %cst_179 : f32 to vector<40x40xf32>
    %303 = arith.mulf %301, %302 : vector<40x40xf32>
    %304 = arith.addf %303, %0 : vector<40x40xf32>
    %cst_180 = arith.constant dense<0xFF800000> : vector<40xf32>
    %305 = vector.multi_reduction <maximumf>, %304, %cst_180 [1] : vector<40x40xf32> to vector<40xf32>
    %306 = vector.shape_cast %305 : vector<40xf32> to vector<40x1xf32>
    %307 = vector.broadcast %306 : vector<40x1xf32> to vector<40x40xf32>
    %308 = arith.subf %304, %307 : vector<40x40xf32>
    %309 = math.exp %308 : vector<40x40xf32>
    %cst_181 = arith.constant dense<0.000000e+00> : vector<40xf32>
    %310 = vector.multi_reduction <add>, %309, %cst_181 [1] : vector<40x40xf32> to vector<40xf32>
    %311 = vector.shape_cast %310 : vector<40xf32> to vector<40x1xf32>
    %312 = vector.broadcast %311 : vector<40x1xf32> to vector<40x40xf32>
    %313 = arith.divf %309, %312 : vector<40x40xf32>
    %cst_182 = arith.constant dense<0.000000e+00> : vector<40x8xf32>
    %314 = tpu.matmul %313, %300, %cst_182 {dimension_numbers = #tpu.dot_dimension_numbers<[1], [0], [0], [1], [0, 0, 1, 1], [], []>} : vector<40x40xf32>, vector<40x8xf32>, vector<40x8xf32> -> vector<40x8xf32>
    %315 = vector.extract_strided_slice %297 {offsets = [0, 8], sizes = [40, 8], strides = [1, 1]} : vector<40x48xf32> to vector<40x8xf32>
    %316 = vector.extract_strided_slice %297 {offsets = [0, 24], sizes = [40, 8], strides = [1, 1]} : vector<40x48xf32> to vector<40x8xf32>
    %317 = vector.extract_strided_slice %297 {offsets = [0, 40], sizes = [40, 8], strides = [1, 1]} : vector<40x48xf32> to vector<40x8xf32>
    %cst_183 = arith.constant dense<0.000000e+00> : vector<40x40xf32>
    %318 = tpu.matmul %315, %316, %cst_183 {dimension_numbers = #tpu.dot_dimension_numbers<[1], [1], [0], [0], [0, 0, 1, 0], [], []>} : vector<40x8xf32>, vector<40x8xf32>, vector<40x40xf32> -> vector<40x40xf32>
    %cst_184 = arith.constant 0.353553385 : f32
    %319 = vector.broadcast %cst_184 : f32 to vector<40x40xf32>
    %320 = arith.mulf %318, %319 : vector<40x40xf32>
    %321 = arith.addf %320, %0 : vector<40x40xf32>
    %cst_185 = arith.constant dense<0xFF800000> : vector<40xf32>
    %322 = vector.multi_reduction <maximumf>, %321, %cst_185 [1] : vector<40x40xf32> to vector<40xf32>
    %323 = vector.shape_cast %322 : vector<40xf32> to vector<40x1xf32>
    %324 = vector.broadcast %323 : vector<40x1xf32> to vector<40x40xf32>
    %325 = arith.subf %321, %324 : vector<40x40xf32>
    %326 = math.exp %325 : vector<40x40xf32>
    %cst_186 = arith.constant dense<0.000000e+00> : vector<40xf32>
    %327 = vector.multi_reduction <add>, %326, %cst_186 [1] : vector<40x40xf32> to vector<40xf32>
    %328 = vector.shape_cast %327 : vector<40xf32> to vector<40x1xf32>
    %329 = vector.broadcast %328 : vector<40x1xf32> to vector<40x40xf32>
    %330 = arith.divf %326, %329 : vector<40x40xf32>
    %cst_187 = arith.constant dense<0.000000e+00> : vector<40x8xf32>
    %331 = tpu.matmul %330, %317, %cst_187 {dimension_numbers = #tpu.dot_dimension_numbers<[1], [0], [0], [1], [0, 0, 1, 1], [], []>} : vector<40x40xf32>, vector<40x8xf32>, vector<40x8xf32> -> vector<40x8xf32>
    %332 = tpu.concatenate %314, %331 in 1 : vector<40x8xf32>, vector<40x8xf32> -> vector<40x16xf32>
    %c1_188 = arith.constant 1 : index
    %c0_189 = arith.constant 0 : index
    %c0_190 = arith.constant 0 : index
    %333 = vector.load %arg14[%c1_188, %c0_189, %c0_190] : memref<2x16x16xf32, #tpu.memory_space<vmem>>, vector<1x16x16xf32>
    %334 = vector.shape_cast %333 : vector<1x16x16xf32> to vector<16x16xf32>
    %cst_191 = arith.constant dense<0.000000e+00> : vector<40x16xf32>
    %335 = tpu.matmul %332, %334, %cst_191 {dimension_numbers = #tpu.dot_dimension_numbers<[1], [0], [0], [1], [0, 0, 1, 1], [], []>} : vector<40x16xf32>, vector<16x16xf32>, vector<40x16xf32> -> vector<40x16xf32>
    %c1_192 = arith.constant 1 : index
    %c0_193 = arith.constant 0 : index
    %c0_194 = arith.constant 0 : index
    %336 = vector.load %arg15[%c1_192, %c0_193, %c0_194] : memref<2x1x16xf32, #tpu.memory_space<vmem>>, vector<1x1x16xf32>
    %337 = vector.shape_cast %336 : vector<1x1x16xf32> to vector<1x16xf32>
    %338 = vector.broadcast %337 : vector<1x16xf32> to vector<40x16xf32>
    %339 = arith.addf %335, %338 : vector<40x16xf32>
    %cst_195 = arith.constant dense<0.000000e+00> : vector<40x16xf32>
    %340 = tpu.matmul %1, %290, %cst_195 {dimension_numbers = #tpu.dot_dimension_numbers<[1], [0], [0], [1], [0, 0, 1, 1], [], []>} : vector<40x40xf32>, vector<40x16xf32>, vector<40x16xf32> -> vector<40x16xf32>
    %cst_196 = arith.constant dense<0.000000e+00> : vector<40x16xf32>
    %341 = tpu.matmul %2, %290, %cst_196 {dimension_numbers = #tpu.dot_dimension_numbers<[1], [0], [0], [1], [0, 0, 1, 1], [], []>} : vector<40x40xf32>, vector<40x16xf32>, vector<40x16xf32> -> vector<40x16xf32>
    %c1_197 = arith.constant 1 : index
    %c0_198 = arith.constant 0 : index
    %c0_199 = arith.constant 0 : index
    %c0_200 = arith.constant 0 : index
    %342 = vector.load %arg16[%c1_197, %c0_198, %c0_199, %c0_200] : memref<2x3x16x16xf32, #tpu.memory_space<vmem>>, vector<1x1x16x16xf32>
    %343 = vector.shape_cast %342 : vector<1x1x16x16xf32> to vector<16x16xf32>
    %cst_201 = arith.constant dense<0.000000e+00> : vector<40x16xf32>
    %344 = tpu.matmul %340, %343, %cst_201 {dimension_numbers = #tpu.dot_dimension_numbers<[1], [0], [0], [1], [0, 0, 1, 1], [], []>} : vector<40x16xf32>, vector<16x16xf32>, vector<40x16xf32> -> vector<40x16xf32>
    %c1_202 = arith.constant 1 : index
    %c1_203 = arith.constant 1 : index
    %c0_204 = arith.constant 0 : index
    %c0_205 = arith.constant 0 : index
    %345 = vector.load %arg16[%c1_202, %c1_203, %c0_204, %c0_205] : memref<2x3x16x16xf32, #tpu.memory_space<vmem>>, vector<1x1x16x16xf32>
    %346 = vector.shape_cast %345 : vector<1x1x16x16xf32> to vector<16x16xf32>
    %cst_206 = arith.constant dense<0.000000e+00> : vector<40x16xf32>
    %347 = tpu.matmul %290, %346, %cst_206 {dimension_numbers = #tpu.dot_dimension_numbers<[1], [0], [0], [1], [0, 0, 1, 1], [], []>} : vector<40x16xf32>, vector<16x16xf32>, vector<40x16xf32> -> vector<40x16xf32>
    %348 = arith.addf %344, %347 : vector<40x16xf32>
    %c1_207 = arith.constant 1 : index
    %c2_208 = arith.constant 2 : index
    %c0_209 = arith.constant 0 : index
    %c0_210 = arith.constant 0 : index
    %349 = vector.load %arg16[%c1_207, %c2_208, %c0_209, %c0_210] : memref<2x3x16x16xf32, #tpu.memory_space<vmem>>, vector<1x1x16x16xf32>
    %350 = vector.shape_cast %349 : vector<1x1x16x16xf32> to vector<16x16xf32>
    %cst_211 = arith.constant dense<0.000000e+00> : vector<40x16xf32>
    %351 = tpu.matmul %341, %350, %cst_211 {dimension_numbers = #tpu.dot_dimension_numbers<[1], [0], [0], [1], [0, 0, 1, 1], [], []>} : vector<40x16xf32>, vector<16x16xf32>, vector<40x16xf32> -> vector<40x16xf32>
    %352 = arith.addf %348, %351 : vector<40x16xf32>
    %c1_212 = arith.constant 1 : index
    %c0_213 = arith.constant 0 : index
    %c0_214 = arith.constant 0 : index
    %353 = vector.load %arg17[%c1_212, %c0_213, %c0_214] : memref<2x1x16xf32, #tpu.memory_space<vmem>>, vector<1x1x16xf32>
    %354 = vector.shape_cast %353 : vector<1x1x16xf32> to vector<1x16xf32>
    %355 = vector.broadcast %354 : vector<1x16xf32> to vector<40x16xf32>
    %356 = arith.addf %352, %355 : vector<40x16xf32>
    %cst_215 = arith.constant 5.000000e-01 : f32
    %357 = vector.broadcast %cst_215 : f32 to vector<40x16xf32>
    %358 = arith.mulf %357, %356 : vector<40x16xf32>
    %cst_216 = arith.constant 0.707106769 : f32
    %359 = vector.broadcast %cst_216 : f32 to vector<40x16xf32>
    %360 = arith.mulf %356, %359 : vector<40x16xf32>
    %361 = math.absf %360 : vector<40x16xf32>
    %cst_217 = arith.constant 0.327591091 : f32
    %362 = vector.broadcast %cst_217 : f32 to vector<40x16xf32>
    %363 = arith.mulf %362, %361 : vector<40x16xf32>
    %cst_218 = arith.constant 1.000000e+00 : f32
    %364 = vector.broadcast %cst_218 : f32 to vector<40x16xf32>
    %365 = arith.addf %364, %363 : vector<40x16xf32>
    %cst_219 = arith.constant 1.000000e+00 : f32
    %366 = vector.broadcast %cst_219 : f32 to vector<40x16xf32>
    %367 = arith.divf %366, %365 : vector<40x16xf32>
    %cst_220 = arith.constant 1.06140542 : f32
    %368 = vector.broadcast %cst_220 : f32 to vector<40x16xf32>
    %369 = arith.mulf %368, %367 : vector<40x16xf32>
    %cst_221 = arith.constant -1.45315206 : f32
    %370 = vector.broadcast %cst_221 : f32 to vector<40x16xf32>
    %371 = arith.addf %369, %370 : vector<40x16xf32>
    %372 = arith.mulf %371, %367 : vector<40x16xf32>
    %cst_222 = arith.constant 1.42141378 : f32
    %373 = vector.broadcast %cst_222 : f32 to vector<40x16xf32>
    %374 = arith.addf %372, %373 : vector<40x16xf32>
    %375 = arith.mulf %374, %367 : vector<40x16xf32>
    %cst_223 = arith.constant -0.284496725 : f32
    %376 = vector.broadcast %cst_223 : f32 to vector<40x16xf32>
    %377 = arith.addf %375, %376 : vector<40x16xf32>
    %378 = arith.mulf %377, %367 : vector<40x16xf32>
    %cst_224 = arith.constant 0.254829586 : f32
    %379 = vector.broadcast %cst_224 : f32 to vector<40x16xf32>
    %380 = arith.addf %378, %379 : vector<40x16xf32>
    %381 = arith.mulf %380, %367 : vector<40x16xf32>
    %382 = arith.mulf %361, %361 : vector<40x16xf32>
    %cst_225 = arith.constant 0.000000e+00 : f32
    %383 = vector.broadcast %cst_225 : f32 to vector<40x16xf32>
    %384 = arith.subf %383, %382 : vector<40x16xf32>
    %385 = math.exp %384 : vector<40x16xf32>
    %386 = arith.mulf %381, %385 : vector<40x16xf32>
    %cst_226 = arith.constant 1.000000e+00 : f32
    %387 = vector.broadcast %cst_226 : f32 to vector<40x16xf32>
    %388 = arith.subf %387, %386 : vector<40x16xf32>
    %cst_227 = arith.constant 0.000000e+00 : f32
    %389 = vector.broadcast %cst_227 : f32 to vector<40x16xf32>
    %390 = arith.cmpf oge, %360, %389 : vector<40x16xf32>
    %cst_228 = arith.constant 0.000000e+00 : f32
    %391 = vector.broadcast %cst_228 : f32 to vector<40x16xf32>
    %392 = arith.subf %391, %388 : vector<40x16xf32>
    %393 = arith.select %390, %388, %392 : vector<40x16xi1>, vector<40x16xf32>
    %cst_229 = arith.constant 1.000000e+00 : f32
    %394 = vector.broadcast %cst_229 : f32 to vector<40x16xf32>
    %395 = arith.addf %394, %393 : vector<40x16xf32>
    %396 = arith.mulf %358, %395 : vector<40x16xf32>
    %cst_230 = arith.constant dense<0.000000e+00> : vector<40x16xf32>
    %397 = tpu.matmul %1, %396, %cst_230 {dimension_numbers = #tpu.dot_dimension_numbers<[1], [0], [0], [1], [0, 0, 1, 1], [], []>} : vector<40x40xf32>, vector<40x16xf32>, vector<40x16xf32> -> vector<40x16xf32>
    %cst_231 = arith.constant dense<0.000000e+00> : vector<40x16xf32>
    %398 = tpu.matmul %2, %396, %cst_231 {dimension_numbers = #tpu.dot_dimension_numbers<[1], [0], [0], [1], [0, 0, 1, 1], [], []>} : vector<40x40xf32>, vector<40x16xf32>, vector<40x16xf32> -> vector<40x16xf32>
    %c1_232 = arith.constant 1 : index
    %c0_233 = arith.constant 0 : index
    %c0_234 = arith.constant 0 : index
    %c0_235 = arith.constant 0 : index
    %399 = vector.load %arg18[%c1_232, %c0_233, %c0_234, %c0_235] : memref<2x3x16x16xf32, #tpu.memory_space<vmem>>, vector<1x1x16x16xf32>
    %400 = vector.shape_cast %399 : vector<1x1x16x16xf32> to vector<16x16xf32>
    %cst_236 = arith.constant dense<0.000000e+00> : vector<40x16xf32>
    %401 = tpu.matmul %397, %400, %cst_236 {dimension_numbers = #tpu.dot_dimension_numbers<[1], [0], [0], [1], [0, 0, 1, 1], [], []>} : vector<40x16xf32>, vector<16x16xf32>, vector<40x16xf32> -> vector<40x16xf32>
    %c1_237 = arith.constant 1 : index
    %c1_238 = arith.constant 1 : index
    %c0_239 = arith.constant 0 : index
    %c0_240 = arith.constant 0 : index
    %402 = vector.load %arg18[%c1_237, %c1_238, %c0_239, %c0_240] : memref<2x3x16x16xf32, #tpu.memory_space<vmem>>, vector<1x1x16x16xf32>
    %403 = vector.shape_cast %402 : vector<1x1x16x16xf32> to vector<16x16xf32>
    %cst_241 = arith.constant dense<0.000000e+00> : vector<40x16xf32>
    %404 = tpu.matmul %396, %403, %cst_241 {dimension_numbers = #tpu.dot_dimension_numbers<[1], [0], [0], [1], [0, 0, 1, 1], [], []>} : vector<40x16xf32>, vector<16x16xf32>, vector<40x16xf32> -> vector<40x16xf32>
    %405 = arith.addf %401, %404 : vector<40x16xf32>
    %c1_242 = arith.constant 1 : index
    %c2_243 = arith.constant 2 : index
    %c0_244 = arith.constant 0 : index
    %c0_245 = arith.constant 0 : index
    %406 = vector.load %arg18[%c1_242, %c2_243, %c0_244, %c0_245] : memref<2x3x16x16xf32, #tpu.memory_space<vmem>>, vector<1x1x16x16xf32>
    %407 = vector.shape_cast %406 : vector<1x1x16x16xf32> to vector<16x16xf32>
    %cst_246 = arith.constant dense<0.000000e+00> : vector<40x16xf32>
    %408 = tpu.matmul %398, %407, %cst_246 {dimension_numbers = #tpu.dot_dimension_numbers<[1], [0], [0], [1], [0, 0, 1, 1], [], []>} : vector<40x16xf32>, vector<16x16xf32>, vector<40x16xf32> -> vector<40x16xf32>
    %409 = arith.addf %405, %408 : vector<40x16xf32>
    %c1_247 = arith.constant 1 : index
    %c0_248 = arith.constant 0 : index
    %c0_249 = arith.constant 0 : index
    %410 = vector.load %arg19[%c1_247, %c0_248, %c0_249] : memref<2x1x16xf32, #tpu.memory_space<vmem>>, vector<1x1x16xf32>
    %411 = vector.shape_cast %410 : vector<1x1x16xf32> to vector<1x16xf32>
    %412 = vector.broadcast %411 : vector<1x16xf32> to vector<40x16xf32>
    %413 = arith.addf %409, %412 : vector<40x16xf32>
    %414 = tpu.concatenate %339, %413 in 1 : vector<40x16xf32>, vector<40x16xf32> -> vector<40x32xf32>
    %c1_250 = arith.constant 1 : index
    %c0_251 = arith.constant 0 : index
    %c0_252 = arith.constant 0 : index
    %415 = vector.load %arg20[%c1_250, %c0_251, %c0_252] : memref<2x32x32xf32, #tpu.memory_space<vmem>>, vector<1x32x32xf32>
    %416 = vector.shape_cast %415 : vector<1x32x32xf32> to vector<32x32xf32>
    %cst_253 = arith.constant dense<0.000000e+00> : vector<40x32xf32>
    %417 = tpu.matmul %414, %416, %cst_253 {dimension_numbers = #tpu.dot_dimension_numbers<[1], [0], [0], [1], [0, 0, 1, 1], [], []>} : vector<40x32xf32>, vector<32x32xf32>, vector<40x32xf32> -> vector<40x32xf32>
    %418 = arith.addf %262, %417 : vector<40x32xf32>
    %c1_254 = arith.constant 1 : index
    %c0_255 = arith.constant 0 : index
    %c0_256 = arith.constant 0 : index
    %419 = vector.load %arg21[%c1_254, %c0_255, %c0_256] : memref<2x1x32xf32, #tpu.memory_space<vmem>>, vector<1x1x32xf32>
    %420 = vector.shape_cast %419 : vector<1x1x32xf32> to vector<1x32xf32>
    %421 = vector.broadcast %420 : vector<1x32xf32> to vector<40x32xf32>
    %422 = arith.addf %418, %421 : vector<40x32xf32>
    %c1_257 = arith.constant 1 : index
    %c0_258 = arith.constant 0 : index
    %c0_259 = arith.constant 0 : index
    %423 = vector.load %arg22[%c1_257, %c0_258, %c0_259] : memref<2x1x32xf32, #tpu.memory_space<vmem>>, vector<1x1x32xf32>
    %424 = vector.shape_cast %423 : vector<1x1x32xf32> to vector<1x32xf32>
    %c1_260 = arith.constant 1 : index
    %c0_261 = arith.constant 0 : index
    %c0_262 = arith.constant 0 : index
    %425 = vector.load %arg23[%c1_260, %c0_261, %c0_262] : memref<2x1x32xf32, #tpu.memory_space<vmem>>, vector<1x1x32xf32>
    %426 = vector.shape_cast %425 : vector<1x1x32xf32> to vector<1x32xf32>
    %cst_263 = arith.constant dense<0.000000e+00> : vector<40xf32>
    %427 = vector.multi_reduction <add>, %422, %cst_263 [1] : vector<40x32xf32> to vector<40xf32>
    %428 = vector.shape_cast %427 : vector<40xf32> to vector<40x1xf32>
    %cst_264 = arith.constant 3.200000e+01 : f32
    %429 = vector.broadcast %cst_264 : f32 to vector<40x1xf32>
    %430 = arith.divf %428, %429 : vector<40x1xf32>
    %431 = vector.broadcast %430 : vector<40x1xf32> to vector<40x32xf32>
    %432 = arith.subf %422, %431 : vector<40x32xf32>
    %433 = arith.mulf %432, %432 : vector<40x32xf32>
    %cst_265 = arith.constant dense<0.000000e+00> : vector<40xf32>
    %434 = vector.multi_reduction <add>, %433, %cst_265 [1] : vector<40x32xf32> to vector<40xf32>
    %435 = vector.shape_cast %434 : vector<40xf32> to vector<40x1xf32>
    %cst_266 = arith.constant 3.200000e+01 : f32
    %436 = vector.broadcast %cst_266 : f32 to vector<40x1xf32>
    %437 = arith.divf %435, %436 : vector<40x1xf32>
    %438 = vector.broadcast %430 : vector<40x1xf32> to vector<40x32xf32>
    %439 = arith.subf %422, %438 : vector<40x32xf32>
    %cst_267 = arith.constant 9.99999997E-7 : f32
    %440 = vector.broadcast %cst_267 : f32 to vector<40x1xf32>
    %441 = arith.addf %437, %440 : vector<40x1xf32>
    %442 = math.rsqrt %441 : vector<40x1xf32>
    %443 = vector.broadcast %442 : vector<40x1xf32> to vector<40x32xf32>
    %444 = arith.mulf %439, %443 : vector<40x32xf32>
    %445 = vector.broadcast %424 : vector<1x32xf32> to vector<40x32xf32>
    %446 = arith.mulf %444, %445 : vector<40x32xf32>
    %447 = vector.broadcast %426 : vector<1x32xf32> to vector<40x32xf32>
    %448 = arith.addf %446, %447 : vector<40x32xf32>
    %c1_268 = arith.constant 1 : index
    %c0_269 = arith.constant 0 : index
    %c0_270 = arith.constant 0 : index
    %449 = vector.load %arg24[%c1_268, %c0_269, %c0_270] : memref<2x32x128xf32, #tpu.memory_space<vmem>>, vector<1x32x128xf32>
    %450 = vector.shape_cast %449 : vector<1x32x128xf32> to vector<32x128xf32>
    %cst_271 = arith.constant dense<0.000000e+00> : vector<40x128xf32>
    %451 = tpu.matmul %448, %450, %cst_271 {dimension_numbers = #tpu.dot_dimension_numbers<[1], [0], [0], [1], [0, 0, 1, 1], [], []>} : vector<40x32xf32>, vector<32x128xf32>, vector<40x128xf32> -> vector<40x128xf32>
    %c1_272 = arith.constant 1 : index
    %c0_273 = arith.constant 0 : index
    %c0_274 = arith.constant 0 : index
    %452 = vector.load %arg25[%c1_272, %c0_273, %c0_274] : memref<2x1x128xf32, #tpu.memory_space<vmem>>, vector<1x1x128xf32>
    %453 = vector.shape_cast %452 : vector<1x1x128xf32> to vector<1x128xf32>
    %454 = vector.broadcast %453 : vector<1x128xf32> to vector<40x128xf32>
    %455 = arith.addf %451, %454 : vector<40x128xf32>
    %cst_275 = arith.constant 5.000000e-01 : f32
    %456 = vector.broadcast %cst_275 : f32 to vector<40x128xf32>
    %457 = arith.mulf %456, %455 : vector<40x128xf32>
    %cst_276 = arith.constant 0.707106769 : f32
    %458 = vector.broadcast %cst_276 : f32 to vector<40x128xf32>
    %459 = arith.mulf %455, %458 : vector<40x128xf32>
    %460 = math.absf %459 : vector<40x128xf32>
    %cst_277 = arith.constant 0.327591091 : f32
    %461 = vector.broadcast %cst_277 : f32 to vector<40x128xf32>
    %462 = arith.mulf %461, %460 : vector<40x128xf32>
    %cst_278 = arith.constant 1.000000e+00 : f32
    %463 = vector.broadcast %cst_278 : f32 to vector<40x128xf32>
    %464 = arith.addf %463, %462 : vector<40x128xf32>
    %cst_279 = arith.constant 1.000000e+00 : f32
    %465 = vector.broadcast %cst_279 : f32 to vector<40x128xf32>
    %466 = arith.divf %465, %464 : vector<40x128xf32>
    %cst_280 = arith.constant 1.06140542 : f32
    %467 = vector.broadcast %cst_280 : f32 to vector<40x128xf32>
    %468 = arith.mulf %467, %466 : vector<40x128xf32>
    %cst_281 = arith.constant -1.45315206 : f32
    %469 = vector.broadcast %cst_281 : f32 to vector<40x128xf32>
    %470 = arith.addf %468, %469 : vector<40x128xf32>
    %471 = arith.mulf %470, %466 : vector<40x128xf32>
    %cst_282 = arith.constant 1.42141378 : f32
    %472 = vector.broadcast %cst_282 : f32 to vector<40x128xf32>
    %473 = arith.addf %471, %472 : vector<40x128xf32>
    %474 = arith.mulf %473, %466 : vector<40x128xf32>
    %cst_283 = arith.constant -0.284496725 : f32
    %475 = vector.broadcast %cst_283 : f32 to vector<40x128xf32>
    %476 = arith.addf %474, %475 : vector<40x128xf32>
    %477 = arith.mulf %476, %466 : vector<40x128xf32>
    %cst_284 = arith.constant 0.254829586 : f32
    %478 = vector.broadcast %cst_284 : f32 to vector<40x128xf32>
    %479 = arith.addf %477, %478 : vector<40x128xf32>
    %480 = arith.mulf %479, %466 : vector<40x128xf32>
    %481 = arith.mulf %460, %460 : vector<40x128xf32>
    %cst_285 = arith.constant 0.000000e+00 : f32
    %482 = vector.broadcast %cst_285 : f32 to vector<40x128xf32>
    %483 = arith.subf %482, %481 : vector<40x128xf32>
    %484 = math.exp %483 : vector<40x128xf32>
    %485 = arith.mulf %480, %484 : vector<40x128xf32>
    %cst_286 = arith.constant 1.000000e+00 : f32
    %486 = vector.broadcast %cst_286 : f32 to vector<40x128xf32>
    %487 = arith.subf %486, %485 : vector<40x128xf32>
    %cst_287 = arith.constant 0.000000e+00 : f32
    %488 = vector.broadcast %cst_287 : f32 to vector<40x128xf32>
    %489 = arith.cmpf oge, %459, %488 : vector<40x128xf32>
    %cst_288 = arith.constant 0.000000e+00 : f32
    %490 = vector.broadcast %cst_288 : f32 to vector<40x128xf32>
    %491 = arith.subf %490, %487 : vector<40x128xf32>
    %492 = arith.select %489, %487, %491 : vector<40x128xi1>, vector<40x128xf32>
    %cst_289 = arith.constant 1.000000e+00 : f32
    %493 = vector.broadcast %cst_289 : f32 to vector<40x128xf32>
    %494 = arith.addf %493, %492 : vector<40x128xf32>
    %495 = arith.mulf %457, %494 : vector<40x128xf32>
    %c1_290 = arith.constant 1 : index
    %c0_291 = arith.constant 0 : index
    %c0_292 = arith.constant 0 : index
    %496 = vector.load %arg26[%c1_290, %c0_291, %c0_292] : memref<2x128x32xf32, #tpu.memory_space<vmem>>, vector<1x128x32xf32>
    %497 = vector.shape_cast %496 : vector<1x128x32xf32> to vector<128x32xf32>
    %cst_293 = arith.constant dense<0.000000e+00> : vector<40x32xf32>
    %498 = tpu.matmul %495, %497, %cst_293 {dimension_numbers = #tpu.dot_dimension_numbers<[1], [0], [0], [1], [0, 0, 1, 1], [], []>} : vector<40x128xf32>, vector<128x32xf32>, vector<40x32xf32> -> vector<40x32xf32>
    %499 = arith.addf %422, %498 : vector<40x32xf32>
    %c1_294 = arith.constant 1 : index
    %c0_295 = arith.constant 0 : index
    %c0_296 = arith.constant 0 : index
    %500 = vector.load %arg27[%c1_294, %c0_295, %c0_296] : memref<2x1x32xf32, #tpu.memory_space<vmem>>, vector<1x1x32xf32>
    %501 = vector.shape_cast %500 : vector<1x1x32xf32> to vector<1x32xf32>
    %502 = vector.broadcast %501 : vector<1x32xf32> to vector<40x32xf32>
    %503 = arith.addf %499, %502 : vector<40x32xf32>
    %c0_297 = arith.constant 0 : index
    %c0_298 = arith.constant 0 : index
    %504 = vector.load %arg6[%c0_297, %c0_298] : memref<8x40xf32, #tpu.memory_space<vmem>>, vector<8x40xf32>
    %cst_299 = arith.constant dense<0.000000e+00> : vector<8x32xf32>
    %505 = tpu.matmul %504, %503, %cst_299 {dimension_numbers = #tpu.dot_dimension_numbers<[1], [0], [0], [1], [0, 0, 1, 1], [], []>} : vector<8x40xf32>, vector<40x32xf32>, vector<8x32xf32> -> vector<8x32xf32>
    %c0_300 = arith.constant 0 : index
    %c0_301 = arith.constant 0 : index
    %506 = vector.load %arg28[%c0_300, %c0_301] : memref<1x32xf32, #tpu.memory_space<vmem>>, vector<1x32xf32>
    %c0_302 = arith.constant 0 : index
    %c0_303 = arith.constant 0 : index
    %507 = vector.load %arg29[%c0_302, %c0_303] : memref<1x32xf32, #tpu.memory_space<vmem>>, vector<1x32xf32>
    %cst_304 = arith.constant dense<0.000000e+00> : vector<8xf32>
    %508 = vector.multi_reduction <add>, %505, %cst_304 [1] : vector<8x32xf32> to vector<8xf32>
    %509 = vector.shape_cast %508 : vector<8xf32> to vector<8x1xf32>
    %cst_305 = arith.constant 3.200000e+01 : f32
    %510 = vector.broadcast %cst_305 : f32 to vector<8x1xf32>
    %511 = arith.divf %509, %510 : vector<8x1xf32>
    %512 = vector.broadcast %511 : vector<8x1xf32> to vector<8x32xf32>
    %513 = arith.subf %505, %512 : vector<8x32xf32>
    %514 = arith.mulf %513, %513 : vector<8x32xf32>
    %cst_306 = arith.constant dense<0.000000e+00> : vector<8xf32>
    %515 = vector.multi_reduction <add>, %514, %cst_306 [1] : vector<8x32xf32> to vector<8xf32>
    %516 = vector.shape_cast %515 : vector<8xf32> to vector<8x1xf32>
    %cst_307 = arith.constant 3.200000e+01 : f32
    %517 = vector.broadcast %cst_307 : f32 to vector<8x1xf32>
    %518 = arith.divf %516, %517 : vector<8x1xf32>
    %519 = vector.broadcast %511 : vector<8x1xf32> to vector<8x32xf32>
    %520 = arith.subf %505, %519 : vector<8x32xf32>
    %cst_308 = arith.constant 9.99999997E-7 : f32
    %521 = vector.broadcast %cst_308 : f32 to vector<8x1xf32>
    %522 = arith.addf %518, %521 : vector<8x1xf32>
    %523 = math.rsqrt %522 : vector<8x1xf32>
    %524 = vector.broadcast %523 : vector<8x1xf32> to vector<8x32xf32>
    %525 = arith.mulf %520, %524 : vector<8x32xf32>
    %526 = vector.broadcast %506 : vector<1x32xf32> to vector<8x32xf32>
    %527 = arith.mulf %525, %526 : vector<8x32xf32>
    %528 = vector.broadcast %507 : vector<1x32xf32> to vector<8x32xf32>
    %529 = arith.addf %527, %528 : vector<8x32xf32>
    %c0_309 = arith.constant 0 : index
    %c0_310 = arith.constant 0 : index
    %530 = vector.load %arg30[%c0_309, %c0_310] : memref<32x10xf32, #tpu.memory_space<vmem>>, vector<32x10xf32>
    %cst_311 = arith.constant dense<0.000000e+00> : vector<8x10xf32>
    %531 = tpu.matmul %529, %530, %cst_311 {dimension_numbers = #tpu.dot_dimension_numbers<[1], [0], [0], [1], [0, 0, 1, 1], [], []>} : vector<8x32xf32>, vector<32x10xf32>, vector<8x10xf32> -> vector<8x10xf32>
    %c0_312 = arith.constant 0 : index
    %c0_313 = arith.constant 0 : index
    %532 = vector.load %arg31[%c0_312, %c0_313] : memref<1x10xf32, #tpu.memory_space<vmem>>, vector<1x10xf32>
    %533 = vector.broadcast %532 : vector<1x10xf32> to vector<8x10xf32>
    %534 = arith.addf %531, %533 : vector<8x10xf32>
    %c0_314 = arith.constant 0 : index
    %c0_315 = arith.constant 0 : index
    %535 = vector.load %arg32[%c0_314, %c0_315] : memref<8x10xf32, #tpu.memory_space<vmem>>, vector<8x10xf32>
    tpu.vector_store %arg32[%c0_314, %c0_315], %534 {strides = array<i32>} : memref<8x10xf32, #tpu.memory_space<vmem>>, vector<8x10xf32>,
    return
  }
  func.func @transform_0(%arg0: i32) -> (i32, i32) {
    %c0_i32 = arith.constant 0 : i32
    %c0_i32_0 = arith.constant 0 : i32
    return %arg0, %c0_i32 : i32, i32
  }
  func.func @transform_1(%arg0: i32) -> (i32, i32) {
    %c0_i32 = arith.constant 0 : i32
    %c0_i32_0 = arith.constant 0 : i32
    %c0_i32_1 = arith.constant 0 : i32
    return %c0_i32, %c0_i32_0 : i32, i32
  }
  func.func @transform_2(%arg0: i32) -> (i32, i32) {
    %c0_i32 = arith.constant 0 : i32
    %c0_i32_0 = arith.constant 0 : i32
    %c0_i32_1 = arith.constant 0 : i32
    return %c0_i32, %c0_i32_0 : i32, i32
  }
  func.func @transform_3(%arg0: i32) -> (i32, i32) {
    %c0_i32 = arith.constant 0 : i32
    %c0_i32_0 = arith.constant 0 : i32
    %c0_i32_1 = arith.constant 0 : i32
    return %c0_i32, %c0_i32_0 : i32, i32
  }
  func.func @transform_4(%arg0: i32) -> (i32, i32) {
    %c0_i32 = arith.constant 0 : i32
    %c0_i32_0 = arith.constant 0 : i32
    %c0_i32_1 = arith.constant 0 : i32
    return %c0_i32, %c0_i32_0 : i32, i32
  }
  func.func @transform_5(%arg0: i32) -> (i32, i32) {
    %c0_i32 = arith.constant 0 : i32
    %c0_i32_0 = arith.constant 0 : i32
    %c0_i32_1 = arith.constant 0 : i32
    return %c0_i32, %c0_i32_0 : i32, i32
  }
  func.func @transform_6(%arg0: i32) -> (i32, i32) {
    %c0_i32 = arith.constant 0 : i32
    %c0_i32_0 = arith.constant 0 : i32
    %c0_i32_1 = arith.constant 0 : i32
    return %c0_i32, %c0_i32_0 : i32, i32
  }
  func.func @transform_7(%arg0: i32) -> (i32, i32, i32) {
    %c0_i32 = arith.constant 0 : i32
    %c0_i32_0 = arith.constant 0 : i32
    %c0_i32_1 = arith.constant 0 : i32
    %c0_i32_2 = arith.constant 0 : i32
    return %c0_i32, %c0_i32_0, %c0_i32_1 : i32, i32, i32
  }
  func.func @transform_8(%arg0: i32) -> (i32, i32, i32) {
    %c0_i32 = arith.constant 0 : i32
    %c0_i32_0 = arith.constant 0 : i32
    %c0_i32_1 = arith.constant 0 : i32
    %c0_i32_2 = arith.constant 0 : i32
    return %c0_i32, %c0_i32_0, %c0_i32_1 : i32, i32, i32
  }
  func.func @transform_9(%arg0: i32) -> (i32, i32, i32) {
    %c0_i32 = arith.constant 0 : i32
    %c0_i32_0 = arith.constant 0 : i32
    %c0_i32_1 = arith.constant 0 : i32
    %c0_i32_2 = arith.constant 0 : i32
    return %c0_i32, %c0_i32_0, %c0_i32_1 : i32, i32, i32
  }
  func.func @transform_10(%arg0: i32) -> (i32, i32, i32) {
    %c0_i32 = arith.constant 0 : i32
    %c0_i32_0 = arith.constant 0 : i32
    %c0_i32_1 = arith.constant 0 : i32
    %c0_i32_2 = arith.constant 0 : i32
    return %c0_i32, %c0_i32_0, %c0_i32_1 : i32, i32, i32
  }
  func.func @transform_11(%arg0: i32) -> (i32, i32, i32) {
    %c0_i32 = arith.constant 0 : i32
    %c0_i32_0 = arith.constant 0 : i32
    %c0_i32_1 = arith.constant 0 : i32
    %c0_i32_2 = arith.constant 0 : i32
    return %c0_i32, %c0_i32_0, %c0_i32_1 : i32, i32, i32
  }
  func.func @transform_12(%arg0: i32) -> (i32, i32, i32) {
    %c0_i32 = arith.constant 0 : i32
    %c0_i32_0 = arith.constant 0 : i32
    %c0_i32_1 = arith.constant 0 : i32
    %c0_i32_2 = arith.constant 0 : i32
    return %c0_i32, %c0_i32_0, %c0_i32_1 : i32, i32, i32
  }
  func.func @transform_13(%arg0: i32) -> (i32, i32, i32) {
    %c0_i32 = arith.constant 0 : i32
    %c0_i32_0 = arith.constant 0 : i32
    %c0_i32_1 = arith.constant 0 : i32
    %c0_i32_2 = arith.constant 0 : i32
    return %c0_i32, %c0_i32_0, %c0_i32_1 : i32, i32, i32
  }
  func.func @transform_14(%arg0: i32) -> (i32, i32, i32) {
    %c0_i32 = arith.constant 0 : i32
    %c0_i32_0 = arith.constant 0 : i32
    %c0_i32_1 = arith.constant 0 : i32
    %c0_i32_2 = arith.constant 0 : i32
    return %c0_i32, %c0_i32_0, %c0_i32_1 : i32, i32, i32
  }
  func.func @transform_15(%arg0: i32) -> (i32, i32, i32, i32) {
    %c0_i32 = arith.constant 0 : i32
    %c0_i32_0 = arith.constant 0 : i32
    %c0_i32_1 = arith.constant 0 : i32
    %c0_i32_2 = arith.constant 0 : i32
    %c0_i32_3 = arith.constant 0 : i32
    return %c0_i32, %c0_i32_0, %c0_i32_1, %c0_i32_2 : i32, i32, i32, i32
  }
  func.func @transform_16(%arg0: i32) -> (i32, i32, i32) {
    %c0_i32 = arith.constant 0 : i32
    %c0_i32_0 = arith.constant 0 : i32
    %c0_i32_1 = arith.constant 0 : i32
    %c0_i32_2 = arith.constant 0 : i32
    return %c0_i32, %c0_i32_0, %c0_i32_1 : i32, i32, i32
  }
  func.func @transform_17(%arg0: i32) -> (i32, i32, i32, i32) {
    %c0_i32 = arith.constant 0 : i32
    %c0_i32_0 = arith.constant 0 : i32
    %c0_i32_1 = arith.constant 0 : i32
    %c0_i32_2 = arith.constant 0 : i32
    %c0_i32_3 = arith.constant 0 : i32
    return %c0_i32, %c0_i32_0, %c0_i32_1, %c0_i32_2 : i32, i32, i32, i32
  }
  func.func @transform_18(%arg0: i32) -> (i32, i32, i32) {
    %c0_i32 = arith.constant 0 : i32
    %c0_i32_0 = arith.constant 0 : i32
    %c0_i32_1 = arith.constant 0 : i32
    %c0_i32_2 = arith.constant 0 : i32
    return %c0_i32, %c0_i32_0, %c0_i32_1 : i32, i32, i32
  }
  func.func @transform_19(%arg0: i32) -> (i32, i32, i32) {
    %c0_i32 = arith.constant 0 : i32
    %c0_i32_0 = arith.constant 0 : i32
    %c0_i32_1 = arith.constant 0 : i32
    %c0_i32_2 = arith.constant 0 : i32
    return %c0_i32, %c0_i32_0, %c0_i32_1 : i32, i32, i32
  }
  func.func @transform_20(%arg0: i32) -> (i32, i32, i32) {
    %c0_i32 = arith.constant 0 : i32
    %c0_i32_0 = arith.constant 0 : i32
    %c0_i32_1 = arith.constant 0 : i32
    %c0_i32_2 = arith.constant 0 : i32
    return %c0_i32, %c0_i32_0, %c0_i32_1 : i32, i32, i32
  }
  func.func @transform_21(%arg0: i32) -> (i32, i32, i32) {
    %c0_i32 = arith.constant 0 : i32
    %c0_i32_0 = arith.constant 0 : i32
    %c0_i32_1 = arith.constant 0 : i32
    %c0_i32_2 = arith.constant 0 : i32
    return %c0_i32, %c0_i32_0, %c0_i32_1 : i32, i32, i32
  }
  func.func @transform_22(%arg0: i32) -> (i32, i32, i32) {
    %c0_i32 = arith.constant 0 : i32
    %c0_i32_0 = arith.constant 0 : i32
    %c0_i32_1 = arith.constant 0 : i32
    %c0_i32_2 = arith.constant 0 : i32
    return %c0_i32, %c0_i32_0, %c0_i32_1 : i32, i32, i32
  }
  func.func @transform_23(%arg0: i32) -> (i32, i32, i32) {
    %c0_i32 = arith.constant 0 : i32
    %c0_i32_0 = arith.constant 0 : i32
    %c0_i32_1 = arith.constant 0 : i32
    %c0_i32_2 = arith.constant 0 : i32
    return %c0_i32, %c0_i32_0, %c0_i32_1 : i32, i32, i32
  }
  func.func @transform_24(%arg0: i32) -> (i32, i32, i32) {
    %c0_i32 = arith.constant 0 : i32
    %c0_i32_0 = arith.constant 0 : i32
    %c0_i32_1 = arith.constant 0 : i32
    %c0_i32_2 = arith.constant 0 : i32
    return %c0_i32, %c0_i32_0, %c0_i32_1 : i32, i32, i32
  }
  func.func @transform_25(%arg0: i32) -> (i32, i32, i32) {
    %c0_i32 = arith.constant 0 : i32
    %c0_i32_0 = arith.constant 0 : i32
    %c0_i32_1 = arith.constant 0 : i32
    %c0_i32_2 = arith.constant 0 : i32
    return %c0_i32, %c0_i32_0, %c0_i32_1 : i32, i32, i32
  }
  func.func @transform_26(%arg0: i32) -> (i32, i32, i32) {
    %c0_i32 = arith.constant 0 : i32
    %c0_i32_0 = arith.constant 0 : i32
    %c0_i32_1 = arith.constant 0 : i32
    %c0_i32_2 = arith.constant 0 : i32
    return %c0_i32, %c0_i32_0, %c0_i32_1 : i32, i32, i32
  }
  func.func @transform_27(%arg0: i32) -> (i32, i32) {
    %c0_i32 = arith.constant 0 : i32
    %c0_i32_0 = arith.constant 0 : i32
    %c0_i32_1 = arith.constant 0 : i32
    return %c0_i32, %c0_i32_0 : i32, i32
  }
  func.func @transform_28(%arg0: i32) -> (i32, i32) {
    %c0_i32 = arith.constant 0 : i32
    %c0_i32_0 = arith.constant 0 : i32
    %c0_i32_1 = arith.constant 0 : i32
    return %c0_i32, %c0_i32_0 : i32, i32
  }
  func.func @transform_29(%arg0: i32) -> (i32, i32) {
    %c0_i32 = arith.constant 0 : i32
    %c0_i32_0 = arith.constant 0 : i32
    %c0_i32_1 = arith.constant 0 : i32
    return %c0_i32, %c0_i32_0 : i32, i32
  }
  func.func @transform_30(%arg0: i32) -> (i32, i32) {
    %c0_i32 = arith.constant 0 : i32
    %c0_i32_0 = arith.constant 0 : i32
    %c0_i32_1 = arith.constant 0 : i32
    return %c0_i32, %c0_i32_0 : i32, i32
  }
  func.func @transform_31(%arg0: i32) -> (i32, i32) {
    %c0_i32 = arith.constant 0 : i32
    %c0_i32_0 = arith.constant 0 : i32
    return %arg0, %c0_i32 : i32, i32
  }
}

</mosaic_0001>

<bundles_post_ra>
// kernel: tpu_custom_call.1
= control target key start
LH: loop header
LB: loop body
LE: loop exit
PB: predicated region body
PF: predicated region fallthrough
CT: control target
= control target key end

     0   :  { %s11263_s6 = smov 1   ;;  %s11264_s10 = smov 2   ;;  %s13975_s0 = inlined_call_operand.smem [shape: u32[32], index: -1, kind: input, shape index: {}] }
   0x1   :  { %s11312_s5 = sld [smem:[%s13975_s0]]   ;;  %s11265_s14 = smov 3  }
   0x2   :  { %s11317_s9 = sld [smem:[%s13975_s0 + %s11263_s6]]   ;;  %s11266_s18 = smov 4  }
   0x3   :  { %s11322_s13 = sld [smem:[%s13975_s0 + %s11264_s10]]   ;;  %s11267_s22 = smov 5  }
   0x4   :  { %s11327_s17 = sld [smem:[%s13975_s0 + %s11265_s14]]   ;;  %s11268_s26 = smov 6  }
   0x5   :  { %s11332_s21 = sld [smem:[%s13975_s0 + %s11266_s18]]   ;;  %s11269_s30 = smov 7  }
   0x6   :  { %s11337_s25 = sld [smem:[%s13975_s0 + %s11267_s22]]   ;;  %s11270_s4 = smov 8  }
   0x7   :  { %14024 = sst [smem:[#allocation5_spill]] %s11312_s5  ;;  %s11271_s10 = smov 9  }
   0x8   :  { %14025 = sst [smem:[#allocation6_spill]] %s11317_s9  ;;  %s11272_s15 = smov 10  }
   0x9   :  { %s11342_s29 = sld [smem:[%s13975_s0 + %s11268_s26]]   ;;  %s11273_s20 = smov 11  }
   0xa   :  { %s11347_s3 = sld [smem:[%s13975_s0 + %s11269_s30]]   ;;  %s11274_s26 = smov 12  }
   0xb   :  { %s11352_s8 = sld [smem:[%s13975_s0 + %s11270_s4]]   ;;  %s11275_s1 = smov 13  }
   0xc   :  { %14026 = sst [smem:[#allocation7_spill]] %s11337_s25  ;;  %s11276_s7 = smov 14  }
   0xd   :  { %s11357_s14 = sld [smem:[%s13975_s0 + %s11271_s10]]   ;;  %s11278_s22 = smov 16  }
   0xe   :  { %s11362_s19 = sld [smem:[%s13975_s0 + %s11272_s15]]   ;;  %s11277_s15 = smov 15  }
   0xf   :  { %14027 = sst [smem:[#allocation8_spill]] %s11342_s29  ;;  %s11279_s28 = smov 17  }
  0x10   :  { %14028 = sst [smem:[#allocation9_spill]] %s11347_s3 }
  0x11   :  { %14029 = sst [smem:[#allocation10_spill]] %s11352_s8 }
  0x12   :  { %s11367_s24 = sld [smem:[%s13975_s0 + %s11273_s20]]  }
  0x13   :  { %14030 = sst [smem:[#allocation11_spill]] %s11357_s14 }
  0x14   :  { %s11372_s30 = sld [smem:[%s13975_s0 + %s11274_s26]]  }
  0x15   :  { %s11377_s6 = sld [smem:[%s13975_s0 + %s11275_s1]]  }
  0x16   :  { %s11382_s12 = sld [smem:[%s13975_s0 + %s11276_s7]]   ;;  %s11280_s7 = smov 18  }
  0x17   :  { %s11387_s20 = sld [smem:[%s13975_s0 + %s11277_s15]]   ;;  %s11281_s15 = smov 19  }
  0x18   :  { %s11392_s27 = sld [smem:[%s13975_s0 + %s11278_s22]]   ;;  %s11282_s22 = smov 20  }
  0x19   :  { %s11397_s4 = sld [smem:[%s13975_s0 + %s11279_s28]]   ;;  %s11283_s28 = smov 21  }
  0x1a   :  { %s11402_s25 = sld [smem:[%s13975_s0 + %s11280_s7]]   ;;  %s11284_s7 = smov 22  }
  0x1b   :  { %14031 = sst [smem:[#allocation12_spill]] %s11377_s6 }
  0x1c   :  { %14032 = sst [smem:[#allocation13_spill]] %s11382_s12 }
  0x1d   :  { %s11407_s12 = sld [smem:[%s13975_s0 + %s11281_s15]]   ;;  %s11285_s15 = smov 23  }
  0x1e   :  { %14033 = sst [smem:[#allocation14_spill]] %s11392_s27 }
  0x1f   :  { %14034 = sst [smem:[#allocation15_spill]] %s11397_s4 }
  0x20   :  { %14035 = sst [smem:[#allocation16_spill]] %s11402_s25 }
  0x21   :  { %s11412_s27 = sld [smem:[%s13975_s0 + %s11282_s22]]   ;;  %s11286_s22 = smov 24  }
  0x22   :  { %s11417_s4 = sld [smem:[%s13975_s0 + %s11283_s28]]   ;;  %s11287_s28 = smov 25  }
  0x23   :  { %14036 = sst [smem:[#allocation17_spill]] %s11407_s12 }
  0x24   :  { %s11422_s25 = sld [smem:[%s13975_s0 + %s11284_s7]]   ;;  %s11288_s7 = smov 26  }
  0x25   :  { %s11427_s12 = sld [smem:[%s13975_s0 + %s11285_s15]]   ;;  %s11289_s15 = smov 27  }
  0x27   :  { %14037 = sst [smem:[#allocation18_spill]] %s11412_s27 }
  0x28   :  { %14038 = sst [smem:[#allocation19_spill]] %s11417_s4 }
  0x29   :  { %s11432_s27 = sld [smem:[%s13975_s0 + %s11286_s22]]   ;;  %s11290_s22 = smov 28  }
  0x2a   :  { %14039 = sst [smem:[#allocation20_spill]] %s11422_s25 }
  0x2b   :  { %14040 = sst [smem:[#allocation21_spill]] %s11427_s12 }
  0x2c   :  { %s11437_s4 = sld [smem:[%s13975_s0 + %s11287_s28]]   ;;  %s11291_s28 = smov 29  }
  0x2d   :  { %s11442_s25 = sld [smem:[%s13975_s0 + %s11288_s7]]   ;;  %s11292_s7 = smov 30  }
  0x2e   :  { %s11447_s12 = sld [smem:[%s13975_s0 + %s11289_s15]]   ;;  %s11293_s15 = smov 31  }
  0x2f   :  { %14041 = sst [smem:[#allocation22_spill]] %s11432_s27 }
  0x30   :  { %s11452_s27 = sld [smem:[%s13975_s0 + %s11290_s22]]  }
  0x32   :  { %14042 = sst [smem:[#allocation23_spill]] %s11437_s4 }
  0x33   :  { %14043 = sst [smem:[#allocation24_spill]] %s11442_s25 }
  0x34   :  { %14044 = sst [smem:[#allocation25_spill]] %s11447_s12 }
  0x35   :  { %s11457_s4 = sld [smem:[%s13975_s0 + %s11291_s28]]  }
  0x36   :  { %s11462_s25 = sld [smem:[%s13975_s0 + %s11292_s7]]  }
  0x37   :  { %s11467_s12 = sld [smem:[%s13975_s0 + %s11293_s15]]  }
  0x3b   :  { %14045 = sst [smem:[#allocation26_spill]] %s11457_s4 }
  0x3d   :  { %14046 = sst [smem:[#allocation27_spill]] %s11467_s12 }
  0x3e   :  { %68 = vsyncpa [#allocation3], 0 }
  0x3f   :  { %70 = vsyncpa [#allocation3 + $0x1], 0  ;;  %s11469_s22 = smov 0   ;;  %s11471_s23 = smov 0  }
  0x40   :  { %s11473_s26 = smov 0   ;;  %s11475_s28 = smov 0  }
  0x41 LB: > { %s14047_s6 = sld [smem:[#allocation12_spill]]  ;;  %s11490_s0 = sadd.s32 4294967295, %s11261_s28   ;;  %s11257_s26 = sphi %s11473_s26, %s14112_s26   ;;  %s11253_s23 = sphi %s11471_s23, %s14114_s23   ;;  %s11249_s22 = sphi %s11469_s22, %s14113_s22   ;;  %s11261_s28 = sphi %s11475_s28, %s14110_s28  }
  0x42   : > { %s14048_s4 = sld [smem:[#allocation26_spill]]  ;;  %s8678_s1 = sadd.s32 4294967294, %s11261_s28  }
  0x43   : > { %s14049_s14 = sld [smem:[#allocation11_spill]]  ;;  %s11494_s2 = sadd.s32 1, %s11261_s28  }
  0x44   : > { %s14050_s8 = sld [smem:[#allocation10_spill]]  ;;  %s739_s7 = sadd.s32 1, %s11257_s26 }
  0x45   : > { %s14051_s3 = sld [smem:[#allocation9_spill]]  ;;  %s736_s10 = ssub.s32 %s11261_s28, %s11494_s2 }
  0x46   : > { %s14052_s29 = sld [smem:[#allocation8_spill]]  ;;  %p749_p0 = scmp.ne.s32.totalorder %s11257_s26, %s11253_s23 }
  0x47   : > { %s14053_s9 = sld [smem:[#allocation6_spill]]  ;;  %p737_p1 = scmp.eq.s32.totalorder %s736_s10, 0 }
  0x48   : > { %14054 = sst [smem:[#allocation28_spill]] %s11257_s26  ;;  %p750_p2 = scmp.eq.s32.totalorder %s11490_s0, 1 }
  0x49   : > { %14055 = sst [smem:[#allocation29_spill]] %s11494_s2  ;;  %p755_p3 = scmp.ne.s32.totalorder %s11253_s23, %s11249_s22 }
  0x4a   : > { %p756_p4 = scmp.eq.s32.totalorder %s8678_s1, 1  ;;  %p11507_p5 = por %p750_p2, %p749_p0 }
  0x4b   : > { %s11505_s11 = scalar_select %p737_p1, %s11257_s26, %s739_s7  }
  0x4c   : > { %s14057_s15 = scalar_select %p11507_p5, 1, 0 }
  0x4d   : > { %14056 = sst [smem:[#allocation30_spill]] %s11505_s11  ;;  %p11511_p6 = por %p756_p4, %p755_p3 }
  0x4e   : > { %14058 = sst [smem:[#allocation31_spill]] %s14057_s15  ;;  %p8681_p7 = scmp.ge.s32.totalorder %s11261_s28, 1 }
  0x4f   : > { %s14059_s16 = scalar_select %p11511_p6, 1, 0 }
  0x50   : > { %p874_p8 = scmp.lt.s32.totalorder %s11261_s28, 3 }
  0x51   : > { %14060 = sst [smem:[#allocation32_spill]] %s14059_s16 }
  0x52   : > { %p875_p9 = pnand %p8681_p7, %p874_p8 }
  0x54   : > { %878 = sbr.rel (%p875_p9) target bundleno = 8621 (0x21ad), region = 144 }
  0x59   : > { %v1128_v0 = vld [vmem:[%s14052_s29 + $0xf8] sm:$0xff]  ;;  %v1127_v4 = vld [vmem:[%s14052_s29 + $0xf0] sm:$0xff]  ;;  %v1126_v8 = vld [vmem:[%s14052_s29 + $0xe8] sm:$0xff]  ;;  %s955_s18 = smul.u32 5, %s11490_s0  ;;  %s14062_s5 = sld [smem:[#allocation5_spill]]  ;;  %vm11295_vm0 = vmmov 0  }
  0x5a   : > { %v1160_v1 = vld [vmem:[%s14052_s29 + $0x1f8] sm:$0xff]  ;;  %8991 = vmatprep.subr.mxu0 %v1128_v0  ;;  %v1159_v5 = vld [vmem:[%s14052_s29 + $0x1f0] sm:$0xff]  ;;  %v1158_v9 = vld [vmem:[%s14052_s29 + $0x1e8] sm:$0xff]  ;;  %vm2577_vm1 = vcmask 261120   ;;  %vm2782_vm2 = vcmask 130048   ;;  %s13998_s1 = smov 104  }
  0x5b   : > { %v1112_v2 = vld [vmem:[%s14052_s29 + $0x78] sm:$0xff]  ;;  %9038 = vmatprep.subr.mxu1 %v1160_v1  ;;  %v1111_v6 = vld [vmem:[%s14052_s29 + $0x70] sm:$0xff]  ;;  %v1110_v10 = vld [vmem:[%s14052_s29 + $0x68] sm:$0xff]  ;;  %p11554_p10 = scmp.lt.s32.totalorder %s955_s18, 9  ;;  %vm2903_vm3 = vcmask 64512   ;;  %vm3024_vm4 = vcmask 326656  }
  0x5c   : > { %v1144_v3 = vld [vmem:[%s14052_s29 + $0x178] sm:$0xff]  ;;  %8992 = vmatpush3.msra.mxu0 %v1112_v2  ;;  %v1143_v7 = vld [vmem:[%s14052_s29 + $0x170] sm:$0xff]  ;;  %v1142_v11 = vld [vmem:[%s14052_s29 + $0x168] sm:$0xff]  ;;  %s14089_s11 = sld [smem:[#allocation19_spill]] }
  0x5d   : > { %9039 = vmatpush3.msra.mxu1 %v1144_v3  ;;  %8993 = vmatprep.subr.mxu0 %v1127_v4  ;;  %v1125_v12 = vld [vmem:[%s14052_s29 + $0xe0] sm:$0xff]  ;;  %v1124_v16 = vld [vmem:[%s14052_s29 + $0xd8] sm:$0xff]  ;;  %v1123_v20 = vld [vmem:[%s14052_s29 + $0xd0] sm:$0xff]  ;;  %s14116_s18 = smov (!%p11554_p10, %s955_s18), 9  ;;  %s14090_s26 = sld [smem:[#allocation20_spill]] }
  0x5e   : > { %9040 = vmatprep.subr.mxu1 %v1159_v5  ;;  %8994 = vmatpush3.msra.mxu0 %v1111_v6  ;;  %v1157_v13 = vld [vmem:[%s14052_s29 + $0x1e0] sm:$0xff]  ;;  %v1156_v17 = vld [vmem:[%s14052_s29 + $0x1d8] sm:$0xff]  ;;  %v1155_v21 = vld [vmem:[%s14052_s29 + $0x1d0] sm:$0xff]  ;;  %s10904_s7 = smul.u32 192, %s14116_s18  ;;  %s14000_s18 = smov 112  }
  0x5f   : > { %9041 = vmatpush3.msra.mxu1 %v1143_v7  ;;  %8995 = vmatprep.subr.mxu0 %v1126_v8  ;;  %v1109_v14 = vld [vmem:[%s14052_s29 + $0x60] sm:$0xff]  ;;  %v1108_v18 = vld [vmem:[%s14052_s29 + $0x58] sm:$0xff]  ;;  %v1107_v22 = vld [vmem:[%s14052_s29 + $0x50] sm:$0xff] }
  0x60   : > { %9042 = vmatprep.subr.mxu1 %v1158_v9  ;;  %v1141_v15 = vld [vmem:[%s14052_s29 + $0x160] sm:$0xff]  ;;  %8996 = vmatpush3.msra.mxu0 %v1110_v10  ;;  %v1140_v19 = vld [vmem:[%s14052_s29 + $0x158] sm:$0xff]  ;;  %v1139_v23 = vld [vmem:[%s14052_s29 + $0x150] sm:$0xff]  ;;  %s11590_s10 = scalar_lea.vmem %s14062_s5, %s10904_s7  ;;  %s13990_s7 = smov 120  }
  0x61   : > { %9043 = vmatpush3.msra.mxu1 %v1142_v11  ;;  %8997 = vmatprep.subr.mxu0 %v1125_v12  ;;  %v1122_v24 = vld [vmem:[%s14052_s29 + $0xc8] sm:$0xff]  ;;  %v1121_v28 = vld [vmem:[%s14052_s29 + $0xc0] sm:$0xff]  ;;  %v1120_v32 = vld [vmem:[%s14052_s29 + $0xb8] sm:$0xff]  ;;  %s14003_s5 = smov 16  }
  0x62   : > { %9044 = vmatprep.subr.mxu1 %v1157_v13  ;;  %8998 = vmatpush3.msra.mxu0 %v1109_v14  ;;  %v1154_v25 = vld [vmem:[%s14052_s29 + $0x1c8] sm:$0xff]  ;;  %v1153_v29 = vld [vmem:[%s14052_s29 + $0x1c0] sm:$0xff]  ;;  %v1152_v33 = vld [vmem:[%s14052_s29 + $0x1b8] sm:$0xff] }
  0x63   : > { %9045 = vmatpush3.msra.mxu1 %v1141_v15  ;;  %8999 = vmatprep.subr.mxu0 %v1124_v16  ;;  %v1106_v26 = vld [vmem:[%s14052_s29 + $0x48] sm:$0xff]  ;;  %v1105_v30 = vld [vmem:[%s14052_s29 + $0x40] sm:$0xff]  ;;  %v1104_v34 = vld [vmem:[%s14052_s29 + $0x38] sm:$0xff]  ;;  %s14091_s2 = smov %s14090_s26 }
  0x64   : > { %9046 = vmatprep.subr.mxu1 %v1156_v17  ;;  %9000 = vmatpush3.msra.mxu0 %v1108_v18  ;;  %v1138_v27 = vld [vmem:[%s14052_s29 + $0x148] sm:$0xff]  ;;  %v1137_v31 = vld [vmem:[%s14052_s29 + $0x140] sm:$0xff]  ;;  %v1136_v35 = vld [vmem:[%s14052_s29 + $0x138] sm:$0xff] }
  0x65   : > { %9047 = vmatpush3.msra.mxu1 %v1140_v19  ;;  %9001 = vmatprep.subr.mxu0 %v1123_v20  ;;  %v1119_v36 = vld [vmem:[%s14052_s29 + $0xb0] sm:$0xff]  ;;  %v1118_v40 = vld [vmem:[%s14052_s29 + $0xa8] sm:$0xff]  ;;  %v1117_v44 = vld [vmem:[%s14052_s29 + $0xa0] sm:$0xff] }
  0x66   : > { %9048 = vmatprep.subr.mxu1 %v1155_v21  ;;  %9002 = vmatpush3.msra.mxu0 %v1107_v22  ;;  %v1151_v37 = vld [vmem:[%s14052_s29 + $0x1b0] sm:$0xff]  ;;  %v1150_v41 = vld [vmem:[%s14052_s29 + $0x1a8] sm:$0xff]  ;;  %v1149_v45 = vld [vmem:[%s14052_s29 + $0x1a0] sm:$0xff] }
  0x67   : > { %9049 = vmatpush3.msra.mxu1 %v1139_v23  ;;  %9003 = vmatprep.subr.mxu0 %v1122_v24  ;;  %v1103_v38 = vld [vmem:[%s14052_s29 + $0x30] sm:$0xff]  ;;  %v1102_v42 = vld [vmem:[%s14052_s29 + $0x28] sm:$0xff]  ;;  %v1101_v46 = vld [vmem:[%s14052_s29 + $0x20] sm:$0xff] }
  0x68   : > { %9050 = vmatprep.subr.mxu1 %v1154_v25  ;;  %9004 = vmatpush3.msra.mxu0 %v1106_v26  ;;  %v1135_v39 = vld [vmem:[%s14052_s29 + $0x130] sm:$0xff]  ;;  %v1134_v43 = vld [vmem:[%s14052_s29 + $0x128] sm:$0xff]  ;;  %v1133_v47 = vld [vmem:[%s14052_s29 + $0x120] sm:$0xff] }
  0x69   : > { %9051 = vmatpush3.msra.mxu1 %v1138_v27  ;;  %9005 = vmatprep.subr.mxu0 %v1121_v28  ;;  %v1116_v48 = vld [vmem:[%s14052_s29 + $0x98] sm:$0xff]  ;;  %v1115_v52 = vld [vmem:[%s14052_s29 + $0x90] sm:$0xff]  ;;  %v1114_v56 = vld [vmem:[%s14052_s29 + $0x88] sm:$0xff] }
  0x6a   : > { %9052 = vmatprep.subr.mxu1 %v1153_v29  ;;  %9006 = vmatpush3.msra.mxu0 %v1105_v30  ;;  %v1148_v49 = vld [vmem:[%s14052_s29 + $0x198] sm:$0xff]  ;;  %v1147_v53 = vld [vmem:[%s14052_s29 + $0x190] sm:$0xff]  ;;  %v1146_v57 = vld [vmem:[%s14052_s29 + $0x188] sm:$0xff] }
  0x6b   : > { %9053 = vmatpush3.msra.mxu1 %v1137_v31  ;;  %9007 = vmatprep.subr.mxu0 %v1120_v32  ;;  %v1100_v50 = vld [vmem:[%s14052_s29 + $0x18] sm:$0xff]  ;;  %v1099_v54 = vld [vmem:[%s14052_s29 + $0x10] sm:$0xff]  ;;  %v1098_v58 = vld [vmem:[%s14052_s29 + $0x8] sm:$0xff] }
  0x6c   : > { %9054 = vmatprep.subr.mxu1 %v1152_v33  ;;  %9008 = vmatpush3.msra.mxu0 %v1104_v34  ;;  %v1132_v51 = vld [vmem:[%s14052_s29 + $0x118] sm:$0xff]  ;;  %v1131_v55 = vld [vmem:[%s14052_s29 + $0x110] sm:$0xff]  ;;  %v1130_v59 = vld [vmem:[%s14052_s29 + $0x108] sm:$0xff] }
  0x6d   : > { %9055 = vmatpush3.msra.mxu1 %v1136_v35  ;;  %9009 = vmatprep.subr.mxu0 %v1119_v36  ;;  %v1113_v60 = vld [vmem:[%s14052_s29 + $0x80] sm:$0xff]  ;;  %v978_v63 = vld [vmem:[%s11590_s10 + $0x8] sm:$0xff]  ;;  %v980_v2 = vld [vmem:[%s11590_s10 + $0x18] sm:$0xff] }
  0x6e   : > { %9056 = vmatprep.subr.mxu1 %v1151_v37  ;;  %9010 = vmatpush3.msra.mxu0 %v1103_v38  ;;  %v1145_v61 = vld [vmem:[%s14052_s29 + $0x180] sm:$0xff]  ;;  %v1192_v3 = vld [vmem:[%s14052_s29 + $0x2f8] sm:$0xff]  ;;  %v979_v5 = vld [vmem:[%s11590_s10 + $0x10] sm:$0xff] }
  0x6f   : > { %9057 = vmatpush3.msra.mxu1 %v1135_v39  ;;  %9011 = vmatprep.subr.mxu0 %v1118_v40  ;;  %v1097_v62 = vld [vmem:[%s14052_s29] sm:$0xff]  ;;  %v1224_v4 = vld [vmem:[%s14052_s29 + $0x3f8] sm:$0xff]  ;;  %v1191_v8 = vld [vmem:[%s14052_s29 + $0x2f0] sm:$0xff] }
  0x70   : > { %9058 = vmatprep.subr.mxu1 %v1150_v41  ;;  %9012 = vmatpush3.msra.mxu0 %v1102_v42  ;;  %v1129_v0 = vld [vmem:[%s14052_s29 + $0x100] sm:$0xff]  ;;  %v1176_v6 = vld [vmem:[%s14052_s29 + $0x278] sm:$0xff]  ;;  %v1223_v9 = vld [vmem:[%s14052_s29 + $0x3f0] sm:$0xff] }
  0x71   : > { %9059 = vmatpush3.msra.mxu1 %v1134_v43  ;;  %9013 = vmatprep.subr.mxu0 %v1117_v44  ;;  %v977_v1 = vld [vmem:[%s11590_s10] sm:$0xff]  ;;  %v1208_v7 = vld [vmem:[%s14052_s29 + $0x378] sm:$0xff]  ;;  %v1175_v10 = vld [vmem:[%s14052_s29 + $0x270] sm:$0xff] }
  0x72   : > { %9060 = vmatprep.subr.mxu1 %v1149_v45  ;;  %9014 = vmatpush3.msra.mxu0 %v1101_v46  ;;  %v1207_v11 = vld [vmem:[%s14052_s29 + $0x370] sm:$0xff]  ;;  %v1190_v12 = vld [vmem:[%s14052_s29 + $0x2e8] sm:$0xff]  ;;  %v1189_v16 = vld [vmem:[%s14052_s29 + $0x2e0] sm:$0xff] }
  0x73   : > { %9061 = vmatpush3.msra.mxu1 %v1133_v47  ;;  %9015 = vmatprep.subr.mxu0 %v1116_v48  ;;  %v1222_v13 = vld [vmem:[%s14052_s29 + $0x3e8] sm:$0xff]  ;;  %v1221_v17 = vld [vmem:[%s14052_s29 + $0x3e0] sm:$0xff]  ;;  %v1188_v20 = vld [vmem:[%s14052_s29 + $0x2d8] sm:$0xff] }
  0x74   : > { %9062 = vmatprep.subr.mxu1 %v1148_v49  ;;  %9016 = vmatpush3.msra.mxu0 %v1100_v50  ;;  %v1174_v14 = vld [vmem:[%s14052_s29 + $0x268] sm:$0xff]  ;;  %v1173_v18 = vld [vmem:[%s14052_s29 + $0x260] sm:$0xff]  ;;  %v1220_v21 = vld [vmem:[%s14052_s29 + $0x3d8] sm:$0xff] }
  0x75   : > { %9063 = vmatpush3.msra.mxu1 %v1132_v51  ;;  %9017 = vmatprep.subr.mxu0 %v1115_v52  ;;  %v1206_v15 = vld [vmem:[%s14052_s29 + $0x368] sm:$0xff]  ;;  %v1205_v19 = vld [vmem:[%s14052_s29 + $0x360] sm:$0xff]  ;;  %v1172_v22 = vld [vmem:[%s14052_s29 + $0x258] sm:$0xff] }
  0x76   : > { %9064 = vmatprep.subr.mxu1 %v1147_v53  ;;  %9018 = vmatpush3.msra.mxu0 %v1099_v54  ;;  %v1204_v23 = vld [vmem:[%s14052_s29 + $0x358] sm:$0xff]  ;;  %v1187_v24 = vld [vmem:[%s14052_s29 + $0x2d0] sm:$0xff]  ;;  %v1186_v28 = vld [vmem:[%s14052_s29 + $0x2c8] sm:$0xff] }
  0x77   : > { %9065 = vmatpush3.msra.mxu1 %v1131_v55  ;;  %9019 = vmatprep.subr.mxu0 %v1114_v56  ;;  %v1219_v25 = vld [vmem:[%s14052_s29 + $0x3d0] sm:$0xff]  ;;  %v1218_v29 = vld [vmem:[%s14052_s29 + $0x3c8] sm:$0xff]  ;;  %v1185_v33 = vld [vmem:[%s14052_s29 + $0x2c0] sm:$0xff] }
  0x78   : > { %9066 = vmatprep.subr.mxu1 %v1146_v57  ;;  %9020 = vmatpush3.msra.mxu0 %v1098_v58  ;;  %v1171_v26 = vld [vmem:[%s14052_s29 + $0x250] sm:$0xff]  ;;  %v1170_v30 = vld [vmem:[%s14052_s29 + $0x248] sm:$0xff]  ;;  %v1217_v34 = vld [vmem:[%s14052_s29 + $0x3c0] sm:$0xff] }
  0x79   : > { %9067 = vmatpush3.msra.mxu1 %v1130_v59  ;;  %9021 = vmatprep.subr.mxu0 %v1113_v60  ;;  %v1203_v27 = vld [vmem:[%s14052_s29 + $0x350] sm:$0xff]  ;;  %v1202_v31 = vld [vmem:[%s14052_s29 + $0x348] sm:$0xff]  ;;  %v1001_v35 = vld [vmem:[%s11590_s10 + $0xc0] sm:$0xff] }
  0x7a   : > { %9068 = vmatprep.subr.mxu1 %v1145_v61  ;;  %9022 = vmatpush3.msra.mxu0 %v1097_v62  ;;  %v1002_v32 = vld [vmem:[%s11590_s10 + $0xc8] sm:$0xff]  ;;  %v1169_v36 = vld [vmem:[%s14052_s29 + $0x240] sm:$0xff]  ;;  %v1004_v38 = vld [vmem:[%s11590_s10 + $0xd8] sm:$0xff] }
  0x7b   : > { %1550 = vmatprep.mubr.f32.mxu0 %v978_v63  ;;  %9069 = vmatpush3.msra.mxu1 %v1129_v0  ;;  %v1201_v37 = vld [vmem:[%s14052_s29 + $0x340] sm:$0xff]  ;;  %v1184_v39 = vld [vmem:[%s14052_s29 + $0x2b8] sm:$0xff]  ;;  %v1003_v41 = vld [vmem:[%s11590_s10 + $0xd0] sm:$0xff] }
  0x7c   : > { %1551 = vmatmul.mubr.f32.vlgmr.msra.gmra.mxu0 %v977_v1  ;;  %1640 = vmatprep.mubr.f32.mxu1 %v980_v2  ;;  %v1216_v40 = vld [vmem:[%s14052_s29 + $0x3b8] sm:$0xff]  ;;  %v1026_v44 = vld [vmem:[%s11590_s10 + $0x188] sm:$0xff]  ;;  %v1183_v45 = vld [vmem:[%s14052_s29 + $0x2b0] sm:$0xff] }
  0x7d   : > { %9085 = vmatprep.subr.mxu0 %v1192_v3  ;;  %9132 = vmatprep.subr.mxu1 %v1224_v4  ;;  %v1168_v42 = vld [vmem:[%s14052_s29 + $0x238] sm:$0xff]  ;;  %v1215_v46 = vld [vmem:[%s14052_s29 + $0x3b0] sm:$0xff]  ;;  %v1025_v47 = vld [vmem:[%s11590_s10 + $0x180] sm:$0xff] }
  0x7e   : > { %1641 = vmatmul.mubr.f32.vlgmr.msra.gmra.mxu1 %v979_v5  ;;  %9086 = vmatpush3.msra.mxu0 %v1176_v6  ;;  %v1200_v43 = vld [vmem:[%s14052_s29 + $0x338] sm:$0xff]  ;;  %v1167_v48 = vld [vmem:[%s14052_s29 + $0x230] sm:$0xff]  ;;  %v1182_v51 = vld [vmem:[%s14052_s29 + $0x2a8] sm:$0xff] }
  0x7f   : > { %9133 = vmatpush3.msra.mxu1 %v1208_v7  ;;  %9087 = vmatprep.subr.mxu0 %v1191_v8  ;;  %v1199_v49 = vld [vmem:[%s14052_s29 + $0x330] sm:$0xff]  ;;  %v1028_v50 = vld [vmem:[%s11590_s10 + $0x198] sm:$0xff]  ;;  %v1214_v52 = vld [vmem:[%s14052_s29 + $0x3a8] sm:$0xff] }
  0x80   : > { %9134 = vmatprep.subr.mxu1 %v1223_v9  ;;  %9088 = vmatpush3.msra.mxu0 %v1175_v10  ;;  %v1027_v53 = vld [vmem:[%s11590_s10 + $0x190] sm:$0xff]  ;;  %v1166_v54 = vld [vmem:[%s14052_s29 + $0x228] sm:$0xff]  ;;  %v1181_v57 = vld [vmem:[%s14052_s29 + $0x2a0] sm:$0xff] }
  0x81   : > { %9135 = vmatpush3.msra.mxu1 %v1207_v11  ;;  %9089 = vmatprep.subr.mxu0 %v1190_v12  ;;  %v1198_v55 = vld [vmem:[%s14052_s29 + $0x328] sm:$0xff]  ;;  %v1213_v58 = vld [vmem:[%s14052_s29 + $0x3a0] sm:$0xff]  ;;  %v1052_v62 = vld [vmem:[%s11590_s10 + $0x258] sm:$0xff] }
  0x82   : > { %9136 = vmatprep.subr.mxu1 %v1222_v13  ;;  %9090 = vmatpush3.msra.mxu0 %v1174_v14  ;;  %v1050_v56 = vld [vmem:[%s11590_s10 + $0x248] sm:$0xff]  ;;  %v1049_v59 = vld [vmem:[%s11590_s10 + $0x240] sm:$0xff]  ;;  %v1180_v63 = vld [vmem:[%s14052_s29 + $0x298] sm:$0xff] }
  0x83   : > { %9137 = vmatpush3.msra.mxu1 %v1206_v15  ;;  %9091 = vmatprep.subr.mxu0 %v1189_v16  ;;  %v1165_v60 = vld [vmem:[%s14052_s29 + $0x220] sm:$0xff]  ;;  %v1212_v0 = vld [vmem:[%s14052_s29 + $0x398] sm:$0xff]  ;;  %v1051_v1 = vld [vmem:[%s11590_s10 + $0x250] sm:$0xff] }
  0x84   : > { %9138 = vmatprep.subr.mxu1 %v1221_v17  ;;  %9092 = vmatpush3.msra.mxu0 %v1173_v18  ;;  %v1197_v61 = vld [vmem:[%s14052_s29 + $0x320] sm:$0xff]  ;;  %v1164_v2 = vld [vmem:[%s14052_s29 + $0x218] sm:$0xff]  ;;  %v1074_v4 = vld [vmem:[%s11590_s10 + $0x308] sm:$0xff] }
  0x85   : > { %9139 = vmatpush3.msra.mxu1 %v1205_v19  ;;  %9093 = vmatprep.subr.mxu0 %v1188_v20  ;;  %v1196_v3 = vld [vmem:[%s14052_s29 + $0x318] sm:$0xff]  ;;  %v1179_v5 = vld [vmem:[%s14052_s29 + $0x290] sm:$0xff]  ;;  %v1073_v7 = vld [vmem:[%s11590_s10 + $0x300] sm:$0xff] }
  0x86   : > { %9140 = vmatprep.subr.mxu1 %v1220_v21  ;;  %9094 = vmatpush3.msra.mxu0 %v1172_v22  ;;  %v1211_v6 = vld [vmem:[%s14052_s29 + $0x390] sm:$0xff]  ;;  %v1076_v10 = vld [vmem:[%s11590_s10 + $0x318] sm:$0xff]  ;;  %v1178_v11 = vld [vmem:[%s14052_s29 + $0x288] sm:$0xff] }
  0x87   : > { %9141 = vmatpush3.msra.mxu1 %v1204_v23  ;;  %9095 = vmatprep.subr.mxu0 %v1187_v24  ;;  %v1163_v8 = vld [vmem:[%s14052_s29 + $0x210] sm:$0xff]  ;;  %v1210_v12 = vld [vmem:[%s14052_s29 + $0x388] sm:$0xff]  ;;  %v1177_v16 = vld [vmem:[%s14052_s29 + $0x280] sm:$0xff] }
  0x88   : > { %9142 = vmatprep.subr.mxu1 %v1219_v25  ;;  %9096 = vmatpush3.msra.mxu0 %v1171_v26  ;;  %v1195_v9 = vld [vmem:[%s14052_s29 + $0x310] sm:$0xff]  ;;  %v1162_v14 = vld [vmem:[%s14052_s29 + $0x208] sm:$0xff]  ;;  %v1209_v17 = vld [vmem:[%s14052_s29 + $0x380] sm:$0xff] }
  0x89   : > { %9143 = vmatpush3.msra.mxu1 %v1203_v27  ;;  %9097 = vmatprep.subr.mxu0 %v1186_v28  ;;  %v1075_v13 = vld [vmem:[%s11590_s10 + $0x310] sm:$0xff]  ;;  %v1194_v15 = vld [vmem:[%s14052_s29 + $0x308] sm:$0xff]  ;;  %v1161_v18 = vld [vmem:[%s14052_s29 + $0x200] sm:$0xff] }
  0x8a   : > { %9144 = vmatprep.subr.mxu1 %v1218_v29  ;;  %9098 = vmatpush3.msra.mxu0 %v1170_v30  ;;  %v982_v19 = vld [vmem:[%s11590_s10 + $0x28] sm:$0xff]  ;;  %v1193_v20 = vld [vmem:[%s14052_s29 + $0x300] sm:$0xff]  ;;  %v984_v22 = vld [vmem:[%s11590_s10 + $0x38] sm:$0xff] }
  0x8b   : > { %9145 = vmatpush3.msra.mxu1 %v1202_v31  ;;  %1555 = vmatprep.mubr.f32.mxu0 %v1002_v32  ;;  %v981_v21 = vld [vmem:[%s11590_s10 + $0x20] sm:$0xff]  ;;  %v1256_v23 = vld [vmem:[%s14052_s29 + $0x4f8] sm:$0xff]  ;;  %v983_v25 = vld [vmem:[%s11590_s10 + $0x30] sm:$0xff] }
  0x8c   : > { %9099 = vmatprep.subr.mxu0 %v1185_v33  ;;  %9146 = vmatprep.subr.mxu1 %v1217_v34  ;;  %v1288_v24 = vld [vmem:[%s14052_s29 + $0x5f8] sm:$0xff]  ;;  %v1255_v28 = vld [vmem:[%s14052_s29 + $0x4f0] sm:$0xff]  ;;  %v1006_v30 = vld [vmem:[%s11590_s10 + $0xe8] sm:$0xff] }
  0x8d   : > { %1556 = vmatmul.mubr.f32.gmra.mxu0 %v1001_v35  ;;  %9147 = vmatpush3.msra.mxu1 %v1201_v37  ;;  %v1240_v26 = vld [vmem:[%s14052_s29 + $0x478] sm:$0xff]  ;;  %v1287_v29 = vld [vmem:[%s14052_s29 + $0x5f0] sm:$0xff]  ;;  %v1005_v33 = vld [vmem:[%s11590_s10 + $0xe0] sm:$0xff] }
  0x8e   : > { %9100 = vmatpush3.msra.mxu0 %v1169_v36  ;;  %1645 = vmatprep.mubr.f32.mxu1 %v1004_v38  ;;  %v1272_v27 = vld [vmem:[%s14052_s29 + $0x578] sm:$0xff]  ;;  %v1239_v31 = vld [vmem:[%s14052_s29 + $0x470] sm:$0xff]  ;;  %v1254_v34 = vld [vmem:[%s14052_s29 + $0x4e8] sm:$0xff] }
  0x8f   : > { %9101 = vmatprep.subr.mxu0 %v1184_v39  ;;  %9148 = vmatprep.subr.mxu1 %v1216_v40  ;;  %v1271_v32 = vld [vmem:[%s14052_s29 + $0x570] sm:$0xff]  ;;  %v1286_v35 = vld [vmem:[%s14052_s29 + $0x5e8] sm:$0xff]  ;;  %v1008_v36 = vld [vmem:[%s11590_s10 + $0xf8] sm:$0xff] }
  0x90   : > { %1646 = vmatmul.mubr.f32.gmra.mxu1 %v1003_v41  ;;  %9102 = vmatpush3.msra.mxu0 %v1168_v42  ;;  %v1238_v37 = vld [vmem:[%s14052_s29 + $0x468] sm:$0xff]  ;;  %v1253_v39 = vld [vmem:[%s14052_s29 + $0x4e0] sm:$0xff]  ;;  %v1007_v40 = vld [vmem:[%s11590_s10 + $0xf0] sm:$0xff] }
  0x91   : > { %9149 = vmatpush3.msra.mxu1 %v1200_v43  ;;  %1560 = vmatprep.mubr.f32.mxu0 %v1026_v44  ;;  %v1270_v38 = vld [vmem:[%s14052_s29 + $0x568] sm:$0xff]  ;;  %v1285_v41 = vld [vmem:[%s14052_s29 + $0x5e0] sm:$0xff] }
  0x92   : > { %9103 = vmatprep.subr.mxu0 %v1183_v45  ;;  %9150 = vmatprep.subr.mxu1 %v1215_v46  ;;  %v1030_v42 = vld [vmem:[%s11590_s10 + $0x1a8] sm:$0xff]  ;;  %v1237_v43 = vld [vmem:[%s14052_s29 + $0x460] sm:$0xff]  ;;  %v1252_v46 = vld [vmem:[%s14052_s29 + $0x4d8] sm:$0xff] }
  0x93   : > { %1561 = vmatmul.mubr.f32.gmra.mxu0 %v1025_v47  ;;  %9151 = vmatpush3.msra.mxu1 %v1199_v49  ;;  %v1269_v44 = vld [vmem:[%s14052_s29 + $0x560] sm:$0xff]  ;;  %v1284_v47 = vld [vmem:[%s14052_s29 + $0x5d8] sm:$0xff] }
  0x94   : > { %9104 = vmatpush3.msra.mxu0 %v1167_v48  ;;  %1650 = vmatprep.mubr.f32.mxu1 %v1028_v50  ;;  %v1029_v45 = vld [vmem:[%s11590_s10 + $0x1a0] sm:$0xff]  ;;  %v1032_v48 = vld [vmem:[%s11590_s10 + $0x1b8] sm:$0xff] }
  0x95   : > { %9105 = vmatprep.subr.mxu0 %v1182_v51  ;;  %9152 = vmatprep.subr.mxu1 %v1214_v52  ;;  %v1236_v49 = vld [vmem:[%s14052_s29 + $0x458] sm:$0xff]  ;;  %v1251_v51 = vld [vmem:[%s14052_s29 + $0x4d0] sm:$0xff] }
  0x96   : > { %1651 = vmatmul.mubr.f32.gmra.mxu1 %v1027_v53  ;;  %9106 = vmatpush3.msra.mxu0 %v1166_v54  ;;  %v1268_v50 = vld [vmem:[%s14052_s29 + $0x558] sm:$0xff]  ;;  %v1031_v52 = vld [vmem:[%s11590_s10 + $0x1b0] sm:$0xff]  ;;  %v1054_v54 = vld [vmem:[%s11590_s10 + $0x268] sm:$0xff] }
  0x97   : > { %9153 = vmatpush3.msra.mxu1 %v1198_v55  ;;  %1565 = vmatprep.mubr.f32.mxu0 %v1050_v56  ;;  %v1283_v53 = vld [vmem:[%s14052_s29 + $0x5d0] sm:$0xff] }
  0x98   : > { %9107 = vmatprep.subr.mxu0 %v1181_v57  ;;  %9154 = vmatprep.subr.mxu1 %v1213_v58  ;;  %v1235_v55 = vld [vmem:[%s14052_s29 + $0x450] sm:$0xff]  ;;  %v1053_v57 = vld [vmem:[%s11590_s10 + $0x260] sm:$0xff]  ;;  %v1250_v58 = vld [vmem:[%s14052_s29 + $0x4c8] sm:$0xff] }
  0x99   : > { %1566 = vmatmul.mubr.f32.gmra.mxu0 %v1049_v59  ;;  %9155 = vmatpush3.msra.mxu1 %v1197_v61  ;;  %v1267_v56 = vld [vmem:[%s14052_s29 + $0x550] sm:$0xff]  ;;  %v1282_v59 = vld [vmem:[%s14052_s29 + $0x5c8] sm:$0xff] }
  0x9a   : > { %9108 = vmatpush3.msra.mxu0 %v1165_v60  ;;  %1655 = vmatprep.mubr.f32.mxu1 %v1052_v62  ;;  %v1056_v60 = vld [vmem:[%s11590_s10 + $0x278] sm:$0xff]  ;;  %v1234_v61 = vld [vmem:[%s14052_s29 + $0x448] sm:$0xff] }
  0x9b   : > { %9109 = vmatprep.subr.mxu0 %v1180_v63  ;;  %9156 = vmatprep.subr.mxu1 %v1212_v0  ;;  %v1266_v62 = vld [vmem:[%s14052_s29 + $0x548] sm:$0xff]  ;;  %v1249_v63 = vld [vmem:[%s14052_s29 + $0x4c0] sm:$0xff]  ;;  %v1055_v0 = vld [vmem:[%s11590_s10 + $0x270] sm:$0xff] }
  0x9c   : > { %1656 = vmatmul.mubr.f32.gmra.mxu1 %v1051_v1  ;;  %9110 = vmatpush3.msra.mxu0 %v1164_v2  ;;  %v1281_v1 = vld [vmem:[%s14052_s29 + $0x5c0] sm:$0xff]  ;;  %v1078_v2 = vld [vmem:[%s11590_s10 + $0x328] sm:$0xff] }
  0x9d   : > { %9157 = vmatpush3.msra.mxu1 %v1196_v3  ;;  %1570 = vmatprep.mubr.f32.mxu0 %v1074_v4  ;;  %v1233_v3 = vld [vmem:[%s14052_s29 + $0x440] sm:$0xff] }
  0x9e   : > { %9111 = vmatprep.subr.mxu0 %v1179_v5  ;;  %9158 = vmatprep.subr.mxu1 %v1211_v6  ;;  %v1265_v4 = vld [vmem:[%s14052_s29 + $0x540] sm:$0xff]  ;;  %v1248_v6 = vld [vmem:[%s14052_s29 + $0x4b8] sm:$0xff] }
  0x9f   : > { %1571 = vmatmul.mubr.f32.gmra.mxu0 %v1073_v7  ;;  %9159 = vmatpush3.msra.mxu1 %v1195_v9  ;;  %v1077_v5 = vld [vmem:[%s11590_s10 + $0x320] sm:$0xff]  ;;  %v1280_v7 = vld [vmem:[%s14052_s29 + $0x5b8] sm:$0xff] }
  0xa0   : > { %9112 = vmatpush3.msra.mxu0 %v1163_v8  ;;  %1660 = vmatprep.mubr.f32.mxu1 %v1076_v10  ;;  %v1080_v8 = vld [vmem:[%s11590_s10 + $0x338] sm:$0xff] }
  0xa1   : > { %9113 = vmatprep.subr.mxu0 %v1178_v11  ;;  %9160 = vmatprep.subr.mxu1 %v1210_v12  ;;  %v1232_v9 = vld [vmem:[%s14052_s29 + $0x438] sm:$0xff]  ;;  %v1247_v11 = vld [vmem:[%s14052_s29 + $0x4b0] sm:$0xff] }
  0xa2   : > { %1661 = vmatmul.mubr.f32.gmra.mxu1 %v1075_v13  ;;  %9114 = vmatpush3.msra.mxu0 %v1162_v14  ;;  %v1264_v10 = vld [vmem:[%s14052_s29 + $0x538] sm:$0xff]  ;;  %v1079_v12 = vld [vmem:[%s11590_s10 + $0x330] sm:$0xff] }
  0xa3   : > { %9161 = vmatpush3.msra.mxu1 %v1194_v15  ;;  %9115 = vmatprep.subr.mxu0 %v1177_v16  ;;  %v1279_v13 = vld [vmem:[%s14052_s29 + $0x5b0] sm:$0xff]  ;;  %v1246_v16 = vld [vmem:[%s14052_s29 + $0x4a8] sm:$0xff] }
  0xa4   : > { %9162 = vmatprep.subr.mxu1 %v1209_v17  ;;  %9116 = vmatpush3.msra.mxu0 %v1161_v18  ;;  %v1231_v14 = vld [vmem:[%s14052_s29 + $0x430] sm:$0xff]  ;;  %v1278_v17 = vld [vmem:[%s14052_s29 + $0x5a8] sm:$0xff] }
  0xa5   : > { %1730 = vmatprep.mubr.f32.mxu0 %v982_v19  ;;  %9163 = vmatpush3.msra.mxu1 %v1193_v20  ;;  %v1263_v15 = vld [vmem:[%s14052_s29 + $0x530] sm:$0xff]  ;;  %v1230_v18 = vld [vmem:[%s14052_s29 + $0x428] sm:$0xff]  ;;  %v1245_v20 = vld [vmem:[%s14052_s29 + $0x4a0] sm:$0xff] }
  0xa6   : > { %1731 = vmatmul.mubr.f32.vlgmr.msra.gmra.mxu0 %v981_v21  ;;  %1820 = vmatprep.mubr.f32.mxu1 %v984_v22  ;;  %v1262_v19 = vld [vmem:[%s14052_s29 + $0x528] sm:$0xff]  ;;  %v1277_v21 = vld [vmem:[%s14052_s29 + $0x5a0] sm:$0xff] }
  0xa7   : > { %9179 = vmatprep.subr.mxu0 %v1256_v23  ;;  %9226 = vmatprep.subr.mxu1 %v1288_v24  ;;  %v1229_v22 = vld [vmem:[%s14052_s29 + $0x420] sm:$0xff]  ;;  %v1244_v24 = vld [vmem:[%s14052_s29 + $0x498] sm:$0xff] }
  0xa8   : > { %1821 = vmatmul.mubr.f32.vlgmr.msra.gmra.mxu1 %v983_v25  ;;  %9180 = vmatpush3.msra.mxu0 %v1240_v26  ;;  %v1261_v23 = vld [vmem:[%s14052_s29 + $0x520] sm:$0xff]  ;;  %v1276_v25 = vld [vmem:[%s14052_s29 + $0x598] sm:$0xff] }
  0xa9   : > { %9227 = vmatpush3.msra.mxu1 %v1272_v27  ;;  %9181 = vmatprep.subr.mxu0 %v1255_v28  ;;  %v1228_v26 = vld [vmem:[%s14052_s29 + $0x418] sm:$0xff]  ;;  %v1243_v28 = vld [vmem:[%s14052_s29 + $0x490] sm:$0xff] }
  0xaa   : > { %9228 = vmatprep.subr.mxu1 %v1287_v29  ;;  %1735 = vmatprep.mubr.f32.mxu0 %v1006_v30  ;;  %v1260_v27 = vld [vmem:[%s14052_s29 + $0x518] sm:$0xff]  ;;  %v1275_v29 = vld [vmem:[%s14052_s29 + $0x590] sm:$0xff] }
  0xab   : > { %9182 = vmatpush3.msra.mxu0 %v1239_v31  ;;  %9229 = vmatpush3.msra.mxu1 %v1271_v32  ;;  %v1227_v30 = vld [vmem:[%s14052_s29 + $0x410] sm:$0xff]  ;;  %v1242_v32 = vld [vmem:[%s14052_s29 + $0x488] sm:$0xff] }
  0xac   : > { %1736 = vmatmul.mubr.f32.gmra.mxu0 %v1005_v33  ;;  %9183 = vmatprep.subr.mxu0 %v1254_v34  ;;  %v1259_v31 = vld [vmem:[%s14052_s29 + $0x510] sm:$0xff]  ;;  %v1274_v33 = vld [vmem:[%s14052_s29 + $0x588] sm:$0xff] }
  0xad   : > { %9230 = vmatprep.subr.mxu1 %v1286_v35  ;;  %1825 = vmatprep.mubr.f32.mxu1 %v1008_v36  ;;  %v1226_v34 = vld [vmem:[%s14052_s29 + $0x408] sm:$0xff]  ;;  %v1241_v36 = vld [vmem:[%s14052_s29 + $0x480] sm:$0xff] }
  0xae   : > { %9184 = vmatpush3.msra.mxu0 %v1238_v37  ;;  %9231 = vmatpush3.msra.mxu1 %v1270_v38  ;;  %v1258_v35 = vld [vmem:[%s14052_s29 + $0x508] sm:$0xff]  ;;  %v1273_v37 = vld [vmem:[%s14052_s29 + $0x580] sm:$0xff] }
  0xaf   : > { %9185 = vmatprep.subr.mxu0 %v1253_v39  ;;  %1826 = vmatmul.mubr.f32.gmra.mxu1 %v1007_v40  ;;  %v1225_v38 = vld [vmem:[%s14052_s29 + $0x400] sm:$0xff]  ;;  %v986_v39 = vld [vmem:[%s11590_s10 + $0x48] sm:$0xff] }
  0xb0   : > { %9232 = vmatprep.subr.mxu1 %v1285_v41  ;;  %1740 = vmatprep.mubr.f32.mxu0 %v1030_v42  ;;  %v1257_v40 = vld [vmem:[%s14052_s29 + $0x500] sm:$0xff]  ;;  %v988_v42 = vld [vmem:[%s11590_s10 + $0x58] sm:$0xff] }
  0xb1   : > { %9186 = vmatpush3.msra.mxu0 %v1237_v43  ;;  %9233 = vmatpush3.msra.mxu1 %v1269_v44  ;;  %v985_v41 = vld [vmem:[%s11590_s10 + $0x40] sm:$0xff]  ;;  %v1320_v43 = vld [vmem:[%s14052_s29 + $0x6f8] sm:$0xff] }
  0xb2   : > { %1741 = vmatmul.mubr.f32.gmra.mxu0 %v1029_v45  ;;  %9187 = vmatprep.subr.mxu0 %v1252_v46  ;;  %v1352_v44 = vld [vmem:[%s14052_s29 + $0x7f8] sm:$0xff]  ;;  %v987_v45 = vld [vmem:[%s11590_s10 + $0x50] sm:$0xff] }
  0xb3   : > { %9234 = vmatprep.subr.mxu1 %v1284_v47  ;;  %1830 = vmatprep.mubr.f32.mxu1 %v1032_v48  ;;  %v1304_v46 = vld [vmem:[%s14052_s29 + $0x678] sm:$0xff]  ;;  %v1319_v48 = vld [vmem:[%s14052_s29 + $0x6f0] sm:$0xff] }
  0xb4   : > { %9188 = vmatpush3.msra.mxu0 %v1236_v49  ;;  %9235 = vmatpush3.msra.mxu1 %v1268_v50  ;;  %v1336_v47 = vld [vmem:[%s14052_s29 + $0x778] sm:$0xff]  ;;  %v1351_v49 = vld [vmem:[%s14052_s29 + $0x7f0] sm:$0xff]  ;;  %v1010_v50 = vld [vmem:[%s11590_s10 + $0x108] sm:$0xff] }
  0xb5   : > { %9189 = vmatprep.subr.mxu0 %v1251_v51  ;;  %1831 = vmatmul.mubr.f32.gmra.mxu1 %v1031_v52  ;;  %v1303_v51 = vld [vmem:[%s14052_s29 + $0x670] sm:$0xff] }
  0xb6   : > { %9236 = vmatprep.subr.mxu1 %v1283_v53  ;;  %1745 = vmatprep.mubr.f32.mxu0 %v1054_v54  ;;  %v1335_v52 = vld [vmem:[%s14052_s29 + $0x770] sm:$0xff]  ;;  %v1009_v53 = vld [vmem:[%s11590_s10 + $0x100] sm:$0xff]  ;;  %v1318_v54 = vld [vmem:[%s14052_s29 + $0x6e8] sm:$0xff] }
  0xb7   : > { %9190 = vmatpush3.msra.mxu0 %v1235_v55  ;;  %9237 = vmatpush3.msra.mxu1 %v1267_v56  ;;  %v1350_v55 = vld [vmem:[%s14052_s29 + $0x7e8] sm:$0xff]  ;;  %v1012_v56 = vld [vmem:[%s11590_s10 + $0x118] sm:$0xff] }
  0xb8   : > { %1746 = vmatmul.mubr.f32.gmra.mxu0 %v1053_v57  ;;  %9191 = vmatprep.subr.mxu0 %v1250_v58  ;;  %v1302_v57 = vld [vmem:[%s14052_s29 + $0x668] sm:$0xff] }
  0xb9   : > { %9238 = vmatprep.subr.mxu1 %v1282_v59  ;;  %1835 = vmatprep.mubr.f32.mxu1 %v1056_v60  ;;  %v1334_v58 = vld [vmem:[%s14052_s29 + $0x768] sm:$0xff]  ;;  %v1317_v59 = vld [vmem:[%s14052_s29 + $0x6e0] sm:$0xff]  ;;  %v1011_v60 = vld [vmem:[%s11590_s10 + $0x110] sm:$0xff] }
  0xba   : > { %9192 = vmatpush3.msra.mxu0 %v1234_v61  ;;  %9239 = vmatpush3.msra.mxu1 %v1266_v62  ;;  %v1349_v61 = vld [vmem:[%s14052_s29 + $0x7e0] sm:$0xff]  ;;  %v1034_v62 = vld [vmem:[%s11590_s10 + $0x1c8] sm:$0xff] }
  0xbb   : > { %9193 = vmatprep.subr.mxu0 %v1249_v63  ;;  %1836 = vmatmul.mubr.f32.gmra.mxu1 %v1055_v0  ;;  %v1301_v63 = vld [vmem:[%s14052_s29 + $0x660] sm:$0xff] }
  0xbc   : > { %9240 = vmatprep.subr.mxu1 %v1281_v1  ;;  %1750 = vmatprep.mubr.f32.mxu0 %v1078_v2  ;;  %v1333_v0 = vld [vmem:[%s14052_s29 + $0x760] sm:$0xff]  ;;  %v1316_v2 = vld [vmem:[%s14052_s29 + $0x6d8] sm:$0xff] }
  0xbd   : > { %9194 = vmatpush3.msra.mxu0 %v1233_v3  ;;  %9241 = vmatpush3.msra.mxu1 %v1265_v4  ;;  %v1033_v1 = vld [vmem:[%s11590_s10 + $0x1c0] sm:$0xff]  ;;  %v1348_v3 = vld [vmem:[%s14052_s29 + $0x7d8] sm:$0xff] }
  0xbe   : > { %1751 = vmatmul.mubr.f32.gmra.mxu0 %v1077_v5  ;;  %9195 = vmatprep.subr.mxu0 %v1248_v6  ;;  %v1036_v4 = vld [vmem:[%s11590_s10 + $0x1d8] sm:$0xff] }
  0xbf   : > { %9242 = vmatprep.subr.mxu1 %v1280_v7  ;;  %1840 = vmatprep.mubr.f32.mxu1 %v1080_v8  ;;  %v1300_v5 = vld [vmem:[%s14052_s29 + $0x658] sm:$0xff]  ;;  %v1315_v7 = vld [vmem:[%s14052_s29 + $0x6d0] sm:$0xff] }
  0xc0   : > { %9196 = vmatpush3.msra.mxu0 %v1232_v9  ;;  %9243 = vmatpush3.msra.mxu1 %v1264_v10  ;;  %v1332_v6 = vld [vmem:[%s14052_s29 + $0x758] sm:$0xff]  ;;  %v1035_v8 = vld [vmem:[%s11590_s10 + $0x1d0] sm:$0xff]  ;;  %v1058_v10 = vld [vmem:[%s11590_s10 + $0x288] sm:$0xff] }
  0xc1   : > { %9197 = vmatprep.subr.mxu0 %v1247_v11  ;;  %1841 = vmatmul.mubr.f32.gmra.mxu1 %v1079_v12  ;;  %v1347_v9 = vld [vmem:[%s14052_s29 + $0x7d0] sm:$0xff] }
  0xc2   : > { %9244 = vmatprep.subr.mxu1 %v1279_v13  ;;  %9198 = vmatpush3.msra.mxu0 %v1231_v14  ;;  %v1299_v11 = vld [vmem:[%s14052_s29 + $0x650] sm:$0xff]  ;;  %v1057_v13 = vld [vmem:[%s11590_s10 + $0x280] sm:$0xff]  ;;  %v1314_v14 = vld [vmem:[%s14052_s29 + $0x6c8] sm:$0xff] }
  0xc3   : > { %9245 = vmatpush3.msra.mxu1 %v1263_v15  ;;  %9199 = vmatprep.subr.mxu0 %v1246_v16  ;;  %v1331_v12 = vld [vmem:[%s14052_s29 + $0x750] sm:$0xff]  ;;  %v1346_v15 = vld [vmem:[%s14052_s29 + $0x7c8] sm:$0xff]  ;;  %v1060_v16 = vld [vmem:[%s11590_s10 + $0x298] sm:$0xff] }
  0xc4   : > { %9246 = vmatprep.subr.mxu1 %v1278_v17  ;;  %9200 = vmatpush3.msra.mxu0 %v1230_v18  ;;  %v1298_v17 = vld [vmem:[%s14052_s29 + $0x648] sm:$0xff] }
  0xc5   : > { %9247 = vmatpush3.msra.mxu1 %v1262_v19  ;;  %9201 = vmatprep.subr.mxu0 %v1245_v20  ;;  %v1330_v18 = vld [vmem:[%s14052_s29 + $0x748] sm:$0xff]  ;;  %v1313_v19 = vld [vmem:[%s14052_s29 + $0x6c0] sm:$0xff]  ;;  %v1059_v20 = vld [vmem:[%s11590_s10 + $0x290] sm:$0xff] }
  0xc6   : > { %9248 = vmatprep.subr.mxu1 %v1277_v21  ;;  %9202 = vmatpush3.msra.mxu0 %v1229_v22  ;;  %v1345_v21 = vld [vmem:[%s14052_s29 + $0x7c0] sm:$0xff]  ;;  %v1082_v22 = vld [vmem:[%s11590_s10 + $0x348] sm:$0xff] }
  0xc7   : > { %9249 = vmatpush3.msra.mxu1 %v1261_v23  ;;  %9203 = vmatprep.subr.mxu0 %v1244_v24  ;;  %v1297_v23 = vld [vmem:[%s14052_s29 + $0x640] sm:$0xff] }
  0xc8   : > { %9250 = vmatprep.subr.mxu1 %v1276_v25  ;;  %9204 = vmatpush3.msra.mxu0 %v1228_v26  ;;  %v1329_v24 = vld [vmem:[%s14052_s29 + $0x740] sm:$0xff]  ;;  %v1312_v26 = vld [vmem:[%s14052_s29 + $0x6b8] sm:$0xff] }
  0xc9   : > { %9251 = vmatpush3.msra.mxu1 %v1260_v27  ;;  %9205 = vmatprep.subr.mxu0 %v1243_v28  ;;  %v1081_v25 = vld [vmem:[%s11590_s10 + $0x340] sm:$0xff]  ;;  %v1344_v27 = vld [vmem:[%s14052_s29 + $0x7b8] sm:$0xff] }
  0xca   : > { %9252 = vmatprep.subr.mxu1 %v1275_v29  ;;  %9206 = vmatpush3.msra.mxu0 %v1227_v30  ;;  %v1084_v28 = vld [vmem:[%s11590_s10 + $0x358] sm:$0xff] }
  0xcb   : > { %9253 = vmatpush3.msra.mxu1 %v1259_v31  ;;  %9207 = vmatprep.subr.mxu0 %v1242_v32  ;;  %v1296_v29 = vld [vmem:[%s14052_s29 + $0x638] sm:$0xff]  ;;  %v1311_v31 = vld [vmem:[%s14052_s29 + $0x6b0] sm:$0xff] }
  0xcc   : > { %9254 = vmatprep.subr.mxu1 %v1274_v33  ;;  %9208 = vmatpush3.msra.mxu0 %v1226_v34  ;;  %v1328_v30 = vld [vmem:[%s14052_s29 + $0x738] sm:$0xff]  ;;  %v1083_v32 = vld [vmem:[%s11590_s10 + $0x350] sm:$0xff] }
  0xcd   : > { %9255 = vmatpush3.msra.mxu1 %v1258_v35  ;;  %9209 = vmatprep.subr.mxu0 %v1241_v36  ;;  %v1343_v33 = vld [vmem:[%s14052_s29 + $0x7b0] sm:$0xff]  ;;  %v1310_v36 = vld [vmem:[%s14052_s29 + $0x6a8] sm:$0xff] }
  0xce   : > { %9256 = vmatprep.subr.mxu1 %v1273_v37  ;;  %9210 = vmatpush3.msra.mxu0 %v1225_v38  ;;  %v1295_v34 = vld [vmem:[%s14052_s29 + $0x630] sm:$0xff]  ;;  %v1342_v37 = vld [vmem:[%s14052_s29 + $0x7a8] sm:$0xff] }
  0xcf   : > { %1910 = vmatprep.mubr.f32.mxu0 %v986_v39  ;;  %9257 = vmatpush3.msra.mxu1 %v1257_v40  ;;  %v1327_v35 = vld [vmem:[%s14052_s29 + $0x730] sm:$0xff]  ;;  %v1294_v38 = vld [vmem:[%s14052_s29 + $0x628] sm:$0xff]  ;;  %v1309_v40 = vld [vmem:[%s14052_s29 + $0x6a0] sm:$0xff] }
  0xd0   : > { %1911 = vmatmul.mubr.f32.vlgmr.msra.gmra.mxu0 %v985_v41  ;;  %2000 = vmatprep.mubr.f32.mxu1 %v988_v42  ;;  %v1326_v39 = vld [vmem:[%s14052_s29 + $0x728] sm:$0xff]  ;;  %v1341_v41 = vld [vmem:[%s14052_s29 + $0x7a0] sm:$0xff] }
  0xd1   : > { %9273 = vmatprep.subr.mxu0 %v1320_v43  ;;  %9320 = vmatprep.subr.mxu1 %v1352_v44  ;;  %v1293_v42 = vld [vmem:[%s14052_s29 + $0x620] sm:$0xff]  ;;  %v1308_v44 = vld [vmem:[%s14052_s29 + $0x698] sm:$0xff] }
  0xd2   : > { %2001 = vmatmul.mubr.f32.vlgmr.msra.gmra.mxu1 %v987_v45  ;;  %9274 = vmatpush3.msra.mxu0 %v1304_v46  ;;  %v1325_v43 = vld [vmem:[%s14052_s29 + $0x720] sm:$0xff]  ;;  %v1340_v45 = vld [vmem:[%s14052_s29 + $0x798] sm:$0xff] }
  0xd3   : > { %9321 = vmatpush3.msra.mxu1 %v1336_v47  ;;  %9275 = vmatprep.subr.mxu0 %v1319_v48  ;;  %v1292_v46 = vld [vmem:[%s14052_s29 + $0x618] sm:$0xff]  ;;  %v1307_v48 = vld [vmem:[%s14052_s29 + $0x690] sm:$0xff] }
  0xd4   : > { %9322 = vmatprep.subr.mxu1 %v1351_v49  ;;  %1915 = vmatprep.mubr.f32.mxu0 %v1010_v50  ;;  %v1324_v47 = vld [vmem:[%s14052_s29 + $0x718] sm:$0xff]  ;;  %v1339_v49 = vld [vmem:[%s14052_s29 + $0x790] sm:$0xff] }
  0xd5   : > { %9276 = vmatpush3.msra.mxu0 %v1303_v51  ;;  %9323 = vmatpush3.msra.mxu1 %v1335_v52  ;;  %v1291_v50 = vld [vmem:[%s14052_s29 + $0x610] sm:$0xff]  ;;  %v1306_v52 = vld [vmem:[%s14052_s29 + $0x688] sm:$0xff] }
  0xd6   : > { %1916 = vmatmul.mubr.f32.gmra.mxu0 %v1009_v53  ;;  %9277 = vmatprep.subr.mxu0 %v1318_v54  ;;  %v1323_v51 = vld [vmem:[%s14052_s29 + $0x710] sm:$0xff]  ;;  %v1338_v53 = vld [vmem:[%s14052_s29 + $0x788] sm:$0xff] }
  0xd7   : > { %9324 = vmatprep.subr.mxu1 %v1350_v55  ;;  %2005 = vmatprep.mubr.f32.mxu1 %v1012_v56  ;;  %v1290_v54 = vld [vmem:[%s14052_s29 + $0x608] sm:$0xff]  ;;  %v1305_v56 = vld [vmem:[%s14052_s29 + $0x680] sm:$0xff] }
  0xd8   : > { %9278 = vmatpush3.msra.mxu0 %v1302_v57  ;;  %9325 = vmatpush3.msra.mxu1 %v1334_v58  ;;  %v1322_v55 = vld [vmem:[%s14052_s29 + $0x708] sm:$0xff]  ;;  %v1337_v57 = vld [vmem:[%s14052_s29 + $0x780] sm:$0xff] }
  0xd9   : > { %9279 = vmatprep.subr.mxu0 %v1317_v59  ;;  %2006 = vmatmul.mubr.f32.gmra.mxu1 %v1011_v60  ;;  %v1289_v58 = vld [vmem:[%s14052_s29 + $0x600] sm:$0xff]  ;;  %v990_v59 = vld [vmem:[%s11590_s10 + $0x68] sm:$0xff] }
  0xda   : > { %9326 = vmatprep.subr.mxu1 %v1349_v61  ;;  %1920 = vmatprep.mubr.f32.mxu0 %v1034_v62  ;;  %v1321_v60 = vld [vmem:[%s14052_s29 + $0x700] sm:$0xff]  ;;  %v992_v62 = vld [vmem:[%s11590_s10 + $0x78] sm:$0xff] }
  0xdb   : > { %9280 = vmatpush3.msra.mxu0 %v1301_v63  ;;  %9327 = vmatpush3.msra.mxu1 %v1333_v0  ;;  %v989_v61 = vld [vmem:[%s11590_s10 + $0x60] sm:$0xff]  ;;  %v1384_v63 = vld [vmem:[%s14052_s29 + $0x8f8] sm:$0xff] }
  0xdc   : > { %1921 = vmatmul.mubr.f32.gmra.mxu0 %v1033_v1  ;;  %9281 = vmatprep.subr.mxu0 %v1316_v2  ;;  %v1416_v0 = vld [vmem:[%s14052_s29 + $0x9f8] sm:$0xff]  ;;  %v991_v1 = vld [vmem:[%s11590_s10 + $0x70] sm:$0xff] }
  0xdd   : > { %9328 = vmatprep.subr.mxu1 %v1348_v3  ;;  %2010 = vmatprep.mubr.f32.mxu1 %v1036_v4  ;;  %v1368_v2 = vld [vmem:[%s14052_s29 + $0x878] sm:$0xff]  ;;  %v1383_v4 = vld [vmem:[%s14052_s29 + $0x8f0] sm:$0xff] }
  0xde   : > { %9282 = vmatpush3.msra.mxu0 %v1300_v5  ;;  %9329 = vmatpush3.msra.mxu1 %v1332_v6  ;;  %v1400_v3 = vld [vmem:[%s14052_s29 + $0x978] sm:$0xff]  ;;  %v1415_v5 = vld [vmem:[%s14052_s29 + $0x9f0] sm:$0xff]  ;;  %v1014_v6 = vld [vmem:[%s11590_s10 + $0x128] sm:$0xff] }
  0xdf   : > { %9283 = vmatprep.subr.mxu0 %v1315_v7  ;;  %2011 = vmatmul.mubr.f32.gmra.mxu1 %v1035_v8  ;;  %v1367_v7 = vld [vmem:[%s14052_s29 + $0x870] sm:$0xff] }
  0xe0   : > { %9330 = vmatprep.subr.mxu1 %v1347_v9  ;;  %1925 = vmatprep.mubr.f32.mxu0 %v1058_v10  ;;  %v1399_v8 = vld [vmem:[%s14052_s29 + $0x970] sm:$0xff]  ;;  %v1013_v9 = vld [vmem:[%s11590_s10 + $0x120] sm:$0xff]  ;;  %v1382_v10 = vld [vmem:[%s14052_s29 + $0x8e8] sm:$0xff] }
  0xe1   : > { %9284 = vmatpush3.msra.mxu0 %v1299_v11  ;;  %9331 = vmatpush3.msra.mxu1 %v1331_v12  ;;  %v1414_v11 = vld [vmem:[%s14052_s29 + $0x9e8] sm:$0xff]  ;;  %v1016_v12 = vld [vmem:[%s11590_s10 + $0x138] sm:$0xff] }
  0xe2   : > { %1926 = vmatmul.mubr.f32.gmra.mxu0 %v1057_v13  ;;  %9285 = vmatprep.subr.mxu0 %v1314_v14  ;;  %v1366_v13 = vld [vmem:[%s14052_s29 + $0x868] sm:$0xff] }
  0xe3   : > { %9332 = vmatprep.subr.mxu1 %v1346_v15  ;;  %2015 = vmatprep.mubr.f32.mxu1 %v1060_v16  ;;  %v1398_v14 = vld [vmem:[%s14052_s29 + $0x968] sm:$0xff]  ;;  %v1381_v15 = vld [vmem:[%s14052_s29 + $0x8e0] sm:$0xff]  ;;  %v1015_v16 = vld [vmem:[%s11590_s10 + $0x130] sm:$0xff] }
  0xe4   : > { %9286 = vmatpush3.msra.mxu0 %v1298_v17  ;;  %9333 = vmatpush3.msra.mxu1 %v1330_v18  ;;  %v1413_v17 = vld [vmem:[%s14052_s29 + $0x9e0] sm:$0xff]  ;;  %v1038_v18 = vld [vmem:[%s11590_s10 + $0x1e8] sm:$0xff] }
  0xe5   : > { %9287 = vmatprep.subr.mxu0 %v1313_v19  ;;  %2016 = vmatmul.mubr.f32.gmra.mxu1 %v1059_v20  ;;  %v1365_v19 = vld [vmem:[%s14052_s29 + $0x860] sm:$0xff] }
  0xe6   : > { %9334 = vmatprep.subr.mxu1 %v1345_v21  ;;  %1930 = vmatprep.mubr.f32.mxu0 %v1082_v22  ;;  %v1397_v20 = vld [vmem:[%s14052_s29 + $0x960] sm:$0xff]  ;;  %v1380_v22 = vld [vmem:[%s14052_s29 + $0x8d8] sm:$0xff] }
  0xe7   : > { %9288 = vmatpush3.msra.mxu0 %v1297_v23  ;;  %9335 = vmatpush3.msra.mxu1 %v1329_v24  ;;  %v1037_v21 = vld [vmem:[%s11590_s10 + $0x1e0] sm:$0xff]  ;;  %v1412_v23 = vld [vmem:[%s14052_s29 + $0x9d8] sm:$0xff] }
  0xe8   : > { %1931 = vmatmul.mubr.f32.gmra.mxu0 %v1081_v25  ;;  %9289 = vmatprep.subr.mxu0 %v1312_v26  ;;  %v1040_v24 = vld [vmem:[%s11590_s10 + $0x1f8] sm:$0xff] }
  0xe9   : > { %9336 = vmatprep.subr.mxu1 %v1344_v27  ;;  %2020 = vmatprep.mubr.f32.mxu1 %v1084_v28  ;;  %v1364_v25 = vld [vmem:[%s14052_s29 + $0x858] sm:$0xff]  ;;  %v1379_v27 = vld [vmem:[%s14052_s29 + $0x8d0] sm:$0xff] }
  0xea   : > { %9290 = vmatpush3.msra.mxu0 %v1296_v29  ;;  %9337 = vmatpush3.msra.mxu1 %v1328_v30  ;;  %v1396_v26 = vld [vmem:[%s14052_s29 + $0x958] sm:$0xff]  ;;  %v1039_v28 = vld [vmem:[%s11590_s10 + $0x1f0] sm:$0xff]  ;;  %v1062_v30 = vld [vmem:[%s11590_s10 + $0x2a8] sm:$0xff] }
  0xeb   : > { %9291 = vmatprep.subr.mxu0 %v1311_v31  ;;  %2021 = vmatmul.mubr.f32.gmra.mxu1 %v1083_v32  ;;  %v1411_v29 = vld [vmem:[%s14052_s29 + $0x9d0] sm:$0xff] }
  0xec   : > { %9338 = vmatprep.subr.mxu1 %v1343_v33  ;;  %9292 = vmatpush3.msra.mxu0 %v1295_v34  ;;  %v1363_v31 = vld [vmem:[%s14052_s29 + $0x850] sm:$0xff]  ;;  %v1061_v33 = vld [vmem:[%s11590_s10 + $0x2a0] sm:$0xff]  ;;  %v1378_v34 = vld [vmem:[%s14052_s29 + $0x8c8] sm:$0xff] }
  0xed   : > { %9339 = vmatpush3.msra.mxu1 %v1327_v35  ;;  %9293 = vmatprep.subr.mxu0 %v1310_v36  ;;  %v1395_v32 = vld [vmem:[%s14052_s29 + $0x950] sm:$0xff]  ;;  %v1410_v35 = vld [vmem:[%s14052_s29 + $0x9c8] sm:$0xff]  ;;  %v1064_v36 = vld [vmem:[%s11590_s10 + $0x2b8] sm:$0xff] }
  0xee   : > { %9340 = vmatprep.subr.mxu1 %v1342_v37  ;;  %9294 = vmatpush3.msra.mxu0 %v1294_v38  ;;  %v1362_v37 = vld [vmem:[%s14052_s29 + $0x848] sm:$0xff] }
  0xef   : > { %9341 = vmatpush3.msra.mxu1 %v1326_v39  ;;  %9295 = vmatprep.subr.mxu0 %v1309_v40  ;;  %v1394_v38 = vld [vmem:[%s14052_s29 + $0x948] sm:$0xff]  ;;  %v1377_v39 = vld [vmem:[%s14052_s29 + $0x8c0] sm:$0xff]  ;;  %v1063_v40 = vld [vmem:[%s11590_s10 + $0x2b0] sm:$0xff] }
  0xf0   : > { %9342 = vmatprep.subr.mxu1 %v1341_v41  ;;  %9296 = vmatpush3.msra.mxu0 %v1293_v42  ;;  %v1409_v41 = vld [vmem:[%s14052_s29 + $0x9c0] sm:$0xff]  ;;  %v1086_v42 = vld [vmem:[%s11590_s10 + $0x368] sm:$0xff] }
  0xf1   : > { %9343 = vmatpush3.msra.mxu1 %v1325_v43  ;;  %9297 = vmatprep.subr.mxu0 %v1308_v44  ;;  %v1361_v43 = vld [vmem:[%s14052_s29 + $0x840] sm:$0xff] }
  0xf2   : > { %9344 = vmatprep.subr.mxu1 %v1340_v45  ;;  %9298 = vmatpush3.msra.mxu0 %v1292_v46  ;;  %v1393_v44 = vld [vmem:[%s14052_s29 + $0x940] sm:$0xff]  ;;  %v1376_v46 = vld [vmem:[%s14052_s29 + $0x8b8] sm:$0xff] }
  0xf3   : > { %9345 = vmatpush3.msra.mxu1 %v1324_v47  ;;  %9299 = vmatprep.subr.mxu0 %v1307_v48  ;;  %v1085_v45 = vld [vmem:[%s11590_s10 + $0x360] sm:$0xff]  ;;  %v1408_v47 = vld [vmem:[%s14052_s29 + $0x9b8] sm:$0xff] }
  0xf4   : > { %9346 = vmatprep.subr.mxu1 %v1339_v49  ;;  %9300 = vmatpush3.msra.mxu0 %v1291_v50  ;;  %v1088_v48 = vld [vmem:[%s11590_s10 + $0x378] sm:$0xff] }
  0xf5   : > { %9347 = vmatpush3.msra.mxu1 %v1323_v51  ;;  %9301 = vmatprep.subr.mxu0 %v1306_v52  ;;  %v1360_v49 = vld [vmem:[%s14052_s29 + $0x838] sm:$0xff]  ;;  %v1375_v51 = vld [vmem:[%s14052_s29 + $0x8b0] sm:$0xff] }
  0xf6   : > { %9348 = vmatprep.subr.mxu1 %v1338_v53  ;;  %9302 = vmatpush3.msra.mxu0 %v1290_v54  ;;  %v1392_v50 = vld [vmem:[%s14052_s29 + $0x938] sm:$0xff]  ;;  %v1087_v52 = vld [vmem:[%s11590_s10 + $0x370] sm:$0xff] }
  0xf7   : > { %9349 = vmatpush3.msra.mxu1 %v1322_v55  ;;  %9303 = vmatprep.subr.mxu0 %v1305_v56  ;;  %v1407_v53 = vld [vmem:[%s14052_s29 + $0x9b0] sm:$0xff]  ;;  %v1374_v56 = vld [vmem:[%s14052_s29 + $0x8a8] sm:$0xff] }
  0xf8   : > { %9350 = vmatprep.subr.mxu1 %v1337_v57  ;;  %9304 = vmatpush3.msra.mxu0 %v1289_v58  ;;  %v1359_v54 = vld [vmem:[%s14052_s29 + $0x830] sm:$0xff]  ;;  %v1406_v57 = vld [vmem:[%s14052_s29 + $0x9a8] sm:$0xff] }
  0xf9   : > { %2090 = vmatprep.mubr.f32.mxu0 %v990_v59  ;;  %9351 = vmatpush3.msra.mxu1 %v1321_v60  ;;  %v1391_v55 = vld [vmem:[%s14052_s29 + $0x930] sm:$0xff]  ;;  %v1358_v58 = vld [vmem:[%s14052_s29 + $0x828] sm:$0xff]  ;;  %v1373_v60 = vld [vmem:[%s14052_s29 + $0x8a0] sm:$0xff] }
  0xfa   : > { %2091 = vmatmul.mubr.f32.vlgmr.msra.gmra.mxu0 %v989_v61  ;;  %2180 = vmatprep.mubr.f32.mxu1 %v992_v62  ;;  %v1390_v59 = vld [vmem:[%s14052_s29 + $0x928] sm:$0xff]  ;;  %v1405_v61 = vld [vmem:[%s14052_s29 + $0x9a0] sm:$0xff] }
  0xfb   : > { %9367 = vmatprep.subr.mxu0 %v1384_v63  ;;  %9414 = vmatprep.subr.mxu1 %v1416_v0  ;;  %v1357_v62 = vld [vmem:[%s14052_s29 + $0x820] sm:$0xff]  ;;  %v1372_v0 = vld [vmem:[%s14052_s29 + $0x898] sm:$0xff] }
  0xfc   : > { %2181 = vmatmul.mubr.f32.vlgmr.msra.gmra.mxu1 %v991_v1  ;;  %9368 = vmatpush3.msra.mxu0 %v1368_v2  ;;  %v1389_v63 = vld [vmem:[%s14052_s29 + $0x920] sm:$0xff]  ;;  %v1404_v1 = vld [vmem:[%s14052_s29 + $0x998] sm:$0xff] }
  0xfd   : > { %9415 = vmatpush3.msra.mxu1 %v1400_v3  ;;  %9369 = vmatprep.subr.mxu0 %v1383_v4  ;;  %v1356_v2 = vld [vmem:[%s14052_s29 + $0x818] sm:$0xff]  ;;  %v1371_v4 = vld [vmem:[%s14052_s29 + $0x890] sm:$0xff] }
  0xfe   : > { %9416 = vmatprep.subr.mxu1 %v1415_v5  ;;  %2095 = vmatprep.mubr.f32.mxu0 %v1014_v6  ;;  %v1388_v3 = vld [vmem:[%s14052_s29 + $0x918] sm:$0xff]  ;;  %v1403_v5 = vld [vmem:[%s14052_s29 + $0x990] sm:$0xff] }
  0xff   : > { %9370 = vmatpush3.msra.mxu0 %v1367_v7  ;;  %9417 = vmatpush3.msra.mxu1 %v1399_v8  ;;  %v1355_v6 = vld [vmem:[%s14052_s29 + $0x810] sm:$0xff]  ;;  %v1370_v8 = vld [vmem:[%s14052_s29 + $0x888] sm:$0xff] }
 0x100   : > { %2096 = vmatmul.mubr.f32.gmra.mxu0 %v1013_v9  ;;  %9371 = vmatprep.subr.mxu0 %v1382_v10  ;;  %v1387_v7 = vld [vmem:[%s14052_s29 + $0x910] sm:$0xff]  ;;  %v1402_v9 = vld [vmem:[%s14052_s29 + $0x988] sm:$0xff] }
 0x101   : > { %9418 = vmatprep.subr.mxu1 %v1414_v11  ;;  %2185 = vmatprep.mubr.f32.mxu1 %v1016_v12  ;;  %v1354_v10 = vld [vmem:[%s14052_s29 + $0x808] sm:$0xff]  ;;  %v1369_v12 = vld [vmem:[%s14052_s29 + $0x880] sm:$0xff] }
 0x102   : > { %9372 = vmatpush3.msra.mxu0 %v1366_v13  ;;  %9419 = vmatpush3.msra.mxu1 %v1398_v14  ;;  %v1386_v11 = vld [vmem:[%s14052_s29 + $0x908] sm:$0xff]  ;;  %v1401_v13 = vld [vmem:[%s14052_s29 + $0x980] sm:$0xff] }
 0x103   : > { %9373 = vmatprep.subr.mxu0 %v1381_v15  ;;  %2186 = vmatmul.mubr.f32.gmra.mxu1 %v1015_v16  ;;  %v1353_v14 = vld [vmem:[%s14052_s29 + $0x800] sm:$0xff]  ;;  %v994_v15 = vld [vmem:[%s11590_s10 + $0x88] sm:$0xff] }
 0x104   : > { %9420 = vmatprep.subr.mxu1 %v1413_v17  ;;  %2100 = vmatprep.mubr.f32.mxu0 %v1038_v18  ;;  %v1385_v16 = vld [vmem:[%s14052_s29 + $0x900] sm:$0xff]  ;;  %v996_v18 = vld [vmem:[%s11590_s10 + $0x98] sm:$0xff] }
 0x105   : > { %9374 = vmatpush3.msra.mxu0 %v1365_v19  ;;  %9421 = vmatpush3.msra.mxu1 %v1397_v20  ;;  %v993_v17 = vld [vmem:[%s11590_s10 + $0x80] sm:$0xff]  ;;  %v1448_v19 = vld [vmem:[%s14052_s29 + $0xaf8] sm:$0xff] }
 0x106   : > { %2101 = vmatmul.mubr.f32.gmra.mxu0 %v1037_v21  ;;  %9375 = vmatprep.subr.mxu0 %v1380_v22  ;;  %v1480_v20 = vld [vmem:[%s14052_s29 + $0xbf8] sm:$0xff]  ;;  %v995_v21 = vld [vmem:[%s11590_s10 + $0x90] sm:$0xff] }
 0x107   : > { %9422 = vmatprep.subr.mxu1 %v1412_v23  ;;  %2190 = vmatprep.mubr.f32.mxu1 %v1040_v24  ;;  %v1432_v22 = vld [vmem:[%s14052_s29 + $0xa78] sm:$0xff]  ;;  %v1447_v24 = vld [vmem:[%s14052_s29 + $0xaf0] sm:$0xff] }
 0x108   : > { %9376 = vmatpush3.msra.mxu0 %v1364_v25  ;;  %9423 = vmatpush3.msra.mxu1 %v1396_v26  ;;  %v1464_v23 = vld [vmem:[%s14052_s29 + $0xb78] sm:$0xff]  ;;  %v1479_v25 = vld [vmem:[%s14052_s29 + $0xbf0] sm:$0xff]  ;;  %v1018_v26 = vld [vmem:[%s11590_s10 + $0x148] sm:$0xff] }
 0x109   : > { %9377 = vmatprep.subr.mxu0 %v1379_v27  ;;  %2191 = vmatmul.mubr.f32.gmra.mxu1 %v1039_v28  ;;  %v1431_v27 = vld [vmem:[%s14052_s29 + $0xa70] sm:$0xff] }
 0x10a   : > { %9424 = vmatprep.subr.mxu1 %v1411_v29  ;;  %2105 = vmatprep.mubr.f32.mxu0 %v1062_v30  ;;  %v1463_v28 = vld [vmem:[%s14052_s29 + $0xb70] sm:$0xff]  ;;  %v1017_v29 = vld [vmem:[%s11590_s10 + $0x140] sm:$0xff]  ;;  %v1446_v30 = vld [vmem:[%s14052_s29 + $0xae8] sm:$0xff] }
 0x10b   : > { %9378 = vmatpush3.msra.mxu0 %v1363_v31  ;;  %9425 = vmatpush3.msra.mxu1 %v1395_v32  ;;  %v1478_v31 = vld [vmem:[%s14052_s29 + $0xbe8] sm:$0xff]  ;;  %v1020_v32 = vld [vmem:[%s11590_s10 + $0x158] sm:$0xff] }
 0x10c   : > { %2106 = vmatmul.mubr.f32.gmra.mxu0 %v1061_v33  ;;  %9379 = vmatprep.subr.mxu0 %v1378_v34  ;;  %v1430_v33 = vld [vmem:[%s14052_s29 + $0xa68] sm:$0xff] }
 0x10d   : > { %9426 = vmatprep.subr.mxu1 %v1410_v35  ;;  %2195 = vmatprep.mubr.f32.mxu1 %v1064_v36  ;;  %v1462_v34 = vld [vmem:[%s14052_s29 + $0xb68] sm:$0xff]  ;;  %v1445_v35 = vld [vmem:[%s14052_s29 + $0xae0] sm:$0xff]  ;;  %v1019_v36 = vld [vmem:[%s11590_s10 + $0x150] sm:$0xff] }
 0x10e   : > { %9380 = vmatpush3.msra.mxu0 %v1362_v37  ;;  %9427 = vmatpush3.msra.mxu1 %v1394_v38  ;;  %v1477_v37 = vld [vmem:[%s14052_s29 + $0xbe0] sm:$0xff]  ;;  %v1042_v38 = vld [vmem:[%s11590_s10 + $0x208] sm:$0xff] }
 0x10f   : > { %9381 = vmatprep.subr.mxu0 %v1377_v39  ;;  %2196 = vmatmul.mubr.f32.gmra.mxu1 %v1063_v40  ;;  %v1429_v39 = vld [vmem:[%s14052_s29 + $0xa60] sm:$0xff] }
 0x110   : > { %9428 = vmatprep.subr.mxu1 %v1409_v41  ;;  %2110 = vmatprep.mubr.f32.mxu0 %v1086_v42  ;;  %v1461_v40 = vld [vmem:[%s14052_s29 + $0xb60] sm:$0xff]  ;;  %v1444_v42 = vld [vmem:[%s14052_s29 + $0xad8] sm:$0xff] }
 0x111   : > { %9382 = vmatpush3.msra.mxu0 %v1361_v43  ;;  %9429 = vmatpush3.msra.mxu1 %v1393_v44  ;;  %v1041_v41 = vld [vmem:[%s11590_s10 + $0x200] sm:$0xff]  ;;  %v1476_v43 = vld [vmem:[%s14052_s29 + $0xbd8] sm:$0xff] }
 0x112   : > { %2111 = vmatmul.mubr.f32.gmra.mxu0 %v1085_v45  ;;  %9383 = vmatprep.subr.mxu0 %v1376_v46  ;;  %v1044_v44 = vld [vmem:[%s11590_s10 + $0x218] sm:$0xff] }
 0x113   : > { %9430 = vmatprep.subr.mxu1 %v1408_v47  ;;  %2200 = vmatprep.mubr.f32.mxu1 %v1088_v48  ;;  %v1428_v45 = vld [vmem:[%s14052_s29 + $0xa58] sm:$0xff]  ;;  %v1443_v47 = vld [vmem:[%s14052_s29 + $0xad0] sm:$0xff] }
 0x114   : > { %9384 = vmatpush3.msra.mxu0 %v1360_v49  ;;  %9431 = vmatpush3.msra.mxu1 %v1392_v50  ;;  %v1460_v46 = vld [vmem:[%s14052_s29 + $0xb58] sm:$0xff]  ;;  %v1043_v48 = vld [vmem:[%s11590_s10 + $0x210] sm:$0xff]  ;;  %v1066_v50 = vld [vmem:[%s11590_s10 + $0x2c8] sm:$0xff] }
 0x115   : > { %9385 = vmatprep.subr.mxu0 %v1375_v51  ;;  %2201 = vmatmul.mubr.f32.gmra.mxu1 %v1087_v52  ;;  %v1475_v49 = vld [vmem:[%s14052_s29 + $0xbd0] sm:$0xff] }
 0x116   : > { %9432 = vmatprep.subr.mxu1 %v1407_v53  ;;  %9386 = vmatpush3.msra.mxu0 %v1359_v54  ;;  %v1427_v51 = vld [vmem:[%s14052_s29 + $0xa50] sm:$0xff]  ;;  %v1065_v53 = vld [vmem:[%s11590_s10 + $0x2c0] sm:$0xff]  ;;  %v1442_v54 = vld [vmem:[%s14052_s29 + $0xac8] sm:$0xff] }
 0x117   : > { %9433 = vmatpush3.msra.mxu1 %v1391_v55  ;;  %9387 = vmatprep.subr.mxu0 %v1374_v56  ;;  %v1459_v52 = vld [vmem:[%s14052_s29 + $0xb50] sm:$0xff]  ;;  %v1474_v55 = vld [vmem:[%s14052_s29 + $0xbc8] sm:$0xff]  ;;  %v1068_v56 = vld [vmem:[%s11590_s10 + $0x2d8] sm:$0xff] }
 0x118   : > { %9434 = vmatprep.subr.mxu1 %v1406_v57  ;;  %9388 = vmatpush3.msra.mxu0 %v1358_v58  ;;  %v1426_v57 = vld [vmem:[%s14052_s29 + $0xa48] sm:$0xff] }
 0x119   : > { %9435 = vmatpush3.msra.mxu1 %v1390_v59  ;;  %9389 = vmatprep.subr.mxu0 %v1373_v60  ;;  %v1458_v58 = vld [vmem:[%s14052_s29 + $0xb48] sm:$0xff]  ;;  %v1441_v59 = vld [vmem:[%s14052_s29 + $0xac0] sm:$0xff]  ;;  %v1067_v60 = vld [vmem:[%s11590_s10 + $0x2d0] sm:$0xff] }
 0x11a   : > { %9436 = vmatprep.subr.mxu1 %v1405_v61  ;;  %9390 = vmatpush3.msra.mxu0 %v1357_v62  ;;  %v1473_v61 = vld [vmem:[%s14052_s29 + $0xbc0] sm:$0xff]  ;;  %v1090_v62 = vld [vmem:[%s11590_s10 + $0x388] sm:$0xff] }
 0x11b   : > { %9437 = vmatpush3.msra.mxu1 %v1389_v63  ;;  %9391 = vmatprep.subr.mxu0 %v1372_v0  ;;  %v1425_v63 = vld [vmem:[%s14052_s29 + $0xa40] sm:$0xff] }
 0x11c   : > { %9438 = vmatprep.subr.mxu1 %v1404_v1  ;;  %9392 = vmatpush3.msra.mxu0 %v1356_v2  ;;  %v1457_v0 = vld [vmem:[%s14052_s29 + $0xb40] sm:$0xff]  ;;  %v1440_v2 = vld [vmem:[%s14052_s29 + $0xab8] sm:$0xff] }
 0x11d   : > { %9439 = vmatpush3.msra.mxu1 %v1388_v3  ;;  %9393 = vmatprep.subr.mxu0 %v1371_v4  ;;  %v1089_v1 = vld [vmem:[%s11590_s10 + $0x380] sm:$0xff]  ;;  %v1472_v3 = vld [vmem:[%s14052_s29 + $0xbb8] sm:$0xff] }
 0x11e   : > { %9440 = vmatprep.subr.mxu1 %v1403_v5  ;;  %9394 = vmatpush3.msra.mxu0 %v1355_v6  ;;  %v1092_v4 = vld [vmem:[%s11590_s10 + $0x398] sm:$0xff] }
 0x11f   : > { %9441 = vmatpush3.msra.mxu1 %v1387_v7  ;;  %9395 = vmatprep.subr.mxu0 %v1370_v8  ;;  %v1424_v5 = vld [vmem:[%s14052_s29 + $0xa38] sm:$0xff]  ;;  %v1439_v7 = vld [vmem:[%s14052_s29 + $0xab0] sm:$0xff] }
 0x120   : > { %9442 = vmatprep.subr.mxu1 %v1402_v9  ;;  %9396 = vmatpush3.msra.mxu0 %v1354_v10  ;;  %v1456_v6 = vld [vmem:[%s14052_s29 + $0xb38] sm:$0xff]  ;;  %v1091_v9 = vld [vmem:[%s11590_s10 + $0x390] sm:$0xff] }
 0x121   : > { %9443 = vmatpush3.msra.mxu1 %v1386_v11  ;;  %9397 = vmatprep.subr.mxu0 %v1369_v12  ;;  %v1471_v10 = vld [vmem:[%s14052_s29 + $0xbb0] sm:$0xff] }
 0x122   : > { %9444 = vmatprep.subr.mxu1 %v1401_v13  ;;  %9398 = vmatpush3.msra.mxu0 %v1353_v14  ;;  %v1423_v11 = vld [vmem:[%s14052_s29 + $0xa30] sm:$0xff]  ;;  %v1481_v14 = vld [vmem:[%s14053_s9] sm:$0xff] }
 0x123   : > { %2270 = vmatprep.mubr.f32.mxu0 %v994_v15  ;;  %9445 = vmatpush3.msra.mxu1 %v1385_v16  ;;  %v1455_v12 = vld [vmem:[%s14052_s29 + $0xb30] sm:$0xff]  ;;  %v1438_v16 = vld [vmem:[%s14052_s29 + $0xaa8] sm:$0xff] }
 0x124   : > { %2271 = vmatmul.mubr.f32.vlgmr.msra.gmra.mxu0 %v993_v17  ;;  %2360 = vmatprep.mubr.f32.mxu1 %v996_v18  ;;  %v1470_v17 = vld [vmem:[%s14052_s29 + $0xba8] sm:$0xff] }
 0x125   : > { %9461 = vmatprep.subr.mxu0 %v1448_v19  ;;  %9508 = vmatprep.subr.mxu1 %v1480_v20  ;;  %v1422_v19 = vld [vmem:[%s14052_s29 + $0xa28] sm:$0xff] }
 0x126   : > { %2361 = vmatmul.mubr.f32.vlgmr.msra.gmra.mxu1 %v995_v21  ;;  %9462 = vmatpush3.msra.mxu0 %v1432_v22  ;;  %v1454_v20 = vld [vmem:[%s14052_s29 + $0xb28] sm:$0xff]  ;;  %v1437_v22 = vld [vmem:[%s14052_s29 + $0xaa0] sm:$0xff] }
 0x127   : > { %9509 = vmatpush3.msra.mxu1 %v1464_v23  ;;  %9463 = vmatprep.subr.mxu0 %v1447_v24  ;;  %v1469_v23 = vld [vmem:[%s14052_s29 + $0xba0] sm:$0xff] }
 0x128   : > { %9510 = vmatprep.subr.mxu1 %v1479_v25  ;;  %2275 = vmatprep.mubr.f32.mxu0 %v1018_v26  ;;  %v1421_v26 = vld [vmem:[%s14052_s29 + $0xa20] sm:$0xff] }
 0x129   : > { %9464 = vmatpush3.msra.mxu0 %v1431_v27  ;;  %9511 = vmatpush3.msra.mxu1 %v1463_v28  ;;  %v1453_v27 = vld [vmem:[%s14052_s29 + $0xb20] sm:$0xff]  ;;  %v1436_v28 = vld [vmem:[%s14052_s29 + $0xa98] sm:$0xff] }
 0x12a   : > { %2276 = vmatmul.mubr.f32.gmra.mxu0 %v1017_v29  ;;  %9465 = vmatprep.subr.mxu0 %v1446_v30  ;;  %v1468_v29 = vld [vmem:[%s14052_s29 + $0xb98] sm:$0xff] }
 0x12b   : > { %9512 = vmatprep.subr.mxu1 %v1478_v31  ;;  %2365 = vmatprep.mubr.f32.mxu1 %v1020_v32  ;;  %v1420_v31 = vld [vmem:[%s14052_s29 + $0xa18] sm:$0xff] }
 0x12c   : > { %9466 = vmatpush3.msra.mxu0 %v1430_v33  ;;  %9513 = vmatpush3.msra.mxu1 %v1462_v34  ;;  %v1452_v32 = vld [vmem:[%s14052_s29 + $0xb18] sm:$0xff]  ;;  %v1435_v33 = vld [vmem:[%s14052_s29 + $0xa90] sm:$0xff] }
 0x12d   : > { %9467 = vmatprep.subr.mxu0 %v1445_v35  ;;  %2366 = vmatmul.mubr.f32.gmra.mxu1 %v1019_v36  ;;  %v1467_v34 = vld [vmem:[%s14052_s29 + $0xb90] sm:$0xff] }
 0x12e   : > { %9514 = vmatprep.subr.mxu1 %v1477_v37  ;;  %2280 = vmatprep.mubr.f32.mxu0 %v1042_v38  ;;  %v1419_v35 = vld [vmem:[%s14052_s29 + $0xa10] sm:$0xff]  ;;  %v1434_v37 = vld [vmem:[%s14052_s29 + $0xa88] sm:$0xff] }
 0x12f   : > { %9468 = vmatpush3.msra.mxu0 %v1429_v39  ;;  %9515 = vmatpush3.msra.mxu1 %v1461_v40  ;;  %v1451_v36 = vld [vmem:[%s14052_s29 + $0xb10] sm:$0xff]  ;;  %v1466_v38 = vld [vmem:[%s14052_s29 + $0xb88] sm:$0xff] }
 0x130   : > { %2281 = vmatmul.mubr.f32.gmra.mxu0 %v1041_v41  ;;  %9469 = vmatprep.subr.mxu0 %v1444_v42  ;;  %v1418_v39 = vld [vmem:[%s14052_s29 + $0xa08] sm:$0xff]  ;;  %v1433_v41 = vld [vmem:[%s14052_s29 + $0xa80] sm:$0xff] }
 0x131   : > { %9516 = vmatprep.subr.mxu1 %v1476_v43  ;;  %2370 = vmatprep.mubr.f32.mxu1 %v1044_v44  ;;  %v1450_v40 = vld [vmem:[%s14052_s29 + $0xb08] sm:$0xff]  ;;  %v1465_v42 = vld [vmem:[%s14052_s29 + $0xb80] sm:$0xff] }
 0x132   : > { %9470 = vmatpush3.msra.mxu0 %v1428_v45  ;;  %9517 = vmatpush3.msra.mxu1 %v1460_v46  ;;  %v1417_v43 = vld [vmem:[%s14052_s29 + $0xa00] sm:$0xff]  ;;  %v998_v44 = vld [vmem:[%s11590_s10 + $0xa8] sm:$0xff]  ;;  %v1000_v46 = vld [vmem:[%s11590_s10 + $0xb8] sm:$0xff] }
 0x133   : > { %9471 = vmatprep.subr.mxu0 %v1443_v47  ;;  %2371 = vmatmul.mubr.f32.gmra.mxu1 %v1043_v48  ;;  %v1449_v45 = vld [vmem:[%s14052_s29 + $0xb00] sm:$0xff]  ;;  %v999_v48 = vld [vmem:[%s11590_s10 + $0xb0] sm:$0xff]  ;;  %s14088_s29 = sld [smem:[#allocation21_spill]] }
 0x134   : > { %9518 = vmatprep.subr.mxu1 %v1475_v49  ;;  %2285 = vmatprep.mubr.f32.mxu0 %v1066_v50  ;;  %v997_v47 = vld [vmem:[%s11590_s10 + $0xa0] sm:$0xff]  ;;  %v1022_v49 = vld [vmem:[%s11590_s10 + $0x168] sm:$0xff]  ;;  %v1024_v50 = vld [vmem:[%s11590_s10 + $0x178] sm:$0xff] }
 0x135   : > { %9472 = vmatpush3.msra.mxu0 %v1427_v51  ;;  %9519 = vmatpush3.msra.mxu1 %v1459_v52  ;;  %v1482_v52 = vld [vmem:[%s14053_s9 + $0x8] sm:$0xff] }
 0x136   : > { %2286 = vmatmul.mubr.f32.gmra.mxu0 %v1065_v53  ;;  %9473 = vmatprep.subr.mxu0 %v1442_v54  ;;  %v1021_v54 = vld [vmem:[%s11590_s10 + $0x160] sm:$0xff] }
 0x137   : > { %9520 = vmatprep.subr.mxu1 %v1474_v55  ;;  %2375 = vmatprep.mubr.f32.mxu1 %v1068_v56  ;;  %v1023_v55 = vld [vmem:[%s11590_s10 + $0x170] sm:$0xff] }
 0x138   : > { %9474 = vmatpush3.msra.mxu0 %v1426_v57  ;;  %9521 = vmatpush3.msra.mxu1 %v1458_v58  ;;  %v1046_v58 = vld [vmem:[%s11590_s10 + $0x228] sm:$0xff] }
 0x139   : > { %9475 = vmatprep.subr.mxu0 %v1441_v59  ;;  %2376 = vmatmul.mubr.f32.gmra.mxu1 %v1067_v60  ;;  %v1048_v59 = vld [vmem:[%s11590_s10 + $0x238] sm:$0xff] }
 0x13a   : > { %9522 = vmatprep.subr.mxu1 %v1473_v61  ;;  %2290 = vmatprep.mubr.f32.mxu0 %v1090_v62 }
 0x13b   : > { %9476 = vmatpush3.msra.mxu0 %v1425_v63  ;;  %9523 = vmatpush3.msra.mxu1 %v1457_v0  ;;  %v1045_v0 = vld [vmem:[%s11590_s10 + $0x220] sm:$0xff] }
 0x13c   : > { %2291 = vmatmul.mubr.f32.gmra.mxu0 %v1089_v1  ;;  %v9023_v8 = vpop.f32.mrf.mxu0  ;;  %9477 = vmatprep.subr.mxu0 %v1440_v2  ;;  %v1047_v1 = vld [vmem:[%s11590_s10 + $0x230] sm:$0xff]  ;;  %v1070_v2 = vld [vmem:[%s11590_s10 + $0x2e8] sm:$0xff] }
 0x13d   : > { %9524 = vmatprep.subr.mxu1 %v1472_v3  ;;  %2380 = vmatprep.mubr.f32.mxu1 %v1092_v4  ;;  %v1072_v3 = vld [vmem:[%s11590_s10 + $0x2f8] sm:$0xff] }
 0x13e   : > { %9478 = vmatpush3.msra.mxu0 %v1424_v5  ;;  %v9070_v13 = vpop.f32.mrf.mxu1  ;;  %v9024_v15 = vpop.f32.mrf.mxu0  ;;  %9525 = vmatpush3.msra.mxu1 %v1456_v6  ;;  %v1483_v5 = vld [vmem:[%s14053_s9 + $0x10] sm:$0xff] }
 0x13f   : > { %9479 = vmatprep.subr.mxu0 %v1439_v7  ;;  %v9025_v18 = vadd.f32 %v9024_v15, %v9023_v8  ;;  %2381 = vmatmul.mubr.f32.gmra.mxu1 %v1091_v9  ;;  %v1069_v9 = vld [vmem:[%s11590_s10 + $0x2e0] sm:$0xff] }
 0x140   : > { %9526 = vmatprep.subr.mxu1 %v1471_v10  ;;  %v9071_v21 = vpop.f32.mrf.mxu1  ;;  %9480 = vmatpush3.msra.mxu0 %v1423_v11  ;;  %v1071_v10 = vld [vmem:[%s11590_s10 + $0x2f0] sm:$0xff] }
 0x141   : > { %9527 = vmatpush3.msra.mxu1 %v1455_v12  ;;  %v1553_v24 = vadd.f32 %v9025_v18, %v1481_v14  ;;  %v9072_v25 = vadd.f32 %v9071_v21, %v9070_v13  ;;  %9481 = vmatprep.subr.mxu0 %v1438_v16  ;;  %v1094_v13 = vld [vmem:[%s11590_s10 + $0x3a8] sm:$0xff]  ;;  %v1096_v14 = vld [vmem:[%s11590_s10 + $0x3b8] sm:$0xff]  ;;  %v1095_v21 = vld [vmem:[%s11590_s10 + $0x3b0] sm:$0xff] }
 0x142   : > { %9528 = vmatprep.subr.mxu1 %v1470_v17  ;;  %9482 = vmatpush3.msra.mxu0 %v1422_v19  ;;  %v1484_v18 = vld [vmem:[%s14053_s9 + $0x18] sm:$0xff] }
 0x143   : > { %9529 = vmatpush3.msra.mxu1 %v1454_v20  ;;  %v12005_v30 = vadd.f32 %v9072_v25, %v1553_v24  ;;  %9483 = vmatprep.subr.mxu0 %v1437_v22  ;;  %v1093_v20 = vld [vmem:[%s11590_s10 + $0x3a0] sm:$0xff]  ;;  %s13996_s10 = smov 96  }
 0x144   : > { %9530 = vmatprep.subr.mxu1 %v1469_v23  ;;  %9484 = vmatpush3.msra.mxu0 %v1421_v26 }
 0x145   : > { %9531 = vmatpush3.msra.mxu1 %v1453_v27  ;;  %9485 = vmatprep.subr.mxu0 %v1436_v28 }
 0x146   : > { %9532 = vmatprep.subr.mxu1 %v1468_v29  ;;  %9486 = vmatpush3.msra.mxu0 %v1420_v31  ;;  %v1485_v29 = vld [vmem:[%s14053_s9 + $0x20] sm:$0xff]  ;;  %s14086_s9 = sld [smem:[#allocation13_spill]] }
 0x147   : > { %9533 = vmatpush3.msra.mxu1 %v1452_v32  ;;  %9487 = vmatprep.subr.mxu0 %v1435_v33 }
 0x148   : > { %9534 = vmatprep.subr.mxu1 %v1467_v34  ;;  %9488 = vmatpush3.msra.mxu0 %v1419_v35 }
 0x149   : > { %9535 = vmatpush3.msra.mxu1 %v1451_v36  ;;  %9489 = vmatprep.subr.mxu0 %v1434_v37 }
 0x14a   : > { %9536 = vmatprep.subr.mxu1 %v1466_v38  ;;  %9490 = vmatpush3.msra.mxu0 %v1418_v39 }
 0x14b   : > { %9537 = vmatpush3.msra.mxu1 %v1450_v40  ;;  %9491 = vmatprep.subr.mxu0 %v1433_v41 }
 0x14c   : > { %9538 = vmatprep.subr.mxu1 %v1465_v42  ;;  %9492 = vmatpush3.msra.mxu0 %v1417_v43 }
 0x14d   : > { %2450 = vmatprep.mubr.f32.mxu0 %v998_v44  ;;  %v9026_v51 = vpop.f32.mrf.mxu0  ;;  %9539 = vmatpush3.msra.mxu1 %v1449_v45 }
 0x14e   : > { %2540 = vmatprep.mubr.f32.mxu1 %v1000_v46  ;;  %2451 = vmatmul.mubr.f32.vlgmr.msra.gmra.mxu0 %v997_v47 }
 0x14f   : > { %2541 = vmatmul.mubr.f32.vlgmr.msra.gmra.mxu1 %v999_v48  ;;  %v9027_v53 = vpop.f32.mrf.mxu0  ;;  %2455 = vmatprep.mubr.f32.mxu0 %v1022_v49 }
 0x150   : > { %2545 = vmatprep.mubr.f32.mxu1 %v1024_v50  ;;  %v9028_v56 = vadd.f32 %v9027_v53, %v9026_v51  ;;  %v9073_v57 = vpop.f32.mrf.mxu1 }
 0x152   : > { %v1558_v60 = vadd.f32 %v9028_v56, %v1482_v52  ;;  %v9074_v61 = vpop.f32.mrf.mxu1  ;;  %2456 = vmatmul.mubr.f32.gmra.mxu0 %v1021_v54 }
 0x153   : > { %2546 = vmatmul.mubr.f32.gmra.mxu1 %v1023_v55  ;;  %v9029_v62 = vpop.f32.mrf.mxu0  ;;  %v9075_v63 = vadd.f32 %v9074_v61, %v9073_v57  ;;  %2460 = vmatprep.mubr.f32.mxu0 %v1046_v58 }
 0x154   : > { %2550 = vmatprep.mubr.f32.mxu1 %v1048_v59 }
 0x155   : > { %v1648_v4 = vadd.f32 %v9075_v63, %v1558_v60  ;;  %v9030_v6 = vpop.f32.mrf.mxu0 }
 0x156   : > { %v9031_v7 = vadd.f32 %v9030_v6, %v9029_v62  ;;  %v9076_v8 = vpop.f32.mrf.mxu1  ;;  %2461 = vmatmul.mubr.f32.gmra.mxu0 %v1045_v0 }
 0x157   : > { %2551 = vmatmul.mubr.f32.gmra.mxu1 %v1047_v1  ;;  %2465 = vmatprep.mubr.f32.mxu0 %v1070_v2 }
 0x158   : > { %2555 = vmatprep.mubr.f32.mxu1 %v1072_v3  ;;  %v1563_v11 = vadd.f32 %v9031_v7, %v1483_v5  ;;  %v9077_v12 = vpop.f32.mrf.mxu1 }
 0x159   : > { %v9032_v15 = vpop.f32.mrf.mxu0  ;;  %v9078_v16 = vadd.f32 %v9077_v12, %v9076_v8  ;;  %v13988_v12 = vmov 0.0  }
 0x15a   : > { %2466 = vmatmul.mubr.f32.gmra.mxu0 %v1069_v9  ;;  %9934 = vmatprep.subr.mxu0 %v13988_v12 }
 0x15b   : > { %2556 = vmatmul.mubr.f32.gmra.mxu1 %v1071_v10  ;;  %v1653_v17 = vadd.f32 %v9078_v16, %v1563_v11  ;;  %v9033_v19 = vpop.f32.mrf.mxu0  ;;  %2470 = vmatprep.mubr.f32.mxu0 %v1094_v13  ;;  %v2567_v16 = vld [vmem:[%s14051_s3 + $0x8] sm:$0xff] }
 0x15c   : > { %2560 = vmatprep.mubr.f32.mxu1 %v1096_v14  ;;  %v9034_v22 = vadd.f32 %v9033_v19, %v9032_v15  ;;  %v9079_v23 = vpop.f32.mrf.mxu1  ;;  %9957 = vmatprep.subr.mxu1 %v13988_v12  ;;  %v2569_v14 = vld [vmem:[%s14051_s3 + $0x18] sm:$0xff]  ;;  %v2568_v15 = vld [vmem:[%s14051_s3 + $0x10] sm:$0xff] }
 0x15d   : > { %9935 = vmatpush3.msra.mxu0 %v2569_v14 }
 0x15e   : > { %v1568_v24 = vadd.f32 %v9034_v22, %v1484_v18  ;;  %v9080_v25 = vpop.f32.mrf.mxu1  ;;  %2471 = vmatmul.mubr.f32.gmra.mxu0 %v1093_v20  ;;  %9936 = vmatprep.subr.mxu0 %v13988_v12 }
 0x15f   : > { %2561 = vmatmul.mubr.f32.gmra.mxu1 %v1095_v21  ;;  %v9035_v26 = vpop.f32.mrf.mxu0  ;;  %v9081_v27 = vadd.f32 %v9080_v25, %v9079_v23  ;;  %9937 = vmatpush3.msra.mxu0 %v2568_v15 }
 0x160   : > { %9938 = vmatprep.subr.mxu0 %v13988_v12  ;;  %9942 = vmatprep.mubr.msk.f32.mxu0 %vm11295_vm0, %v13988_v12 }
 0x161   : > { %v1658_v28 = vadd.f32 %v9081_v27, %v1568_v24  ;;  %v9036_v31 = vpop.f32.mrf.mxu0  ;;  %9939 = vmatpush3.msra.mxu0 %v2567_v16  ;;  %9961 = vmatprep.mubr.msk.f32.mxu1 %vm11295_vm0, %v13988_v12 }
 0x162   : > { %v9037_v32 = vadd.f32 %v9036_v31, %v9035_v26  ;;  %v9082_v33 = vpop.f32.mrf.mxu1  ;;  %9940 = vmatprep.subr.mxu0 %v13988_v12 }
 0x164   : > { %v1573_v34 = vadd.f32 %v9037_v32, %v1485_v29  ;;  %v9083_v35 = vpop.f32.mrf.mxu1 }
 0x165   : > { %v9084_v36 = vadd.f32 %v9083_v35, %v9082_v33 }
 0x166   : > { %v9117_v37 = vpop.f32.mrf.mxu0 }
 0x167   : > { %v1663_v38 = vadd.f32 %v9084_v36, %v1573_v34 }
 0x168   : > { %v9164_v39 = vpop.f32.mrf.mxu1  ;;  %v9118_v40 = vpop.f32.mrf.mxu0 }
 0x169   : > { %v9119_v41 = vadd.f32 %v9118_v40, %v9117_v37 }
 0x16a   : > { %v9165_v42 = vpop.f32.mrf.mxu1 }
 0x16b   : > { %v1733_v43 = vadd.f32 %v9119_v41, %v12005_v30  ;;  %v9166_v44 = vadd.f32 %v9165_v42, %v9164_v39 }
 0x16c   : > { %v9120_v45 = vpop.f32.mrf.mxu0 }
 0x16d   : > { %v12046_v46 = vadd.f32 %v9166_v44, %v1733_v43 }
 0x16e   : > { %v9121_v47 = vpop.f32.mrf.mxu0 }
 0x16f   : > { %v9122_v48 = vadd.f32 %v9121_v47, %v9120_v45  ;;  %v9167_v49 = vpop.f32.mrf.mxu1 }
 0x171   : > { %v1738_v50 = vadd.f32 %v9122_v48, %v1648_v4  ;;  %v9168_v52 = vpop.f32.mrf.mxu1 }
 0x172   : > { %v9123_v51 = vpop.f32.mrf.mxu0  ;;  %v9169_v53 = vadd.f32 %v9168_v52, %v9167_v49 }
 0x174   : > { %v9124_v54 = vpop.f32.mrf.mxu0  ;;  %v12048_v55 = vadd.f32 %v9169_v53, %v1738_v50 }
 0x175   : > { %v9125_v56 = vadd.f32 %v9124_v54, %v9123_v51  ;;  %v9170_v57 = vpop.f32.mrf.mxu1 }
 0x177   : > { %v1743_v58 = vadd.f32 %v9125_v56, %v1653_v17  ;;  %v9171_v60 = vpop.f32.mrf.mxu1  ;;  %v2566_v17 = vld [vmem:[%s14051_s3] sm:$0xff] }
 0x178   : > { %v9126_v59 = vpop.f32.mrf.mxu0  ;;  %v9172_v30 = vadd.f32 %v9171_v60, %v9170_v57  ;;  %9941 = vmatpush3.msra.mxu0 %v2566_v17 }
 0x179   : > { %9976 = vmatprep.subr.mxu0 %v13988_v12 }
 0x17a   : > { %v9127_v61 = vpop.f32.mrf.mxu0  ;;  %v12050_v62 = vadd.f32 %v9172_v30, %v1743_v58 }
 0x17b   : > { %v9128_v63 = vadd.f32 %v9127_v61, %v9126_v59  ;;  %v9173_v0 = vpop.f32.mrf.mxu1 }
 0x17d   : > { %v1748_v1 = vadd.f32 %v9128_v63, %v1658_v28  ;;  %v9174_v3 = vpop.f32.mrf.mxu1 }
 0x17e   : > { %v9129_v2 = vpop.f32.mrf.mxu0  ;;  %v9175_v4 = vadd.f32 %v9174_v3, %v9173_v0 }
 0x180   : > { %v9130_v5 = vpop.f32.mrf.mxu0  ;;  %v12052_v6 = vadd.f32 %v9175_v4, %v1748_v1 }
 0x181   : > { %v9131_v7 = vadd.f32 %v9130_v5, %v9129_v2  ;;  %v9176_v8 = vpop.f32.mrf.mxu1 }
 0x183   : > { %v1753_v9 = vadd.f32 %v9131_v7, %v1663_v38  ;;  %v9177_v10 = vpop.f32.mrf.mxu1 }
 0x184   : > { %v9178_v11 = vadd.f32 %v9177_v10, %v9176_v8 }
 0x186   : > { %v12056_v13 = vadd.f32 %v9178_v11, %v1753_v9 }
 0x190   : > { %v9211_v18 = vpop.f32.mrf.mxu0 }
 0x192   : > { %v9258_v19 = vpop.f32.mrf.mxu1  ;;  %v9212_v20 = vpop.f32.mrf.mxu0 }
 0x193   : > { %v9213_v10 = vadd.f32 %v9212_v20, %v9211_v18 }
 0x194   : > { %v9259_v21 = vpop.f32.mrf.mxu1 }
 0x195   : > { %v1913_v16 = vadd.f32 %v9213_v10, %v12046_v46  ;;  %v9260_v17 = vadd.f32 %v9259_v21, %v9258_v19 }
 0x196   : > { %v9214_v22 = vpop.f32.mrf.mxu0 }
 0x198   : > { %v9215_v24 = vpop.f32.mrf.mxu0 }
 0x199   : > { %v9261_v23 = vpop.f32.mrf.mxu1  ;;  %v9216_v11 = vadd.f32 %v9215_v24, %v9214_v22 }
 0x19b   : > { %v9262_v25 = vpop.f32.mrf.mxu1 }
 0x19c   : > { %v9217_v26 = vpop.f32.mrf.mxu0 }
 0x19e   : > { %v9218_v28 = vpop.f32.mrf.mxu0 }
 0x19f   : > { %v12070_v27 = vpop.f32.mrf.mxu1 }
 0x1a1   : > { %v9265_v29 = vpop.f32.mrf.mxu1 }
 0x1a2   : > { %v9220_v31 = vpop.f32.mrf.mxu0  ;;  %v9266_v19 = vadd.f32 %v9265_v29, %v12070_v27 }
 0x1a4   : > { %v9221_v33 = vpop.f32.mrf.mxu0 }
 0x1a5   : > { %v12072_v32 = vpop.f32.mrf.mxu1 }
 0x1a7   : > { %v12074_v34 = vpop.f32.mrf.mxu1 }
 0x1a8   : > { %v12076_v35 = vpop.f32.mrf.mxu0 }
 0x1aa   : > { %v12080_v37 = vpop.f32.mrf.mxu0 }
 0x1ab   : > { %v12078_v36 = vpop.f32.mrf.mxu1 }
 0x1ad   : > { %v12082_v38 = vpop.f32.mrf.mxu1 }
 0x1ae   : > { %14063 = vst [vmem:[#allocation33_spill] sm:$0xff] %v12082_v38  ;;  %v9222_v38 = vadd.f32 %v9221_v33, %v9220_v31  ;;  %v9225_v31 = vadd.f32 %v12080_v37, %v12076_v35 }
 0x1b5   : > { %v14072_v35 = vld [vmem:[#allocation33_spill] sm:$0xff] }
 0x1b6   : > { %v9272_v37 = vadd.f32 %v14072_v35, %v12078_v36 }
 0x1ba   : > { %v9305_v39 = vpop.f32.mrf.mxu0 }
 0x1bc   : > { %v9352_v40 = vpop.f32.mrf.mxu1  ;;  %v9306_v41 = vpop.f32.mrf.mxu0 }
 0x1bd   : > { %v9307_v12 = vadd.f32 %v9306_v41, %v9305_v39 }
 0x1be   : > { %v9353_v42 = vpop.f32.mrf.mxu1 }
 0x1bf   : > { %v9354_v18 = vadd.f32 %v9353_v42, %v9352_v40 }
 0x1c0   : > { %v9308_v43 = vpop.f32.mrf.mxu0 }
 0x1c2   : > { %v9309_v45 = vpop.f32.mrf.mxu0 }
 0x1c3   : > { %v9355_v44 = vpop.f32.mrf.mxu1 }
 0x1c5   : > { %v9356_v47 = vpop.f32.mrf.mxu1 }
 0x1c6   : > { %v9311_v48 = vpop.f32.mrf.mxu0 }
 0x1c8   : > { %v9312_v50 = vpop.f32.mrf.mxu0 }
 0x1c9   : > { %v12084_v49 = vpop.f32.mrf.mxu1 }
 0x1cb   : > { %v12086_v51 = vpop.f32.mrf.mxu1 }
 0x1cc   : > { %v9314_v52 = vpop.f32.mrf.mxu0 }
 0x1ce   : > { %v9315_v54 = vpop.f32.mrf.mxu0 }
 0x1cf   : > { %v12088_v53 = vpop.f32.mrf.mxu1  ;;  %v9316_v42 = vadd.f32 %v9315_v54, %v9314_v52 }
 0x1d0   : > { %14064 = vst [vmem:[#allocation34_spill] sm:$0xff] %v12088_v53  ;;  %v9310_v53 = vadd.f32 %v9309_v45, %v9308_v43 }
 0x1d1   : > { %v12090_v56 = vpop.f32.mrf.mxu1 }
 0x1d2   : > { %14065 = vst [vmem:[#allocation35_spill] sm:$0xff] %v12090_v56  ;;  %v12092_v57 = vpop.f32.mrf.mxu0  ;;  %v2003_v56 = vadd.f32 %v9260_v17, %v1913_v16 }
 0x1d3   : > { %14066 = vst [vmem:[#allocation36_spill] sm:$0xff] %v12092_v57 }
 0x1d4   : > { %v12096_v59 = vpop.f32.mrf.mxu0 }
 0x1d5   : > { %v12094_v58 = vpop.f32.mrf.mxu1  ;;  %14068 = vst [vmem:[#allocation38_spill] sm:$0xff] %v12096_v59 }
 0x1d6   : > { %14067 = vst [vmem:[#allocation37_spill] sm:$0xff] %v12094_v58  ;;  %v9263_v58 = vadd.f32 %v9262_v25, %v9261_v23  ;;  %v9357_v23 = vadd.f32 %v9356_v47, %v9355_v44  ;;  %v1928_v25 = vadd.f32 %v9222_v38, %v12052_v6 }
 0x1d7   : > { %v12098_v60 = vpop.f32.mrf.mxu1  ;;  %v14073_v54 = vld [vmem:[#allocation34_spill] sm:$0xff] }
 0x1d8   : > { %14069 = vst [vmem:[#allocation39_spill] sm:$0xff] %v12098_v60  ;;  %v1918_v60 = vadd.f32 %v9216_v11, %v12048_v55 }
 0x1da   : > { %v2008_v20 = vadd.f32 %v9263_v58, %v1918_v60  ;;  %v14074_v60 = vld [vmem:[#allocation35_spill] sm:$0xff] }
 0x1dc   : > { %v2098_v21 = vadd.f32 %v9310_v53, %v2008_v20 }
 0x1de   : > { %v2188_v29 = vadd.f32 %v9357_v23, %v2098_v21 }
 0x1df   : > { %v14080_v21 = vld [vmem:[#allocation39_spill] sm:$0xff] }
 0x1e4   : > { %v9399_v30 = vpop.f32.mrf.mxu0 }
 0x1e6   : > { %v9446_v61 = vpop.f32.mrf.mxu1  ;;  %v9400_v63 = vpop.f32.mrf.mxu0 }
 0x1e7   : > { %v9401_v55 = vadd.f32 %v9400_v63, %v9399_v30  ;;  %v9363_v30 = vadd.f32 %v14074_v60, %v14073_v54 }
 0x1e8   : > { %v9447_v0 = vpop.f32.mrf.mxu1 }
 0x1e9   : > { %v9448_v27 = vadd.f32 %v9447_v0, %v9446_v61 }
 0x1ea   : > { %v9402_v1 = vpop.f32.mrf.mxu0 }
 0x1ec   : > { %v9403_v3 = vpop.f32.mrf.mxu0 }
 0x1ed   : > { %v9449_v2 = vpop.f32.mrf.mxu1  ;;  %v9404_v33 = vadd.f32 %v9403_v3, %v9402_v1 }
 0x1ef   : > { %v9450_v4 = vpop.f32.mrf.mxu1  ;;  %v2278_v45 = vadd.f32 %v9404_v33, %v2188_v29 }
 0x1f0   : > { %v9405_v5 = vpop.f32.mrf.mxu0  ;;  %v9451_v47 = vadd.f32 %v9450_v4, %v9449_v2 }
 0x1f2   : > { %v9406_v8 = vpop.f32.mrf.mxu0 }
 0x1f3   : > { %v12100_v7 = vpop.f32.mrf.mxu1 }
 0x1f4   : > { %14070 = vst [vmem:[#allocation40_spill] sm:$0xff] %v12100_v7  ;;  %v9219_v7 = vadd.f32 %v9218_v28, %v9217_v26  ;;  %v9269_v26 = vadd.f32 %v12074_v34, %v12072_v32  ;;  %v9360_v32 = vadd.f32 %v12086_v51, %v12084_v49  ;;  %v1933_v34 = vadd.f32 %v9225_v31, %v12056_v13  ;;  %v14075_v49 = vld [vmem:[#allocation36_spill] sm:$0xff]  ;;  %v14076_v51 = vld [vmem:[#allocation38_spill] sm:$0xff] }
 0x1f5   : > { %v12102_v9 = vpop.f32.mrf.mxu1  ;;  %v9319_v13 = vadd.f32 %v14076_v51, %v14075_v49  ;;  %v14081_v31 = vmov 0.0  }
 0x1f6   : > { %14071 = vst [vmem:[#allocation41_spill] sm:$0xff] %v12102_v9  ;;  %v9408_v14 = vpop.f32.mrf.mxu0  ;;  %v2093_v9 = vadd.f32 %v9307_v12, %v2003_v56  ;;  %v1923_v46 = vadd.f32 %v9219_v7, %v12050_v62  ;;  %v9313_v12 = vadd.f32 %v9312_v50, %v9311_v48  ;;  %v2018_v6 = vadd.f32 %v9269_v26, %v1928_v25 }
 0x1f7   : > { %v9407_v56 = vadd.f32 %v9406_v8, %v9405_v5  ;;  %v2023_v36 = vadd.f32 %v9272_v37, %v1933_v34  ;;  %v2368_v7 = vadd.f32 %v9451_v47, %v2278_v45 }
 0x1f8   : > { %v9409_v59 = vpop.f32.mrf.mxu0  ;;  %v2183_v28 = vadd.f32 %v9354_v18, %v2093_v9  ;;  %v2013_v62 = vadd.f32 %v9266_v19, %v1923_v46  ;;  %v2108_v52 = vadd.f32 %v9316_v42, %v2018_v6 }
 0x1f9   : > { %v12104_v15 = vpop.f32.mrf.mxu1  ;;  %v9410_v2 = vadd.f32 %v9409_v59, %v9408_v14  ;;  %v2113_v19 = vadd.f32 %v9319_v13, %v2023_v36 }
 0x1fa   : > { %v2273_v41 = vadd.f32 %v9401_v55, %v2183_v28  ;;  %v2103_v38 = vadd.f32 %v9313_v12, %v2013_v62  ;;  %v2198_v18 = vadd.f32 %v9363_v30, %v2108_v52  ;;  %v14079_v55 = vld [vmem:[#allocation37_spill] sm:$0xff] }
 0x1fb   : > { %v12108_v57 = vpop.f32.mrf.mxu1  ;;  %v14077_v8 = vld [vmem:[#allocation40_spill] sm:$0xff]  ;;  %v9366_v23 = vadd.f32 %v14080_v21, %v14079_v55 }
 0x1fc   : > { %v12110_v22 = vpop.f32.mrf.mxu0  ;;  %v2363_v53 = vadd.f32 %v9448_v27, %v2273_v41  ;;  %v2193_v0 = vadd.f32 %v9360_v32, %v2103_v38  ;;  %v2288_v59 = vadd.f32 %v9410_v2, %v2198_v18  ;;  %v9457_v14 = vadd.f32 %v12108_v57, %v12104_v15 }
 0x1fd   : > { %v14078_v10 = vld [vmem:[#allocation41_spill] sm:$0xff] }
 0x1fe   : > { %v9412_v39 = vpop.f32.mrf.mxu0  ;;  %v2283_v5 = vadd.f32 %v9407_v56, %v2193_v0  ;;  %v9454_v11 = vadd.f32 %v14078_v10, %v14077_v8  ;;  %v2378_v38 = vadd.f32 %v9457_v14, %v2288_v59 }
 0x1ff   : > { %v12112_v24 = vpop.f32.mrf.mxu1  ;;  %v9413_v62 = vadd.f32 %v9412_v39, %v12110_v22 }
 0x200   : > { %v2373_v33 = vadd.f32 %v9454_v11, %v2283_v5 }
 0x201   : > { %v12121_v40 = vpop.f32.mrf.mxu1 }
 0x202   : > { %v9460_v34 = vadd.f32 %v12121_v40, %v12112_v24  ;;  %v8684_v40 = vld [vmem:[%s14050_s8] ss:$0 sm:$0xff] }
 0x20e   : > { %v9493_v43 = vpop.f32.mrf.mxu0 }
 0x20f   : > { %v9540_v44 = vpop.f32.mrf.mxu1 }
 0x210   : > { %v9494_v48 = vpop.f32.mrf.mxu0 }
 0x211   : > { %v9541_v50 = vpop.f32.mrf.mxu1  ;;  %v9495_v58 = vadd.f32 %v9494_v48, %v9493_v43  ;;  %v2203_v43 = vadd.f32 %v9366_v23, %v2113_v19 }
 0x212   : > { %v9496_v61 = vpop.f32.mrf.mxu0  ;;  %v9542_v3 = vadd.f32 %v9541_v50, %v9540_v44 }
 0x213   : > { %v9543_v63 = vpop.f32.mrf.mxu1  ;;  %v2453_v1 = vadd.f32 %v9495_v58, %v2363_v53  ;;  %v2293_v15 = vadd.f32 %v9413_v62, %v2203_v43 }
 0x214   : > { %v9497_v4 = vpop.f32.mrf.mxu0 }
 0x215   : > { %v9544_v9 = vpop.f32.mrf.mxu1  ;;  %v2543_v16 = vadd.f32 %v9542_v3, %v2453_v1  ;;  %v9498_v17 = vadd.f32 %v9497_v4, %v9496_v61  ;;  %v2383_v53 = vadd.f32 %v9460_v34, %v2293_v15  ;;  %v2773_v15 = vld [vmem:[%s11367_s24] sm:$0xff] }
 0x216   : > { %v9499_v20 = vpop.f32.mrf.mxu0  ;;  %v9545_v26 = vadd.f32 %v9544_v9, %v9543_v63 }
 0x217   : > { %v9546_v46 = vpop.f32.mrf.mxu1  ;;  %v2458_v25 = vadd.f32 %v9498_v17, %v2368_v7  ;;  %9943 = vmatmul.mubr.msk.f32.vlgmr.msra.gmra.mxu0 %vm2577_vm1, %v2543_v16 }
 0x218   : > { %v9500_v28 = vpop.f32.mrf.mxu0  ;;  %9945 = vmatprep.mubr.msk.f32.mxu0 %vm11295_vm0, %v14081_v31 }
 0x219   : > { %v9547_v12 = vpop.f32.mrf.mxu1  ;;  %v2548_v41 = vadd.f32 %v9545_v26, %v2458_v25  ;;  %v9501_v27 = vadd.f32 %v9500_v28, %v9499_v20 }
 0x21a   : > { %v9502_v29 = vpop.f32.mrf.mxu0  ;;  %v9548_v6 = vadd.f32 %v9547_v12, %v9546_v46 }
 0x21b   : > { %v9549_v42 = vpop.f32.mrf.mxu1  ;;  %v2463_v44 = vadd.f32 %v9501_v27, %v2373_v33  ;;  %9946 = vmatmul.mubr.msk.f32.gmra.mxu0 %vm2577_vm1, %v2548_v41 }
 0x21c   : > { %v9503_v32 = vpop.f32.mrf.mxu0  ;;  %9948 = vmatprep.mubr.msk.f32.mxu0 %vm11295_vm0, %v14081_v31 }
 0x21d   : > { %v9550_v57 = vpop.f32.mrf.mxu1  ;;  %v2553_v22 = vadd.f32 %v9548_v6, %v2463_v44  ;;  %v9504_v39 = vadd.f32 %v9503_v32, %v9502_v29 }
 0x21e   : > { %v9505_v35 = vpop.f32.mrf.mxu0  ;;  %v9551_v47 = vadd.f32 %v9550_v57, %v9549_v42  ;;  %v2774_v57 = vld [vmem:[%s11367_s24 + $0x8] sm:$0xff] }
 0x21f   : > { %v9552_v37 = vpop.f32.mrf.mxu1  ;;  %v2468_v45 = vadd.f32 %v9504_v39, %v2378_v38  ;;  %9949 = vmatmul.mubr.msk.f32.gmra.mxu0 %vm2577_vm1, %v2553_v22  ;;  %9958 = vmatpush3.msra.mxu1 %v2774_v57 }
 0x220   : > { %v9506_v48 = vpop.f32.mrf.mxu0  ;;  %9951 = vmatprep.mubr.msk.f32.mxu0 %vm11295_vm0, %v14081_v31  ;;  %9959 = vmatprep.subr.mxu1 %v14081_v31 }
 0x221   : > { %v9553_v50 = vpop.f32.mrf.mxu1  ;;  %v2558_v56 = vadd.f32 %v9551_v47, %v2468_v45  ;;  %v9507_v58 = vadd.f32 %v9506_v48, %v9505_v35  ;;  %9960 = vmatpush3.msra.mxu1 %v2773_v15 }
 0x222   : > { %v9554_v54 = vadd.f32 %v9553_v50, %v9552_v37  ;;  %10001 = vmatprep.subr.mxu1 %v14081_v31 }
 0x223   : > { %v2473_v52 = vadd.f32 %v9507_v58, %v2383_v53  ;;  %9952 = vmatmul.mubr.msk.f32.gmra.mxu0 %vm2577_vm1, %v2558_v56 }
 0x224   : > { %9954 = vmatprep.mubr.msk.f32.mxu0 %vm11295_vm0, %v14081_v31 }
 0x225   : > { %v2563_v24 = vadd.f32 %v9554_v54, %v2473_v52 }
 0x227   : > { %9955 = vmatmul.mubr.msk.f32.gmra.mxu0 %vm2577_vm1, %v2563_v24 }
 0x228   : > { %9986 = vmatprep.mubr.msk.f32.mxu0 %vm11295_vm0, %v14081_v31 }
 0x2d7   : > { %v2659_v60 = vpop.f32.mrf.mxu0 }
 0x2d8   : > { %v12157_v30 = vadd.f32 %v8684_v40, %v2659_v60 }
 0x2d9   : > { %v9944_v61 = vpop.f32.mrf.mxu0 }
 0x2da   : > { %v2685_v63 = vsel %vm2577_vm1, %v12157_v30, 0.0 }
 0x2db   : > { %2686 = vadd.xlane.f32.xlu0 %v2685_v63  ;;  %v2664_v0 = vpop.f32.mrf.mxu0  ;;  %v8691_v63 = vld [vmem:[%s11362_s19] ss:$0 sm:$0xff] }
 0x2dc   : > { %v12161_v49 = vadd.f32 %v8684_v40, %v2664_v0 }
 0x2dd   : > { %v9947_v51 = vpop.f32.mrf.mxu0 }
 0x2de   : > { %v2688_v13 = vsel %vm2577_vm1, %v12161_v49, 0.0 }
 0x2df   : > { %2689 = vadd.xlane.f32.xlu0 %v2688_v13  ;;  %v2669_v1 = vpop.f32.mrf.mxu0 }
 0x2e0   : > { %v12165_v3 = vadd.f32 %v8684_v40, %v2669_v1 }
 0x2e1   : > { %v9950_v36 = vpop.f32.mrf.mxu0 }
 0x2e2   : > { %v2691_v7 = vsel %vm2577_vm1, %v12165_v3, 0.0 }
 0x2e3   : > { %2692 = vadd.xlane.f32.xlu1 %v2691_v7  ;;  %v2674_v2 = vpop.f32.mrf.mxu0 }
 0x2e4   : > { %v12169_v4 = vadd.f32 %v8684_v40, %v2674_v2 }
 0x2e5   : > { %v9953_v9 = vpop.f32.mrf.mxu0 }
 0x2e6   : > { %v2694_v5 = vsel %vm2577_vm1, %v12169_v4, 0.0 }
 0x2e7   : > { %2695 = vadd.xlane.f32.xlu1 %v2694_v5  ;;  %v2679_v8 = vpop.f32.mrf.mxu0 }
 0x2e8   : > { %v12173_v10 = vadd.f32 %v8684_v40, %v2679_v8  ;;  %v8690_v40 = vld [vmem:[%s14049_s14] ss:$0 sm:$0xff] }
 0x2e9   : > { %v9956_v11 = vpop.f32.mrf.mxu0 }
 0x2ea   : > { %v2697_v16 = vsel %vm2577_vm1, %v12173_v10, 0.0 }
 0x2eb   : > { %2698 = vadd.xlane.f32.xlu0 %v2697_v16 }
 0x364   : > { %v2687_v17 = vpop.xlane.xlu0 %2686 }
 0x365   : > { %v2701_v18 = vmul.f32 0.03125, %v2687_v17 }
 0x367   : > { %v2706_v20 = vsub.f32 %v12157_v30, %v2701_v18 }
 0x368   : > { %v2690_v46 = vpop.xlane.xlu0 %2689 }
 0x369   : > { %v2702_v19 = vmul.f32 0.03125, %v2690_v46  ;;  %v2711_v55 = vmul.f32 %v2706_v20, %v2706_v20 }
 0x36b   : > { %v2707_v21 = vsub.f32 %v12161_v49, %v2702_v19  ;;  %v2716_v23 = vsel %vm2577_vm1, %v2711_v55, 0.0 }
 0x36c   : > { %v2693_v25 = vpop.xlane.xlu1 %2692  ;;  %2717 = vadd.xlane.f32.xlu1 %v2716_v23 }
 0x36d   : > { %v2703_v26 = vmul.f32 0.03125, %v2693_v25  ;;  %v2712_v59 = vmul.f32 %v2707_v21, %v2707_v21 }
 0x36f   : > { %v2708_v14 = vsub.f32 %v12165_v3, %v2703_v26  ;;  %v2719_v28 = vsel %vm2577_vm1, %v2712_v59, 0.0 }
 0x370   : > { %v2696_v12 = vpop.xlane.xlu1 %2695  ;;  %2720 = vadd.xlane.f32.xlu0 %v2719_v28  ;;  %v8692_v28 = vld [vmem:[%s11372_s30] ss:$0 sm:$0xff] }
 0x371   : > { %v2704_v33 = vmul.f32 0.03125, %v2696_v12  ;;  %v2713_v62 = vmul.f32 %v2708_v14, %v2708_v14 }
 0x373   : > { %v2709_v41 = vsub.f32 %v12169_v4, %v2704_v33  ;;  %v2722_v27 = vsel %vm2577_vm1, %v2713_v62, 0.0 }
 0x374   : > { %2723 = vadd.xlane.f32.xlu1 %v2722_v27  ;;  %v2699_v29 = vpop.xlane.xlu0 %2698 }
 0x375   : > { %v2705_v42 = vmul.f32 0.03125, %v2699_v29  ;;  %v2714_v43 = vmul.f32 %v2709_v41, %v2709_v41 }
 0x377   : > { %v2710_v44 = vsub.f32 %v12173_v10, %v2705_v42  ;;  %v2725_v6 = vsel %vm2577_vm1, %v2714_v43, 0.0 }
 0x378   : > { %2726 = vadd.xlane.f32.xlu0 %v2725_v6 }
 0x379   : > { %v2715_v38 = vmul.f32 %v2710_v44, %v2710_v44 }
 0x37b   : > { %v2728_v32 = vsel %vm2577_vm1, %v2715_v38, 0.0 }
 0x37c   : > { %2729 = vadd.xlane.f32.xlu1 %v2728_v32 }
 0x3f5   : > { %v2718_v34 = vpop.xlane.xlu1 %2717 }
 0x3f6   : > { %v2731_v22 = vmul.f32 0.03125, %v2718_v34 }
 0x3f8   : > { %v2736_v39 = vadd.f32 1e-06, %v2731_v22 }
 0x3f9   : > { %v2721_v35 = vpop.xlane.xlu0 %2720 }
 0x3fa   : > { %10984 = vrsqrt.f32 %v2736_v39  ;;  %v2732_v37 = vmul.f32 0.03125, %v2721_v35 }
 0x3fc   : > { %v2737_v45 = vadd.f32 1e-06, %v2732_v37 }
 0x3fd   : > { %v2724_v47 = vpop.xlane.xlu1 %2723 }
 0x3fe   : > { %10986 = vrsqrt.f32 %v2737_v45  ;;  %v2733_v48 = vmul.f32 0.03125, %v2724_v47 }
 0x400   : > { %v2738_v50 = vadd.f32 1e-06, %v2733_v48 }
 0x401   : > { %v2727_v53 = vpop.xlane.xlu0 %2726 }
 0x402   : > { %10988 = vrsqrt.f32 %v2738_v50  ;;  %v2734_v56 = vmul.f32 0.03125, %v2727_v53 }
 0x404   : > { %v2739_v58 = vadd.f32 1e-06, %v2734_v56 }
 0x405   : > { %v2730_v52 = vpop.xlane.xlu1 %2729 }
 0x406   : > { %10990 = vrsqrt.f32 %v2739_v58  ;;  %v2735_v54 = vmul.f32 0.03125, %v2730_v52 }
 0x407   : > { %v10985_v24 = vpop.eup %10984 }
 0x408   : > { %v2746_v60 = vmul.f32 %v10985_v24, %v2706_v20  ;;  %v2740_v61 = vadd.f32 1e-06, %v2735_v54  ;;  %v962_v24 = vld [vmem:[%s11322_s13] sm:$0xff] }
 0x40a   : > { %v2757_v0 = vmul.f32 %v8690_v40, %v2746_v60  ;;  %10992 = vrsqrt.f32 %v2740_v61 }
 0x40b   : > { %v10987_v51 = vpop.eup %10986 }
 0x40c   : > { %v12193_v13 = vadd.f32 %v8691_v63, %v2757_v0  ;;  %v2747_v1 = vmul.f32 %v10987_v51, %v2707_v21  ;;  %v963_v0 = vld [vmem:[%s11322_s13 + $0x8] sm:$0xff] }
 0x40e   : > { %9962 = vmatmul.mubr.msk.f32.vlgmr.msra.gmra.mxu1 %vm2782_vm2, %v12193_v13  ;;  %v2758_v36 = vmul.f32 %v8690_v40, %v2747_v1 }
 0x40f   : > { %v10989_v7 = vpop.eup %10988  ;;  %9964 = vmatprep.mubr.msk.f32.mxu1 %vm11295_vm0, %v14081_v31 }
 0x410   : > { %v12199_v2 = vadd.f32 %v8691_v63, %v2758_v36  ;;  %v2748_v9 = vmul.f32 %v10989_v7, %v2708_v14 }
 0x412   : > { %9965 = vmatmul.mubr.msk.f32.gmra.mxu1 %vm2782_vm2, %v12199_v2  ;;  %v2759_v5 = vmul.f32 %v8690_v40, %v2748_v9 }
 0x413   : > { %v10991_v8 = vpop.eup %10990  ;;  %9967 = vmatprep.mubr.msk.f32.mxu1 %vm11295_vm0, %v14081_v31 }
 0x414   : > { %v12205_v11 = vadd.f32 %v8691_v63, %v2759_v5  ;;  %v2749_v16 = vmul.f32 %v10991_v8, %v2709_v41  ;;  %v964_v5 = vld [vmem:[%s11322_s13 + $0x10] sm:$0xff] }
 0x416   : > { %9968 = vmatmul.mubr.msk.f32.gmra.mxu1 %vm2782_vm2, %v12205_v11  ;;  %v2760_v17 = vmul.f32 %v8690_v40, %v2749_v16 }
 0x417   : > { %v10993_v18 = vpop.eup %10992  ;;  %9970 = vmatprep.mubr.msk.f32.mxu1 %vm11295_vm0, %v14081_v31 }
 0x418   : > { %v12211_v20 = vadd.f32 %v8691_v63, %v2760_v17  ;;  %v2750_v46 = vmul.f32 %v10993_v18, %v2710_v44 }
 0x41a   : > { %9971 = vmatmul.mubr.msk.f32.gmra.mxu1 %vm2782_vm2, %v12211_v20  ;;  %v2761_v19 = vmul.f32 %v8690_v40, %v2750_v46 }
 0x41b   : > { %9973 = vmatprep.mubr.msk.f32.mxu1 %vm11295_vm0, %v14081_v31 }
 0x41c   : > { %v12217_v55 = vadd.f32 %v8691_v63, %v2761_v19  ;;  %v965_v19 = vld [vmem:[%s11322_s13 + $0x18] sm:$0xff] }
 0x41e   : > { %9974 = vmatmul.mubr.msk.f32.gmra.mxu1 %vm2782_vm2, %v12217_v55 }
 0x41f   : > { %10011 = vmatprep.mubr.msk.f32.mxu1 %vm11295_vm0, %v14081_v31 }
 0x4ce   : > { %v2864_v21 = vpop.f32.mrf.mxu1 }
 0x4cf   : > { %v12236_v43 = vadd.f32 %v8692_v28, %v2864_v21 }
 0x4d0   : > { %v9963_v23 = vpop.f32.mrf.mxu1 }
 0x4d2   : > { %v2869_v25 = vpop.f32.mrf.mxu1 }
 0x4d3   : > { %v12238_v44 = vadd.f32 %v8692_v28, %v2869_v25 }
 0x4d4   : > { %v9966_v26 = vpop.f32.mrf.mxu1 }
 0x4d6   : > { %v2874_v59 = vpop.f32.mrf.mxu1 }
 0x4d7   : > { %v12228_v27 = vadd.f32 %v8692_v28, %v2874_v59 }
 0x4d8   : > { %v9969_v14 = vpop.f32.mrf.mxu1 }
 0x4d9   : > { %v966_v14 = vld [vmem:[%s11322_s13 + $0x20] sm:$0xff] }
 0x4da   : > { %v2879_v12 = vpop.f32.mrf.mxu1 }
 0x4db   : > { %v12224_v33 = vadd.f32 %v8692_v28, %v2879_v12 }
 0x4dc   : > { %v9972_v62 = vpop.f32.mrf.mxu1 }
 0x4dd   : > { %2899 = vrot.lane.b32.xlu1 %v12224_v33, %s14000_s18 }
 0x4de   : > { %v2884_v41 = vpop.f32.mrf.mxu1 }
 0x4df   : > { %v12230_v29 = vadd.f32 %v8692_v28, %v2884_v41 }
 0x4e0   : > { %v9975_v42 = vpop.f32.mrf.mxu1 }
 0x4e1   : > { %2897 = vrot.lane.b32.xlu1 %v12228_v27, %s14000_s18  ;;  %2901 = vrot.lane.b32.xlu0 %v12230_v29, %s14000_s18 }
 0x4e5   : > { %2895 = vrot.lane.b32.xlu1 %v12238_v44, %s14000_s18  ;;  %2893 = vrot.lane.b32.xlu0 %v12236_v43, %s14000_s18 }
 0x4e9   : > { %3218 = vrot.lane.b32.xlu1 %v12230_v29, %s13998_s1  ;;  %3216 = vrot.lane.b32.xlu0 %v12224_v33, %s13998_s1 }
 0x4ed   : > { %3214 = vrot.lane.b32.xlu1 %v12228_v27, %s13998_s1  ;;  %3212 = vrot.lane.b32.xlu0 %v12238_v44, %s13998_s1 }
 0x4f1   : > { %3210 = vrot.lane.b32.xlu1 %v12236_v43, %s13998_s1  ;;  %3200 = vrot.lane.b32.xlu0 %v12236_v43, %s13990_s7  ;;  %s14084_s1 = sld [smem:[#allocation17_spill]] }
 0x4f5   : > { %3202 = vrot.lane.b32.xlu1 %v12238_v44, %s13990_s7  ;;  %3204 = vrot.lane.b32.xlu0 %v12228_v27, %s13990_s7 }
 0x4f9   : > { %3206 = vrot.lane.b32.xlu1 %v12224_v33, %s13990_s7  ;;  %3208 = vrot.lane.b32.xlu0 %v12230_v29, %s13990_s7  ;;  %s13992_s7 = smov 88  }
 0x4fd   : > { %3086 = vrot.lane.b32.xlu1 %v12224_v33, %s13996_s10  ;;  %3088 = vrot.lane.b32.xlu0 %v12230_v29, %s13996_s10 }
 0x501   : > { %3084 = vrot.lane.b32.xlu1 %v12228_v27, %s13996_s10 }
 0x54f   : > { %v2900_v6 = vpop.permute.xlu1 %2899 }
 0x553   : > { %v2898_v38 = vpop.permute.xlu1 %2897  ;;  %v2902_v32 = vpop.permute.xlu0 %2901 }
 0x554   : > { %9977 = vmatpush3.xpose.msk.msra.mxu0 %vm2903_vm3, %v2902_v32 }
 0x555   : > { %9978 = vmatprep.subr.mxu0 %v14081_v31 }
 0x557   : > { %v2896_v57 = vpop.permute.xlu1 %2895  ;;  %v2894_v15 = vpop.permute.xlu0 %2893 }
 0x558   : > { %9979 = vmatpush3.xpose.msk.msra.mxu0 %vm2903_vm3, %v2900_v6 }
 0x559   : > { %9980 = vmatprep.subr.mxu0 %v14081_v31 }
 0x55b   : > { %v3219_v34 = vpop.permute.xlu1 %3218  ;;  %v3217_v22 = vpop.permute.xlu0 %3216 }
 0x55c   : > { %9981 = vmatpush3.xpose.msk.msra.mxu0 %vm2903_vm3, %v2898_v38 }
 0x55d   : > { %9982 = vmatprep.subr.mxu0 %v14081_v31 }
 0x55f   : > { %v3215_v39 = vpop.permute.xlu1 %3214  ;;  %v3213_v35 = vpop.permute.xlu0 %3212 }
 0x560   : > { %9983 = vmatpush3.xpose.msk.msra.mxu0 %vm2903_vm3, %v2896_v57 }
 0x561   : > { %9984 = vmatprep.subr.mxu0 %v14081_v31 }
 0x563   : > { %v3211_v37 = vpop.permute.xlu1 %3210  ;;  %v3201_v45 = vpop.permute.xlu0 %3200 }
 0x564   : > { %9985 = vmatpush3.xpose.msk.msra.mxu0 %vm2903_vm3, %v2894_v15 }
 0x565   : > { %10026 = vmatprep.subr.mxu0 %v14081_v31 }
 0x567   : > { %v3203_v47 = vpop.permute.xlu1 %3202  ;;  %9987 = vmatmul.mubr.msk.f32.vlgmr.msra.gmra.mxu0 %vm2903_vm3, %v12236_v43  ;;  %v3205_v48 = vpop.permute.xlu0 %3204 }
 0x568   : > { %10027 = vmatpush3.xpose.msk.msra.mxu0 %vm2903_vm3, %v3219_v34  ;;  %9989 = vmatprep.mubr.msk.f32.mxu0 %vm11295_vm0, %v14081_v31 }
 0x569   : > { %10028 = vmatprep.subr.mxu0 %v14081_v31 }
 0x56b   : > { %v3207_v50 = vpop.permute.xlu1 %3206  ;;  %9990 = vmatmul.mubr.msk.f32.gmra.mxu0 %vm2903_vm3, %v12238_v44  ;;  %v3209_v53 = vpop.permute.xlu0 %3208 }
 0x56c   : > { %10029 = vmatpush3.xpose.msk.msra.mxu0 %vm2903_vm3, %v3217_v22  ;;  %9992 = vmatprep.mubr.msk.f32.mxu0 %vm11295_vm0, %v14081_v31 }
 0x56d   : > { %10030 = vmatprep.subr.mxu0 %v14081_v31 }
 0x56f   : > { %v3087_v56 = vpop.permute.xlu1 %3086  ;;  %9993 = vmatmul.mubr.msk.f32.gmra.mxu0 %vm2903_vm3, %v12228_v27  ;;  %v3089_v58 = vpop.permute.xlu0 %3088 }
 0x570   : > { %10002 = vmatpush3.msra.mxu1 %v3089_v58  ;;  %10031 = vmatpush3.xpose.msk.msra.mxu0 %vm2903_vm3, %v3215_v39 }
 0x571   : > { %10003 = vmatprep.subr.mxu1 %v14081_v31  ;;  %9995 = vmatprep.mubr.msk.f32.mxu0 %vm11295_vm0, %v14081_v31 }
 0x572   : > { %10004 = vmatpush3.msra.mxu1 %v3087_v56  ;;  %10032 = vmatprep.subr.mxu0 %v14081_v31 }
 0x573   : > { %v3085_v52 = vpop.permute.xlu1 %3084  ;;  %9996 = vmatmul.mubr.msk.f32.gmra.mxu0 %vm2903_vm3, %v12224_v33  ;;  %10005 = vmatprep.subr.mxu1 %v14081_v31 }
 0x574   : > { %10006 = vmatpush3.msra.mxu1 %v3085_v52  ;;  %10033 = vmatpush3.xpose.msk.msra.mxu0 %vm2903_vm3, %v3213_v35 }
 0x575   : > { %9998 = vmatprep.mubr.msk.f32.mxu0 %vm11295_vm0, %v14081_v31  ;;  %10034 = vmatprep.subr.mxu0 %v14081_v31 }
 0x576   : > { %10007 = vmatprep.subr.mxu1 %v14081_v31 }
 0x577   : > { %9999 = vmatmul.mubr.msk.f32.gmra.mxu0 %vm2903_vm3, %v12230_v29 }
 0x578   : > { %10035 = vmatpush3.xpose.msk.msra.mxu0 %vm2903_vm3, %v3211_v37  ;;  %10036 = vmatprep.mubr.msk.f32.mxu0 %vm11295_vm0, %v14081_v31 }
 0x579   : > { %10051 = vmatprep.subr.mxu0 %v14081_v31 }
 0x57b   : > { %10037 = vmatmul.mubr.msk.f32.vlgmr.msra.gmra.mxu0 %vm2903_vm3, %v3201_v45 }
 0x57c   : > { %10039 = vmatprep.mubr.msk.f32.mxu0 %vm11295_vm0, %v14081_v31 }
 0x57f   : > { %10040 = vmatmul.mubr.msk.f32.gmra.mxu0 %vm2903_vm3, %v3203_v47 }
 0x580   : > { %10042 = vmatprep.mubr.msk.f32.mxu0 %vm11295_vm0, %v14081_v31 }
 0x583   : > { %10043 = vmatmul.mubr.msk.f32.gmra.mxu0 %vm2903_vm3, %v3205_v48 }
 0x584   : > { %10045 = vmatprep.mubr.msk.f32.mxu0 %vm11295_vm0, %v14081_v31 }
 0x587   : > { %10046 = vmatmul.mubr.msk.f32.gmra.mxu0 %vm2903_vm3, %v3207_v50 }
 0x588   : > { %10048 = vmatprep.mubr.msk.f32.mxu0 %vm11295_vm0, %v14081_v31 }
 0x58b   : > { %10049 = vmatmul.mubr.msk.f32.gmra.mxu0 %vm2903_vm3, %v3209_v53 }
 0x58c   : > { %10061 = vmatprep.mubr.msk.f32.mxu0 %vm11295_vm0, %v14081_v31 }
 0x627   : > { %v2990_v54 = vpop.f32.mrf.mxu0 }
 0x628   : > { %v3014_v40 = vmul.f32 0.35355338, %v2990_v54 }
 0x629   : > { %v9988_v60 = vpop.f32.mrf.mxu0 }
 0x62a   : > { %v12329_v61 = vadd.f32 %v3014_v40, %v962_v24 }
 0x62b   : > { %v2995_v63 = vpop.f32.mrf.mxu0 }
 0x62c   : > { %v3015_v51 = vmul.f32 0.35355338, %v2995_v63  ;;  %v3025_v1 = vsel %vm3024_vm4, %v12329_v61, -inf }
 0x62d   : > { %3026 = vmax.xlane.f32.xlu1 %v3025_v1  ;;  %v9991_v36 = vpop.f32.mrf.mxu0 }
 0x62e   : > { %v12334_v7 = vadd.f32 %v3015_v51, %v963_v0 }
 0x62f   : > { %v3000_v9 = vpop.f32.mrf.mxu0 }
 0x630   : > { %v3016_v8 = vmul.f32 0.35355338, %v3000_v9  ;;  %v3028_v16 = vsel %vm3024_vm4, %v12334_v7, -inf }
 0x631   : > { %3029 = vmax.xlane.f32.xlu0 %v3028_v16  ;;  %v9994_v17 = vpop.f32.mrf.mxu0 }
 0x632   : > { %v12339_v18 = vadd.f32 %v3016_v8, %v964_v5 }
 0x633   : > { %v3005_v46 = vpop.f32.mrf.mxu0 }
 0x634   : > { %v3017_v21 = vmul.f32 0.35355338, %v3005_v46  ;;  %v3031_v23 = vsel %vm3024_vm4, %v12339_v18, -inf }
 0x635   : > { %3032 = vmax.xlane.f32.xlu0 %v3031_v23  ;;  %v9997_v25 = vpop.f32.mrf.mxu0 }
 0x636   : > { %v3022_v26 = vadd.f32 %v3017_v21, %v965_v19 }
 0x637   : > { %v3010_v59 = vpop.f32.mrf.mxu0 }
 0x638   : > { %v3018_v28 = vmul.f32 0.35355338, %v3010_v59  ;;  %v3034_v12 = vsel %vm3024_vm4, %v3022_v26, -inf }
 0x639   : > { %3035 = vmax.xlane.f32.xlu0 %v3034_v12  ;;  %v10000_v62 = vpop.f32.mrf.mxu0 }
 0x63a   : > { %v3023_v41 = vadd.f32 %v3018_v28, %v966_v14 }
 0x63b   : > { %v3306_v42 = vpop.f32.mrf.mxu0 }
 0x63c   : > { %v3037_v6 = vsel %vm3024_vm4, %v3023_v41, -inf  ;;  %v3330_v58 = vmul.f32 0.35355338, %v3306_v42 }
 0x63d   : > { %3038 = vmax.xlane.f32.xlu0 %v3037_v6  ;;  %v10038_v38 = vpop.f32.mrf.mxu0 }
 0x63e   : > { %3082 = vrot.lane.b32.xlu1 %v12238_v44, %s13996_s10  ;;  %v3335_v54 = vadd.f32 %v3330_v58, %v962_v24 }
 0x63f   : > { %v3311_v32 = vpop.f32.mrf.mxu0 }
 0x640   : > { %v3331_v52 = vmul.f32 0.35355338, %v3311_v32  ;;  %v3340_v60 = vsel %vm3024_vm4, %v3335_v54, -inf }
 0x641   : > { %v10041_v57 = vpop.f32.mrf.mxu0 }
 0x642   : > { %v3336_v63 = vadd.f32 %v3331_v52, %v963_v0 }
 0x643   : > { %v3316_v15 = vpop.f32.mrf.mxu0 }
 0x644   : > { %v3332_v34 = vmul.f32 0.35355338, %v3316_v15  ;;  %v3343_v51 = vsel %vm3024_vm4, %v3336_v63, -inf }
 0x645   : > { %v10044_v22 = vpop.f32.mrf.mxu0 }
 0x646   : > { %v12349_v39 = vadd.f32 %v3332_v34, %v964_v5 }
 0x647   : > { %v3321_v35 = vpop.f32.mrf.mxu0 }
 0x648   : > { %v3346_v37 = vsel %vm3024_vm4, %v12349_v39, -inf  ;;  %v3333_v40 = vmul.f32 0.35355338, %v3321_v35 }
 0x649   : > { %3347 = vmax.xlane.f32.xlu0 %v3346_v37  ;;  %v10047_v45 = vpop.f32.mrf.mxu0 }
 0x64a   : > { %v12359_v1 = vadd.f32 %v3333_v40, %v965_v19 }
 0x64b   : > { %v3326_v47 = vpop.f32.mrf.mxu0 }
 0x64c   : > { %v3334_v48 = vmul.f32 0.35355338, %v3326_v47  ;;  %v3349_v36 = vsel %vm3024_vm4, %v12359_v1, -inf }
 0x64d   : > { %v10050_v50 = vpop.f32.mrf.mxu0 }
 0x64e   : > { %v12353_v53 = vadd.f32 %v3334_v48, %v966_v14 }
 0x650   : > { %v3352_v56 = vsel %vm3024_vm4, %v12353_v53, -inf }
 0x651   : > { %3353 = vmax.xlane.f32.xlu0 %v3352_v56 }
 0x662   : > { %3341 = vmax.xlane.f32.xlu1 %v3340_v60 }
 0x666   : > { %3344 = vmax.xlane.f32.xlu1 %v3343_v51 }
 0x667   : > { %3403 = vrot.lane.b32.xlu0 %v12230_v29, %s13992_s7 }
 0x66a   : > { %3350 = vmax.xlane.f32.xlu1 %v3349_v36 }
 0x67b   : > { %3080 = vrot.lane.b32.xlu1 %v12236_v43, %s13996_s10  ;;  %s14083_s10 = sld [smem:[#allocation15_spill]] }
 0x6b6   : > { %v3027_v24 = vpop.xlane.xlu1 %3026 }
 0x6b7   : > { %v3040_v0 = vsub.f32 %v12329_v61, %v3027_v24 }
 0x6b9   : > { %v3045_v9 = vmul.f32 1.442695, %v3040_v0 }
 0x6ba   : > { %v3083_v5 = vpop.permute.xlu1 %3082  ;;  %v3030_v8 = vpop.xlane.xlu0 %3029 }
 0x6bb   : > { %10994 = vpow2.f32 %v3045_v9  ;;  %v3041_v16 = vsub.f32 %v12334_v7, %v3030_v8  ;;  %10008 = vmatpush3.msra.mxu1 %v3083_v5 }
 0x6bc   : > { %10009 = vmatprep.subr.mxu1 %v14081_v31 }
 0x6bd   : > { %v3047_v29 = vmul.f32 1.442695, %v3041_v16 }
 0x6be   : > { %v3033_v17 = vpop.xlane.xlu0 %3032 }
 0x6bf   : > { %10996 = vpow2.f32 %v3047_v29  ;;  %v3042_v46 = vsub.f32 %v12339_v18, %v3033_v17 }
 0x6c1   : > { %v3049_v19 = vmul.f32 1.442695, %v3042_v46 }
 0x6c2   : > { %v3036_v21 = vpop.xlane.xlu0 %3035 }
 0x6c3   : > { %10998 = vpow2.f32 %v3049_v19  ;;  %v3043_v23 = vsub.f32 %v3022_v26, %v3036_v21 }
 0x6c5   : > { %v3051_v25 = vmul.f32 1.442695, %v3043_v23 }
 0x6c6   : > { %v3039_v61 = vpop.xlane.xlu0 %3038 }
 0x6c7   : > { %11000 = vpow2.f32 %v3051_v25  ;;  %v3044_v59 = vsub.f32 %v3023_v41, %v3039_v61 }
 0x6c8   : > { %v12371_v14 = vpop.eup %10994 }
 0x6c9   : > { %v3053_v28 = vmul.f32 1.442695, %v3044_v59  ;;  %v3055_v7 = vsel %vm3024_vm4, %v12371_v14, 0.0 }
 0x6ca   : > { %3056 = vadd.xlane.f32.xlu1 %v3055_v7 }
 0x6cb   : > { %11002 = vpow2.f32 %v3053_v28 }
 0x6cc   : > { %v12375_v12 = vpop.eup %10996 }
 0x6cd   : > { %v3058_v18 = vsel %vm3024_vm4, %v12375_v12, 0.0 }
 0x6ce   : > { %3059 = vadd.xlane.f32.xlu0 %v3058_v18 }
 0x6d0   : > { %v12379_v62 = vpop.eup %10998 }
 0x6d1   : > { %v3061_v26 = vsel %vm3024_vm4, %v12379_v62, 0.0 }
 0x6d2   : > { %3062 = vadd.xlane.f32.xlu1 %v3061_v26  ;;  %v3348_v6 = vpop.xlane.xlu0 %3347 }
 0x6d3   : > { %v3357_v35 = vsub.f32 %v12349_v39, %v3348_v6 }
 0x6d4   : > { %v12383_v41 = vpop.eup %11000 }
 0x6d5   : > { %v3064_v42 = vsel %vm3024_vm4, %v12383_v41, 0.0  ;;  %v3364_v48 = vmul.f32 1.442695, %v3357_v35 }
 0x6d6   : > { %3065 = vadd.xlane.f32.xlu0 %v3064_v42 }
 0x6d8   : > { %v12387_v38 = vpop.eup %11002 }
 0x6d9   : > { %v3067_v32 = vsel %vm3024_vm4, %v12387_v38, 0.0 }
 0x6da   : > { %3068 = vadd.xlane.f32.xlu0 %v3067_v32  ;;  %v3354_v57 = vpop.xlane.xlu0 %3353 }
 0x6db   : > { %v3359_v50 = vsub.f32 %v12353_v53, %v3354_v57 }
 0x6dd   : > { %v3368_v40 = vmul.f32 1.442695, %v3359_v50 }
 0x6de   : > { %v3404_v15 = vpop.permute.xlu0 %3403 }
 0x6df   : > { %10052 = vmatpush3.msra.mxu0 %v3404_v15 }
 0x6e0   : > { %10053 = vmatprep.subr.mxu0 %v14081_v31 }
 0x6eb   : > { %v3342_v34 = vpop.xlane.xlu1 %3341 }
 0x6ec   : > { %v3355_v22 = vsub.f32 %v3335_v54, %v3342_v34 }
 0x6ee   : > { %v3360_v37 = vmul.f32 1.442695, %v3355_v22 }
 0x6ef   : > { %v3345_v45 = vpop.xlane.xlu1 %3344 }
 0x6f0   : > { %11004 = vpow2.f32 %v3360_v37  ;;  %v3356_v47 = vsub.f32 %v3336_v63, %v3345_v45 }
 0x6f2   : > { %v3362_v56 = vmul.f32 1.442695, %v3356_v47  ;;  %v3541_v47 = vld [vmem:[%s14047_s6 + $0x8] sm:$0xff] }
 0x6f3   : > { %v3351_v58 = vpop.xlane.xlu1 %3350 }
 0x6f4   : > { %11006 = vpow2.f32 %v3362_v56  ;;  %v3358_v52 = vsub.f32 %v12359_v1, %v3351_v58 }
 0x6f5   : > { %11008 = vpow2.f32 %v3364_v48 }
 0x6f6   : > { %v3366_v60 = vmul.f32 1.442695, %v3358_v52 }
 0x6f7   : > { %v3081_v51 = vpop.permute.xlu1 %3080 }
 0x6f8   : > { %11010 = vpow2.f32 %v3366_v60  ;;  %10010 = vmatpush3.msra.mxu1 %v3081_v51 }
 0x6f9   : > { %10894 = vmatprep.subr.mxu1 %v14081_v31  ;;  %11012 = vpow2.f32 %v3368_v40 }
 0x6fd   : > { %v12396_v39 = vpop.eup %11004 }
 0x6fe   : > { %v3370_v54 = vsel %vm3024_vm4, %v12396_v39, 0.0 }
 0x6ff   : > { %3371 = vadd.xlane.f32.xlu1 %v3370_v54 }
 0x701   : > { %v12400_v53 = vpop.eup %11006 }
 0x702   : > { %v3373_v63 = vsel %vm3024_vm4, %v12400_v53, 0.0  ;;  %v12404_v1 = vpop.eup %11008 }
 0x703   : > { %3374 = vadd.xlane.f32.xlu1 %v3373_v63  ;;  %v3376_v24 = vsel %vm3024_vm4, %v12404_v1, 0.0 }
 0x705   : > { %v12406_v36 = vpop.eup %11010 }
 0x706   : > { %v3379_v0 = vsel %vm3024_vm4, %v12406_v36, 0.0  ;;  %v12412_v9 = vpop.eup %11012 }
 0x707   : > { %3377 = vadd.xlane.f32.xlu1 %v3376_v24  ;;  %3380 = vadd.xlane.f32.xlu0 %v3379_v0  ;;  %v3382_v5 = vsel %vm3024_vm4, %v12412_v9, 0.0 }
 0x70b   : > { %3383 = vadd.xlane.f32.xlu1 %v3382_v5 }
 0x71c   : > { %3401 = vrot.lane.b32.xlu1 %v12224_v33, %s13992_s7 }
 0x71d   : > { %3399 = vrot.lane.b32.xlu0 %v12228_v27, %s13992_s7 }
 0x721   : > { %3397 = vrot.lane.b32.xlu0 %v12238_v44, %s13992_s7 }
 0x725   : > { %3395 = vrot.lane.b32.xlu0 %v12236_v43, %s13992_s7  ;;  %s13994_s7 = smov 8  }
 0x753   : > { %v3057_v8 = vpop.xlane.xlu1 %3056 }
 0x754   : > { %11014 = vrcp.f32 %v3057_v8 }
 0x757   : > { %v3060_v16 = vpop.xlane.xlu0 %3059 }
 0x758   : > { %11016 = vrcp.f32 %v3060_v16 }
 0x75b   : > { %v3063_v29 = vpop.xlane.xlu1 %3062 }
 0x75c   : > { %11018 = vrcp.f32 %v3063_v29 }
 0x75f   : > { %v3066_v17 = vpop.xlane.xlu0 %3065 }
 0x760   : > { %11020 = vrcp.f32 %v3066_v17 }
 0x761   : > { %v11015_v46 = vpop.eup %11014 }
 0x762   : > { %v3071_v33 = vmul.f32 %v11015_v46, %v12371_v14 }
 0x763   : > { %v3069_v19 = vpop.xlane.xlu0 %3068 }
 0x764   : > { %11022 = vrcp.f32 %v3069_v19  ;;  %10012 = vmatmul.mubr.msk.f32.vlgmr.msra.gmra.mxu1 %vm3024_vm4, %v3071_v33 }
 0x765   : > { %v11017_v27 = vpop.eup %11016  ;;  %10899 = vmatpush3.msra.mxu1 %v3404_v15  ;;  %10014 = vmatprep.mubr.msk.f32.mxu1 %vm11295_vm0, %v14081_v31 }
 0x766   : > { %v3073_v43 = vmul.f32 %v11017_v27, %v12375_v12  ;;  %10895 = vmatprep.subr.mxu1 %v14081_v31 }
 0x768   : > { %10015 = vmatmul.mubr.msk.f32.gmra.mxu1 %vm3024_vm4, %v3073_v43 }
 0x769   : > { %v11019_v44 = vpop.eup %11018  ;;  %10017 = vmatprep.mubr.msk.f32.mxu1 %vm11295_vm0, %v14081_v31 }
 0x76a   : > { %v3075_v21 = vmul.f32 %v11019_v44, %v12379_v62 }
 0x76c   : > { %10018 = vmatmul.mubr.msk.f32.gmra.mxu1 %vm3024_vm4, %v3075_v21 }
 0x76d   : > { %v11021_v23 = vpop.eup %11020  ;;  %10020 = vmatprep.mubr.msk.f32.mxu1 %vm11295_vm0, %v14081_v31 }
 0x76e   : > { %v3077_v25 = vmul.f32 %v11021_v23, %v12383_v41 }
 0x770   : > { %10021 = vmatmul.mubr.msk.f32.gmra.mxu1 %vm3024_vm4, %v3077_v25  ;;  %v12530_v25 = vld [vmem:[%s11327_s17] sm:$0xff] }
 0x771   : > { %v11023_v61 = vpop.eup %11022  ;;  %10023 = vmatprep.mubr.msk.f32.mxu1 %vm11295_vm0, %v14081_v31 }
 0x772   : > { %v3079_v59 = vmul.f32 %v11023_v61, %v12387_v38 }
 0x774   : > { %10024 = vmatmul.mubr.msk.f32.gmra.mxu1 %vm3024_vm4, %v3079_v59  ;;  %v12536_v59 = vld [vmem:[%s11332_s21] sm:$0xff] }
 0x775   : > { %10067 = vmatprep.mubr.msk.f32.mxu1 %vm11295_vm0, %v14081_v31 }
 0x788   : > { %v3372_v14 = vpop.xlane.xlu1 %3371 }
 0x789   : > { %11024 = vrcp.f32 %v3372_v14  ;;  %v8745_v14 = vld [vmem:[%s11387_s20 + $0x18] sm:$0xff] }
 0x78c   : > { %v3375_v28 = vpop.xlane.xlu1 %3374 }
 0x790   : > { %v3378_v7 = vpop.xlane.xlu1 %3377  ;;  %v3381_v12 = vpop.xlane.xlu0 %3380 }
 0x791   : > { %11026 = vrcp.f32 %v3378_v7  ;;  %v12552_v7 = vld [vmem:[%s11332_s21 + $0x8] sm:$0xff] }
 0x792   : > { %11028 = vrcp.f32 %v3375_v28  ;;  %v12547_v28 = vld [vmem:[%s11327_s17 + $0x8] sm:$0xff] }
 0x793   : > { %11030 = vrcp.f32 %v3381_v12  ;;  %v8744_v12 = vld [vmem:[%s11387_s20 + $0x10] sm:$0xff] }
 0x794   : > { %v3384_v18 = vpop.xlane.xlu1 %3383  ;;  %v3400_v62 = vpop.permute.xlu0 %3399 }
 0x795   : > { %11032 = vrcp.f32 %v3384_v18  ;;  %v12564_v18 = vld [vmem:[%s11327_s17 + $0x10] sm:$0xff] }
 0x796   : > { %v11025_v42 = vpop.eup %11024 }
 0x797   : > { %v3386_v38 = vmul.f32 %v11025_v42, %v12396_v39  ;;  %v12593_v42 = vld [vmem:[%s11327_s17 + $0x20] sm:$0xff] }
 0x798   : > { %v3402_v26 = vpop.permute.xlu1 %3401  ;;  %v3398_v41 = vpop.permute.xlu0 %3397 }
 0x799   : > { %10054 = vmatpush3.msra.mxu0 %v3402_v26  ;;  %10900 = vmatpush3.msra.mxu1 %v3402_v26  ;;  %v12579_v26 = vld [vmem:[%s11327_s17 + $0x18] sm:$0xff] }
 0x79a   : > { %10055 = vmatprep.subr.mxu0 %v14081_v31  ;;  %10896 = vmatprep.subr.mxu1 %v14081_v31 }
 0x79b   : > { %10056 = vmatpush3.msra.mxu0 %v3400_v62  ;;  %10901 = vmatpush3.msra.mxu1 %v3400_v62  ;;  %v12569_v62 = vld [vmem:[%s11332_s21 + $0x10] sm:$0xff] }
 0x79c   : > { %10057 = vmatprep.subr.mxu0 %v14081_v31  ;;  %10897 = vmatprep.subr.mxu1 %v14081_v31  ;;  %v3396_v32 = vpop.permute.xlu0 %3395 }
 0x79d   : > { %10058 = vmatpush3.msra.mxu0 %v3398_v41  ;;  %10902 = vmatpush3.msra.mxu1 %v3398_v41  ;;  %v12584_v41 = vld [vmem:[%s11332_s21 + $0x18] sm:$0xff] }
 0x79e   : > { %v11027_v6 = vpop.eup %11026  ;;  %10059 = vmatprep.subr.mxu0 %v14081_v31  ;;  %10898 = vmatprep.subr.mxu1 %v14081_v31 }
 0x79f   : > { %v11029_v57 = vpop.eup %11028  ;;  %v3390_v15 = vmul.f32 %v11027_v6, %v12404_v1  ;;  %10060 = vmatpush3.msra.mxu0 %v3396_v32  ;;  %10903 = vmatpush3.msra.mxu1 %v3396_v32  ;;  %v12598_v6 = vld [vmem:[%s11332_s21 + $0x20] sm:$0xff]  ;;  %v8757_v32 = vld [vmem:[%s11387_s20 + $0x28] sm:$0xff] }
 0x7a0   : > { %v11031_v34 = vpop.eup %11030  ;;  %10062 = vmatmul.mubr.msk.f32.vlgmr.msra.gmra.mxu0 %vm3024_vm4, %v3386_v38  ;;  %10076 = vmatprep.subr.mxu0 %v14081_v31  ;;  %v3388_v22 = vmul.f32 %v11029_v57, %v12400_v53  ;;  %v3540_v53 = vld [vmem:[%s14047_s6] sm:$0xff]  ;;  %v3880_v38 = vld [vmem:[%s11387_s20 + $0x8] sm:$0xff] }
 0x7a1   : > { %10068 = vmatmul.mubr.msk.f32.vlgmr.msra.gmra.mxu1 %vm3024_vm4, %v3390_v15  ;;  %10064 = vmatprep.mubr.msk.f32.mxu0 %vm11295_vm0, %v14081_v31  ;;  %v3392_v35 = vmul.f32 %v11031_v34, %v12406_v36  ;;  %v3879_v57 = vld [vmem:[%s11387_s20] sm:$0xff] }
 0x7a2   : > { %10070 = vmatprep.mubr.msk.f32.mxu1 %vm11295_vm0, %v14081_v31  ;;  %10095 = vmatprep.subr.mxu1 %v14081_v31  ;;  %v11033_v37 = vpop.eup %11032  ;;  %v8756_v15 = vld [vmem:[%s11387_s20 + $0x20] sm:$0xff] }
 0x7a3   : > { %v3394_v45 = vmul.f32 %v11033_v37, %v12412_v9  ;;  %10077 = vmatpush3.msra.mxu0 %v3541_v47 }
 0x7a4   : > { %10065 = vmatmul.mubr.msk.f32.gmra.mxu0 %vm3024_vm4, %v3388_v22  ;;  %10078 = vmatprep.subr.mxu0 %v14081_v31 }
 0x7a5   : > { %10071 = vmatmul.mubr.msk.f32.gmra.mxu1 %vm3024_vm4, %v3392_v35  ;;  %10080 = vmatprep.mubr.msk.f32.mxu0 %vm11295_vm0, %v14081_v31 }
 0x7a6   : > { %10073 = vmatprep.mubr.msk.f32.mxu1 %vm11295_vm0, %v14081_v31  ;;  %10079 = vmatpush3.msra.mxu0 %v3540_v53 }
 0x7a7   : > { %10120 = vmatprep.subr.mxu0 %v14081_v31 }
 0x7a9   : > { %10074 = vmatmul.mubr.msk.f32.gmra.mxu1 %vm3024_vm4, %v3394_v45 }
 0x7aa   : > { %10105 = vmatprep.mubr.msk.f32.mxu1 %vm11295_vm0, %v14081_v31 }
 0x824   : > { %v3176_v48 = vpop.f32.mrf.mxu1 }
 0x826   : > { %v10013_v50 = vpop.f32.mrf.mxu1 }
 0x828   : > { %v3181_v56 = vpop.f32.mrf.mxu1 }
 0x82a   : > { %v10016_v58 = vpop.f32.mrf.mxu1 }
 0x82c   : > { %v3186_v52 = vpop.f32.mrf.mxu1 }
 0x82e   : > { %v10019_v40 = vpop.f32.mrf.mxu1 }
 0x830   : > { %v3191_v60 = vpop.f32.mrf.mxu1 }
 0x832   : > { %v10022_v51 = vpop.f32.mrf.mxu1 }
 0x834   : > { %v3196_v39 = vpop.f32.mrf.mxu1 }
 0x836   : > { %v10025_v54 = vpop.f32.mrf.mxu1 }
 0x860   : > { %v3491_v63 = vpop.f32.mrf.mxu0 }
 0x861   : > { %v3501_v1 = vpop.f32.mrf.mxu1  ;;  %3520 = vrot.lane.b32.xlu1 %v3491_v63, %s13994_s7 }
 0x862   : > { %v10063_v36 = vpop.f32.mrf.mxu0 }
 0x863   : > { %v10069_v24 = vpop.f32.mrf.mxu1 }
 0x864   : > { %v3496_v0 = vpop.f32.mrf.mxu0 }
 0x865   : > { %v3506_v9 = vpop.f32.mrf.mxu1  ;;  %3658 = vrot.lane.b32.xlu1 %v12205_v11, %s14000_s18  ;;  %3522 = vrot.lane.b32.xlu0 %v3496_v0, %s13994_s7 }
 0x866   : > { %v10066_v5 = vpop.f32.mrf.mxu0 }
 0x867   : > { %v10072_v8 = vpop.f32.mrf.mxu1 }
 0x869   : > { %v3511_v16 = vpop.f32.mrf.mxu1  ;;  %3524 = vrot.lane.b32.xlu1 %v3501_v1, %s13994_s7  ;;  %3662 = vrot.lane.b32.xlu0 %v12217_v55, %s14000_s18 }
 0x86b   : > { %v10075_v29 = vpop.f32.mrf.mxu1 }
 0x86d   : > { %3526 = vrot.lane.b32.xlu1 %v3506_v9, %s13994_s7  ;;  %3660 = vrot.lane.b32.xlu0 %v12211_v20, %s14000_s18 }
 0x871   : > { %3656 = vrot.lane.b32.xlu1 %v12199_v2, %s14000_s18  ;;  %3528 = vrot.lane.b32.xlu0 %v3511_v16, %s13994_s7  ;;  %s14082_s7 = sld [smem:[#allocation14_spill]] }
 0x875   : > { %3654 = vrot.lane.b32.xlu0 %v12193_v13, %s14000_s18  ;;  %s14085_s18 = sld [smem:[#allocation16_spill]] }
 0x8d3   : > { %v3521_v11 = vpop.permute.xlu1 %3520 }
 0x8d4   : > { %v3535_v17 = vsel %vm2903_vm3, %v3176_v48, %v3521_v11 }
 0x8d5   : > { %10081 = vmatmul.mubr.msk.f32.vlgmr.msra.gmra.mxu0 %vm2782_vm2, %v3535_v17 }
 0x8d6   : > { %10083 = vmatprep.mubr.msk.f32.mxu0 %vm11295_vm0, %v14081_v31 }
 0x8d7   : > { %v12496_v55 = vpop.permute.xlu1 %3658  ;;  %v3523_v46 = vpop.permute.xlu0 %3522 }
 0x8d8   : > { %v3536_v20 = vsel %vm2903_vm3, %v3181_v56, %v3523_v46 }
 0x8d9   : > { %10084 = vmatmul.mubr.msk.f32.gmra.mxu0 %vm2782_vm2, %v3536_v20 }
 0x8da   : > { %10086 = vmatprep.mubr.msk.f32.mxu0 %vm11295_vm0, %v14081_v31 }
 0x8db   : > { %v3525_v2 = vpop.permute.xlu1 %3524  ;;  %v12502_v13 = vpop.permute.xlu0 %3662 }
 0x8dc   : > { %v3537_v33 = vsel %vm2903_vm3, %v3186_v52, %v3525_v2  ;;  %10096 = vmatpush3.msra.mxu1 %v12502_v13  ;;  %10121 = vmatpush3.msra.mxu0 %v12502_v13 }
 0x8dd   : > { %10087 = vmatmul.mubr.msk.f32.gmra.mxu0 %vm2782_vm2, %v3537_v33  ;;  %10097 = vmatprep.subr.mxu1 %v14081_v31 }
 0x8de   : > { %10122 = vmatprep.subr.mxu0 %v14081_v31  ;;  %10089 = vmatprep.mubr.msk.f32.mxu0 %vm11295_vm0, %v14081_v31 }
 0x8df   : > { %v3527_v19 = vpop.permute.xlu1 %3526  ;;  %v12512_v27 = vpop.permute.xlu0 %3660 }
 0x8e0   : > { %v3538_v43 = vsel %vm2903_vm3, %v3191_v60, %v3527_v19  ;;  %10098 = vmatpush3.msra.mxu1 %v12512_v27  ;;  %10123 = vmatpush3.msra.mxu0 %v12512_v27 }
 0x8e1   : > { %10090 = vmatmul.mubr.msk.f32.gmra.mxu0 %vm2782_vm2, %v3538_v43  ;;  %10099 = vmatprep.subr.mxu1 %v14081_v31 }
 0x8e2   : > { %10124 = vmatprep.subr.mxu0 %v14081_v31  ;;  %10100 = vmatpush3.msra.mxu1 %v12496_v55 }
 0x8e3   : > { %10125 = vmatpush3.msra.mxu0 %v12496_v55  ;;  %v3657_v44 = vpop.permute.xlu1 %3656  ;;  %10101 = vmatprep.subr.mxu1 %v14081_v31  ;;  %v3529_v21 = vpop.permute.xlu0 %3528 }
 0x8e4   : > { %10126 = vmatprep.subr.mxu0 %v14081_v31  ;;  %v3539_v23 = vsel %vm2903_vm3, %v3196_v39, %v3529_v21  ;;  %10092 = vmatprep.mubr.msk.f32.mxu0 %vm11295_vm0, %v14081_v31 }
 0x8e5   : > { %10102 = vmatpush3.msra.mxu1 %v3657_v44  ;;  %10127 = vmatpush3.msra.mxu0 %v3657_v44 }
 0x8e6   : > { %10093 = vmatmul.mubr.msk.f32.gmra.mxu0 %vm2782_vm2, %v3539_v23  ;;  %10103 = vmatprep.subr.mxu1 %v14081_v31 }
 0x8e7   : > { %10128 = vmatprep.subr.mxu0 %v14081_v31  ;;  %v3655_v61 = vpop.permute.xlu0 %3654  ;;  %10130 = vmatprep.mubr.msk.f32.mxu0 %vm11295_vm0, %v14081_v31 }
 0x8e8   : > { %10104 = vmatpush3.msra.mxu1 %v3655_v61  ;;  %10129 = vmatpush3.msra.mxu0 %v3655_v61 }
 0x8e9   : > { %10106 = vmatmul.mubr.msk.f32.vlgmr.msra.gmra.mxu1 %vm3024_vm4, %v12530_v25  ;;  %10145 = vmatprep.subr.mxu1 %v14081_v31 }
 0x8ea   : > { %10131 = vmatmul.mubr.msk.f32.vlgmr.msra.gmra.mxu0 %vm3024_vm4, %v12536_v59  ;;  %10108 = vmatprep.mubr.msk.f32.mxu1 %vm11295_vm0, %v14081_v31 }
 0x8eb   : > { %10133 = vmatprep.mubr.msk.f32.mxu0 %vm11295_vm0, %v14081_v31  ;;  %10146 = vmatpush3.msra.mxu1 %v8745_v14 }
 0x8ec   : > { %10147 = vmatprep.subr.mxu1 %v14081_v31  ;;  %10164 = vmatprep.subr.mxu0 %v14081_v31 }
 0x8ed   : > { %10109 = vmatmul.mubr.msk.f32.gmra.mxu1 %vm3024_vm4, %v12547_v28  ;;  %10165 = vmatpush3.msra.mxu0 %v3880_v38 }
 0x8ee   : > { %10134 = vmatmul.mubr.msk.f32.gmra.mxu0 %vm3024_vm4, %v12552_v7  ;;  %10111 = vmatprep.mubr.msk.f32.mxu1 %vm11295_vm0, %v14081_v31 }
 0x8ef   : > { %10136 = vmatprep.mubr.msk.f32.mxu0 %vm11295_vm0, %v14081_v31  ;;  %10148 = vmatpush3.msra.mxu1 %v8744_v12  ;;  %v8763_v12 = vld [vmem:[%s14082_s7] ss:$0 sm:$0xff] }
 0x8f0   : > { %10183 = vmatprep.subr.mxu1 %v14081_v31  ;;  %10166 = vmatprep.subr.mxu0 %v14081_v31 }
 0x8f1   : > { %10112 = vmatmul.mubr.msk.f32.gmra.mxu1 %vm3024_vm4, %v12564_v18  ;;  %10167 = vmatpush3.msra.mxu0 %v3879_v57 }
 0x8f2   : > { %10137 = vmatmul.mubr.msk.f32.gmra.mxu0 %vm3024_vm4, %v12569_v62  ;;  %10114 = vmatprep.mubr.msk.f32.mxu1 %vm11295_vm0, %v14081_v31 }
 0x8f3   : > { %10139 = vmatprep.mubr.msk.f32.mxu0 %vm11295_vm0, %v14081_v31  ;;  %10202 = vmatprep.subr.mxu0 %v14081_v31 }
 0x8f5   : > { %10115 = vmatmul.mubr.msk.f32.gmra.mxu1 %vm3024_vm4, %v12579_v26 }
 0x8f6   : > { %10140 = vmatmul.mubr.msk.f32.gmra.mxu0 %vm3024_vm4, %v12584_v41  ;;  %10117 = vmatprep.mubr.msk.f32.mxu1 %vm11295_vm0, %v14081_v31 }
 0x8f7   : > { %10142 = vmatprep.mubr.msk.f32.mxu0 %vm11295_vm0, %v14081_v31 }
 0x8f9   : > { %10118 = vmatmul.mubr.msk.f32.gmra.mxu1 %vm3024_vm4, %v12593_v42 }
 0x8fa   : > { %10143 = vmatmul.mubr.msk.f32.gmra.mxu0 %vm3024_vm4, %v12598_v6  ;;  %10149 = vmatprep.mubr.msk.f32.mxu1 %vm11295_vm0, %v14081_v31 }
 0x8fb   : > { %10168 = vmatprep.mubr.msk.f32.mxu0 %vm11295_vm0, %v14081_v31 }
 0x8fd   : > { %10150 = vmatmul.mubr.msk.f32.vlgmr.msra.gmra.mxu1 %vm2782_vm2, %v3655_v61 }
 0x8fe   : > { %10152 = vmatprep.mubr.msk.f32.mxu1 %vm11295_vm0, %v14081_v31  ;;  %10184 = vmatpush3.msra.mxu1 %v8757_v32 }
 0x8ff   : > { %10185 = vmatprep.subr.mxu1 %v14081_v31 }
 0x900   : > { %10186 = vmatpush3.msra.mxu1 %v8756_v15 }
 0x901   : > { %10153 = vmatmul.mubr.msk.f32.gmra.mxu1 %vm2782_vm2, %v3657_v44  ;;  %10227 = vmatprep.subr.mxu1 %v14081_v31 }
 0x902   : > { %10155 = vmatprep.mubr.msk.f32.mxu1 %vm11295_vm0, %v14081_v31 }
 0x905   : > { %10156 = vmatmul.mubr.msk.f32.gmra.mxu1 %vm2782_vm2, %v12496_v55 }
 0x906   : > { %10158 = vmatprep.mubr.msk.f32.mxu1 %vm11295_vm0, %v14081_v31 }
 0x909   : > { %10159 = vmatmul.mubr.msk.f32.gmra.mxu1 %vm2782_vm2, %v12512_v27 }
 0x90a   : > { %10161 = vmatprep.mubr.msk.f32.mxu1 %vm11295_vm0, %v14081_v31 }
 0x90d   : > { %10162 = vmatmul.mubr.msk.f32.gmra.mxu1 %vm2782_vm2, %v12502_v13 }
 0x90e   : > { %10187 = vmatprep.mubr.msk.f32.mxu1 %vm11295_vm0, %v14081_v31 }
 0x995   : > { %v12634_v34 = vpop.f32.mrf.mxu0 }
 0x997   : > { %v10082_v22 = vpop.f32.mrf.mxu0 }
 0x999   : > { %v12636_v35 = vpop.f32.mrf.mxu0 }
 0x99b   : > { %v10085_v37 = vpop.f32.mrf.mxu0 }
 0x99d   : > { %v12638_v45 = vpop.f32.mrf.mxu0 }
 0x99f   : > { %v10088_v47 = vpop.f32.mrf.mxu0 }
 0x9a1   : > { %v12640_v48 = vpop.f32.mrf.mxu0 }
 0x9a3   : > { %v10091_v50 = vpop.f32.mrf.mxu0 }
 0x9a6   : > { %v12642_v56 = vpop.f32.mrf.mxu0 }
 0x9a8   : > { %v10094_v58 = vpop.f32.mrf.mxu0 }
 0x9a9   : > { %v3750_v52 = vpop.f32.mrf.mxu1 }
 0x9aa   : > { %v3855_v40 = vpop.f32.mrf.mxu0  ;;  %10169 = vmatmul.mubr.msk.f32.vlgmr.msra.gmra.mxu0 %vm2782_vm2, %v3750_v52 }
 0x9ab   : > { %10188 = vmatmul.mubr.msk.f32.vlgmr.msra.gmra.mxu1 %vm2782_vm2, %v3855_v40  ;;  %v10107_v60 = vpop.f32.mrf.mxu1  ;;  %10171 = vmatprep.mubr.msk.f32.mxu0 %vm11295_vm0, %v14081_v31 }
 0x9ac   : > { %v10132_v51 = vpop.f32.mrf.mxu0  ;;  %10190 = vmatprep.mubr.msk.f32.mxu1 %vm11295_vm0, %v14081_v31 }
 0x9ad   : > { %v3755_v39 = vpop.f32.mrf.mxu1 }
 0x9ae   : > { %v3860_v54 = vpop.f32.mrf.mxu0  ;;  %10172 = vmatmul.mubr.msk.f32.gmra.mxu0 %vm2782_vm2, %v3755_v39 }
 0x9af   : > { %10191 = vmatmul.mubr.msk.f32.gmra.mxu1 %vm2782_vm2, %v3860_v54  ;;  %v10110_v53 = vpop.f32.mrf.mxu1  ;;  %10174 = vmatprep.mubr.msk.f32.mxu0 %vm11295_vm0, %v14081_v31 }
 0x9b0   : > { %v10135_v63 = vpop.f32.mrf.mxu0  ;;  %10193 = vmatprep.mubr.msk.f32.mxu1 %vm11295_vm0, %v14081_v31 }
 0x9b1   : > { %v3760_v1 = vpop.f32.mrf.mxu1 }
 0x9b2   : > { %v3865_v36 = vpop.f32.mrf.mxu0  ;;  %10175 = vmatmul.mubr.msk.f32.gmra.mxu0 %vm2782_vm2, %v3760_v1 }
 0x9b3   : > { %10194 = vmatmul.mubr.msk.f32.gmra.mxu1 %vm2782_vm2, %v3865_v36  ;;  %v10113_v24 = vpop.f32.mrf.mxu1  ;;  %10177 = vmatprep.mubr.msk.f32.mxu0 %vm11295_vm0, %v14081_v31 }
 0x9b4   : > { %v10138_v0 = vpop.f32.mrf.mxu0  ;;  %10196 = vmatprep.mubr.msk.f32.mxu1 %vm11295_vm0, %v14081_v31 }
 0x9b5   : > { %v3765_v9 = vpop.f32.mrf.mxu1 }
 0x9b6   : > { %v3870_v5 = vpop.f32.mrf.mxu0  ;;  %10178 = vmatmul.mubr.msk.f32.gmra.mxu0 %vm2782_vm2, %v3765_v9 }
 0x9b7   : > { %10197 = vmatmul.mubr.msk.f32.gmra.mxu1 %vm2782_vm2, %v3870_v5  ;;  %v10116_v8 = vpop.f32.mrf.mxu1  ;;  %10180 = vmatprep.mubr.msk.f32.mxu0 %vm11295_vm0, %v14081_v31 }
 0x9b8   : > { %v10141_v16 = vpop.f32.mrf.mxu0  ;;  %10199 = vmatprep.mubr.msk.f32.mxu1 %vm11295_vm0, %v14081_v31 }
 0x9b9   : > { %v3770_v29 = vpop.f32.mrf.mxu1 }
 0x9ba   : > { %v3875_v11 = vpop.f32.mrf.mxu0  ;;  %10181 = vmatmul.mubr.msk.f32.gmra.mxu0 %vm2782_vm2, %v3770_v29 }
 0x9bb   : > { %10200 = vmatmul.mubr.msk.f32.gmra.mxu1 %vm2782_vm2, %v3875_v11  ;;  %v10119_v17 = vpop.f32.mrf.mxu1  ;;  %10212 = vmatprep.mubr.msk.f32.mxu0 %vm11295_vm0, %v14081_v31 }
 0x9bc   : > { %v10144_v55 = vpop.f32.mrf.mxu0  ;;  %10237 = vmatprep.mubr.msk.f32.mxu1 %vm11295_vm0, %v14081_v31 }
 0x9bd   : > { %v3960_v46 = vpop.f32.mrf.mxu1 }
 0x9bf   : > { %v10151_v20 = vpop.f32.mrf.mxu1 }
 0x9c1   : > { %v3965_v2 = vpop.f32.mrf.mxu1 }
 0x9c3   : > { %v10154_v13 = vpop.f32.mrf.mxu1 }
 0x9c5   : > { %v3970_v33 = vpop.f32.mrf.mxu1 }
 0x9c7   : > { %v10157_v19 = vpop.f32.mrf.mxu1 }
 0x9c9   : > { %v3975_v27 = vpop.f32.mrf.mxu1 }
 0x9cb   : > { %v10160_v43 = vpop.f32.mrf.mxu1 }
 0x9cd   : > { %v3980_v44 = vpop.f32.mrf.mxu1 }
 0x9cf   : > { %v10163_v21 = vpop.f32.mrf.mxu1 }
 0xa6a   : > { %v4065_v23 = vpop.f32.mrf.mxu0 }
 0xa6b   : > { %v4066_v61 = vadd.f32 %v4065_v23, %v3960_v46  ;;  %v4173_v14 = vpop.f32.mrf.mxu1 }
 0xa6c   : > { %v10170_v38 = vpop.f32.mrf.mxu0 }
 0xa6d   : > { %v4197_v32 = vadd.f32 %v4173_v14, %v4066_v61  ;;  %v10189_v57 = vpop.f32.mrf.mxu1 }
 0xa6e   : > { %v4070_v15 = vpop.f32.mrf.mxu0 }
 0xa6f   : > { %v12675_v22 = vadd.f32 %v8763_v12, %v4197_v32  ;;  %v4071_v37 = vadd.f32 %v4070_v15, %v3965_v2  ;;  %v4178_v47 = vpop.f32.mrf.mxu1 }
 0xa70   : > { %v10173_v50 = vpop.f32.mrf.mxu0 }
 0xa71   : > { %v12678_v58 = vmul.f32 0.70710677, %v12675_v22  ;;  %v4198_v52 = vadd.f32 %v4178_v47, %v4071_v37  ;;  %v10192_v40 = vpop.f32.mrf.mxu1 }
 0xa72   : > { %v4075_v60 = vpop.f32.mrf.mxu0 }
 0xa73   : > { %v4224_v51 = vand.u32 2147483647, %v12678_v58  ;;  %v12681_v39 = vadd.f32 %v8763_v12, %v4198_v52  ;;  %v4076_v54 = vadd.f32 %v4075_v60, %v3970_v33  ;;  %v4183_v53 = vpop.f32.mrf.mxu1  ;;  %vm4324_vm9 = vcmp.ge.f32.partialorder %v12678_v58, 0.0 }
 0xa74   : > { %v10176_v63 = vpop.f32.mrf.mxu0 }
 0xa75   : > { %v4229_v1 = vmul.f32 0.3275911, %v4224_v51  ;;  %v12684_v36 = vmul.f32 0.70710677, %v12681_v39  ;;  %v10195_v24 = vpop.f32.mrf.mxu1  ;;  %v4199_v0 = vadd.f32 %v4183_v53, %v4076_v54 }
 0xa76   : > { %v4080_v9 = vpop.f32.mrf.mxu0 }
 0xa77   : > { %v4234_v5 = vadd.f32 1.0, %v4229_v1  ;;  %v4225_v8 = vand.u32 2147483647, %v12684_v36  ;;  %v4188_v16 = vpop.f32.mrf.mxu1  ;;  %v12687_v29 = vadd.f32 %v8763_v12, %v4199_v0  ;;  %v4081_v11 = vadd.f32 %v4080_v9, %v3975_v27 }
 0xa78   : > { %v10179_v17 = vpop.f32.mrf.mxu0  ;;  %vm4325_vm8 = vcmp.ge.f32.partialorder %v12684_v36, 0.0  ;;  %v4215_v36 = vmul.f32 0.5, %v12681_v39 }
 0xa79   : > { %11034 = vrcp.f32 %v4234_v5  ;;  %v4230_v55 = vmul.f32 0.3275911, %v4225_v8  ;;  %v10198_v46 = vpop.f32.mrf.mxu1  ;;  %v12690_v20 = vmul.f32 0.70710677, %v12687_v29  ;;  %v4200_v2 = vadd.f32 %v4188_v16, %v4081_v11 }
 0xa7a   : > { %v4085_v13 = vpop.f32.mrf.mxu0  ;;  %v4295_v9 = vmul.f32 %v4225_v8, %v4225_v8  ;;  %v4294_v16 = vmul.f32 %v4224_v51, %v4224_v51 }
 0xa7b   : > { %v4235_v33 = vadd.f32 1.0, %v4230_v55  ;;  %v4086_v19 = vadd.f32 %v4085_v13, %v3980_v44  ;;  %v4193_v43 = vpop.f32.mrf.mxu1  ;;  %v4226_v21 = vand.u32 2147483647, %v12690_v20  ;;  %v12693_v23 = vadd.f32 %v8763_v12, %v4200_v2 }
 0xa7c   : > { %v10182_v61 = vpop.f32.mrf.mxu0  ;;  %v4300_v13 = vsub.f32 0.0, %v4295_v9  ;;  %vm4326_vm6 = vcmp.ge.f32.partialorder %v12690_v20, 0.0 }
 0xa7d   : > { %11036 = vrcp.f32 %v4235_v33  ;;  %v4201_v14 = vadd.f32 %v4193_v43, %v4086_v19  ;;  %v10201_v27 = vpop.f32.mrf.mxu1  ;;  %v4231_v38 = vmul.f32 0.3275911, %v4226_v21  ;;  %v12696_v32 = vmul.f32 0.70710677, %v12693_v23 }
 0xa7e   : > { %v4296_v63 = vmul.f32 %v4226_v21, %v4226_v21  ;;  %v4299_v61 = vsub.f32 0.0, %v4294_v16  ;;  %v4306_v8 = vmul.f32 1.442695, %v4300_v13 }
 0xa7f   : > { %v12698_v57 = vadd.f32 %v8763_v12, %v4201_v14  ;;  %v4236_v15 = vadd.f32 1.0, %v4231_v38  ;;  %v4227_v37 = vand.u32 2147483647, %v12696_v32  ;;  %vm4327_vm5 = vcmp.ge.f32.partialorder %v12696_v32, 0.0 }
 0xa80   : > { %v4301_v17 = vsub.f32 0.0, %v4296_v63 }
 0xa81   : > { %v12702_v44 = vmul.f32 0.70710677, %v12698_v57  ;;  %11038 = vrcp.f32 %v4236_v15  ;;  %v4232_v47 = vmul.f32 0.3275911, %v4227_v37  ;;  %v4297_v5 = vmul.f32 %v4227_v37, %v4227_v37 }
 0xa82   : > { %v4308_v21 = vmul.f32 1.442695, %v4301_v17 }
 0xa83   : > { %v4228_v50 = vand.u32 2147483647, %v12702_v44  ;;  %v4237_v52 = vadd.f32 1.0, %v4232_v47  ;;  %v4302_v43 = vsub.f32 0.0, %v4297_v5  ;;  %vm4328_vm7 = vcmp.ge.f32.partialorder %v12702_v44, 0.0 }
 0xa84   : > { %v4216_v44 = vmul.f32 0.5, %v12687_v29  ;;  %v4214_v29 = vmul.f32 0.5, %v12675_v22  ;;  %v8775_v22 = vld [vmem:[%s14083_s10 + $0x18] sm:$0xff] }
 0xa85   : > { %v4233_v40 = vmul.f32 0.3275911, %v4228_v50  ;;  %11040 = vrcp.f32 %v4237_v52  ;;  %v4298_v33 = vmul.f32 %v4228_v50, %v4228_v50 }
 0xa86   : > { %v12705_v60 = vpop.eup %11034 }
 0xa87   : > { %v4249_v54 = vmul.f32 1.0614054, %v12705_v60  ;;  %v4238_v53 = vadd.f32 1.0, %v4233_v40  ;;  %v4303_v37 = vsub.f32 0.0, %v4298_v33  ;;  %v4310_v40 = vmul.f32 1.442695, %v4302_v43 }
 0xa89   : > { %v4254_v12 = vadd.f32 -1.4531521, %v4249_v54  ;;  %11042 = vrcp.f32 %v4238_v53  ;;  %v4304_v54 = vmul.f32 1.442695, %v4299_v61  ;;  %v4312_v9 = vmul.f32 1.442695, %v4303_v37 }
 0xa8a   : > { %v11037_v1 = vpop.eup %11036  ;;  %11044 = vpow2.f32 %v4308_v21 }
 0xa8b   : > { %v4259_v24 = vmul.f32 %v12705_v60, %v4254_v12  ;;  %v4250_v0 = vmul.f32 1.0614054, %v11037_v1  ;;  %11046 = vpow2.f32 %v4306_v8 }
 0xa8c   : > { %11048 = vpow2.f32 %v4310_v40 }
 0xa8d   : > { %v4255_v11 = vadd.f32 -1.4531521, %v4250_v0  ;;  %v4264_v46 = vadd.f32 1.4214138, %v4259_v24  ;;  %11050 = vpow2.f32 %v4304_v54 }
 0xa8e   : > { %v11039_v55 = vpop.eup %11038  ;;  %11052 = vpow2.f32 %v4312_v9 }
 0xa8f   : > { %v4260_v2 = vmul.f32 %v11037_v1, %v4255_v11  ;;  %v4251_v19 = vmul.f32 1.0614054, %v11039_v55  ;;  %v4269_v15 = vmul.f32 %v12705_v60, %v4264_v46 }
 0xa91   : > { %v4265_v14 = vadd.f32 1.4214138, %v4260_v2  ;;  %v4256_v27 = vadd.f32 -1.4531521, %v4251_v19  ;;  %v4274_v24 = vadd.f32 -0.28449672, %v4269_v15 }
 0xa92   : > { %v11041_v38 = vpop.eup %11040 }
 0xa93   : > { %v4270_v47 = vmul.f32 %v11037_v1, %v4265_v14  ;;  %v4261_v51 = vmul.f32 %v11039_v55, %v4256_v27  ;;  %v4252_v52 = vmul.f32 1.0614054, %v11041_v38  ;;  %v4279_v13 = vmul.f32 %v12705_v60, %v4274_v24 }
 0xa95   : > { %v4275_v53 = vadd.f32 -0.28449672, %v4270_v47  ;;  %v4266_v50 = vadd.f32 1.4214138, %v4261_v51  ;;  %v4257_v63 = vadd.f32 -1.4531521, %v4252_v52 }
 0xa96   : > { %v11043_v12 = vpop.eup %11042  ;;  %v4284_v15 = vadd.f32 0.2548296, %v4279_v13 }
 0xa97   : > { %v4253_v0 = vmul.f32 1.0614054, %v11043_v12  ;;  %v4271_v5 = vmul.f32 %v11039_v55, %v4266_v50  ;;  %v4262_v16 = vmul.f32 %v11041_v38, %v4257_v63  ;;  %v4280_v11 = vmul.f32 %v11037_v1, %v4275_v53  ;;  %v11045_v40 = vpop.eup %11044 }
 0xa98   : > { %v4289_v53 = vmul.f32 %v12705_v60, %v4284_v15  ;;  %v11047_v24 = vpop.eup %11046 }
 0xa99   : > { %v4258_v17 = vadd.f32 -1.4531521, %v4253_v0  ;;  %v4276_v46 = vadd.f32 -0.28449672, %v4271_v5  ;;  %v4267_v2 = vadd.f32 1.4214138, %v4262_v16  ;;  %v11049_v9 = vpop.eup %11048 }
 0xa9a   : > { %v4285_v61 = vadd.f32 0.2548296, %v4280_v11  ;;  %v11051_v11 = vpop.eup %11050 }
 0xa9b   : > { %v4263_v33 = vmul.f32 %v11043_v12, %v4258_v17  ;;  %v4281_v19 = vmul.f32 %v11039_v55, %v4276_v46  ;;  %v4272_v43 = vmul.f32 %v11041_v38, %v4267_v2  ;;  %v4314_v46 = vmul.f32 %v11051_v11, %v4289_v53 }
 0xa9c   : > { %v4290_v51 = vmul.f32 %v11037_v1, %v4285_v61 }
 0xa9d   : > { %v4268_v14 = vadd.f32 1.4214138, %v4263_v33  ;;  %v4286_v21 = vadd.f32 0.2548296, %v4281_v19  ;;  %v4277_v27 = vadd.f32 -0.28449672, %v4272_v43 }
 0xa9e   : > { %v4315_v5 = vmul.f32 %v11047_v24, %v4290_v51  ;;  %v4319_v61 = vsub.f32 1.0, %v4314_v46 }
 0xa9f   : > { %v4273_v47 = vmul.f32 %v11043_v12, %v4268_v14  ;;  %v4291_v8 = vmul.f32 %v11039_v55, %v4286_v21  ;;  %v4282_v37 = vmul.f32 %v11041_v38, %v4277_v27  ;;  %v11053_v55 = vpop.eup %11052 }
 0xaa0   : > { %v4320_v1 = vsub.f32 1.0, %v4315_v5  ;;  %v4329_v15 = vsub.f32 0.0, %v4319_v61 }
 0xaa1   : > { %v4278_v52 = vadd.f32 -0.28449672, %v4273_v47  ;;  %v4287_v54 = vadd.f32 0.2548296, %v4282_v37  ;;  %v4316_v50 = vmul.f32 %v11045_v40, %v4291_v8  ;;  %v4218_v37 = vmul.f32 0.5, %v12698_v57 }
 0xaa2   : > { %v4330_v21 = vsub.f32 0.0, %v4320_v1  ;;  %v4217_v40 = vmul.f32 0.5, %v12693_v23  ;;  %v4334_v20 = vsel %vm4324_vm9, %v4319_v61, %v4329_v15 }
 0xaa3   : > { %v4283_v63 = vmul.f32 %v11043_v12, %v4278_v52  ;;  %v4292_v0 = vmul.f32 %v11041_v38, %v4287_v54  ;;  %v4321_v2 = vsub.f32 1.0, %v4316_v50  ;;  %v4339_v58 = vadd.f32 1.0, %v4334_v20  ;;  %v8793_v20 = vld [vmem:[%s14085_s18] ss:$0 sm:$0xff] }
 0xaa4   : > { %v4335_v52 = vsel %vm4325_vm8, %v4320_v1, %v4330_v21 }
 0xaa5   : > { %v4288_v16 = vadd.f32 0.2548296, %v4283_v63  ;;  %v4317_v17 = vmul.f32 %v11049_v9, %v4292_v0  ;;  %v4331_v14 = vsub.f32 0.0, %v4321_v2  ;;  %v4340_v53 = vadd.f32 1.0, %v4335_v52  ;;  %v4530_v63 = vld [vmem:[%s14083_s10 + $0x8] sm:$0xff]  ;;  %v4894_v52 = vld [vmem:[%s14084_s1] sm:$0xff] }
 0xaa6   : > { %v4344_v39 = vmul.f32 %v4339_v58, %v4214_v29 }
 0xaa7   : > { %v4293_v13 = vmul.f32 %v11043_v12, %v4288_v16  ;;  %v4322_v33 = vsub.f32 1.0, %v4317_v17  ;;  %v4336_v47 = vsel %vm4326_vm6, %v4321_v2, %v4331_v14  ;;  %v4345_v57 = vmul.f32 %v4340_v53, %v4215_v36 }
 0xaa8   : > { %v4341_v32 = vadd.f32 1.0, %v4336_v47 }
 0xaa9   : > { %v4318_v19 = vmul.f32 %v11053_v55, %v4293_v13  ;;  %v4332_v43 = vsub.f32 0.0, %v4322_v33 }
 0xaaa   : > { %v4346_v23 = vmul.f32 %v4341_v32, %v4216_v44 }
 0xaab   : > { %v4323_v60 = vsub.f32 1.0, %v4318_v19  ;;  %v4337_v38 = vsel %vm4327_vm5, %v4322_v33, %v4332_v43 }
 0xaac   : > { %v4342_v8 = vadd.f32 1.0, %v4337_v38 }
 0xaad   : > { %v4333_v27 = vsub.f32 0.0, %v4323_v60 }
 0xaae   : > { %v12722_v50 = vmul.f32 %v4342_v8, %v4217_v40  ;;  %v4897_v8 = vld [vmem:[%s14084_s1 + $0x18] sm:$0xff] }
 0xaaf   : > { %v4338_v12 = vsel %vm4328_vm7, %v4323_v60, %v4333_v27 }
 0xab0   : > { %v4343_v51 = vadd.f32 1.0, %v4338_v12 }
 0xab2   : > { %v12719_v54 = vmul.f32 %v4343_v51, %v4218_v37  ;;  %v4896_v37 = vld [vmem:[%s14084_s1 + $0x10] sm:$0xff]  ;;  %v4895_v51 = vld [vmem:[%s14084_s1 + $0x8] sm:$0xff] }
 0xab4   : > { %10203 = vmatpush3.msra.mxu0 %v12719_v54  ;;  %10228 = vmatpush3.msra.mxu1 %v12719_v54 }
 0xab5   : > { %10204 = vmatprep.subr.mxu0 %v14081_v31  ;;  %10229 = vmatprep.subr.mxu1 %v14081_v31 }
 0xab6   : > { %10205 = vmatpush3.msra.mxu0 %v12722_v50  ;;  %10230 = vmatpush3.msra.mxu1 %v12722_v50 }
 0xab7   : > { %10206 = vmatprep.subr.mxu0 %v14081_v31  ;;  %10231 = vmatprep.subr.mxu1 %v14081_v31 }
 0xab8   : > { %10207 = vmatpush3.msra.mxu0 %v4346_v23  ;;  %10232 = vmatpush3.msra.mxu1 %v4346_v23 }
 0xab9   : > { %10208 = vmatprep.subr.mxu0 %v14081_v31  ;;  %10233 = vmatprep.subr.mxu1 %v14081_v31 }
 0xaba   : > { %10209 = vmatpush3.msra.mxu0 %v4345_v57  ;;  %10234 = vmatpush3.msra.mxu1 %v4345_v57 }
 0xabb   : > { %10210 = vmatprep.subr.mxu0 %v14081_v31  ;;  %10235 = vmatprep.subr.mxu1 %v14081_v31 }
 0xabc   : > { %10211 = vmatpush3.msra.mxu0 %v4344_v39  ;;  %10236 = vmatpush3.msra.mxu1 %v4344_v39 }
 0xabd   : > { %10213 = vmatmul.mubr.msk.f32.vlgmr.msra.gmra.mxu0 %vm3024_vm4, %v12530_v25  ;;  %10238 = vmatmul.mubr.msk.f32.vlgmr.msra.gmra.mxu1 %vm3024_vm4, %v12536_v59  ;;  %v8774_v25 = vld [vmem:[%s14083_s10 + $0x10] sm:$0xff]  ;;  %v8787_v59 = vld [vmem:[%s14083_s10 + $0x28] sm:$0xff] }
 0xabe   : > { %10215 = vmatprep.mubr.msk.f32.mxu0 %vm11295_vm0, %v14081_v31  ;;  %10240 = vmatprep.mubr.msk.f32.mxu1 %vm11295_vm0, %v14081_v31 }
 0xabf   : > { %10252 = vmatprep.subr.mxu0 %v14081_v31  ;;  %10271 = vmatprep.subr.mxu1 %v14081_v31 }
 0xac0   : > { %10253 = vmatpush3.msra.mxu0 %v8775_v22  ;;  %10272 = vmatpush3.msra.mxu1 %v4530_v63 }
 0xac1   : > { %10216 = vmatmul.mubr.msk.f32.gmra.mxu0 %vm3024_vm4, %v12547_v28  ;;  %10241 = vmatmul.mubr.msk.f32.gmra.mxu1 %vm3024_vm4, %v12552_v7  ;;  %v4529_v28 = vld [vmem:[%s14083_s10] sm:$0xff] }
 0xac2   : > { %10218 = vmatprep.mubr.msk.f32.mxu0 %vm11295_vm0, %v14081_v31  ;;  %10243 = vmatprep.mubr.msk.f32.mxu1 %vm11295_vm0, %v14081_v31  ;;  %v8786_v7 = vld [vmem:[%s14083_s10 + $0x20] sm:$0xff] }
 0xac3   : > { %10254 = vmatprep.subr.mxu0 %v14081_v31  ;;  %10273 = vmatprep.subr.mxu1 %v14081_v31 }
 0xac4   : > { %10255 = vmatpush3.msra.mxu0 %v8774_v25  ;;  %10274 = vmatpush3.msra.mxu1 %v4529_v28 }
 0xac5   : > { %10219 = vmatmul.mubr.msk.f32.gmra.mxu0 %vm3024_vm4, %v12564_v18  ;;  %10244 = vmatmul.mubr.msk.f32.gmra.mxu1 %vm3024_vm4, %v12569_v62 }
 0xac6   : > { %10221 = vmatprep.mubr.msk.f32.mxu0 %vm11295_vm0, %v14081_v31  ;;  %10246 = vmatprep.mubr.msk.f32.mxu1 %vm11295_vm0, %v14081_v31 }
 0xac7   : > { %10290 = vmatprep.subr.mxu0 %v14081_v31  ;;  %10309 = vmatprep.subr.mxu1 %v14081_v31 }
 0xac9   : > { %10222 = vmatmul.mubr.msk.f32.gmra.mxu0 %vm3024_vm4, %v12579_v26  ;;  %10247 = vmatmul.mubr.msk.f32.gmra.mxu1 %vm3024_vm4, %v12584_v41 }
 0xaca   : > { %10224 = vmatprep.mubr.msk.f32.mxu0 %vm11295_vm0, %v14081_v31  ;;  %10249 = vmatprep.mubr.msk.f32.mxu1 %vm11295_vm0, %v14081_v31 }
 0xacd   : > { %10225 = vmatmul.mubr.msk.f32.gmra.mxu0 %vm3024_vm4, %v12593_v42  ;;  %10250 = vmatmul.mubr.msk.f32.gmra.mxu1 %vm3024_vm4, %v12598_v6 }
 0xace   : > { %10256 = vmatprep.mubr.msk.f32.mxu0 %vm11295_vm0, %v14081_v31  ;;  %10275 = vmatprep.mubr.msk.f32.mxu1 %vm11295_vm0, %v14081_v31 }
 0xad1   : > { %10257 = vmatmul.mubr.msk.f32.vlgmr.msra.gmra.mxu0 %vm2782_vm2, %v4344_v39 }
 0xad2   : > { %10259 = vmatprep.mubr.msk.f32.mxu0 %vm11295_vm0, %v14081_v31  ;;  %10291 = vmatpush3.msra.mxu0 %v8787_v59 }
 0xad3   : > { %10292 = vmatprep.subr.mxu0 %v14081_v31 }
 0xad4   : > { %10293 = vmatpush3.msra.mxu0 %v8786_v7 }
 0xad5   : > { %10260 = vmatmul.mubr.msk.f32.gmra.mxu0 %vm2782_vm2, %v4345_v57  ;;  %10332 = vmatprep.subr.mxu0 %v14081_v31 }
 0xad6   : > { %10262 = vmatprep.mubr.msk.f32.mxu0 %vm11295_vm0, %v14081_v31 }
 0xad9   : > { %10263 = vmatmul.mubr.msk.f32.gmra.mxu0 %vm2782_vm2, %v4346_v23 }
 0xada   : > { %10265 = vmatprep.mubr.msk.f32.mxu0 %vm11295_vm0, %v14081_v31 }
 0xadd   : > { %10266 = vmatmul.mubr.msk.f32.gmra.mxu0 %vm2782_vm2, %v12722_v50 }
 0xade   : > { %10268 = vmatprep.mubr.msk.f32.mxu0 %vm11295_vm0, %v14081_v31 }
 0xae1   : > { %10269 = vmatmul.mubr.msk.f32.gmra.mxu0 %vm2782_vm2, %v12719_v54 }
 0xae2   : > { %10294 = vmatprep.mubr.msk.f32.mxu0 %vm11295_vm0, %v14081_v31 }
 0xb7d   : > { %v4415_v18 = vpop.f32.mrf.mxu0  ;;  %v4505_v62 = vpop.f32.mrf.mxu1 }
 0xb7e   : > { %10276 = vmatmul.mubr.msk.f32.vlgmr.msra.gmra.mxu1 %vm2782_vm2, %v4415_v18  ;;  %10295 = vmatmul.mubr.msk.f32.vlgmr.msra.gmra.mxu0 %vm2782_vm2, %v4505_v62 }
 0xb7f   : > { %v10214_v26 = vpop.f32.mrf.mxu0  ;;  %v10239_v41 = vpop.f32.mrf.mxu1  ;;  %10278 = vmatprep.mubr.msk.f32.mxu1 %vm11295_vm0, %v14081_v31  ;;  %10297 = vmatprep.mubr.msk.f32.mxu0 %vm11295_vm0, %v14081_v31 }
 0xb80   : > { %10310 = vmatpush3.msra.mxu1 %v4897_v8 }
 0xb81   : > { %v4420_v42 = vpop.f32.mrf.mxu0  ;;  %v4510_v6 = vpop.f32.mrf.mxu1  ;;  %10311 = vmatprep.subr.mxu1 %v14081_v31 }
 0xb82   : > { %10279 = vmatmul.mubr.msk.f32.gmra.mxu1 %vm2782_vm2, %v4420_v42  ;;  %10298 = vmatmul.mubr.msk.f32.gmra.mxu0 %vm2782_vm2, %v4510_v6 }
 0xb83   : > { %v10217_v24 = vpop.f32.mrf.mxu0  ;;  %v10242_v0 = vpop.f32.mrf.mxu1  ;;  %10281 = vmatprep.mubr.msk.f32.mxu1 %vm11295_vm0, %v14081_v31  ;;  %10300 = vmatprep.mubr.msk.f32.mxu0 %vm11295_vm0, %v14081_v31 }
 0xb84   : > { %10312 = vmatpush3.msra.mxu1 %v4896_v37 }
 0xb85   : > { %v4425_v9 = vpop.f32.mrf.mxu0  ;;  %v4515_v5 = vpop.f32.mrf.mxu1  ;;  %10313 = vmatprep.subr.mxu1 %v14081_v31 }
 0xb86   : > { %10282 = vmatmul.mubr.msk.f32.gmra.mxu1 %vm2782_vm2, %v4425_v9  ;;  %10301 = vmatmul.mubr.msk.f32.gmra.mxu0 %vm2782_vm2, %v4515_v5 }
 0xb87   : > { %v10220_v16 = vpop.f32.mrf.mxu0  ;;  %v10245_v11 = vpop.f32.mrf.mxu1  ;;  %10284 = vmatprep.mubr.msk.f32.mxu1 %vm11295_vm0, %v14081_v31  ;;  %10303 = vmatprep.mubr.msk.f32.mxu0 %vm11295_vm0, %v14081_v31 }
 0xb88   : > { %10314 = vmatpush3.msra.mxu1 %v4895_v51 }
 0xb89   : > { %v4430_v17 = vpop.f32.mrf.mxu0  ;;  %v4520_v46 = vpop.f32.mrf.mxu1  ;;  %10315 = vmatprep.subr.mxu1 %v14081_v31 }
 0xb8a   : > { %10285 = vmatmul.mubr.msk.f32.gmra.mxu1 %vm2782_vm2, %v4430_v17  ;;  %10304 = vmatmul.mubr.msk.f32.gmra.mxu0 %vm2782_vm2, %v4520_v46 }
 0xb8b   : > { %v10223_v2 = vpop.f32.mrf.mxu0  ;;  %v10248_v13 = vpop.f32.mrf.mxu1  ;;  %10287 = vmatprep.mubr.msk.f32.mxu1 %vm11295_vm0, %v14081_v31  ;;  %10306 = vmatprep.mubr.msk.f32.mxu0 %vm11295_vm0, %v14081_v31 }
 0xb8c   : > { %10316 = vmatpush3.msra.mxu1 %v4894_v52 }
 0xb8d   : > { %v4435_v55 = vpop.f32.mrf.mxu0  ;;  %v4525_v33 = vpop.f32.mrf.mxu1  ;;  %10355 = vmatprep.subr.mxu1 %v14081_v31 }
 0xb8e   : > { %10288 = vmatmul.mubr.msk.f32.gmra.mxu1 %vm2782_vm2, %v4435_v55  ;;  %10307 = vmatmul.mubr.msk.f32.gmra.mxu0 %vm2782_vm2, %v4525_v33  ;;  %v8728_v33 = vld [vmem:[%s14086_s9] ss:$0 sm:$0xff] }
 0xb8f   : > { %v10226_v1 = vpop.f32.mrf.mxu0  ;;  %v10251_v19 = vpop.f32.mrf.mxu1  ;;  %10317 = vmatprep.mubr.msk.f32.mxu1 %vm11295_vm0, %v14081_v31  ;;  %10340 = vmatprep.mubr.msk.f32.mxu0 %vm11295_vm0, %v14081_v31 }
 0xb90   : > { %v3631_v1 = vadd.f32 %v8728_v33, %v12634_v34 }
 0xb91   : > { %v4615_v43 = vpop.f32.mrf.mxu0 }
 0xb93   : > { %v10258_v61 = vpop.f32.mrf.mxu0 }
 0xb94   : > { %v3636_v61 = vadd.f32 %v8728_v33, %v12636_v35  ;;  %v3646_v35 = vadd.f32 %v8728_v33, %v12640_v48 }
 0xb95   : > { %v4620_v14 = vpop.f32.mrf.mxu0 }
 0xb97   : > { %v10261_v60 = vpop.f32.mrf.mxu0 }
 0xb99   : > { %v4625_v21 = vpop.f32.mrf.mxu0 }
 0xb9b   : > { %v10264_v38 = vpop.f32.mrf.mxu0 }
 0xb9d   : > { %v4630_v27 = vpop.f32.mrf.mxu0 }
 0xb9f   : > { %v10267_v15 = vpop.f32.mrf.mxu0 }
 0xba1   : > { %v4635_v47 = vpop.f32.mrf.mxu0 }
 0xba3   : > { %v10270_v12 = vpop.f32.mrf.mxu0 }
 0xc3e   : > { %v4720_v32 = vpop.f32.mrf.mxu1  ;;  %v4828_v40 = vpop.f32.mrf.mxu0 }
 0xc3f   : > { %v4721_v54 = vadd.f32 %v4720_v32, %v4615_v43 }
 0xc40   : > { %v10277_v53 = vpop.f32.mrf.mxu1  ;;  %v10296_v44 = vpop.f32.mrf.mxu0 }
 0xc41   : > { %v4852_v50 = vadd.f32 %v4828_v40, %v4721_v54 }
 0xc42   : > { %v4725_v58 = vpop.f32.mrf.mxu1  ;;  %v4833_v36 = vpop.f32.mrf.mxu0 }
 0xc43   : > { %v4864_v23 = vadd.f32 %v8793_v20, %v4852_v50  ;;  %v4726_v29 = vadd.f32 %v4725_v58, %v4620_v14 }
 0xc44   : > { %v10280_v57 = vpop.f32.mrf.mxu1  ;;  %v10299_v39 = vpop.f32.mrf.mxu0 }
 0xc45   : > { %v4853_v22 = vadd.f32 %v4833_v36, %v4726_v29  ;;  %4874 = vrot.lane.b32.xlu1 %v4864_v23, %s14003_s5 }
 0xc46   : > { %v4730_v63 = vpop.f32.mrf.mxu1  ;;  %v4838_v25 = vpop.f32.mrf.mxu0 }
 0xc47   : > { %v4865_v59 = vadd.f32 %v8793_v20, %v4853_v22  ;;  %v4731_v28 = vadd.f32 %v4730_v63, %v4625_v21  ;;  %v3641_v21 = vadd.f32 %v8728_v33, %v12638_v45  ;;  %v3651_v45 = vadd.f32 %v8728_v33, %v12642_v56 }
 0xc48   : > { %v10283_v7 = vpop.f32.mrf.mxu1  ;;  %v10302_v18 = vpop.f32.mrf.mxu0 }
 0xc49   : > { %v4854_v62 = vadd.f32 %v4838_v25, %v4731_v28  ;;  %4876 = vrot.lane.b32.xlu0 %v4865_v59, %s14003_s5 }
 0xc4a   : > { %v4735_v26 = vpop.f32.mrf.mxu1  ;;  %v4843_v41 = vpop.f32.mrf.mxu0 }
 0xc4b   : > { %v4866_v42 = vadd.f32 %v8793_v20, %v4854_v62  ;;  %v4736_v6 = vadd.f32 %v4735_v26, %v4630_v27 }
 0xc4c   : > { %v10286_v24 = vpop.f32.mrf.mxu1  ;;  %v10305_v0 = vpop.f32.mrf.mxu0 }
 0xc4d   : > { %v4855_v9 = vadd.f32 %v4843_v41, %v4736_v6  ;;  %4878 = vrot.lane.b32.xlu1 %v4866_v42, %s14003_s5 }
 0xc4e   : > { %v4740_v5 = vpop.f32.mrf.mxu1  ;;  %v4848_v16 = vpop.f32.mrf.mxu0 }
 0xc4f   : > { %v4867_v11 = vadd.f32 %v8793_v20, %v4855_v9  ;;  %v4741_v17 = vadd.f32 %v4740_v5, %v4635_v47 }
 0xc50   : > { %v10289_v46 = vpop.f32.mrf.mxu1  ;;  %v10308_v2 = vpop.f32.mrf.mxu0 }
 0xc51   : > { %v4856_v13 = vadd.f32 %v4848_v16, %v4741_v17  ;;  %4880 = vrot.lane.b32.xlu0 %v4867_v11, %s14003_s5 }
 0xc53   : > { %v4868_v55 = vadd.f32 %v8793_v20, %v4856_v13 }
 0xc55   : > { %4882 = vrot.lane.b32.xlu1 %v4868_v55, %s14003_s5  ;;  %s14087_s5 = sld [smem:[#allocation18_spill]] }
 0xc5b   : > { %v8799_v8 = vld [vmem:[%s14087_s5] ss:$0 sm:$0xff] }
 0xcb7   : > { %v4875_v19 = vpop.permute.xlu1 %4874 }
 0xcb8   : > { %v4889_v43 = vsel %vm2782_vm2, %v3631_v1, %v4875_v19 }
 0xcb9   : > { %10318 = vmatmul.mubr.msk.f32.vlgmr.msra.gmra.mxu1 %vm2577_vm1, %v4889_v43 }
 0xcba   : > { %10320 = vmatprep.mubr.msk.f32.mxu1 %vm11295_vm0, %v14081_v31 }
 0xcbb   : > { %v4877_v14 = vpop.permute.xlu0 %4876 }
 0xcbc   : > { %v4890_v60 = vsel %vm2782_vm2, %v3636_v61, %v4877_v14  ;;  %v5112_v61 = vld [vmem:[%s14088_s29 + $0x18] sm:$0xff]  ;;  %v5111_v14 = vld [vmem:[%s14088_s29 + $0x10] sm:$0xff] }
 0xcbd   : > { %10321 = vmatmul.mubr.msk.f32.gmra.mxu1 %vm2577_vm1, %v4890_v60  ;;  %10333 = vmatpush3.msra.mxu0 %v5112_v61  ;;  %v5110_v60 = vld [vmem:[%s14088_s29 + $0x8] sm:$0xff] }
 0xcbe   : > { %10323 = vmatprep.mubr.msk.f32.mxu1 %vm11295_vm0, %v14081_v31  ;;  %10334 = vmatprep.subr.mxu0 %v14081_v31 }
 0xcbf   : > { %v4879_v34 = vpop.permute.xlu1 %4878  ;;  %10335 = vmatpush3.msra.mxu0 %v5111_v14 }
 0xcc0   : > { %v4891_v38 = vsel %vm2782_vm2, %v3641_v21, %v4879_v34  ;;  %10336 = vmatprep.subr.mxu0 %v14081_v31  ;;  %v5109_v21 = vld [vmem:[%s14088_s29] sm:$0xff] }
 0xcc1   : > { %10324 = vmatmul.mubr.msk.f32.gmra.mxu1 %vm2577_vm1, %v4891_v38  ;;  %10337 = vmatpush3.msra.mxu0 %v5110_v60 }
 0xcc2   : > { %10326 = vmatprep.mubr.msk.f32.mxu1 %vm11295_vm0, %v14081_v31  ;;  %10338 = vmatprep.subr.mxu0 %v14081_v31 }
 0xcc3   : > { %v4881_v27 = vpop.permute.xlu0 %4880  ;;  %10339 = vmatpush3.msra.mxu0 %v5109_v21 }
 0xcc4   : > { %v4892_v15 = vsel %vm2782_vm2, %v3646_v35, %v4881_v27  ;;  %10402 = vmatprep.subr.mxu0 %v14081_v31 }
 0xcc5   : > { %10327 = vmatmul.mubr.msk.f32.gmra.mxu1 %vm2577_vm1, %v4892_v15 }
 0xcc6   : > { %10329 = vmatprep.mubr.msk.f32.mxu1 %vm11295_vm0, %v14081_v31 }
 0xcc7   : > { %v4883_v47 = vpop.permute.xlu1 %4882 }
 0xcc8   : > { %v4893_v12 = vsel %vm2782_vm2, %v3651_v45, %v4883_v47 }
 0xcc9   : > { %10330 = vmatmul.mubr.msk.f32.gmra.mxu1 %vm2577_vm1, %v4893_v12 }
 0xcca   : > { %10387 = vmatprep.mubr.msk.f32.mxu1 %vm11295_vm0, %v14081_v31 }
 0xd79   : > { %v4979_v48 = vpop.f32.mrf.mxu1 }
 0xd7a   : > { %v5003_v37 = vadd.f32 %v4979_v48, %v12157_v30 }
 0xd7b   : > { %v10319_v51 = vpop.f32.mrf.mxu1 }
 0xd7c   : > { %v12881_v52 = vadd.f32 %v8799_v8, %v5003_v37 }
 0xd7d   : > { %v4984_v32 = vpop.f32.mrf.mxu1 }
 0xd7e   : > { %v5004_v56 = vadd.f32 %v4984_v32, %v12161_v49  ;;  %v5022_v40 = vsel %vm2577_vm1, %v12881_v52, 0.0 }
 0xd7f   : > { %v10322_v54 = vpop.f32.mrf.mxu1  ;;  %5023 = vadd.xlane.f32.xlu0 %v5022_v40 }
 0xd80   : > { %v12886_v20 = vadd.f32 %v8799_v8, %v5004_v56  ;;  %v8800_v54 = vld [vmem:[%s14089_s11] ss:$0 sm:$0xff] }
 0xd81   : > { %v4989_v53 = vpop.f32.mrf.mxu1 }
 0xd82   : > { %v5005_v44 = vadd.f32 %v4989_v53, %v12165_v3  ;;  %v5025_v50 = vsel %vm2577_vm1, %v12886_v20, 0.0 }
 0xd83   : > { %v10325_v30 = vpop.f32.mrf.mxu1  ;;  %5026 = vadd.xlane.f32.xlu1 %v5025_v50  ;;  %v8801_v50 = vld [vmem:[%s14090_s26] ss:$0 sm:$0xff]  ;;  %s14092_s26 = sld [smem:[#allocation23_spill]] }
 0xd84   : > { %v12891_v58 = vadd.f32 %v8799_v8, %v5005_v44 }
 0xd85   : > { %v4994_v36 = vpop.f32.mrf.mxu1 }
 0xd86   : > { %v5006_v49 = vadd.f32 %v4994_v36, %v12169_v4  ;;  %v5028_v23 = vsel %vm2577_vm1, %v12891_v58, 0.0 }
 0xd87   : > { %5029 = vadd.xlane.f32.xlu0 %v5028_v23  ;;  %v10328_v29 = vpop.f32.mrf.mxu1 }
 0xd88   : > { %v12896_v57 = vadd.f32 %v8799_v8, %v5006_v49 }
 0xd89   : > { %v4999_v39 = vpop.f32.mrf.mxu1  ;;  %s14093_s16 = smov %s14092_s26 }
 0xd8a   : > { %v5007_v3 = vadd.f32 %v4999_v39, %v12173_v10  ;;  %v5031_v22 = vsel %vm2577_vm1, %v12896_v57, 0.0 }
 0xd8b   : > { %5032 = vadd.xlane.f32.xlu0 %v5031_v22  ;;  %v10331_v63 = vpop.f32.mrf.mxu1 }
 0xd8c   : > { %v12901_v25 = vadd.f32 %v8799_v8, %v5007_v3 }
 0xd8e   : > { %v5034_v4 = vsel %vm2577_vm1, %v12901_v25, 0.0 }
 0xd8f   : > { %5035 = vadd.xlane.f32.xlu0 %v5034_v4 }
 0xe08   : > { %v5024_v59 = vpop.xlane.xlu0 %5023 }
 0xe09   : > { %v5037_v28 = vmul.f32 0.03125, %v5024_v59 }
 0xe0b   : > { %v5042_v7 = vsub.f32 %v12881_v52, %v5037_v28 }
 0xe0c   : > { %v5027_v18 = vpop.xlane.xlu1 %5026 }
 0xe0d   : > { %v5038_v62 = vmul.f32 0.03125, %v5027_v18  ;;  %v5047_v26 = vmul.f32 %v5042_v7, %v5042_v7 }
 0xe0f   : > { %v12907_v10 = vsub.f32 %v12886_v20, %v5038_v62  ;;  %v5052_v41 = vsel %vm2577_vm1, %v5047_v26, 0.0 }
 0xe10   : > { %v5030_v42 = vpop.xlane.xlu0 %5029  ;;  %5053 = vadd.xlane.f32.xlu1 %v5052_v41 }
 0xe11   : > { %v5039_v6 = vmul.f32 0.03125, %v5030_v42  ;;  %v5048_v24 = vmul.f32 %v12907_v10, %v12907_v10  ;;  %v5375_v42 = vld [vmem:[%s14092_s26 + $0x78] sm:$0xff]  ;;  %s14094_s26 = sld [smem:[#allocation22_spill]] }
 0xe12   : > { %10356 = vmatpush3.msra.mxu1 %v5375_v42 }
 0xe13   : > { %v5044_v0 = vsub.f32 %v12891_v58, %v5039_v6  ;;  %v5055_v9 = vsel %vm2577_vm1, %v5048_v24, 0.0  ;;  %10357 = vmatprep.subr.mxu1 %v14081_v31  ;;  %v5374_v6 = vld [vmem:[%s14093_s16 + $0x70] sm:$0xff]  ;;  %v5373_v24 = vld [vmem:[%s14093_s16 + $0x68] sm:$0xff] }
 0xe14   : > { %v5033_v5 = vpop.xlane.xlu0 %5032  ;;  %5056 = vadd.xlane.f32.xlu0 %v5055_v9  ;;  %10358 = vmatpush3.msra.mxu1 %v5374_v6  ;;  %v5371_v9 = vld [vmem:[%s14093_s16 + $0x58] sm:$0xff] }
 0xe15   : > { %v5040_v16 = vmul.f32 0.03125, %v5033_v5  ;;  %v5049_v11 = vmul.f32 %v5044_v0, %v5044_v0  ;;  %10359 = vmatprep.subr.mxu1 %v14081_v31  ;;  %v5370_v5 = vld [vmem:[%s14093_s16 + $0x50] sm:$0xff] }
 0xe16   : > { %10360 = vmatpush3.msra.mxu1 %v5373_v24 }
 0xe17   : > { %v5045_v17 = vsub.f32 %v12896_v57, %v5040_v16  ;;  %v5058_v46 = vsel %vm2577_vm1, %v5049_v11, 0.0  ;;  %10361 = vmatprep.subr.mxu1 %v14081_v31  ;;  %v5369_v16 = vld [vmem:[%s14093_s16 + $0x48] sm:$0xff]  ;;  %v5368_v11 = vld [vmem:[%s14093_s16 + $0x40] sm:$0xff]  ;;  %s14095_s15 = smov %s14094_s26 }
 0xe18   : > { %5059 = vadd.xlane.f32.xlu1 %v5058_v46  ;;  %v5036_v2 = vpop.xlane.xlu0 %5035  ;;  %v5366_v46 = vld [vmem:[%s14093_s16 + $0x30] sm:$0xff]  ;;  %v8802_v61 = vld [vmem:[%s14094_s26] ss:$0 sm:$0xff]  ;;  %s14096_s26 = sld [smem:[#allocation24_spill]] }
 0xe19   : > { %v5041_v13 = vmul.f32 0.03125, %v5036_v2  ;;  %v5050_v55 = vmul.f32 %v5045_v17, %v5045_v17  ;;  %v5365_v2 = vld [vmem:[%s14093_s16 + $0x28] sm:$0xff] }
 0xe1b   : > { %v5046_v33 = vsub.f32 %v12901_v25, %v5041_v13  ;;  %v5061_v1 = vsel %vm2577_vm1, %v5050_v55, 0.0  ;;  %v5364_v13 = vld [vmem:[%s14093_s16 + $0x20] sm:$0xff]  ;;  %v5363_v55 = vld [vmem:[%s14093_s16 + $0x18] sm:$0xff] }
 0xe1c   : > { %5062 = vadd.xlane.f32.xlu0 %v5061_v1  ;;  %v5361_v1 = vld [vmem:[%s14093_s16 + $0x8] sm:$0xff] }
 0xe1d   : > { %v5051_v19 = vmul.f32 %v5046_v33, %v5046_v33 }
 0xe1e   : > { %s14097_s12 = smov %s14096_s26 }
 0xe1f   : > { %v5064_v43 = vsel %vm2577_vm1, %v5051_v19, 0.0  ;;  %v5360_v19 = vld [vmem:[%s14093_s16] sm:$0xff] }
 0xe20   : > { %5065 = vadd.xlane.f32.xlu1 %v5064_v43  ;;  %v8812_v43 = vld [vmem:[%s14051_s3 + $0x38] sm:$0xff] }
 0xe99   : > { %v5054_v34 = vpop.xlane.xlu1 %5053 }
 0xe9a   : > { %v5067_v38 = vmul.f32 0.03125, %v5054_v34 }
 0xe9c   : > { %v5072_v35 = vadd.f32 1e-06, %v5067_v38 }
 0xe9d   : > { %v5057_v27 = vpop.xlane.xlu0 %5056 }
 0xe9e   : > { %11054 = vrsqrt.f32 %v5072_v35  ;;  %v5068_v15 = vmul.f32 0.03125, %v5057_v27 }
 0xea0   : > { %v5073_v45 = vadd.f32 1e-06, %v5068_v15 }
 0xea1   : > { %v5060_v47 = vpop.xlane.xlu1 %5059 }
 0xea2   : > { %11056 = vrsqrt.f32 %v5073_v45  ;;  %v5069_v12 = vmul.f32 0.03125, %v5060_v47 }
 0xea4   : > { %v5074_v48 = vadd.f32 1e-06, %v5069_v12 }
 0xea5   : > { %v5063_v8 = vpop.xlane.xlu0 %5062 }
 0xea6   : > { %11058 = vrsqrt.f32 %v5074_v48  ;;  %v5070_v37 = vmul.f32 0.03125, %v5063_v8 }
 0xea8   : > { %v5075_v51 = vadd.f32 1e-06, %v5070_v37 }
 0xea9   : > { %v5066_v32 = vpop.xlane.xlu1 %5065 }
 0xeaa   : > { %11060 = vrsqrt.f32 %v5075_v51  ;;  %v5071_v56 = vmul.f32 0.03125, %v5066_v32 }
 0xeab   : > { %v11055_v40 = vpop.eup %11054 }
 0xeac   : > { %v5082_v53 = vmul.f32 %v11055_v40, %v5042_v7  ;;  %v5076_v44 = vadd.f32 1e-06, %v5071_v56 }
 0xeae   : > { %v5093_v30 = vmul.f32 %v8800_v54, %v5082_v53  ;;  %11062 = vrsqrt.f32 %v5076_v44 }
 0xeaf   : > { %v11057_v36 = vpop.eup %11056 }
 0xeb0   : > { %v5104_v49 = vadd.f32 %v8801_v50, %v5093_v30  ;;  %v5083_v23 = vmul.f32 %v11057_v36, %v12907_v10 }
 0xeb2   : > { %10341 = vmatmul.mubr.msk.f32.vlgmr.msra.gmra.mxu0 %vm2577_vm1, %v5104_v49  ;;  %v5094_v29 = vmul.f32 %v8800_v54, %v5083_v23 }
 0xeb3   : > { %v11059_v39 = vpop.eup %11058  ;;  %10343 = vmatprep.mubr.msk.f32.mxu0 %vm11295_vm0, %v14081_v31  ;;  %10403 = vmatpush3.msra.mxu0 %v8812_v43 }
 0xeb4   : > { %v5084_v3 = vmul.f32 %v11059_v39, %v5044_v0  ;;  %v5105_v22 = vadd.f32 %v8801_v50, %v5094_v29  ;;  %v5372_v0 = vld [vmem:[%s14093_s16 + $0x60] sm:$0xff]  ;;  %10404 = vmatprep.subr.mxu0 %v14081_v31 }
 0xeb5   : > { %10362 = vmatpush3.msra.mxu1 %v5372_v0 }
 0xeb6   : > { %10344 = vmatmul.mubr.msk.f32.gmra.mxu0 %vm2577_vm1, %v5105_v22  ;;  %v5095_v63 = vmul.f32 %v8800_v54, %v5084_v3  ;;  %10363 = vmatprep.subr.mxu1 %v14081_v31 }
 0xeb7   : > { %v11061_v4 = vpop.eup %11060  ;;  %10346 = vmatprep.mubr.msk.f32.mxu0 %vm11295_vm0, %v14081_v31  ;;  %10364 = vmatpush3.msra.mxu1 %v5371_v9 }
 0xeb8   : > { %v5085_v59 = vmul.f32 %v11061_v4, %v5045_v17  ;;  %v5106_v28 = vadd.f32 %v8801_v50, %v5095_v63  ;;  %10365 = vmatprep.subr.mxu1 %v14081_v31  ;;  %v5367_v17 = vld [vmem:[%s14093_s16 + $0x38] sm:$0xff] }
 0xeb9   : > { %10366 = vmatpush3.msra.mxu1 %v5370_v5 }
 0xeba   : > { %10347 = vmatmul.mubr.msk.f32.gmra.mxu0 %vm2577_vm1, %v5106_v28  ;;  %v5096_v7 = vmul.f32 %v8800_v54, %v5085_v59  ;;  %10367 = vmatprep.subr.mxu1 %v14081_v31 }
 0xebb   : > { %v11063_v18 = vpop.eup %11062  ;;  %10349 = vmatprep.mubr.msk.f32.mxu0 %vm11295_vm0, %v14081_v31  ;;  %10368 = vmatpush3.msra.mxu1 %v5369_v16 }
 0xebc   : > { %v5086_v62 = vmul.f32 %v11063_v18, %v5046_v33  ;;  %v5107_v26 = vadd.f32 %v8801_v50, %v5096_v7  ;;  %10369 = vmatprep.subr.mxu1 %v14081_v31  ;;  %v5362_v33 = vld [vmem:[%s14093_s16 + $0x10] sm:$0xff] }
 0xebd   : > { %10370 = vmatpush3.msra.mxu1 %v5368_v11 }
 0xebe   : > { %10350 = vmatmul.mubr.msk.f32.gmra.mxu0 %vm2577_vm1, %v5107_v26  ;;  %v5097_v10 = vmul.f32 %v8800_v54, %v5086_v62  ;;  %10371 = vmatprep.subr.mxu1 %v14081_v31 }
 0xebf   : > { %10352 = vmatprep.mubr.msk.f32.mxu0 %vm11295_vm0, %v14081_v31  ;;  %10372 = vmatpush3.msra.mxu1 %v5367_v17 }
 0xec0   : > { %v5108_v41 = vadd.f32 %v8801_v50, %v5097_v10  ;;  %10373 = vmatprep.subr.mxu1 %v14081_v31 }
 0xec1   : > { %10374 = vmatpush3.msra.mxu1 %v5366_v46 }
 0xec2   : > { %10353 = vmatmul.mubr.msk.f32.gmra.mxu0 %vm2577_vm1, %v5108_v41  ;;  %10375 = vmatprep.subr.mxu1 %v14081_v31 }
 0xec3   : > { %10410 = vmatprep.mubr.msk.f32.mxu0 %vm11295_vm0, %v14081_v31  ;;  %10376 = vmatpush3.msra.mxu1 %v5365_v2 }
 0xec4   : > { %10377 = vmatprep.subr.mxu1 %v14081_v31 }
 0xec5   : > { %10378 = vmatpush3.msra.mxu1 %v5364_v13 }
 0xec6   : > { %10379 = vmatprep.subr.mxu1 %v14081_v31 }
 0xec7   : > { %10380 = vmatpush3.msra.mxu1 %v5363_v55 }
 0xec8   : > { %10381 = vmatprep.subr.mxu1 %v14081_v31 }
 0xec9   : > { %10382 = vmatpush3.msra.mxu1 %v5362_v33 }
 0xeca   : > { %10383 = vmatprep.subr.mxu1 %v14081_v31 }
 0xecb   : > { %10384 = vmatpush3.msra.mxu1 %v5361_v1 }
 0xecc   : > { %10385 = vmatprep.subr.mxu1 %v14081_v31 }
 0xecd   : > { %10386 = vmatpush3.msra.mxu1 %v5360_v19 }
 0xece   : > { %10425 = vmatprep.subr.mxu1 %v14081_v31 }
 0xf72   : > { %v5201_v14 = vpop.f32.mrf.mxu0 }
 0xf73   : > { %v12980_v60 = vadd.f32 %v8802_v61, %v5201_v14 }
 0xf74   : > { %v10342_v21 = vpop.f32.mrf.mxu0 }
 0xf75   : > { %v12983_v34 = vmul.f32 0.70710677, %v12980_v60 }
 0xf76   : > { %v5206_v38 = vpop.f32.mrf.mxu0 }
 0xf77   : > { %v5235_v35 = vand.u32 2147483647, %v12983_v34  ;;  %v12986_v27 = vadd.f32 %v8802_v61, %v5206_v38  ;;  %vm5335_vm10 = vcmp.ge.f32.partialorder %v12983_v34, 0.0 }
 0xf78   : > { %v10345_v15 = vpop.f32.mrf.mxu0 }
 0xf79   : > { %v5240_v45 = vmul.f32 0.3275911, %v5235_v35  ;;  %v12989_v47 = vmul.f32 0.70710677, %v12986_v27  ;;  %v5305_v23 = vmul.f32 %v5235_v35, %v5235_v35 }
 0xf7a   : > { %v5211_v12 = vpop.f32.mrf.mxu0 }
 0xf7b   : > { %v5245_v48 = vadd.f32 1.0, %v5240_v45  ;;  %v5236_v8 = vand.u32 2147483647, %v12989_v47  ;;  %v12992_v37 = vadd.f32 %v8802_v61, %v5211_v12  ;;  %v5310_v59 = vsub.f32 0.0, %v5305_v23 }
 0xf7c   : > { %v10348_v51 = vpop.f32.mrf.mxu0  ;;  %vm5336_vm11 = vcmp.ge.f32.partialorder %v12989_v47, 0.0 }
 0xf7d   : > { %11064 = vrcp.f32 %v5245_v48  ;;  %v5241_v32 = vmul.f32 0.3275911, %v5236_v8  ;;  %v12995_v56 = vmul.f32 0.70710677, %v12992_v37  ;;  %v5306_v28 = vmul.f32 %v5236_v8, %v5236_v8 }
 0xf7e   : > { %v5216_v40 = vpop.f32.mrf.mxu0  ;;  %v5315_v41 = vmul.f32 1.442695, %v5310_v59 }
 0xf7f   : > { %v5246_v54 = vadd.f32 1.0, %v5241_v32  ;;  %v12997_v53 = vadd.f32 %v8802_v61, %v5216_v40  ;;  %v5237_v44 = vand.u32 2147483647, %v12995_v56  ;;  %v5311_v42 = vsub.f32 0.0, %v5306_v28 }
 0xf80   : > { %v10351_v50 = vpop.f32.mrf.mxu0  ;;  %vm5337_vm12 = vcmp.ge.f32.partialorder %v12995_v56, 0.0 }
 0xf81   : > { %11066 = vrcp.f32 %v5246_v54  ;;  %v13001_v30 = vmul.f32 0.70710677, %v12997_v53  ;;  %v5242_v36 = vmul.f32 0.3275911, %v5237_v44  ;;  %v5307_v24 = vmul.f32 %v5237_v44, %v5237_v44 }
 0xf82   : > { %v5221_v49 = vpop.f32.mrf.mxu0  ;;  %v5317_v17 = vmul.f32 1.442695, %v5311_v42  ;;  %v5228_v56 = vmul.f32 0.5, %v12997_v53  ;;  %v8811_v53 = vld [vmem:[%s14051_s3 + $0x30] sm:$0xff] }
 0xf83   : > { %v5238_v29 = vand.u32 2147483647, %v13001_v30  ;;  %v13004_v39 = vadd.f32 %v8802_v61, %v5221_v49  ;;  %v5247_v3 = vadd.f32 1.0, %v5242_v36  ;;  %v5312_v46 = vsub.f32 0.0, %v5307_v24  ;;  %10405 = vmatpush3.msra.mxu0 %v8811_v53 }
 0xf84   : > { %v10354_v22 = vpop.f32.mrf.mxu0  ;;  %vm5338_vm13 = vcmp.ge.f32.partialorder %v13001_v30, 0.0  ;;  %10406 = vmatprep.subr.mxu0 %v14081_v31 }
 0xf85   : > { %v5243_v63 = vmul.f32 0.3275911, %v5238_v29  ;;  %v13007_v4 = vmul.f32 0.70710677, %v13004_v39  ;;  %11068 = vrcp.f32 %v5247_v3  ;;  %v5308_v5 = vmul.f32 %v5238_v29, %v5238_v29 }
 0xf86   : > { %v5319_v14 = vmul.f32 1.442695, %v5312_v46  ;;  %v5229_v30 = vmul.f32 0.5, %v13004_v39  ;;  %v8809_v39 = vld [vmem:[%s14051_s3 + $0x20] sm:$0xff] }
 0xf87   : > { %v5248_v7 = vadd.f32 1.0, %v5243_v63  ;;  %v5239_v18 = vand.u32 2147483647, %v13007_v4  ;;  %v5313_v55 = vsub.f32 0.0, %v5308_v5  ;;  %vm5339_vm14 = vcmp.ge.f32.partialorder %v13007_v4, 0.0  ;;  %v8810_v4 = vld [vmem:[%s14051_s3 + $0x28] sm:$0xff] }
 0xf88   : > { %10407 = vmatpush3.msra.mxu0 %v8810_v4  ;;  %s14099_s3 = smov 104  }
 0xf89   : > { %11070 = vrcp.f32 %v5248_v7  ;;  %v5244_v62 = vmul.f32 0.3275911, %v5239_v18  ;;  %v5309_v33 = vmul.f32 %v5239_v18, %v5239_v18  ;;  %v5321_v45 = vmul.f32 1.442695, %v5313_v55  ;;  %10408 = vmatprep.subr.mxu0 %v14081_v31 }
 0xf8a   : > { %v11065_v26 = vpop.eup %11064  ;;  %10409 = vmatpush3.msra.mxu0 %v8809_v39 }
 0xf8b   : > { %v5260_v10 = vmul.f32 1.0614054, %v11065_v26  ;;  %v5249_v6 = vadd.f32 1.0, %v5244_v62  ;;  %v5314_v12 = vsub.f32 0.0, %v5309_v33  ;;  %10444 = vmatprep.subr.mxu0 %v14081_v31 }
 0xf8d   : > { %v5265_v0 = vadd.f32 -1.4531521, %v5260_v10  ;;  %11072 = vrcp.f32 %v5249_v6  ;;  %v5323_v49 = vmul.f32 1.442695, %v5314_v12 }
 0xf8e   : > { %v11067_v9 = vpop.eup %11066  ;;  %11074 = vpow2.f32 %v5315_v41 }
 0xf8f   : > { %v5270_v16 = vmul.f32 %v11065_v26, %v5265_v0  ;;  %v5261_v11 = vmul.f32 1.0614054, %v11067_v9  ;;  %11076 = vpow2.f32 %v5317_v17 }
 0xf90   : > { %11078 = vpow2.f32 %v5319_v14 }
 0xf91   : > { %v5275_v2 = vadd.f32 1.4214138, %v5270_v16  ;;  %v5266_v13 = vadd.f32 -1.4531521, %v5261_v11  ;;  %11080 = vpow2.f32 %v5321_v45 }
 0xf92   : > { %v11069_v1 = vpop.eup %11068  ;;  %11082 = vpow2.f32 %v5323_v49 }
 0xf93   : > { %v5280_v19 = vmul.f32 %v11065_v26, %v5275_v2  ;;  %v5271_v43 = vmul.f32 %v11067_v9, %v5266_v13  ;;  %v5262_v61 = vmul.f32 1.0614054, %v11069_v1 }
 0xf95   : > { %v5285_v21 = vadd.f32 -0.28449672, %v5280_v19  ;;  %v5276_v38 = vadd.f32 1.4214138, %v5271_v43  ;;  %v5267_v15 = vadd.f32 -1.4531521, %v5262_v61 }
 0xf96   : > { %v11071_v35 = vpop.eup %11070  ;;  %v5225_v19 = vmul.f32 0.5, %v12980_v60 }
 0xf97   : > { %v5290_v48 = vmul.f32 %v11065_v26, %v5285_v21  ;;  %v5281_v8 = vmul.f32 %v11067_v9, %v5276_v38  ;;  %v5263_v51 = vmul.f32 1.0614054, %v11071_v35  ;;  %v5272_v32 = vmul.f32 %v11069_v1, %v5267_v15 }
 0xf99   : > { %v5295_v40 = vadd.f32 0.2548296, %v5290_v48  ;;  %v5286_v54 = vadd.f32 -0.28449672, %v5281_v8  ;;  %v5268_v44 = vadd.f32 -1.4531521, %v5263_v51 }
 0xf9a   : > { %v11073_v50 = vpop.eup %11072  ;;  %v5277_v36 = vadd.f32 1.4214138, %v5272_v32  ;;  %v5226_v51 = vmul.f32 0.5, %v12986_v27 }
 0xf9b   : > { %v5300_v23 = vmul.f32 %v11065_v26, %v5295_v40  ;;  %v5291_v29 = vmul.f32 %v11067_v9, %v5286_v54  ;;  %v5273_v3 = vmul.f32 %v11071_v35, %v5268_v44  ;;  %v5264_v22 = vmul.f32 1.0614054, %v11073_v50  ;;  %v11075_v63 = vpop.eup %11074 }
 0xf9c   : > { %v5282_v59 = vmul.f32 %v11069_v1, %v5277_v36  ;;  %v11077_v0 = vpop.eup %11076 }
 0xf9d   : > { %v5325_v28 = vmul.f32 %v11075_v63, %v5300_v23  ;;  %v5296_v7 = vadd.f32 0.2548296, %v5291_v29  ;;  %v5278_v18 = vadd.f32 1.4214138, %v5273_v3  ;;  %v5269_v62 = vadd.f32 -1.4531521, %v5264_v22 }
 0xf9e   : > { %v5287_v10 = vadd.f32 -0.28449672, %v5282_v59 }
 0xf9f   : > { %v5330_v41 = vsub.f32 1.0, %v5325_v28  ;;  %v5301_v42 = vmul.f32 %v11067_v9, %v5296_v7  ;;  %v5283_v6 = vmul.f32 %v11071_v35, %v5278_v18  ;;  %v5274_v24 = vmul.f32 %v11073_v50, %v5269_v62  ;;  %v11079_v9 = vpop.eup %11078 }
 0xfa0   : > { %v5292_v5 = vmul.f32 %v11069_v1, %v5287_v10  ;;  %v11081_v12 = vpop.eup %11080 }
 0xfa1   : > { %v5340_v16 = vsub.f32 0.0, %v5330_v41  ;;  %v5326_v11 = vmul.f32 %v11077_v0, %v5301_v42  ;;  %v5288_v26 = vadd.f32 -0.28449672, %v5283_v6  ;;  %v5279_v17 = vadd.f32 1.4214138, %v5274_v24  ;;  %v11083_v36 = vpop.eup %11082 }
 0xfa2   : > { %v5297_v46 = vadd.f32 0.2548296, %v5292_v5 }
 0xfa3   : > { %v5345_v2 = vsel %vm5335_vm10, %v5330_v41, %v5340_v16  ;;  %v5331_v13 = vsub.f32 1.0, %v5326_v11  ;;  %v5293_v55 = vmul.f32 %v11071_v35, %v5288_v26  ;;  %v5284_v33 = vmul.f32 %v11073_v50, %v5279_v17  ;;  %v8808_v41 = vld [vmem:[%s14096_s26] ss:$0 sm:$0xff]  ;;  %s14098_s26 = smov 112  }
 0xfa4   : > { %v5350_v43 = vadd.f32 1.0, %v5345_v2  ;;  %v5302_v61 = vmul.f32 %v11069_v1, %v5297_v46 }
 0xfa5   : > { %v5341_v14 = vsub.f32 0.0, %v5331_v13  ;;  %v5298_v21 = vadd.f32 0.2548296, %v5293_v55  ;;  %v5289_v38 = vadd.f32 -0.28449672, %v5284_v33 }
 0xfa6   : > { %v5355_v15 = vmul.f32 %v5350_v43, %v5225_v19  ;;  %v5327_v45 = vmul.f32 %v11079_v9, %v5302_v61 }
 0xfa7   : > { %v5346_v48 = vsel %vm5336_vm11, %v5331_v13, %v5341_v14  ;;  %v5303_v34 = vmul.f32 %v11071_v35, %v5298_v21  ;;  %v5294_v8 = vmul.f32 %v11073_v50, %v5289_v38  ;;  %v5227_v35 = vmul.f32 0.5, %v12992_v37 }
 0xfa8   : > { %v5351_v32 = vadd.f32 1.0, %v5346_v48  ;;  %v5332_v40 = vsub.f32 1.0, %v5327_v45  ;;  %10388 = vmatmul.mubr.f32.vlgmr.msra.gmra.mxu1 %v5355_v15 }
 0xfa9   : > { %v5328_v60 = vmul.f32 %v11081_v12, %v5303_v34  ;;  %v5299_v54 = vadd.f32 0.2548296, %v5294_v8  ;;  %10390 = vmatprep.mubr.msk.f32.mxu1 %vm11295_vm0, %v14081_v31 }
 0xfaa   : > { %v5356_v1 = vmul.f32 %v5351_v32, %v5226_v51  ;;  %v5342_v44 = vsub.f32 0.0, %v5332_v40 }
 0xfab   : > { %v5333_v47 = vsub.f32 1.0, %v5328_v60  ;;  %v5304_v49 = vmul.f32 %v11073_v50, %v5299_v54 }
 0xfac   : > { %v5347_v23 = vsel %vm5337_vm12, %v5332_v40, %v5342_v44  ;;  %10391 = vmatmul.mubr.f32.gmra.mxu1 %v5356_v1 }
 0xfad   : > { %v5352_v27 = vadd.f32 1.0, %v5347_v23  ;;  %v5343_v29 = vsub.f32 0.0, %v5333_v47  ;;  %v5329_v3 = vmul.f32 %v11083_v36, %v5304_v49  ;;  %10393 = vmatprep.mubr.msk.f32.mxu1 %vm11295_vm0, %v14081_v31 }
 0xfaf   : > { %v5357_v22 = vmul.f32 %v5352_v27, %v5227_v35  ;;  %v5348_v63 = vsel %vm5338_vm13, %v5333_v47, %v5343_v29  ;;  %v5334_v59 = vsub.f32 1.0, %v5329_v3 }
 0xfb0   : > { %v5353_v28 = vadd.f32 1.0, %v5348_v63 }
 0xfb1   : > { %v5344_v50 = vsub.f32 0.0, %v5334_v59  ;;  %10394 = vmatmul.mubr.f32.gmra.mxu1 %v5357_v22 }
 0xfb2   : > { %v5358_v7 = vmul.f32 %v5353_v28, %v5228_v56  ;;  %10396 = vmatprep.mubr.msk.f32.mxu1 %vm11295_vm0, %v14081_v31 }
 0xfb3   : > { %v5349_v37 = vsel %vm5339_vm14, %v5334_v59, %v5344_v50 }
 0xfb4   : > { %v5354_v18 = vadd.f32 1.0, %v5349_v37 }
 0xfb5   : > { %10397 = vmatmul.mubr.f32.gmra.mxu1 %v5358_v7 }
 0xfb6   : > { %v5359_v62 = vmul.f32 %v5354_v18, %v5229_v30  ;;  %10399 = vmatprep.mubr.msk.f32.mxu1 %vm11295_vm0, %v14081_v31 }
 0xfb9   : > { %10400 = vmatmul.mubr.f32.gmra.mxu1 %v5359_v62 }
 0xfba   : > { %10429 = vmatprep.mubr.msk.f32.mxu1 %vm11295_vm0, %v14081_v31 }
0x1068   : > { %v5442_v10 = vpop.f32.mrf.mxu1 }
0x1069   : > { %v5466_v42 = vadd.f32 %v5442_v10, %v12881_v52 }
0x106a   : > { %v10389_v6 = vpop.f32.mrf.mxu1 }
0x106b   : > { %v5478_v24 = vadd.f32 %v8808_v41, %v5466_v42 }
0x106c   : > { %v5447_v0 = vpop.f32.mrf.mxu1 }
0x106d   : > { %v5467_v5 = vadd.f32 %v5447_v0, %v12886_v20  ;;  %10411 = vmatmul.mubr.msk.f32.vlgmr.msra.gmra.mxu0 %vm2577_vm1, %v5478_v24  ;;  %v8825_v24 = vld [vmem:[%s11367_s24 + $0x18] sm:$0xff]  ;;  %v8824_v0 = vld [vmem:[%s11367_s24 + $0x10] sm:$0xff] }
0x106e   : > { %v10392_v16 = vpop.f32.mrf.mxu1  ;;  %10413 = vmatprep.mubr.msk.f32.mxu0 %vm11295_vm0, %v14081_v31  ;;  %10426 = vmatpush3.msra.mxu1 %v8825_v24 }
0x106f   : > { %v5479_v11 = vadd.f32 %v8808_v41, %v5467_v5  ;;  %10427 = vmatprep.subr.mxu1 %v14081_v31 }
0x1070   : > { %10428 = vmatpush3.msra.mxu1 %v8824_v0 }
0x1071   : > { %v5452_v26 = vpop.f32.mrf.mxu1  ;;  %10414 = vmatmul.mubr.msk.f32.gmra.mxu0 %vm2577_vm1, %v5479_v11  ;;  %10469 = vmatprep.subr.mxu1 %v14081_v31 }
0x1072   : > { %v5468_v17 = vadd.f32 %v5452_v26, %v12891_v58  ;;  %10416 = vmatprep.mubr.msk.f32.mxu0 %vm11295_vm0, %v14081_v31 }
0x1073   : > { %v10395_v52 = vpop.f32.mrf.mxu1 }
0x1074   : > { %v5480_v46 = vadd.f32 %v8808_v41, %v5468_v17 }
0x1075   : > { %v5457_v2 = vpop.f32.mrf.mxu1 }
0x1076   : > { %v5469_v20 = vadd.f32 %v5457_v2, %v12896_v57  ;;  %10417 = vmatmul.mubr.msk.f32.gmra.mxu0 %vm2577_vm1, %v5480_v46  ;;  %v8814_v57 = vld [vmem:[%s14050_s8 + $0x1] ss:$0 sm:$0xff]  ;;  %s14100_s8 = smov 120  }
0x1077   : > { %v10398_v13 = vpop.f32.mrf.mxu1  ;;  %10419 = vmatprep.mubr.msk.f32.mxu0 %vm11295_vm0, %v14081_v31 }
0x1078   : > { %v5481_v55 = vadd.f32 %v8808_v41, %v5469_v20 }
0x1079   : > { %v5462_v33 = vpop.f32.mrf.mxu1 }
0x107a   : > { %v5470_v19 = vadd.f32 %v5462_v33, %v12901_v25  ;;  %10420 = vmatmul.mubr.msk.f32.gmra.mxu0 %vm2577_vm1, %v5481_v55 }
0x107b   : > { %v10401_v58 = vpop.f32.mrf.mxu1  ;;  %10422 = vmatprep.mubr.msk.f32.mxu0 %vm11295_vm0, %v14081_v31 }
0x107c   : > { %v5482_v43 = vadd.f32 %v8808_v41, %v5470_v19 }
0x107e   : > { %10423 = vmatmul.mubr.msk.f32.gmra.mxu0 %vm2577_vm1, %v5482_v43  ;;  %v8822_v43 = vld [vmem:[%s14049_s14 + $0x1] ss:$0 sm:$0xff]  ;;  %s14101_s14 = smov 96  }
0x107f   : > { %10454 = vmatprep.mubr.msk.f32.mxu0 %vm11295_vm0, %v14081_v31 }
0x112d   : > { %v5577_v61 = vpop.f32.mrf.mxu0 }
0x112e   : > { %v13058_v9 = vadd.f32 %v8814_v57, %v5577_v61 }
0x112f   : > { %v10412_v14 = vpop.f32.mrf.mxu0 }
0x1130   : > { %v5605_v25 = vsel %vm2577_vm1, %v13058_v9, 0.0  ;;  %v8823_v14 = vld [vmem:[%s11362_s19 + $0x1] ss:$0 sm:$0xff] }
0x1131   : > { %5606 = vadd.xlane.f32.xlu0 %v5605_v25  ;;  %v5582_v21 = vpop.f32.mrf.mxu0 }
0x1132   : > { %v13062_v38 = vadd.f32 %v8814_v57, %v5582_v21 }
0x1133   : > { %v10415_v15 = vpop.f32.mrf.mxu0 }
0x1134   : > { %v5608_v45 = vsel %vm2577_vm1, %v13062_v38, 0.0 }
0x1135   : > { %5609 = vadd.xlane.f32.xlu1 %v5608_v45 }
0x1136   : > { %v5587_v12 = vpop.f32.mrf.mxu0 }
0x1137   : > { %v13066_v48 = vadd.f32 %v8814_v57, %v5587_v12 }
0x1138   : > { %v10418_v34 = vpop.f32.mrf.mxu0 }
0x1139   : > { %v5611_v8 = vsel %vm2577_vm1, %v13066_v48, 0.0 }
0x113a   : > { %5612 = vadd.xlane.f32.xlu0 %v5611_v8  ;;  %v5592_v51 = vpop.f32.mrf.mxu0 }
0x113b   : > { %v13070_v32 = vadd.f32 %v8814_v57, %v5592_v51 }
0x113c   : > { %v10421_v40 = vpop.f32.mrf.mxu0 }
0x113d   : > { %v5614_v60 = vsel %vm2577_vm1, %v13070_v32, 0.0 }
0x113e   : > { %5615 = vadd.xlane.f32.xlu1 %v5614_v60  ;;  %v5597_v54 = vpop.f32.mrf.mxu0 }
0x113f   : > { %v13074_v1 = vadd.f32 %v8814_v57, %v5597_v54 }
0x1140   : > { %v10424_v44 = vpop.f32.mrf.mxu0 }
0x1141   : > { %v5617_v36 = vsel %vm2577_vm1, %v13074_v1, 0.0 }
0x1142   : > { %5618 = vadd.xlane.f32.xlu0 %v5617_v36 }
0x11ba   : > { %v5607_v47 = vpop.xlane.xlu0 %5606 }
0x11bb   : > { %v5620_v49 = vmul.f32 0.03125, %v5607_v47 }
0x11bd   : > { %v5625_v23 = vsub.f32 %v13058_v9, %v5620_v49 }
0x11be   : > { %v5610_v35 = vpop.xlane.xlu1 %5609 }
0x11bf   : > { %v5621_v27 = vmul.f32 0.03125, %v5610_v35  ;;  %v5630_v29 = vmul.f32 %v5625_v23, %v5625_v23 }
0x11c1   : > { %v5626_v3 = vsub.f32 %v13062_v38, %v5621_v27  ;;  %v5635_v22 = vsel %vm2577_vm1, %v5630_v29, 0.0 }
0x11c2   : > { %5636 = vadd.xlane.f32.xlu1 %v5635_v22 }
0x11c3   : > { %v5613_v63 = vpop.xlane.xlu0 %5612  ;;  %v5631_v59 = vmul.f32 %v5626_v3, %v5626_v3 }
0x11c4   : > { %v5622_v56 = vmul.f32 0.03125, %v5613_v63 }
0x11c5   : > { %v5638_v28 = vsel %vm2577_vm1, %v5631_v59, 0.0 }
0x11c6   : > { %v5627_v50 = vsub.f32 %v13066_v48, %v5622_v56  ;;  %5639 = vadd.xlane.f32.xlu0 %v5638_v28 }
0x11c7   : > { %v5616_v7 = vpop.xlane.xlu1 %5615 }
0x11c8   : > { %v5623_v37 = vmul.f32 0.03125, %v5616_v7  ;;  %v5632_v30 = vmul.f32 %v5627_v50, %v5627_v50 }
0x11ca   : > { %v5628_v18 = vsub.f32 %v13070_v32, %v5623_v37  ;;  %v5641_v62 = vsel %vm2577_vm1, %v5632_v30, 0.0 }
0x11cb   : > { %5642 = vadd.xlane.f32.xlu1 %v5641_v62  ;;  %v5619_v53 = vpop.xlane.xlu0 %5618 }
0x11cc   : > { %v5624_v4 = vmul.f32 0.03125, %v5619_v53  ;;  %v5633_v39 = vmul.f32 %v5628_v18, %v5628_v18 }
0x11ce   : > { %v5629_v10 = vsub.f32 %v13074_v1, %v5624_v4  ;;  %v5644_v41 = vsel %vm2577_vm1, %v5633_v39, 0.0 }
0x11cf   : > { %5645 = vadd.xlane.f32.xlu0 %v5644_v41 }
0x11d0   : > { %v5634_v42 = vmul.f32 %v5629_v10, %v5629_v10 }
0x11d2   : > { %v5647_v6 = vsel %vm2577_vm1, %v5634_v42, 0.0 }
0x11d3   : > { %5648 = vadd.xlane.f32.xlu1 %v5647_v6 }
0x124b   : > { %v5637_v5 = vpop.xlane.xlu1 %5636 }
0x124c   : > { %v5650_v16 = vmul.f32 0.03125, %v5637_v5 }
0x124e   : > { %v5655_v11 = vadd.f32 1e-06, %v5650_v16 }
0x124f   : > { %v5640_v26 = vpop.xlane.xlu0 %5639 }
0x1250   : > { %11084 = vrsqrt.f32 %v5655_v11  ;;  %v5651_v17 = vmul.f32 0.03125, %v5640_v26 }
0x1252   : > { %v5656_v52 = vadd.f32 1e-06, %v5651_v17 }
0x1254   : > { %11086 = vrsqrt.f32 %v5656_v52  ;;  %v5643_v46 = vpop.xlane.xlu1 %5642 }
0x1255   : > { %v5652_v2 = vmul.f32 0.03125, %v5643_v46 }
0x1257   : > { %v5657_v20 = vadd.f32 1e-06, %v5652_v2 }
0x1258   : > { %v5646_v13 = vpop.xlane.xlu0 %5645 }
0x1259   : > { %11088 = vrsqrt.f32 %v5657_v20  ;;  %v5653_v55 = vmul.f32 0.03125, %v5646_v13 }
0x125b   : > { %v5658_v33 = vadd.f32 1e-06, %v5653_v55 }
0x125c   : > { %v5649_v19 = vpop.xlane.xlu1 %5648 }
0x125d   : > { %v11085_v58 = vpop.eup %11084  ;;  %11090 = vrsqrt.f32 %v5658_v33  ;;  %v5654_v57 = vmul.f32 0.03125, %v5649_v19 }
0x125e   : > { %v5665_v61 = vmul.f32 %v11085_v58, %v5625_v23 }
0x125f   : > { %v5659_v25 = vadd.f32 1e-06, %v5654_v57 }
0x1260   : > { %v5676_v21 = vmul.f32 %v8822_v43, %v5665_v61 }
0x1261   : > { %v11087_v15 = vpop.eup %11086  ;;  %11092 = vrsqrt.f32 %v5659_v25 }
0x1262   : > { %v13094_v45 = vadd.f32 %v8823_v14, %v5676_v21  ;;  %v5666_v12 = vmul.f32 %v11087_v15, %v5626_v3 }
0x1264   : > { %10430 = vmatmul.mubr.msk.f32.vlgmr.msra.gmra.mxu1 %vm2782_vm2, %v13094_v45  ;;  %v5677_v34 = vmul.f32 %v8822_v43, %v5666_v12 }
0x1265   : > { %10432 = vmatprep.mubr.msk.f32.mxu1 %vm11295_vm0, %v14081_v31 }
0x1266   : > { %v11089_v8 = vpop.eup %11088  ;;  %v13100_v51 = vadd.f32 %v8823_v14, %v5677_v34 }
0x1267   : > { %v5667_v40 = vmul.f32 %v11089_v8, %v5627_v50  ;;  %v8827_v50 = vld [vmem:[%s11372_s30 + $0x1] ss:$0 sm:$0xff]  ;;  %v11187_v8 = vld [vmem:[%s11322_s13 + $0x8] sm:$0xff] }
0x1268   : > { %10433 = vmatmul.mubr.msk.f32.gmra.mxu1 %vm2782_vm2, %v13100_v51 }
0x1269   : > { %10435 = vmatprep.mubr.msk.f32.mxu1 %vm11295_vm0, %v14081_v31  ;;  %v5678_v60 = vmul.f32 %v8822_v43, %v5667_v40 }
0x126a   : > { %v11091_v54 = vpop.eup %11090 }
0x126b   : > { %v5668_v44 = vmul.f32 %v11091_v54, %v5628_v18  ;;  %v13106_v36 = vadd.f32 %v8823_v14, %v5678_v60 }
0x126d   : > { %10436 = vmatmul.mubr.msk.f32.gmra.mxu1 %vm2782_vm2, %v13106_v36  ;;  %v5679_v47 = vmul.f32 %v8822_v43, %v5668_v44 }
0x126e   : > { %v11093_v49 = vpop.eup %11092  ;;  %10438 = vmatprep.mubr.msk.f32.mxu1 %vm11295_vm0, %v14081_v31 }
0x126f   : > { %v5669_v23 = vmul.f32 %v11093_v49, %v5629_v10  ;;  %v13112_v35 = vadd.f32 %v8823_v14, %v5679_v47  ;;  %v11188_v49 = vld [vmem:[%s11322_s13 + $0x10] sm:$0xff] }
0x1271   : > { %10439 = vmatmul.mubr.msk.f32.gmra.mxu1 %vm2782_vm2, %v13112_v35  ;;  %v5680_v27 = vmul.f32 %v8822_v43, %v5669_v23 }
0x1272   : > { %10441 = vmatprep.mubr.msk.f32.mxu1 %vm11295_vm0, %v14081_v31 }
0x1273   : > { %v13118_v29 = vadd.f32 %v8823_v14, %v5680_v27  ;;  %v11186_v14 = vld [vmem:[%s11322_s13] sm:$0xff] }
0x1275   : > { %10442 = vmatmul.mubr.msk.f32.gmra.mxu1 %vm2782_vm2, %v13118_v29 }
0x1276   : > { %10479 = vmatprep.mubr.msk.f32.mxu1 %vm11295_vm0, %v14081_v31 }
0x1324   : > { %v5784_v3 = vpop.f32.mrf.mxu1 }
0x1325   : > { %v13137_v39 = vadd.f32 %v8827_v50, %v5784_v3 }
0x1326   : > { %v10431_v22 = vpop.f32.mrf.mxu1 }
0x1328   : > { %v5789_v63 = vpop.f32.mrf.mxu1 }
0x1329   : > { %v13139_v10 = vadd.f32 %v8827_v50, %v5789_v63 }
0x132a   : > { %v10434_v59 = vpop.f32.mrf.mxu1 }
0x132b   : > { %v11189_v59 = vld [vmem:[%s11322_s13 + $0x18] sm:$0xff] }
0x132d   : > { %v5794_v56 = vpop.f32.mrf.mxu1 }
0x132e   : > { %v13129_v62 = vadd.f32 %v8827_v50, %v5794_v56 }
0x132f   : > { %v10437_v28 = vpop.f32.mrf.mxu1 }
0x1331   : > { %v5799_v7 = vpop.f32.mrf.mxu1 }
0x1332   : > { %v13125_v37 = vadd.f32 %v8827_v50, %v5799_v7 }
0x1333   : > { %v10440_v30 = vpop.f32.mrf.mxu1 }
0x1334   : > { %5819 = vrot.lane.b32.xlu1 %v13125_v37, %s14098_s26 }
0x1335   : > { %v5804_v18 = vpop.f32.mrf.mxu1 }
0x1336   : > { %v13131_v53 = vadd.f32 %v8827_v50, %v5804_v18  ;;  %v11190_v18 = vld [vmem:[%s11322_s13 + $0x20] sm:$0xff] }
0x1337   : > { %v10443_v4 = vpop.f32.mrf.mxu1 }
0x1338   : > { %5817 = vrot.lane.b32.xlu1 %v13129_v62, %s14098_s26  ;;  %5821 = vrot.lane.b32.xlu0 %v13131_v53, %s14098_s26 }
0x133c   : > { %5815 = vrot.lane.b32.xlu1 %v13139_v10, %s14098_s26  ;;  %5813 = vrot.lane.b32.xlu0 %v13137_v39, %s14098_s26 }
0x1340   : > { %6136 = vrot.lane.b32.xlu1 %v13131_v53, %s14099_s3  ;;  %6134 = vrot.lane.b32.xlu0 %v13125_v37, %s14099_s3 }
0x1344   : > { %6132 = vrot.lane.b32.xlu1 %v13129_v62, %s14099_s3  ;;  %6130 = vrot.lane.b32.xlu0 %v13139_v10, %s14099_s3 }
0x1348   : > { %6128 = vrot.lane.b32.xlu1 %v13137_v39, %s14099_s3  ;;  %6118 = vrot.lane.b32.xlu0 %v13137_v39, %s14100_s8  ;;  %s14102_s3 = smov 88  }
0x134c   : > { %6120 = vrot.lane.b32.xlu1 %v13139_v10, %s14100_s8  ;;  %6122 = vrot.lane.b32.xlu0 %v13129_v62, %s14100_s8 }
0x1350   : > { %6124 = vrot.lane.b32.xlu1 %v13125_v37, %s14100_s8  ;;  %6126 = vrot.lane.b32.xlu0 %v13131_v53, %s14100_s8  ;;  %s14103_s8 = smov 8  }
0x1354   : > { %6004 = vrot.lane.b32.xlu1 %v13125_v37, %s14101_s14  ;;  %6006 = vrot.lane.b32.xlu0 %v13131_v53, %s14101_s14 }
0x1358   : > { %6002 = vrot.lane.b32.xlu1 %v13129_v62, %s14101_s14 }
0x135c   : > { %6000 = vrot.lane.b32.xlu1 %v13139_v10, %s14101_s14 }
0x13a6   : > { %v5820_v41 = vpop.permute.xlu1 %5819 }
0x13aa   : > { %v5818_v42 = vpop.permute.xlu1 %5817  ;;  %v5822_v6 = vpop.permute.xlu0 %5821 }
0x13ab   : > { %10445 = vmatpush3.xpose.msk.msra.mxu0 %vm2903_vm3, %v5822_v6 }
0x13ac   : > { %10446 = vmatprep.subr.mxu0 %v14081_v31 }
0x13ae   : > { %v5816_v24 = vpop.permute.xlu1 %5815  ;;  %v5814_v0 = vpop.permute.xlu0 %5813 }
0x13af   : > { %10447 = vmatpush3.xpose.msk.msra.mxu0 %vm2903_vm3, %v5820_v41 }
0x13b0   : > { %10448 = vmatprep.subr.mxu0 %v14081_v31 }
0x13b2   : > { %v6137_v5 = vpop.permute.xlu1 %6136  ;;  %v6135_v16 = vpop.permute.xlu0 %6134 }
0x13b3   : > { %10449 = vmatpush3.xpose.msk.msra.mxu0 %vm2903_vm3, %v5818_v42 }
0x13b4   : > { %10450 = vmatprep.subr.mxu0 %v14081_v31 }
0x13b6   : > { %v6133_v11 = vpop.permute.xlu1 %6132  ;;  %v6131_v26 = vpop.permute.xlu0 %6130 }
0x13b7   : > { %10451 = vmatpush3.xpose.msk.msra.mxu0 %vm2903_vm3, %v5816_v24 }
0x13b8   : > { %10452 = vmatprep.subr.mxu0 %v14081_v31 }
0x13ba   : > { %v6129_v17 = vpop.permute.xlu1 %6128  ;;  %v6119_v52 = vpop.permute.xlu0 %6118 }
0x13bb   : > { %10453 = vmatpush3.xpose.msk.msra.mxu0 %vm2903_vm3, %v5814_v0 }
0x13bc   : > { %10494 = vmatprep.subr.mxu0 %v14081_v31 }
0x13be   : > { %v6121_v46 = vpop.permute.xlu1 %6120  ;;  %10455 = vmatmul.mubr.msk.f32.vlgmr.msra.gmra.mxu0 %vm2903_vm3, %v13137_v39  ;;  %v6123_v2 = vpop.permute.xlu0 %6122 }
0x13bf   : > { %10495 = vmatpush3.xpose.msk.msra.mxu0 %vm2903_vm3, %v6137_v5  ;;  %10457 = vmatprep.mubr.msk.f32.mxu0 %vm11295_vm0, %v14081_v31 }
0x13c0   : > { %10496 = vmatprep.subr.mxu0 %v14081_v31 }
0x13c2   : > { %v6125_v20 = vpop.permute.xlu1 %6124  ;;  %10458 = vmatmul.mubr.msk.f32.gmra.mxu0 %vm2903_vm3, %v13139_v10  ;;  %v6127_v13 = vpop.permute.xlu0 %6126 }
0x13c3   : > { %10497 = vmatpush3.xpose.msk.msra.mxu0 %vm2903_vm3, %v6135_v16  ;;  %10460 = vmatprep.mubr.msk.f32.mxu0 %vm11295_vm0, %v14081_v31 }
0x13c4   : > { %10498 = vmatprep.subr.mxu0 %v14081_v31 }
0x13c6   : > { %v6005_v55 = vpop.permute.xlu1 %6004  ;;  %10461 = vmatmul.mubr.msk.f32.gmra.mxu0 %vm2903_vm3, %v13129_v62  ;;  %v6007_v33 = vpop.permute.xlu0 %6006 }
0x13c7   : > { %10470 = vmatpush3.msra.mxu1 %v6007_v33  ;;  %10499 = vmatpush3.xpose.msk.msra.mxu0 %vm2903_vm3, %v6133_v11 }
0x13c8   : > { %10471 = vmatprep.subr.mxu1 %v14081_v31  ;;  %10463 = vmatprep.mubr.msk.f32.mxu0 %vm11295_vm0, %v14081_v31 }
0x13c9   : > { %10472 = vmatpush3.msra.mxu1 %v6005_v55  ;;  %10500 = vmatprep.subr.mxu0 %v14081_v31 }
0x13ca   : > { %v6003_v19 = vpop.permute.xlu1 %6002  ;;  %10464 = vmatmul.mubr.msk.f32.gmra.mxu0 %vm2903_vm3, %v13125_v37  ;;  %10473 = vmatprep.subr.mxu1 %v14081_v31 }
0x13cb   : > { %10474 = vmatpush3.msra.mxu1 %v6003_v19  ;;  %10501 = vmatpush3.xpose.msk.msra.mxu0 %vm2903_vm3, %v6131_v26 }
0x13cc   : > { %10466 = vmatprep.mubr.msk.f32.mxu0 %vm11295_vm0, %v14081_v31  ;;  %10475 = vmatprep.subr.mxu1 %v14081_v31 }
0x13cd   : > { %10502 = vmatprep.subr.mxu0 %v14081_v31 }
0x13ce   : > { %v6001_v58 = vpop.permute.xlu1 %6000  ;;  %10467 = vmatmul.mubr.msk.f32.gmra.mxu0 %vm2903_vm3, %v13131_v53 }
0x13cf   : > { %10476 = vmatpush3.msra.mxu1 %v6001_v58  ;;  %10503 = vmatpush3.xpose.msk.msra.mxu0 %vm2903_vm3, %v6129_v17 }
0x13d0   : > { %10504 = vmatprep.mubr.msk.f32.mxu0 %vm11295_vm0, %v14081_v31  ;;  %10477 = vmatprep.subr.mxu1 %v14081_v31 }
0x13d1   : > { %10544 = vmatprep.subr.mxu0 %v14081_v31 }
0x13d2   : > { %10505 = vmatmul.mubr.msk.f32.vlgmr.msra.gmra.mxu0 %vm2903_vm3, %v6119_v52 }
0x13d3   : > { %10507 = vmatprep.mubr.msk.f32.mxu0 %vm11295_vm0, %v14081_v31 }
0x13d6   : > { %10508 = vmatmul.mubr.msk.f32.gmra.mxu0 %vm2903_vm3, %v6121_v46 }
0x13d7   : > { %10510 = vmatprep.mubr.msk.f32.mxu0 %vm11295_vm0, %v14081_v31 }
0x13da   : > { %10511 = vmatmul.mubr.msk.f32.gmra.mxu0 %vm2903_vm3, %v6123_v2 }
0x13db   : > { %10513 = vmatprep.mubr.msk.f32.mxu0 %vm11295_vm0, %v14081_v31 }
0x13de   : > { %10514 = vmatmul.mubr.msk.f32.gmra.mxu0 %vm2903_vm3, %v6125_v20 }
0x13df   : > { %10516 = vmatprep.mubr.msk.f32.mxu0 %vm11295_vm0, %v14081_v31 }
0x13e2   : > { %10517 = vmatmul.mubr.msk.f32.gmra.mxu0 %vm2903_vm3, %v6127_v13 }
0x13e3   : > { %10548 = vmatprep.mubr.msk.f32.mxu0 %vm11295_vm0, %v14081_v31 }
0x147e   : > { %v5909_v43 = vpop.f32.mrf.mxu0 }
0x147f   : > { %v5933_v57 = vmul.f32 0.35355338, %v5909_v43 }
0x1480   : > { %v10456_v61 = vpop.f32.mrf.mxu0 }
0x1481   : > { %v13233_v25 = vadd.f32 %v11186_v14, %v5933_v57 }
0x1482   : > { %v5914_v21 = vpop.f32.mrf.mxu0 }
0x1483   : > { %v5934_v15 = vmul.f32 0.35355338, %v5914_v21  ;;  %v5943_v12 = vsel %vm3024_vm4, %v13233_v25, -inf }
0x1484   : > { %5944 = vmax.xlane.f32.xlu1 %v5943_v12  ;;  %v10459_v34 = vpop.f32.mrf.mxu0 }
0x1485   : > { %v13238_v40 = vadd.f32 %v11187_v8, %v5934_v15 }
0x1486   : > { %v5919_v60 = vpop.f32.mrf.mxu0 }
0x1487   : > { %v5935_v54 = vmul.f32 0.35355338, %v5919_v60  ;;  %v5946_v44 = vsel %vm3024_vm4, %v13238_v40, -inf }
0x1488   : > { %5947 = vmax.xlane.f32.xlu0 %v5946_v44  ;;  %v10462_v47 = vpop.f32.mrf.mxu0 }
0x1489   : > { %v5940_v23 = vadd.f32 %v11188_v49, %v5935_v54 }
0x148a   : > { %v5924_v27 = vpop.f32.mrf.mxu0 }
0x148b   : > { %v5936_v3 = vmul.f32 0.35355338, %v5924_v27  ;;  %v5949_v22 = vsel %vm3024_vm4, %v5940_v23, -inf }
0x148c   : > { %5950 = vmax.xlane.f32.xlu0 %v5949_v22  ;;  %v10465_v63 = vpop.f32.mrf.mxu0 }
0x148d   : > { %v5941_v56 = vadd.f32 %v11189_v59, %v5936_v3 }
0x148e   : > { %v5929_v28 = vpop.f32.mrf.mxu0 }
0x148f   : > { %v5937_v50 = vmul.f32 0.35355338, %v5929_v28  ;;  %v5952_v7 = vsel %vm3024_vm4, %v5941_v56, -inf }
0x1490   : > { %5953 = vmax.xlane.f32.xlu0 %v5952_v7  ;;  %v10468_v30 = vpop.f32.mrf.mxu0 }
0x1491   : > { %v5942_v4 = vadd.f32 %v11190_v18, %v5937_v50 }
0x1492   : > { %v6224_v41 = vpop.f32.mrf.mxu0 }
0x1493   : > { %v6248_v42 = vmul.f32 0.35355338, %v6224_v41  ;;  %v5955_v6 = vsel %vm3024_vm4, %v5942_v4, -inf }
0x1494   : > { %5956 = vmax.xlane.f32.xlu1 %v5955_v6  ;;  %v10506_v24 = vpop.f32.mrf.mxu0 }
0x1495   : > { %v6253_v0 = vadd.f32 %v11186_v14, %v6248_v42 }
0x1496   : > { %v6229_v5 = vpop.f32.mrf.mxu0 }
0x1497   : > { %v6249_v16 = vmul.f32 0.35355338, %v6229_v5  ;;  %v6258_v11 = vsel %vm3024_vm4, %v6253_v0, -inf }
0x1498   : > { %6259 = vmax.xlane.f32.xlu0 %v6258_v11  ;;  %v10509_v26 = vpop.f32.mrf.mxu0 }
0x1499   : > { %v6254_v17 = vadd.f32 %v11187_v8, %v6249_v16 }
0x149a   : > { %v6234_v52 = vpop.f32.mrf.mxu0 }
0x149b   : > { %v6250_v46 = vmul.f32 0.35355338, %v6234_v52  ;;  %v6261_v2 = vsel %vm3024_vm4, %v6254_v17, -inf }
0x149c   : > { %6262 = vmax.xlane.f32.xlu1 %v6261_v2  ;;  %v10512_v20 = vpop.f32.mrf.mxu0 }
0x149d   : > { %v6255_v13 = vadd.f32 %v11188_v49, %v6250_v46 }
0x149e   : > { %v6239_v55 = vpop.f32.mrf.mxu0 }
0x149f   : > { %v6264_v33 = vsel %vm3024_vm4, %v6255_v13, -inf  ;;  %v6251_v57 = vmul.f32 0.35355338, %v6239_v55 }
0x14a0   : > { %6265 = vmax.xlane.f32.xlu0 %v6264_v33  ;;  %v10515_v19 = vpop.f32.mrf.mxu0 }
0x14a1   : > { %v13255_v61 = vadd.f32 %v11189_v59, %v6251_v57 }
0x14a2   : > { %v6244_v58 = vpop.f32.mrf.mxu0 }
0x14a3   : > { %v6252_v14 = vmul.f32 0.35355338, %v6244_v58  ;;  %v6267_v15 = vsel %vm3024_vm4, %v13255_v61, -inf }
0x14a4   : > { %v10518_v43 = vpop.f32.mrf.mxu0 }
0x14a5   : > { %v13257_v21 = vadd.f32 %v11190_v18, %v6252_v14 }
0x14a7   : > { %v6270_v12 = vsel %vm3024_vm4, %v13257_v21, -inf }
0x14ad   : > { %5998 = vrot.lane.b32.xlu1 %v13137_v39, %s14101_s14  ;;  %s14104_s14 = smov 16  }
0x14b6   : > { %6321 = vrot.lane.b32.xlu0 %v13131_v53, %s14102_s3 }
0x14d1   : > { %6268 = vmax.xlane.f32.xlu1 %v6267_v15 }
0x14d5   : > { %6271 = vmax.xlane.f32.xlu0 %v6270_v12 }
0x14e2   : > { %6319 = vrot.lane.b32.xlu1 %v13125_v37, %s14102_s3 }
0x14eb   : > { %6317 = vrot.lane.b32.xlu0 %v13129_v62, %s14102_s3 }
0x150d   : > { %v5945_v53 = vpop.xlane.xlu1 %5944 }
0x150e   : > { %v5958_v34 = vsub.f32 %v13233_v25, %v5945_v53 }
0x1510   : > { %v5963_v8 = vmul.f32 1.442695, %v5958_v34 }
0x1511   : > { %v5948_v60 = vpop.xlane.xlu0 %5947 }
0x1512   : > { %11094 = vpow2.f32 %v5963_v8  ;;  %v5959_v54 = vsub.f32 %v13238_v40, %v5948_v60 }
0x1514   : > { %v5965_v44 = vmul.f32 1.442695, %v5959_v54 }
0x1515   : > { %v5951_v47 = vpop.xlane.xlu0 %5950 }
0x1516   : > { %11096 = vpow2.f32 %v5965_v44  ;;  %v5960_v49 = vsub.f32 %v5940_v23, %v5951_v47 }
0x1518   : > { %v5967_v27 = vmul.f32 1.442695, %v5960_v49 }
0x1519   : > { %v5954_v3 = vpop.xlane.xlu0 %5953 }
0x151a   : > { %11098 = vpow2.f32 %v5967_v27  ;;  %v5961_v22 = vsub.f32 %v5941_v56, %v5954_v3 }
0x151c   : > { %v5969_v37 = vmul.f32 1.442695, %v5961_v22 }
0x151d   : > { %v5957_v63 = vpop.xlane.xlu1 %5956 }
0x151e   : > { %11100 = vpow2.f32 %v5969_v37  ;;  %v5962_v62 = vsub.f32 %v5942_v4, %v5957_v63 }
0x151f   : > { %v13269_v59 = vpop.eup %11094 }
0x1520   : > { %v5971_v25 = vmul.f32 1.442695, %v5962_v62  ;;  %v5973_v28 = vsel %vm3024_vm4, %v13269_v59, 0.0 }
0x1521   : > { %v6260_v50 = vpop.xlane.xlu0 %6259  ;;  %5974 = vadd.xlane.f32.xlu1 %v5973_v28 }
0x1522   : > { %11102 = vpow2.f32 %v5971_v25  ;;  %v6273_v40 = vsub.f32 %v6253_v0, %v6260_v50 }
0x1523   : > { %v13273_v7 = vpop.eup %11096 }
0x1524   : > { %v6278_v23 = vmul.f32 1.442695, %v6273_v40  ;;  %v5976_v56 = vsel %vm3024_vm4, %v13273_v7, 0.0 }
0x1525   : > { %v6263_v30 = vpop.xlane.xlu1 %6262  ;;  %5977 = vadd.xlane.f32.xlu0 %v5976_v56 }
0x1526   : > { %11104 = vpow2.f32 %v6278_v23  ;;  %v6274_v18 = vsub.f32 %v6254_v17, %v6263_v30 }
0x1527   : > { %v13277_v4 = vpop.eup %11098 }
0x1528   : > { %v6280_v41 = vmul.f32 1.442695, %v6274_v18  ;;  %v5979_v42 = vsel %vm3024_vm4, %v13277_v4, 0.0 }
0x1529   : > { %v5999_v6 = vpop.permute.xlu1 %5998  ;;  %v6266_v24 = vpop.xlane.xlu0 %6265  ;;  %5980 = vadd.xlane.f32.xlu1 %v5979_v42 }
0x152a   : > { %11106 = vpow2.f32 %v6280_v41  ;;  %v6275_v0 = vsub.f32 %v6255_v13, %v6266_v24  ;;  %10478 = vmatpush3.msra.mxu1 %v5999_v6 }
0x152b   : > { %v13281_v5 = vpop.eup %11100  ;;  %10519 = vmatprep.subr.mxu1 %v14081_v31 }
0x152c   : > { %v6282_v16 = vmul.f32 1.442695, %v6275_v0  ;;  %v5982_v11 = vsel %vm3024_vm4, %v13281_v5, 0.0 }
0x152d   : > { %5983 = vadd.xlane.f32.xlu0 %v5982_v11  ;;  %v6322_v33 = vpop.permute.xlu0 %6321 }
0x152e   : > { %11108 = vpow2.f32 %v6282_v16 }
0x152f   : > { %v13286_v26 = vpop.eup %11102 }
0x1530   : > { %v5985_v17 = vsel %vm3024_vm4, %v13286_v26, 0.0 }
0x1531   : > { %5986 = vadd.xlane.f32.xlu1 %v5985_v17 }
0x1533   : > { %v13290_v52 = vpop.eup %11104 }
0x1534   : > { %v6288_v46 = vsel %vm3024_vm4, %v13290_v52, 0.0 }
0x1535   : > { %6289 = vadd.xlane.f32.xlu1 %v6288_v46 }
0x1537   : > { %v13294_v2 = vpop.eup %11106 }
0x1538   : > { %v6291_v20 = vsel %vm3024_vm4, %v13294_v2, 0.0 }
0x1539   : > { %6292 = vadd.xlane.f32.xlu0 %v6291_v20 }
0x153b   : > { %v13298_v13 = vpop.eup %11108 }
0x153c   : > { %v6294_v55 = vsel %vm3024_vm4, %v13298_v13, 0.0 }
0x153d   : > { %6295 = vadd.xlane.f32.xlu1 %v6294_v55 }
0x154e   : > { %6315 = vrot.lane.b32.xlu1 %v13139_v10, %s14102_s3 }
0x155a   : > { %v6269_v19 = vpop.xlane.xlu1 %6268 }
0x155b   : > { %v6276_v58 = vsub.f32 %v13255_v61, %v6269_v19 }
0x155d   : > { %v6284_v43 = vmul.f32 1.442695, %v6276_v58 }
0x155e   : > { %v6272_v57 = vpop.xlane.xlu0 %6271  ;;  %v6320_v61 = vpop.permute.xlu1 %6319 }
0x155f   : > { %11110 = vpow2.f32 %v6284_v43  ;;  %v6277_v14 = vsub.f32 %v13257_v21, %v6272_v57  ;;  %v8863_v43 = vld [vmem:[%s14047_s6 + $0x10] sm:$0xff] }
0x1561   : > { %v6286_v15 = vmul.f32 1.442695, %v6277_v14 }
0x1562   : > { %v6318_v8 = vpop.permute.xlu0 %6317 }
0x1563   : > { %11112 = vpow2.f32 %v6286_v15 }
0x156c   : > { %v13306_v12 = vpop.eup %11110 }
0x156d   : > { %v6297_v53 = vsel %vm3024_vm4, %v13306_v12, 0.0 }
0x156e   : > { %6298 = vadd.xlane.f32.xlu0 %v6297_v53 }
0x1570   : > { %v13310_v34 = vpop.eup %11112 }
0x1571   : > { %v6300_v10 = vsel %vm3024_vm4, %v13310_v34, 0.0 }
0x1572   : > { %6301 = vadd.xlane.f32.xlu0 %v6300_v10 }
0x1588   : > { %6313 = vrot.lane.b32.xlu0 %v13137_v39, %s14102_s3  ;;  %s14106_s3 = sld [smem:[#allocation25_spill]] }
0x15aa   : > { %v5975_v21 = vpop.xlane.xlu1 %5974 }
0x15ab   : > { %11114 = vrcp.f32 %v5975_v21 }
0x15ae   : > { %v5978_v60 = vpop.xlane.xlu0 %5977 }
0x15af   : > { %11116 = vrcp.f32 %v5978_v60 }
0x15b2   : > { %v5981_v54 = vpop.xlane.xlu1 %5980 }
0x15b3   : > { %11118 = vrcp.f32 %v5981_v54 }
0x15b6   : > { %v5984_v44 = vpop.xlane.xlu0 %5983 }
0x15b7   : > { %11120 = vrcp.f32 %v5984_v44 }
0x15b8   : > { %v11115_v47 = vpop.eup %11114 }
0x15b9   : > { %v5989_v49 = vmul.f32 %v11115_v47, %v13269_v59 }
0x15ba   : > { %v5987_v27 = vpop.xlane.xlu1 %5986 }
0x15bb   : > { %11122 = vrcp.f32 %v5987_v27  ;;  %10480 = vmatmul.mubr.msk.f32.vlgmr.msra.gmra.mxu1 %vm3024_vm4, %v5989_v49 }
0x15bc   : > { %v11117_v3 = vpop.eup %11116  ;;  %10520 = vmatpush3.msra.mxu1 %v6322_v33  ;;  %10482 = vmatprep.mubr.msk.f32.mxu1 %vm11295_vm0, %v14081_v31 }
0x15bd   : > { %10521 = vmatprep.subr.mxu1 %v14081_v31  ;;  %v5991_v39 = vmul.f32 %v11117_v3, %v13273_v7 }
0x15be   : > { %10522 = vmatpush3.msra.mxu1 %v6320_v61  ;;  %v6290_v63 = vpop.xlane.xlu1 %6289 }
0x15bf   : > { %10523 = vmatprep.subr.mxu1 %v14081_v31  ;;  %10483 = vmatmul.mubr.msk.f32.gmra.mxu1 %vm3024_vm4, %v5991_v39  ;;  %11124 = vrcp.f32 %v6290_v63  ;;  %v8885_v63 = vld [vmem:[%s11387_s20 + $0x48] sm:$0xff] }
0x15c0   : > { %v11119_v22 = vpop.eup %11118  ;;  %10524 = vmatpush3.msra.mxu1 %v6318_v8  ;;  %10485 = vmatprep.mubr.msk.f32.mxu1 %vm11295_vm0, %v14081_v31 }
0x15c1   : > { %v5993_v37 = vmul.f32 %v11119_v22, %v13277_v4  ;;  %10525 = vmatprep.subr.mxu1 %v14081_v31 }
0x15c2   : > { %v6293_v7 = vpop.xlane.xlu0 %6292 }
0x15c3   : > { %10486 = vmatmul.mubr.msk.f32.gmra.mxu1 %vm3024_vm4, %v5993_v37  ;;  %11126 = vrcp.f32 %v6293_v7  ;;  %v13460_v7 = vld [vmem:[%s11332_s21 + $0x10] sm:$0xff] }
0x15c4   : > { %v11121_v62 = vpop.eup %11120  ;;  %10488 = vmatprep.mubr.msk.f32.mxu1 %vm11295_vm0, %v14081_v31 }
0x15c5   : > { %v5995_v59 = vmul.f32 %v11121_v62, %v13281_v5  ;;  %v13422_v62 = vld [vmem:[%s11327_s17] sm:$0xff] }
0x15c6   : > { %v6296_v25 = vpop.xlane.xlu1 %6295 }
0x15c7   : > { %10489 = vmatmul.mubr.msk.f32.gmra.mxu1 %vm3024_vm4, %v5995_v59  ;;  %11128 = vrcp.f32 %v6296_v25  ;;  %v13428_v59 = vld [vmem:[%s11332_s21] sm:$0xff] }
0x15c8   : > { %v11123_v28 = vpop.eup %11122  ;;  %10491 = vmatprep.mubr.msk.f32.mxu1 %vm11295_vm0, %v14081_v31  ;;  %v8884_v25 = vld [vmem:[%s11387_s20 + $0x40] sm:$0xff] }
0x15c9   : > { %v5997_v50 = vmul.f32 %v11123_v28, %v13286_v26  ;;  %v8864_v26 = vld [vmem:[%s14047_s6 + $0x18] sm:$0xff]  ;;  %v13440_v28 = vld [vmem:[%s11327_s17 + $0x8] sm:$0xff] }
0x15ca   : > { %v6316_v40 = vpop.permute.xlu1 %6315  ;;  %10545 = vmatpush3.msra.mxu0 %v8864_v26 }
0x15cb   : > { %10492 = vmatmul.mubr.msk.f32.gmra.mxu1 %vm3024_vm4, %v5997_v50  ;;  %10546 = vmatprep.subr.mxu0 %v14081_v31  ;;  %v13445_v50 = vld [vmem:[%s11332_s21 + $0x8] sm:$0xff] }
0x15cc   : > { %10526 = vmatpush3.msra.mxu1 %v6316_v40  ;;  %10529 = vmatprep.mubr.msk.f32.mxu1 %vm11295_vm0, %v14081_v31  ;;  %v11125_v30 = vpop.eup %11124  ;;  %v13455_v40 = vld [vmem:[%s11327_s17 + $0x10] sm:$0xff] }
0x15cd   : > { %10527 = vmatprep.subr.mxu1 %v14081_v31  ;;  %v6304_v18 = vmul.f32 %v11125_v30, %v13290_v52  ;;  %10547 = vmatpush3.msra.mxu0 %v8863_v43  ;;  %v13483_v30 = vld [vmem:[%s11327_s17 + $0x20] sm:$0xff] }
0x15ce   : > { %10588 = vmatprep.subr.mxu0 %v14081_v31 }
0x15d0   : > { %v11127_v41 = vpop.eup %11126 }
0x15d1   : > { %v6306_v42 = vmul.f32 %v11127_v41, %v13294_v2  ;;  %v8897_v41 = vld [vmem:[%s11387_s20 + $0x58] sm:$0xff] }
0x15d4   : > { %v11129_v6 = vpop.eup %11128 }
0x15d5   : > { %v6308_v24 = vmul.f32 %v11129_v6, %v13298_v13  ;;  %v8896_v6 = vld [vmem:[%s11387_s20 + $0x50] sm:$0xff] }
0x15f7   : > { %v6299_v23 = vpop.xlane.xlu0 %6298 }
0x15f8   : > { %11130 = vrcp.f32 %v6299_v23  ;;  %v13469_v23 = vld [vmem:[%s11327_s17 + $0x18] sm:$0xff] }
0x15fb   : > { %v6302_v56 = vpop.xlane.xlu0 %6301 }
0x15fc   : > { %11132 = vrcp.f32 %v6302_v56  ;;  %v13474_v56 = vld [vmem:[%s11332_s21 + $0x18] sm:$0xff] }
0x15ff   : > { %v6314_v4 = vpop.permute.xlu0 %6313 }
0x1600   : > { %10528 = vmatpush3.msra.mxu1 %v6314_v4  ;;  %v8883_v4 = vld [vmem:[%s11387_s20 + $0x38] sm:$0xff] }
0x1601   : > { %10530 = vmatmul.mubr.msk.f32.vlgmr.msra.gmra.mxu1 %vm3024_vm4, %v6304_v18  ;;  %10563 = vmatprep.subr.mxu1 %v14081_v31  ;;  %v13488_v18 = vld [vmem:[%s11332_s21 + $0x20] sm:$0xff] }
0x1602   : > { %10532 = vmatprep.mubr.msk.f32.mxu1 %vm11295_vm0, %v14081_v31 }
0x1605   : > { %10533 = vmatmul.mubr.msk.f32.gmra.mxu1 %vm3024_vm4, %v6306_v42  ;;  %v11131_v0 = vpop.eup %11130  ;;  %v8882_v42 = vld [vmem:[%s11387_s20 + $0x30] sm:$0xff] }
0x1606   : > { %10535 = vmatprep.mubr.msk.f32.mxu1 %vm11295_vm0, %v14081_v31  ;;  %v6310_v5 = vmul.f32 %v11131_v0, %v13306_v12 }
0x1609   : > { %10536 = vmatmul.mubr.msk.f32.gmra.mxu1 %vm3024_vm4, %v6308_v24  ;;  %v11133_v16 = vpop.eup %11132 }
0x160a   : > { %10538 = vmatprep.mubr.msk.f32.mxu1 %vm11295_vm0, %v14081_v31  ;;  %v6312_v11 = vmul.f32 %v11133_v16, %v13310_v34 }
0x160d   : > { %10539 = vmatmul.mubr.msk.f32.gmra.mxu1 %vm3024_vm4, %v6310_v5 }
0x160e   : > { %10541 = vmatprep.mubr.msk.f32.mxu1 %vm11295_vm0, %v14081_v31 }
0x1611   : > { %10542 = vmatmul.mubr.msk.f32.gmra.mxu1 %vm3024_vm4, %v6312_v11 }
0x1612   : > { %10573 = vmatprep.mubr.msk.f32.mxu1 %vm11295_vm0, %v14081_v31 }
0x167b   : > { %v6094_v17 = vpop.f32.mrf.mxu1 }
0x167d   : > { %v10481_v52 = vpop.f32.mrf.mxu1 }
0x167f   : > { %v6099_v46 = vpop.f32.mrf.mxu1 }
0x1681   : > { %v10484_v2 = vpop.f32.mrf.mxu1 }
0x1683   : > { %v6104_v20 = vpop.f32.mrf.mxu1 }
0x1685   : > { %v10487_v13 = vpop.f32.mrf.mxu1 }
0x1687   : > { %v6109_v55 = vpop.f32.mrf.mxu1 }
0x1689   : > { %v10490_v33 = vpop.f32.mrf.mxu1 }
0x168b   : > { %v6114_v19 = vpop.f32.mrf.mxu1 }
0x168d   : > { %v10493_v58 = vpop.f32.mrf.mxu1 }
0x16c1   : > { %v6409_v57 = vpop.f32.mrf.mxu1 }
0x16c2   : > { %6438 = vrot.lane.b32.xlu1 %v6409_v57, %s14103_s8 }
0x16c3   : > { %v10531_v14 = vpop.f32.mrf.mxu1 }
0x16c5   : > { %v6414_v15 = vpop.f32.mrf.mxu1 }
0x16c6   : > { %6578 = vrot.lane.b32.xlu1 %v13106_v36, %s14098_s26  ;;  %6440 = vrot.lane.b32.xlu0 %v6414_v15, %s14103_s8 }
0x16c7   : > { %v10534_v12 = vpop.f32.mrf.mxu1 }
0x16c9   : > { %v6419_v53 = vpop.f32.mrf.mxu1 }
0x16ca   : > { %6582 = vrot.lane.b32.xlu0 %v13118_v29, %s14098_s26  ;;  %6442 = vrot.lane.b32.xlu1 %v6419_v53, %s14103_s8 }
0x16cb   : > { %v10537_v34 = vpop.f32.mrf.mxu1 }
0x16cd   : > { %v6424_v10 = vpop.f32.mrf.mxu1 }
0x16ce   : > { %6580 = vrot.lane.b32.xlu0 %v13112_v35, %s14098_s26  ;;  %6444 = vrot.lane.b32.xlu1 %v6424_v10, %s14103_s8 }
0x16cf   : > { %v10540_v61 = vpop.f32.mrf.mxu1 }
0x16d1   : > { %v6429_v8 = vpop.f32.mrf.mxu1 }
0x16d2   : > { %6576 = vrot.lane.b32.xlu1 %v13100_v51, %s14098_s26  ;;  %6446 = vrot.lane.b32.xlu0 %v6429_v8, %s14103_s8  ;;  %s14107_s8 = sld [smem:[#allocation27_spill]] }
0x16d3   : > { %v10543_v36 = vpop.f32.mrf.mxu1 }
0x16d6   : > { %6574 = vrot.lane.b32.xlu0 %v13094_v45, %s14098_s26  ;;  %s14105_s26 = sld [smem:[#allocation7_spill]] }
0x1734   : > { %v6439_v29 = vpop.permute.xlu1 %6438 }
0x1735   : > { %v6453_v21 = vsel %vm2903_vm3, %v6094_v17, %v6439_v29 }
0x1736   : > { %10549 = vmatmul.mubr.msk.f32.vlgmr.msra.gmra.mxu0 %vm2782_vm2, %v6453_v21 }
0x1737   : > { %10551 = vmatprep.mubr.msk.f32.mxu0 %vm11295_vm0, %v14081_v31 }
0x1738   : > { %v13384_v35 = vpop.permute.xlu1 %6578  ;;  %v6441_v60 = vpop.permute.xlu0 %6440 }
0x1739   : > { %v6454_v54 = vsel %vm2903_vm3, %v6099_v46, %v6441_v60 }
0x173a   : > { %10552 = vmatmul.mubr.msk.f32.gmra.mxu0 %vm2782_vm2, %v6454_v54 }
0x173b   : > { %10554 = vmatprep.mubr.msk.f32.mxu0 %vm11295_vm0, %v14081_v31 }
0x173c   : > { %v13390_v51 = vpop.permute.xlu0 %6582  ;;  %v6443_v45 = vpop.permute.xlu1 %6442 }
0x173d   : > { %v6455_v44 = vsel %vm2903_vm3, %v6104_v20, %v6443_v45  ;;  %10564 = vmatpush3.msra.mxu1 %v13390_v51  ;;  %10589 = vmatpush3.msra.mxu0 %v13390_v51 }
0x173e   : > { %10555 = vmatmul.mubr.msk.f32.gmra.mxu0 %vm2782_vm2, %v6455_v44  ;;  %10565 = vmatprep.subr.mxu1 %v14081_v31 }
0x173f   : > { %10590 = vmatprep.subr.mxu0 %v14081_v31  ;;  %10557 = vmatprep.mubr.msk.f32.mxu0 %vm11295_vm0, %v14081_v31 }
0x1740   : > { %v13400_v47 = vpop.permute.xlu0 %6580  ;;  %v6445_v49 = vpop.permute.xlu1 %6444 }
0x1741   : > { %v6456_v27 = vsel %vm2903_vm3, %v6109_v55, %v6445_v49  ;;  %10566 = vmatpush3.msra.mxu1 %v13400_v47  ;;  %10591 = vmatpush3.msra.mxu0 %v13400_v47 }
0x1742   : > { %10558 = vmatmul.mubr.msk.f32.gmra.mxu0 %vm2782_vm2, %v6456_v27  ;;  %10567 = vmatprep.subr.mxu1 %v14081_v31 }
0x1743   : > { %10592 = vmatprep.subr.mxu0 %v14081_v31  ;;  %10568 = vmatpush3.msra.mxu1 %v13384_v35 }
0x1744   : > { %10593 = vmatpush3.msra.mxu0 %v13384_v35  ;;  %10569 = vmatprep.subr.mxu1 %v14081_v31  ;;  %v6577_v3 = vpop.permute.xlu1 %6576  ;;  %v6447_v39 = vpop.permute.xlu0 %6446 }
0x1745   : > { %10594 = vmatprep.subr.mxu0 %v14081_v31  ;;  %v6457_v22 = vsel %vm2903_vm3, %v6114_v19, %v6447_v39  ;;  %10560 = vmatprep.mubr.msk.f32.mxu0 %vm11295_vm0, %v14081_v31 }
0x1746   : > { %10570 = vmatpush3.msra.mxu1 %v6577_v3  ;;  %10595 = vmatpush3.msra.mxu0 %v6577_v3 }
0x1747   : > { %10561 = vmatmul.mubr.msk.f32.gmra.mxu0 %vm2782_vm2, %v6457_v22  ;;  %10571 = vmatprep.subr.mxu1 %v14081_v31 }
0x1748   : > { %10596 = vmatprep.subr.mxu0 %v14081_v31  ;;  %v6575_v37 = vpop.permute.xlu0 %6574  ;;  %10598 = vmatprep.mubr.msk.f32.mxu0 %vm11295_vm0, %v14081_v31 }
0x1749   : > { %10572 = vmatpush3.msra.mxu1 %v6575_v37  ;;  %10597 = vmatpush3.msra.mxu0 %v6575_v37 }
0x174a   : > { %10574 = vmatmul.mubr.msk.f32.vlgmr.msra.gmra.mxu1 %vm3024_vm4, %v13422_v62  ;;  %10613 = vmatprep.subr.mxu1 %v14081_v31 }
0x174b   : > { %10599 = vmatmul.mubr.msk.f32.vlgmr.msra.gmra.mxu0 %vm3024_vm4, %v13428_v59  ;;  %10576 = vmatprep.mubr.msk.f32.mxu1 %vm11295_vm0, %v14081_v31 }
0x174c   : > { %10601 = vmatprep.mubr.msk.f32.mxu0 %vm11295_vm0, %v14081_v31  ;;  %10614 = vmatpush3.msra.mxu1 %v8885_v63 }
0x174d   : > { %10615 = vmatprep.subr.mxu1 %v14081_v31  ;;  %10632 = vmatprep.subr.mxu0 %v14081_v31 }
0x174e   : > { %10577 = vmatmul.mubr.msk.f32.gmra.mxu1 %vm3024_vm4, %v13440_v28  ;;  %10633 = vmatpush3.msra.mxu0 %v8883_v4 }
0x174f   : > { %10602 = vmatmul.mubr.msk.f32.gmra.mxu0 %vm3024_vm4, %v13445_v50  ;;  %10579 = vmatprep.mubr.msk.f32.mxu1 %vm11295_vm0, %v14081_v31 }
0x1750   : > { %10604 = vmatprep.mubr.msk.f32.mxu0 %vm11295_vm0, %v14081_v31  ;;  %10616 = vmatpush3.msra.mxu1 %v8884_v25  ;;  %v8904_v25 = vld [vmem:[%s14082_s7 + $0x1] ss:$0 sm:$0xff] }
0x1751   : > { %10651 = vmatprep.subr.mxu1 %v14081_v31  ;;  %10634 = vmatprep.subr.mxu0 %v14081_v31 }
0x1752   : > { %10580 = vmatmul.mubr.msk.f32.gmra.mxu1 %vm3024_vm4, %v13455_v40  ;;  %10635 = vmatpush3.msra.mxu0 %v8882_v42 }
0x1753   : > { %10605 = vmatmul.mubr.msk.f32.gmra.mxu0 %vm3024_vm4, %v13460_v7  ;;  %10582 = vmatprep.mubr.msk.f32.mxu1 %vm11295_vm0, %v14081_v31 }
0x1754   : > { %10607 = vmatprep.mubr.msk.f32.mxu0 %vm11295_vm0, %v14081_v31  ;;  %10670 = vmatprep.subr.mxu0 %v14081_v31 }
0x1756   : > { %10583 = vmatmul.mubr.msk.f32.gmra.mxu1 %vm3024_vm4, %v13469_v23 }
0x1757   : > { %10608 = vmatmul.mubr.msk.f32.gmra.mxu0 %vm3024_vm4, %v13474_v56  ;;  %10585 = vmatprep.mubr.msk.f32.mxu1 %vm11295_vm0, %v14081_v31 }
0x1758   : > { %10610 = vmatprep.mubr.msk.f32.mxu0 %vm11295_vm0, %v14081_v31 }
0x175a   : > { %10586 = vmatmul.mubr.msk.f32.gmra.mxu1 %vm3024_vm4, %v13483_v30 }
0x175b   : > { %10611 = vmatmul.mubr.msk.f32.gmra.mxu0 %vm3024_vm4, %v13488_v18  ;;  %10617 = vmatprep.mubr.msk.f32.mxu1 %vm11295_vm0, %v14081_v31 }
0x175c   : > { %10636 = vmatprep.mubr.msk.f32.mxu0 %vm11295_vm0, %v14081_v31 }
0x175e   : > { %10618 = vmatmul.mubr.msk.f32.vlgmr.msra.gmra.mxu1 %vm2782_vm2, %v6575_v37 }
0x175f   : > { %10620 = vmatprep.mubr.msk.f32.mxu1 %vm11295_vm0, %v14081_v31  ;;  %10652 = vmatpush3.msra.mxu1 %v8897_v41 }
0x1760   : > { %10653 = vmatprep.subr.mxu1 %v14081_v31 }
0x1761   : > { %10654 = vmatpush3.msra.mxu1 %v8896_v6 }
0x1762   : > { %10621 = vmatmul.mubr.msk.f32.gmra.mxu1 %vm2782_vm2, %v6577_v3  ;;  %10695 = vmatprep.subr.mxu1 %v14081_v31 }
0x1763   : > { %10623 = vmatprep.mubr.msk.f32.mxu1 %vm11295_vm0, %v14081_v31 }
0x1766   : > { %10624 = vmatmul.mubr.msk.f32.gmra.mxu1 %vm2782_vm2, %v13384_v35 }
0x1767   : > { %10626 = vmatprep.mubr.msk.f32.mxu1 %vm11295_vm0, %v14081_v31 }
0x176a   : > { %10627 = vmatmul.mubr.msk.f32.gmra.mxu1 %vm2782_vm2, %v13400_v47 }
0x176b   : > { %10629 = vmatprep.mubr.msk.f32.mxu1 %vm11295_vm0, %v14081_v31 }
0x176e   : > { %10630 = vmatmul.mubr.msk.f32.gmra.mxu1 %vm2782_vm2, %v13390_v51 }
0x176f   : > { %10655 = vmatprep.mubr.msk.f32.mxu1 %vm11295_vm0, %v14081_v31 }
0x17f6   : > { %v13522_v24 = vpop.f32.mrf.mxu0 }
0x17f8   : > { %v10550_v0 = vpop.f32.mrf.mxu0 }
0x17fa   : > { %v13524_v5 = vpop.f32.mrf.mxu0 }
0x17fc   : > { %v10553_v16 = vpop.f32.mrf.mxu0 }
0x17fe   : > { %v13526_v11 = vpop.f32.mrf.mxu0 }
0x1800   : > { %v10556_v26 = vpop.f32.mrf.mxu0 }
0x1802   : > { %v13528_v17 = vpop.f32.mrf.mxu0 }
0x1804   : > { %v10559_v52 = vpop.f32.mrf.mxu0 }
0x1807   : > { %v13530_v46 = vpop.f32.mrf.mxu0 }
0x1809   : > { %v10562_v2 = vpop.f32.mrf.mxu0 }
0x180a   : > { %v6655_v20 = vpop.f32.mrf.mxu1 }
0x180b   : > { %v6745_v13 = vpop.f32.mrf.mxu0  ;;  %10637 = vmatmul.mubr.msk.f32.vlgmr.msra.gmra.mxu0 %vm2782_vm2, %v6655_v20 }
0x180c   : > { %10656 = vmatmul.mubr.msk.f32.vlgmr.msra.gmra.mxu1 %vm2782_vm2, %v6745_v13  ;;  %v10575_v55 = vpop.f32.mrf.mxu1  ;;  %10639 = vmatprep.mubr.msk.f32.mxu0 %vm11295_vm0, %v14081_v31 }
0x180d   : > { %v10600_v33 = vpop.f32.mrf.mxu0  ;;  %10658 = vmatprep.mubr.msk.f32.mxu1 %vm11295_vm0, %v14081_v31 }
0x180e   : > { %v6660_v19 = vpop.f32.mrf.mxu1 }
0x180f   : > { %v6750_v58 = vpop.f32.mrf.mxu0  ;;  %10640 = vmatmul.mubr.msk.f32.gmra.mxu0 %vm2782_vm2, %v6660_v19 }
0x1810   : > { %10659 = vmatmul.mubr.msk.f32.gmra.mxu1 %vm2782_vm2, %v6750_v58  ;;  %v10578_v43 = vpop.f32.mrf.mxu1  ;;  %10642 = vmatprep.mubr.msk.f32.mxu0 %vm11295_vm0, %v14081_v31 }
0x1811   : > { %v10603_v57 = vpop.f32.mrf.mxu0  ;;  %10661 = vmatprep.mubr.msk.f32.mxu1 %vm11295_vm0, %v14081_v31 }
0x1812   : > { %v6665_v14 = vpop.f32.mrf.mxu1 }
0x1813   : > { %v6755_v15 = vpop.f32.mrf.mxu0  ;;  %10643 = vmatmul.mubr.msk.f32.gmra.mxu0 %vm2782_vm2, %v6665_v14 }
0x1814   : > { %10662 = vmatmul.mubr.msk.f32.gmra.mxu1 %vm2782_vm2, %v6755_v15  ;;  %v10581_v12 = vpop.f32.mrf.mxu1  ;;  %10645 = vmatprep.mubr.msk.f32.mxu0 %vm11295_vm0, %v14081_v31 }
0x1815   : > { %v10606_v53 = vpop.f32.mrf.mxu0  ;;  %10664 = vmatprep.mubr.msk.f32.mxu1 %vm11295_vm0, %v14081_v31 }
0x1816   : > { %v6670_v34 = vpop.f32.mrf.mxu1 }
0x1817   : > { %v6760_v10 = vpop.f32.mrf.mxu0  ;;  %10646 = vmatmul.mubr.msk.f32.gmra.mxu0 %vm2782_vm2, %v6670_v34 }
0x1818   : > { %10665 = vmatmul.mubr.msk.f32.gmra.mxu1 %vm2782_vm2, %v6760_v10  ;;  %v10584_v61 = vpop.f32.mrf.mxu1  ;;  %10648 = vmatprep.mubr.msk.f32.mxu0 %vm11295_vm0, %v14081_v31 }
0x1819   : > { %v10609_v8 = vpop.f32.mrf.mxu0  ;;  %10667 = vmatprep.mubr.msk.f32.mxu1 %vm11295_vm0, %v14081_v31 }
0x181a   : > { %v6675_v36 = vpop.f32.mrf.mxu1 }
0x181b   : > { %v6765_v29 = vpop.f32.mrf.mxu0  ;;  %10649 = vmatmul.mubr.msk.f32.gmra.mxu0 %vm2782_vm2, %v6675_v36 }
0x181c   : > { %10668 = vmatmul.mubr.msk.f32.gmra.mxu1 %vm2782_vm2, %v6765_v29  ;;  %v10587_v21 = vpop.f32.mrf.mxu1  ;;  %10680 = vmatprep.mubr.msk.f32.mxu0 %vm11295_vm0, %v14081_v31 }
0x181d   : > { %v10612_v35 = vpop.f32.mrf.mxu0  ;;  %10705 = vmatprep.mubr.msk.f32.mxu1 %vm11295_vm0, %v14081_v31 }
0x181e   : > { %v6851_v60 = vpop.f32.mrf.mxu1 }
0x1820   : > { %v10619_v54 = vpop.f32.mrf.mxu1 }
0x1822   : > { %v6856_v51 = vpop.f32.mrf.mxu1 }
0x1824   : > { %v10622_v45 = vpop.f32.mrf.mxu1 }
0x1826   : > { %v6861_v44 = vpop.f32.mrf.mxu1 }
0x1828   : > { %v10625_v47 = vpop.f32.mrf.mxu1 }
0x182a   : > { %v6866_v49 = vpop.f32.mrf.mxu1 }
0x182c   : > { %v10628_v27 = vpop.f32.mrf.mxu1 }
0x182e   : > { %v6871_v3 = vpop.f32.mrf.mxu1 }
0x1830   : > { %v10631_v39 = vpop.f32.mrf.mxu1 }
0x18cb   : > { %v6956_v22 = vpop.f32.mrf.mxu0 }
0x18cc   : > { %v6957_v37 = vadd.f32 %v6956_v22, %v6851_v60  ;;  %v7064_v63 = vpop.f32.mrf.mxu1 }
0x18cd   : > { %v10638_v4 = vpop.f32.mrf.mxu0 }
0x18ce   : > { %v7088_v41 = vadd.f32 %v7064_v63, %v6957_v37  ;;  %v10657_v42 = vpop.f32.mrf.mxu1 }
0x18cf   : > { %v6961_v6 = vpop.f32.mrf.mxu0 }
0x18d0   : > { %v13563_v0 = vadd.f32 %v8904_v25, %v7088_v41  ;;  %v6962_v16 = vadd.f32 %v6961_v6, %v6856_v51  ;;  %v7069_v26 = vpop.f32.mrf.mxu1 }
0x18d1   : > { %v10641_v52 = vpop.f32.mrf.mxu0 }
0x18d2   : > { %v13566_v2 = vmul.f32 0.70710677, %v13563_v0  ;;  %v7089_v20 = vadd.f32 %v7069_v26, %v6962_v16  ;;  %v10660_v13 = vpop.f32.mrf.mxu1 }
0x18d3   : > { %v6966_v55 = vpop.f32.mrf.mxu0 }
0x18d4   : > { %v7116_v33 = vand.u32 2147483647, %v13566_v2  ;;  %v13569_v19 = vadd.f32 %v8904_v25, %v7089_v20  ;;  %v6967_v58 = vadd.f32 %v6966_v55, %v6861_v44  ;;  %v7074_v43 = vpop.f32.mrf.mxu1  ;;  %vm7216_vm7 = vcmp.ge.f32.partialorder %v13566_v2, 0.0 }
0x18d5   : > { %v10644_v57 = vpop.f32.mrf.mxu0 }
0x18d6   : > { %v7121_v14 = vmul.f32 0.3275911, %v7116_v33  ;;  %v13572_v15 = vmul.f32 0.70710677, %v13569_v19  ;;  %v10663_v12 = vpop.f32.mrf.mxu1  ;;  %v7090_v53 = vadd.f32 %v7074_v43, %v6967_v58 }
0x18d7   : > { %v6971_v34 = vpop.f32.mrf.mxu0 }
0x18d8   : > { %v7126_v10 = vadd.f32 1.0, %v7121_v14  ;;  %v7117_v61 = vand.u32 2147483647, %v13572_v15  ;;  %v7079_v8 = vpop.f32.mrf.mxu1  ;;  %v13575_v36 = vadd.f32 %v8904_v25, %v7090_v53  ;;  %v6972_v29 = vadd.f32 %v6971_v34, %v6866_v49 }
0x18d9   : > { %v10647_v21 = vpop.f32.mrf.mxu0  ;;  %vm7217_vm6 = vcmp.ge.f32.partialorder %v13572_v15, 0.0  ;;  %v7107_v15 = vmul.f32 0.5, %v13569_v19 }
0x18da   : > { %11134 = vrcp.f32 %v7126_v10  ;;  %v7122_v35 = vmul.f32 0.3275911, %v7117_v61  ;;  %v10666_v60 = vpop.f32.mrf.mxu1  ;;  %v13578_v54 = vmul.f32 0.70710677, %v13575_v36  ;;  %v7091_v51 = vadd.f32 %v7079_v8, %v6972_v29 }
0x18db   : > { %v6976_v45 = vpop.f32.mrf.mxu0  ;;  %v7187_v34 = vmul.f32 %v7117_v61, %v7117_v61  ;;  %v7186_v8 = vmul.f32 %v7116_v33, %v7116_v33 }
0x18dc   : > { %v7127_v44 = vadd.f32 1.0, %v7122_v35  ;;  %v6977_v47 = vadd.f32 %v6976_v45, %v6871_v3  ;;  %v7084_v27 = vpop.f32.mrf.mxu1  ;;  %v7118_v39 = vand.u32 2147483647, %v13578_v54  ;;  %v13581_v22 = vadd.f32 %v8904_v25, %v7091_v51 }
0x18dd   : > { %v10650_v37 = vpop.f32.mrf.mxu0  ;;  %v7192_v45 = vsub.f32 0.0, %v7187_v34  ;;  %vm7218_vm3 = vcmp.ge.f32.partialorder %v13578_v54, 0.0 }
0x18de   : > { %11136 = vrcp.f32 %v7127_v44  ;;  %v7092_v63 = vadd.f32 %v7084_v27, %v6977_v47  ;;  %v10669_v49 = vpop.f32.mrf.mxu1  ;;  %v7123_v4 = vmul.f32 0.3275911, %v7118_v39  ;;  %v13584_v41 = vmul.f32 0.70710677, %v13581_v22 }
0x18df   : > { %v7188_v57 = vmul.f32 %v7118_v39, %v7118_v39  ;;  %v7191_v37 = vsub.f32 0.0, %v7186_v8  ;;  %v7198_v61 = vmul.f32 1.442695, %v7192_v45 }
0x18e0   : > { %v13586_v42 = vadd.f32 %v8904_v25, %v7092_v63  ;;  %v7128_v6 = vadd.f32 1.0, %v7123_v4  ;;  %v7119_v16 = vand.u32 2147483647, %v13584_v41  ;;  %vm7219_vm15 = vcmp.ge.f32.partialorder %v13584_v41, 0.0 }
0x18e1   : > { %v7193_v21 = vsub.f32 0.0, %v7188_v57 }
0x18e2   : > { %v13590_v3 = vmul.f32 0.70710677, %v13586_v42  ;;  %11138 = vrcp.f32 %v7128_v6  ;;  %v7124_v26 = vmul.f32 0.3275911, %v7119_v16  ;;  %v7189_v10 = vmul.f32 %v7119_v16, %v7119_v16 }
0x18e3   : > { %v7200_v39 = vmul.f32 1.442695, %v7193_v21 }
0x18e4   : > { %v7120_v52 = vand.u32 2147483647, %v13590_v3  ;;  %v7129_v20 = vadd.f32 1.0, %v7124_v26  ;;  %v7194_v27 = vsub.f32 0.0, %v7189_v10  ;;  %vm7220_vm5 = vcmp.ge.f32.partialorder %v13590_v3, 0.0 }
0x18e5   : > { %v7108_v3 = vmul.f32 0.5, %v13575_v36  ;;  %v7106_v36 = vmul.f32 0.5, %v13563_v0  ;;  %v8918_v0 = vld [vmem:[%s14083_s10 + $0x48] sm:$0xff] }
0x18e6   : > { %v7125_v13 = vmul.f32 0.3275911, %v7120_v52  ;;  %11140 = vrcp.f32 %v7129_v20  ;;  %v7190_v44 = vmul.f32 %v7120_v52, %v7120_v52 }
0x18e7   : > { %v13593_v55 = vpop.eup %11134 }
0x18e8   : > { %v7141_v58 = vmul.f32 1.0614054, %v13593_v55  ;;  %v7130_v43 = vadd.f32 1.0, %v7125_v13  ;;  %v7195_v16 = vsub.f32 0.0, %v7190_v44  ;;  %v7202_v13 = vmul.f32 1.442695, %v7194_v27 }
0x18ea   : > { %v7146_v25 = vadd.f32 -1.4531521, %v7141_v58  ;;  %11142 = vrcp.f32 %v7130_v43  ;;  %v7196_v58 = vmul.f32 1.442695, %v7191_v37  ;;  %v7204_v34 = vmul.f32 1.442695, %v7195_v16 }
0x18eb   : > { %v11137_v14 = vpop.eup %11136  ;;  %11144 = vpow2.f32 %v7200_v39 }
0x18ec   : > { %v7151_v12 = vmul.f32 %v13593_v55, %v7146_v25  ;;  %v7142_v53 = vmul.f32 1.0614054, %v11137_v14  ;;  %11146 = vpow2.f32 %v7198_v61 }
0x18ed   : > { %11148 = vpow2.f32 %v7202_v13 }
0x18ee   : > { %v7147_v29 = vadd.f32 -1.4531521, %v7142_v53  ;;  %v7156_v60 = vadd.f32 1.4214138, %v7151_v12  ;;  %11150 = vpow2.f32 %v7196_v58 }
0x18ef   : > { %v11139_v35 = vpop.eup %11138  ;;  %11152 = vpow2.f32 %v7204_v34 }
0x18f0   : > { %v7152_v51 = vmul.f32 %v11137_v14, %v7147_v29  ;;  %v7143_v47 = vmul.f32 1.0614054, %v11139_v35  ;;  %v7161_v6 = vmul.f32 %v13593_v55, %v7156_v60 }
0x18f2   : > { %v7157_v63 = vadd.f32 1.4214138, %v7152_v51  ;;  %v7148_v49 = vadd.f32 -1.4531521, %v7143_v47  ;;  %v7166_v12 = vadd.f32 -0.28449672, %v7161_v6 }
0x18f3   : > { %v11141_v4 = vpop.eup %11140 }
0x18f4   : > { %v7162_v26 = vmul.f32 %v11137_v14, %v7157_v63  ;;  %v7153_v33 = vmul.f32 %v11139_v35, %v7148_v49  ;;  %v7144_v20 = vmul.f32 1.0614054, %v11141_v4  ;;  %v7171_v45 = vmul.f32 %v13593_v55, %v7166_v12 }
0x18f6   : > { %v7167_v43 = vadd.f32 -0.28449672, %v7162_v26  ;;  %v7158_v52 = vadd.f32 1.4214138, %v7153_v33  ;;  %v7149_v57 = vadd.f32 -1.4531521, %v7144_v20 }
0x18f7   : > { %v11143_v25 = vpop.eup %11142  ;;  %v7176_v6 = vadd.f32 0.2548296, %v7171_v45 }
0x18f8   : > { %v7145_v53 = vmul.f32 1.0614054, %v11143_v25  ;;  %v7163_v10 = vmul.f32 %v11139_v35, %v7158_v52  ;;  %v7154_v8 = vmul.f32 %v11141_v4, %v7149_v57  ;;  %v7172_v29 = vmul.f32 %v11137_v14, %v7167_v43  ;;  %v11145_v13 = vpop.eup %11144 }
0x18f9   : > { %v7181_v43 = vmul.f32 %v13593_v55, %v7176_v6  ;;  %v11147_v12 = vpop.eup %11146 }
0x18fa   : > { %v7150_v21 = vadd.f32 -1.4531521, %v7145_v53  ;;  %v7168_v60 = vadd.f32 -0.28449672, %v7163_v10  ;;  %v7159_v51 = vadd.f32 1.4214138, %v7154_v8  ;;  %v11149_v34 = vpop.eup %11148 }
0x18fb   : > { %v7177_v37 = vadd.f32 0.2548296, %v7172_v29  ;;  %v11151_v29 = vpop.eup %11150 }
0x18fc   : > { %v7155_v44 = vmul.f32 %v11143_v25, %v7150_v21  ;;  %v7173_v47 = vmul.f32 %v11139_v35, %v7168_v60  ;;  %v7164_v27 = vmul.f32 %v11141_v4, %v7159_v51  ;;  %v7206_v60 = vmul.f32 %v11151_v29, %v7181_v43 }
0x18fd   : > { %v7182_v33 = vmul.f32 %v11137_v14, %v7177_v37 }
0x18fe   : > { %v7160_v63 = vadd.f32 1.4214138, %v7155_v44  ;;  %v7178_v39 = vadd.f32 0.2548296, %v7173_v47  ;;  %v7169_v49 = vadd.f32 -0.28449672, %v7164_v27 }
0x18ff   : > { %v7207_v10 = vmul.f32 %v11147_v12, %v7182_v33  ;;  %v7211_v37 = vsub.f32 1.0, %v7206_v60 }
0x1900   : > { %v7165_v26 = vmul.f32 %v11143_v25, %v7160_v63  ;;  %v7183_v61 = vmul.f32 %v11139_v35, %v7178_v39  ;;  %v7174_v16 = vmul.f32 %v11141_v4, %v7169_v49  ;;  %v11153_v35 = vpop.eup %11152 }
0x1901   : > { %v7212_v14 = vsub.f32 1.0, %v7207_v10  ;;  %v7221_v6 = vsub.f32 0.0, %v7211_v37 }
0x1902   : > { %v7170_v20 = vadd.f32 -0.28449672, %v7165_v26  ;;  %v7179_v58 = vadd.f32 0.2548296, %v7174_v16  ;;  %v7208_v52 = vmul.f32 %v11145_v13, %v7183_v61  ;;  %v7110_v16 = vmul.f32 0.5, %v13586_v42 }
0x1903   : > { %v7222_v39 = vsub.f32 0.0, %v7212_v14  ;;  %v7109_v13 = vmul.f32 0.5, %v13581_v22  ;;  %v7226_v54 = vsel %vm7216_vm7, %v7211_v37, %v7221_v6 }
0x1904   : > { %v7175_v57 = vmul.f32 %v11143_v25, %v7170_v20  ;;  %v7184_v53 = vmul.f32 %v11141_v4, %v7179_v58  ;;  %v7213_v51 = vsub.f32 1.0, %v7208_v52  ;;  %v7231_v2 = vadd.f32 1.0, %v7226_v54  ;;  %v8937_v54 = vld [vmem:[%s14085_s18 + $0x1] ss:$0 sm:$0xff] }
0x1905   : > { %v7227_v20 = vsel %vm7217_vm6, %v7212_v14, %v7222_v39 }
0x1906   : > { %v7180_v8 = vadd.f32 0.2548296, %v7175_v57  ;;  %v7209_v21 = vmul.f32 %v11149_v34, %v7184_v53  ;;  %v7223_v63 = vsub.f32 0.0, %v7213_v51  ;;  %v7232_v43 = vadd.f32 1.0, %v7227_v20  ;;  %v8916_v57 = vld [vmem:[%s14083_s10 + $0x38] sm:$0xff]  ;;  %v8938_v20 = vld [vmem:[%s14084_s1 + $0x20] sm:$0xff] }
0x1907   : > { %v7236_v19 = vmul.f32 %v7231_v2, %v7106_v36 }
0x1908   : > { %v7185_v45 = vmul.f32 %v11143_v25, %v7180_v8  ;;  %v7214_v44 = vsub.f32 1.0, %v7209_v21  ;;  %v7228_v26 = vsel %vm7218_vm3, %v7213_v51, %v7223_v63  ;;  %v7237_v42 = vmul.f32 %v7232_v43, %v7107_v15 }
0x1909   : > { %v7233_v41 = vadd.f32 1.0, %v7228_v26 }
0x190a   : > { %v7210_v47 = vmul.f32 %v11153_v35, %v7185_v45  ;;  %v7224_v27 = vsub.f32 0.0, %v7214_v44 }
0x190b   : > { %v7238_v22 = vmul.f32 %v7233_v41, %v7108_v3 }
0x190c   : > { %v7215_v55 = vsub.f32 1.0, %v7210_v47  ;;  %v7229_v4 = vsel %vm7219_vm15, %v7214_v44, %v7224_v27 }
0x190d   : > { %v7234_v61 = vadd.f32 1.0, %v7229_v4 }
0x190e   : > { %v7225_v49 = vsub.f32 0.0, %v7215_v55 }
0x190f   : > { %v13610_v52 = vmul.f32 %v7234_v61, %v7109_v13  ;;  %v8941_v61 = vld [vmem:[%s14084_s1 + $0x38] sm:$0xff] }
0x1910   : > { %v7230_v25 = vsel %vm7220_vm5, %v7215_v55, %v7225_v49 }
0x1911   : > { %v7235_v33 = vadd.f32 1.0, %v7230_v25 }
0x1913   : > { %v13607_v58 = vmul.f32 %v7235_v33, %v7110_v16  ;;  %v8940_v16 = vld [vmem:[%s14084_s1 + $0x30] sm:$0xff]  ;;  %v8939_v33 = vld [vmem:[%s14084_s1 + $0x28] sm:$0xff] }
0x1915   : > { %10671 = vmatpush3.msra.mxu0 %v13607_v58  ;;  %10696 = vmatpush3.msra.mxu1 %v13607_v58 }
0x1916   : > { %10672 = vmatprep.subr.mxu0 %v14081_v31  ;;  %10697 = vmatprep.subr.mxu1 %v14081_v31 }
0x1917   : > { %10673 = vmatpush3.msra.mxu0 %v13610_v52  ;;  %10698 = vmatpush3.msra.mxu1 %v13610_v52 }
0x1918   : > { %10674 = vmatprep.subr.mxu0 %v14081_v31  ;;  %10699 = vmatprep.subr.mxu1 %v14081_v31 }
0x1919   : > { %10675 = vmatpush3.msra.mxu0 %v7238_v22  ;;  %10700 = vmatpush3.msra.mxu1 %v7238_v22 }
0x191a   : > { %10676 = vmatprep.subr.mxu0 %v14081_v31  ;;  %10701 = vmatprep.subr.mxu1 %v14081_v31 }
0x191b   : > { %10677 = vmatpush3.msra.mxu0 %v7237_v42  ;;  %10702 = vmatpush3.msra.mxu1 %v7237_v42 }
0x191c   : > { %10678 = vmatprep.subr.mxu0 %v14081_v31  ;;  %10703 = vmatprep.subr.mxu1 %v14081_v31 }
0x191d   : > { %10679 = vmatpush3.msra.mxu0 %v7236_v19  ;;  %10704 = vmatpush3.msra.mxu1 %v7236_v19 }
0x191e   : > { %10681 = vmatmul.mubr.msk.f32.vlgmr.msra.gmra.mxu0 %vm3024_vm4, %v13422_v62  ;;  %10706 = vmatmul.mubr.msk.f32.vlgmr.msra.gmra.mxu1 %vm3024_vm4, %v13428_v59  ;;  %v8917_v62 = vld [vmem:[%s14083_s10 + $0x40] sm:$0xff]  ;;  %v8930_v59 = vld [vmem:[%s14083_s10 + $0x58] sm:$0xff] }
0x191f   : > { %10683 = vmatprep.mubr.msk.f32.mxu0 %vm11295_vm0, %v14081_v31  ;;  %10708 = vmatprep.mubr.msk.f32.mxu1 %vm11295_vm0, %v14081_v31 }
0x1920   : > { %10720 = vmatprep.subr.mxu0 %v14081_v31  ;;  %10739 = vmatprep.subr.mxu1 %v14081_v31 }
0x1921   : > { %10721 = vmatpush3.msra.mxu0 %v8918_v0  ;;  %10740 = vmatpush3.msra.mxu1 %v8916_v57 }
0x1922   : > { %10684 = vmatmul.mubr.msk.f32.gmra.mxu0 %vm3024_vm4, %v13440_v28  ;;  %10709 = vmatmul.mubr.msk.f32.gmra.mxu1 %vm3024_vm4, %v13445_v50  ;;  %v8915_v28 = vld [vmem:[%s14083_s10 + $0x30] sm:$0xff] }
0x1923   : > { %10686 = vmatprep.mubr.msk.f32.mxu0 %vm11295_vm0, %v14081_v31  ;;  %10711 = vmatprep.mubr.msk.f32.mxu1 %vm11295_vm0, %v14081_v31  ;;  %v8929_v50 = vld [vmem:[%s14083_s10 + $0x50] sm:$0xff] }
0x1924   : > { %10722 = vmatprep.subr.mxu0 %v14081_v31  ;;  %10741 = vmatprep.subr.mxu1 %v14081_v31 }
0x1925   : > { %10723 = vmatpush3.msra.mxu0 %v8917_v62  ;;  %10742 = vmatpush3.msra.mxu1 %v8915_v28 }
0x1926   : > { %10687 = vmatmul.mubr.msk.f32.gmra.mxu0 %vm3024_vm4, %v13455_v40  ;;  %10712 = vmatmul.mubr.msk.f32.gmra.mxu1 %vm3024_vm4, %v13460_v7 }
0x1927   : > { %10689 = vmatprep.mubr.msk.f32.mxu0 %vm11295_vm0, %v14081_v31  ;;  %10714 = vmatprep.mubr.msk.f32.mxu1 %vm11295_vm0, %v14081_v31 }
0x1928   : > { %10758 = vmatprep.subr.mxu0 %v14081_v31  ;;  %10777 = vmatprep.subr.mxu1 %v14081_v31 }
0x192a   : > { %10690 = vmatmul.mubr.msk.f32.gmra.mxu0 %vm3024_vm4, %v13469_v23  ;;  %10715 = vmatmul.mubr.msk.f32.gmra.mxu1 %vm3024_vm4, %v13474_v56 }
0x192b   : > { %10692 = vmatprep.mubr.msk.f32.mxu0 %vm11295_vm0, %v14081_v31  ;;  %10717 = vmatprep.mubr.msk.f32.mxu1 %vm11295_vm0, %v14081_v31 }
0x192e   : > { %10693 = vmatmul.mubr.msk.f32.gmra.mxu0 %vm3024_vm4, %v13483_v30  ;;  %10718 = vmatmul.mubr.msk.f32.gmra.mxu1 %vm3024_vm4, %v13488_v18 }
0x192f   : > { %10724 = vmatprep.mubr.msk.f32.mxu0 %vm11295_vm0, %v14081_v31  ;;  %10743 = vmatprep.mubr.msk.f32.mxu1 %vm11295_vm0, %v14081_v31 }
0x1932   : > { %10725 = vmatmul.mubr.msk.f32.vlgmr.msra.gmra.mxu0 %vm2782_vm2, %v7236_v19 }
0x1933   : > { %10727 = vmatprep.mubr.msk.f32.mxu0 %vm11295_vm0, %v14081_v31  ;;  %10759 = vmatpush3.msra.mxu0 %v8930_v59 }
0x1934   : > { %10760 = vmatprep.subr.mxu0 %v14081_v31 }
0x1935   : > { %10761 = vmatpush3.msra.mxu0 %v8929_v50 }
0x1936   : > { %10728 = vmatmul.mubr.msk.f32.gmra.mxu0 %vm2782_vm2, %v7237_v42  ;;  %10800 = vmatprep.subr.mxu0 %v14081_v31 }
0x1937   : > { %10730 = vmatprep.mubr.msk.f32.mxu0 %vm11295_vm0, %v14081_v31 }
0x193a   : > { %10731 = vmatmul.mubr.msk.f32.gmra.mxu0 %vm2782_vm2, %v7238_v22 }
0x193b   : > { %10733 = vmatprep.mubr.msk.f32.mxu0 %vm11295_vm0, %v14081_v31 }
0x193e   : > { %10734 = vmatmul.mubr.msk.f32.gmra.mxu0 %vm2782_vm2, %v13610_v52 }
0x193f   : > { %10736 = vmatprep.mubr.msk.f32.mxu0 %vm11295_vm0, %v14081_v31 }
0x1942   : > { %10737 = vmatmul.mubr.msk.f32.gmra.mxu0 %vm2782_vm2, %v13607_v58 }
0x1943   : > { %10762 = vmatprep.mubr.msk.f32.mxu0 %vm11295_vm0, %v14081_v31 }
0x19de   : > { %v7307_v40 = vpop.f32.mrf.mxu0  ;;  %v7397_v7 = vpop.f32.mrf.mxu1 }
0x19df   : > { %10744 = vmatmul.mubr.msk.f32.vlgmr.msra.gmra.mxu1 %vm2782_vm2, %v7307_v40  ;;  %10763 = vmatmul.mubr.msk.f32.vlgmr.msra.gmra.mxu0 %vm2782_vm2, %v7397_v7 }
0x19e0   : > { %v10682_v23 = vpop.f32.mrf.mxu0  ;;  %v10707_v56 = vpop.f32.mrf.mxu1  ;;  %10746 = vmatprep.mubr.msk.f32.mxu1 %vm11295_vm0, %v14081_v31  ;;  %10765 = vmatprep.mubr.msk.f32.mxu0 %vm11295_vm0, %v14081_v31 }
0x19e1   : > { %10778 = vmatpush3.msra.mxu1 %v8941_v61  ;;  %v8948_v61 = vld [vmem:[%s14087_s5 + $0x1] ss:$0 sm:$0xff] }
0x19e2   : > { %v7312_v30 = vpop.f32.mrf.mxu0  ;;  %v7402_v18 = vpop.f32.mrf.mxu1  ;;  %10779 = vmatprep.subr.mxu1 %v14081_v31 }
0x19e3   : > { %10747 = vmatmul.mubr.msk.f32.gmra.mxu1 %vm2782_vm2, %v7312_v30  ;;  %10766 = vmatmul.mubr.msk.f32.gmra.mxu0 %vm2782_vm2, %v7402_v18 }
0x19e4   : > { %v10685_v12 = vpop.f32.mrf.mxu0  ;;  %v10710_v53 = vpop.f32.mrf.mxu1  ;;  %10749 = vmatprep.mubr.msk.f32.mxu1 %vm11295_vm0, %v14081_v31  ;;  %10768 = vmatprep.mubr.msk.f32.mxu0 %vm11295_vm0, %v14081_v31 }
0x19e5   : > { %10780 = vmatpush3.msra.mxu1 %v8940_v16 }
0x19e6   : > { %v7317_v34 = vpop.f32.mrf.mxu0  ;;  %v7407_v10 = vpop.f32.mrf.mxu1  ;;  %10781 = vmatprep.subr.mxu1 %v14081_v31 }
0x19e7   : > { %10750 = vmatmul.mubr.msk.f32.gmra.mxu1 %vm2782_vm2, %v7317_v34  ;;  %10769 = vmatmul.mubr.msk.f32.gmra.mxu0 %vm2782_vm2, %v7407_v10 }
0x19e8   : > { %v10688_v8 = vpop.f32.mrf.mxu0  ;;  %v10713_v29 = vpop.f32.mrf.mxu1  ;;  %10752 = vmatprep.mubr.msk.f32.mxu1 %vm11295_vm0, %v14081_v31  ;;  %10771 = vmatprep.mubr.msk.f32.mxu0 %vm11295_vm0, %v14081_v31 }
0x19e9   : > { %10782 = vmatpush3.msra.mxu1 %v8939_v33 }
0x19ea   : > { %v7322_v21 = vpop.f32.mrf.mxu0  ;;  %v7412_v60 = vpop.f32.mrf.mxu1  ;;  %10783 = vmatprep.subr.mxu1 %v14081_v31 }
0x19eb   : > { %10753 = vmatmul.mubr.msk.f32.gmra.mxu1 %vm2782_vm2, %v7322_v21  ;;  %10772 = vmatmul.mubr.msk.f32.gmra.mxu0 %vm2782_vm2, %v7412_v60 }
0x19ec   : > { %v10691_v51 = vpop.f32.mrf.mxu0  ;;  %v10716_v45 = vpop.f32.mrf.mxu1  ;;  %10755 = vmatprep.mubr.msk.f32.mxu1 %vm11295_vm0, %v14081_v31  ;;  %10774 = vmatprep.mubr.msk.f32.mxu0 %vm11295_vm0, %v14081_v31 }
0x19ed   : > { %10784 = vmatpush3.msra.mxu1 %v8938_v20 }
0x19ee   : > { %v7327_v35 = vpop.f32.mrf.mxu0  ;;  %v7417_v44 = vpop.f32.mrf.mxu1  ;;  %10823 = vmatprep.subr.mxu1 %v14081_v31 }
0x19ef   : > { %10756 = vmatmul.mubr.msk.f32.gmra.mxu1 %vm2782_vm2, %v7327_v35  ;;  %10775 = vmatmul.mubr.msk.f32.gmra.mxu0 %vm2782_vm2, %v7417_v44  ;;  %v8866_v44 = vld [vmem:[%s14086_s9 + $0x1] ss:$0 sm:$0xff]  ;;  %s11303_s9 = smov [#allocation2]  }
0x19f0   : > { %v10694_v14 = vpop.f32.mrf.mxu0  ;;  %v10719_v47 = vpop.f32.mrf.mxu1  ;;  %10785 = vmatprep.mubr.msk.f32.mxu1 %vm11295_vm0, %v14081_v31  ;;  %10808 = vmatprep.mubr.msk.f32.mxu0 %vm11295_vm0, %v14081_v31  ;;  %s11205_s10 = sshll.u32 %s11303_s9, 4  ;;  %s11206_s10 = int_to_ptr.vmem [resolvable:$false] %s11205_s10 }
0x19f1   : > { %v6551_v14 = vadd.f32 %v8866_v44, %v13522_v24 }
0x19f2   : > { %v7508_v27 = vpop.f32.mrf.mxu0 }
0x19f4   : > { %v10726_v37 = vpop.f32.mrf.mxu0 }
0x19f5   : > { %v6556_v37 = vadd.f32 %v8866_v44, %v13524_v5  ;;  %v6566_v5 = vadd.f32 %v8866_v44, %v13528_v17 }
0x19f6   : > { %v7513_v63 = vpop.f32.mrf.mxu0 }
0x19f8   : > { %v10729_v55 = vpop.f32.mrf.mxu0 }
0x19fa   : > { %v7518_v39 = vpop.f32.mrf.mxu0 }
0x19fc   : > { %v10732_v4 = vpop.f32.mrf.mxu0 }
0x19fe   : > { %v7523_v49 = vpop.f32.mrf.mxu0 }
0x1a00   : > { %v10735_v6 = vpop.f32.mrf.mxu0 }
0x1a02   : > { %v7528_v26 = vpop.f32.mrf.mxu0 }
0x1a04   : > { %v10738_v25 = vpop.f32.mrf.mxu0 }
0x1a9f   : > { %v7613_v41 = vpop.f32.mrf.mxu1  ;;  %v7721_v13 = vpop.f32.mrf.mxu0 }
0x1aa0   : > { %v7614_v58 = vadd.f32 %v7613_v41, %v7508_v27 }
0x1aa1   : > { %v10745_v43 = vpop.f32.mrf.mxu1  ;;  %v10764_v3 = vpop.f32.mrf.mxu0 }
0x1aa2   : > { %v7745_v52 = vadd.f32 %v7721_v13, %v7614_v58 }
0x1aa3   : > { %v7618_v2 = vpop.f32.mrf.mxu1  ;;  %v7726_v15 = vpop.f32.mrf.mxu0 }
0x1aa4   : > { %v7758_v22 = vadd.f32 %v8937_v54, %v7745_v52  ;;  %v7619_v36 = vadd.f32 %v7618_v2, %v7513_v63 }
0x1aa5   : > { %v10748_v42 = vpop.f32.mrf.mxu1  ;;  %v10767_v19 = vpop.f32.mrf.mxu0 }
0x1aa6   : > { %v7746_v0 = vadd.f32 %v7726_v15, %v7619_v36  ;;  %7768 = vrot.lane.b32.xlu1 %v7758_v22, %s14104_s14 }
0x1aa7   : > { %v7623_v57 = vpop.f32.mrf.mxu1  ;;  %v7731_v62 = vpop.f32.mrf.mxu0 }
0x1aa8   : > { %v7759_v59 = vadd.f32 %v8937_v54, %v7746_v0  ;;  %v7624_v28 = vadd.f32 %v7623_v57, %v7518_v39  ;;  %v6561_v39 = vadd.f32 %v8866_v44, %v13526_v11  ;;  %v6571_v11 = vadd.f32 %v8866_v44, %v13530_v46 }
0x1aa9   : > { %v10751_v50 = vpop.f32.mrf.mxu1  ;;  %v10770_v40 = vpop.f32.mrf.mxu0 }
0x1aaa   : > { %v7747_v7 = vadd.f32 %v7731_v62, %v7624_v28  ;;  %7770 = vrot.lane.b32.xlu0 %v7759_v59, %s14104_s14 }
0x1aab   : > { %v7628_v23 = vpop.f32.mrf.mxu1  ;;  %v7736_v56 = vpop.f32.mrf.mxu0 }
0x1aac   : > { %v7760_v30 = vadd.f32 %v8937_v54, %v7747_v7  ;;  %v7629_v18 = vadd.f32 %v7628_v23, %v7523_v49 }
0x1aad   : > { %v10754_v12 = vpop.f32.mrf.mxu1  ;;  %v10773_v53 = vpop.f32.mrf.mxu0 }
0x1aae   : > { %v7748_v34 = vadd.f32 %v7736_v56, %v7629_v18  ;;  %7772 = vrot.lane.b32.xlu1 %v7760_v30, %s14104_s14 }
0x1aaf   : > { %v7633_v10 = vpop.f32.mrf.mxu1  ;;  %v7741_v8 = vpop.f32.mrf.mxu0 }
0x1ab0   : > { %v7761_v29 = vadd.f32 %v8937_v54, %v7748_v34  ;;  %v7634_v21 = vadd.f32 %v7633_v10, %v7528_v26 }
0x1ab1   : > { %v10757_v60 = vpop.f32.mrf.mxu1  ;;  %v10776_v51 = vpop.f32.mrf.mxu0 }
0x1ab2   : > { %v7749_v45 = vadd.f32 %v7741_v8, %v7634_v21  ;;  %7774 = vrot.lane.b32.xlu0 %v7761_v29, %s14104_s14 }
0x1ab4   : > { %v7762_v35 = vadd.f32 %v8937_v54, %v7749_v45 }
0x1ab6   : > { %7776 = vrot.lane.b32.xlu1 %v7762_v35, %s14104_s14  ;;  %s952_s14 = sand.u32 1, %s11253_s23  }
0x1ab7   : > { %s8682_s1 = sshll.u32 %s952_s14, 3 }
0x1b18   : > { %v7769_v47 = vpop.permute.xlu1 %7768 }
0x1b19   : > { %v7783_v27 = vsel %vm2782_vm2, %v6551_v14, %v7769_v47 }
0x1b1a   : > { %10786 = vmatmul.mubr.msk.f32.vlgmr.msra.gmra.mxu1 %vm2577_vm1, %v7783_v27 }
0x1b1b   : > { %10788 = vmatprep.mubr.msk.f32.mxu1 %vm11295_vm0, %v14081_v31 }
0x1b1c   : > { %v7771_v63 = vpop.permute.xlu0 %7770 }
0x1b1d   : > { %v7784_v55 = vsel %vm2782_vm2, %v6556_v37, %v7771_v63  ;;  %v8956_v37 = vld [vmem:[%s14088_s29 + $0x38] sm:$0xff]  ;;  %v8955_v63 = vld [vmem:[%s14088_s29 + $0x30] sm:$0xff] }
0x1b1e   : > { %10789 = vmatmul.mubr.msk.f32.gmra.mxu1 %vm2577_vm1, %v7784_v55  ;;  %10801 = vmatpush3.msra.mxu0 %v8956_v37  ;;  %v8954_v55 = vld [vmem:[%s14088_s29 + $0x28] sm:$0xff] }
0x1b1f   : > { %10791 = vmatprep.mubr.msk.f32.mxu1 %vm11295_vm0, %v14081_v31  ;;  %10802 = vmatprep.subr.mxu0 %v14081_v31 }
0x1b20   : > { %v7773_v24 = vpop.permute.xlu1 %7772  ;;  %10803 = vmatpush3.msra.mxu0 %v8955_v63 }
0x1b21   : > { %v7785_v4 = vsel %vm2782_vm2, %v6561_v39, %v7773_v24  ;;  %10804 = vmatprep.subr.mxu0 %v14081_v31  ;;  %v8953_v39 = vld [vmem:[%s14088_s29 + $0x20] sm:$0xff] }
0x1b22   : > { %10792 = vmatmul.mubr.msk.f32.gmra.mxu1 %vm2577_vm1, %v7785_v4  ;;  %10805 = vmatpush3.msra.mxu0 %v8954_v55 }
0x1b23   : > { %10794 = vmatprep.mubr.msk.f32.mxu1 %vm11295_vm0, %v14081_v31  ;;  %10806 = vmatprep.subr.mxu0 %v14081_v31 }
0x1b24   : > { %v7775_v49 = vpop.permute.xlu0 %7774  ;;  %10807 = vmatpush3.msra.mxu0 %v8953_v39 }
0x1b25   : > { %v7786_v6 = vsel %vm2782_vm2, %v6566_v5, %v7775_v49  ;;  %10870 = vmatprep.subr.mxu0 %v14081_v31 }
0x1b26   : > { %10795 = vmatmul.mubr.msk.f32.gmra.mxu1 %vm2577_vm1, %v7786_v6 }
0x1b27   : > { %10797 = vmatprep.mubr.msk.f32.mxu1 %vm11295_vm0, %v14081_v31 }
0x1b28   : > { %v7777_v26 = vpop.permute.xlu1 %7776 }
0x1b29   : > { %v7787_v25 = vsel %vm2782_vm2, %v6571_v11, %v7777_v26 }
0x1b2a   : > { %10798 = vmatmul.mubr.msk.f32.gmra.mxu1 %vm2577_vm1, %v7787_v25 }
0x1b2b   : > { %10855 = vmatprep.mubr.msk.f32.mxu1 %vm11295_vm0, %v14081_v31 }
0x1bda   : > { %v7874_v17 = vpop.f32.mrf.mxu1 }
0x1bdb   : > { %v7898_v16 = vadd.f32 %v7874_v17, %v13058_v9 }
0x1bdc   : > { %v10787_v33 = vpop.f32.mrf.mxu1 }
0x1bdd   : > { %v13769_v20 = vadd.f32 %v8948_v61, %v7898_v16 }
0x1bde   : > { %v7879_v41 = vpop.f32.mrf.mxu1 }
0x1bdf   : > { %v7899_v46 = vadd.f32 %v7879_v41, %v13062_v38  ;;  %v7920_v13 = vsel %vm2577_vm1, %v13769_v20, 0.0 }
0x1be0   : > { %v10790_v58 = vpop.f32.mrf.mxu1  ;;  %7921 = vadd.xlane.f32.xlu0 %v7920_v13 }
0x1be1   : > { %v13774_v54 = vadd.f32 %v8948_v61, %v7899_v46  ;;  %v8951_v58 = vld [vmem:[%s14089_s11 + $0x1] ss:$0 sm:$0xff] }
0x1be2   : > { %v7884_v43 = vpop.f32.mrf.mxu1 }
0x1be3   : > { %v7900_v3 = vadd.f32 %v7884_v43, %v13066_v48  ;;  %v7923_v52 = vsel %vm2577_vm1, %v13774_v54, 0.0 }
0x1be4   : > { %v10793_v9 = vpop.f32.mrf.mxu1  ;;  %7924 = vadd.xlane.f32.xlu1 %v7923_v52  ;;  %v8952_v52 = vld [vmem:[%s14091_s2 + $0x1] ss:$0 sm:$0xff]  ;;  %s8988_s2 = sshll.u32 %s11490_s0, 7  ;;  %s11207_s0 = scalar_lea.vmem %s11206_s10, 256 }
0x1be5   : > { %v13779_v2 = vadd.f32 %v8948_v61, %v7900_v3  ;;  %s13944_s6 = scalar_lea.hbm %s14107_s8, %s8988_s2 }
0x1be6   : > { %v7889_v15 = vpop.f32.mrf.mxu1 }
0x1be7   : > { %v7901_v38 = vadd.f32 %v7889_v15, %v13070_v32  ;;  %v7926_v22 = vsel %vm2577_vm1, %v13779_v2, 0.0 }
0x1be8   : > { %7927 = vadd.xlane.f32.xlu0 %v7926_v22  ;;  %v10796_v36 = vpop.f32.mrf.mxu1 }
0x1be9   : > { %v13784_v42 = vadd.f32 %v8948_v61, %v7901_v38 }
0x1bea   : > { %v7894_v19 = vpop.f32.mrf.mxu1 }
0x1beb   : > { %v7902_v48 = vadd.f32 %v7894_v19, %v13074_v1  ;;  %v7929_v0 = vsel %vm2577_vm1, %v13784_v42, 0.0 }
0x1bec   : > { %7930 = vadd.xlane.f32.xlu0 %v7929_v0  ;;  %v10799_v57 = vpop.f32.mrf.mxu1 }
0x1bed   : > { %v13789_v62 = vadd.f32 %v8948_v61, %v7902_v48 }
0x1bef   : > { %v7932_v32 = vsel %vm2577_vm1, %v13789_v62, 0.0 }
0x1bf0   : > { %7933 = vadd.xlane.f32.xlu0 %v7932_v32 }
0x1c69   : > { %v7922_v59 = vpop.xlane.xlu0 %7921 }
0x1c6a   : > { %v7935_v28 = vmul.f32 0.03125, %v7922_v59 }
0x1c6c   : > { %v7940_v50 = vsub.f32 %v13769_v20, %v7935_v28 }
0x1c6d   : > { %v7925_v40 = vpop.xlane.xlu1 %7924 }
0x1c6e   : > { %v7936_v7 = vmul.f32 0.03125, %v7925_v40  ;;  %v7945_v23 = vmul.f32 %v7940_v50, %v7940_v50 }
0x1c70   : > { %v13795_v1 = vsub.f32 %v13774_v54, %v7936_v7  ;;  %v7950_v56 = vsel %vm2577_vm1, %v7945_v23, 0.0 }
0x1c71   : > { %v7928_v30 = vpop.xlane.xlu0 %7927  ;;  %7951 = vadd.xlane.f32.xlu1 %v7950_v56 }
0x1c72   : > { %v7937_v18 = vmul.f32 0.03125, %v7928_v30  ;;  %v7946_v12 = vmul.f32 %v13795_v1, %v13795_v1  ;;  %v8979_v30 = vld [vmem:[%s14093_s16 + $0xf8] sm:$0xff] }
0x1c73   : > { %10824 = vmatpush3.msra.mxu1 %v8979_v30 }
0x1c74   : > { %v7942_v53 = vsub.f32 %v13779_v2, %v7937_v18  ;;  %v7953_v34 = vsel %vm2577_vm1, %v7946_v12, 0.0  ;;  %10825 = vmatprep.subr.mxu1 %v14081_v31  ;;  %v8978_v18 = vld [vmem:[%s14093_s16 + $0xf0] sm:$0xff]  ;;  %v8977_v12 = vld [vmem:[%s14093_s16 + $0xe8] sm:$0xff] }
0x1c75   : > { %v7931_v10 = vpop.xlane.xlu0 %7930  ;;  %7954 = vadd.xlane.f32.xlu0 %v7953_v34  ;;  %10826 = vmatpush3.msra.mxu1 %v8978_v18  ;;  %v8975_v34 = vld [vmem:[%s14093_s16 + $0xd8] sm:$0xff] }
0x1c76   : > { %v7938_v8 = vmul.f32 0.03125, %v7931_v10  ;;  %v7947_v29 = vmul.f32 %v7942_v53, %v7942_v53  ;;  %10827 = vmatprep.subr.mxu1 %v14081_v31  ;;  %v8974_v10 = vld [vmem:[%s14093_s16 + $0xd0] sm:$0xff] }
0x1c77   : > { %10828 = vmatpush3.msra.mxu1 %v8977_v12 }
0x1c78   : > { %v7943_v21 = vsub.f32 %v13784_v42, %v7938_v8  ;;  %v7956_v60 = vsel %vm2577_vm1, %v7947_v29, 0.0  ;;  %10829 = vmatprep.subr.mxu1 %v14081_v31  ;;  %v8973_v8 = vld [vmem:[%s14093_s16 + $0xc8] sm:$0xff]  ;;  %v8972_v29 = vld [vmem:[%s14093_s16 + $0xc0] sm:$0xff] }
0x1c79   : > { %7957 = vadd.xlane.f32.xlu1 %v7956_v60  ;;  %v7934_v51 = vpop.xlane.xlu0 %7933  ;;  %v8970_v60 = vld [vmem:[%s14093_s16 + $0xb0] sm:$0xff] }
0x1c7a   : > { %v7939_v45 = vmul.f32 0.03125, %v7934_v51  ;;  %v7948_v35 = vmul.f32 %v7943_v21, %v7943_v21  ;;  %v8969_v51 = vld [vmem:[%s14093_s16 + $0xa8] sm:$0xff] }
0x1c7c   : > { %v7944_v44 = vsub.f32 %v13789_v62, %v7939_v45  ;;  %v7959_v14 = vsel %vm2577_vm1, %v7948_v35, 0.0  ;;  %v8968_v45 = vld [vmem:[%s14093_s16 + $0xa0] sm:$0xff]  ;;  %v8967_v35 = vld [vmem:[%s14093_s16 + $0x98] sm:$0xff] }
0x1c7d   : > { %7960 = vadd.xlane.f32.xlu0 %v7959_v14  ;;  %v8965_v14 = vld [vmem:[%s14093_s16 + $0x88] sm:$0xff] }
0x1c7e   : > { %v7949_v47 = vmul.f32 %v7944_v44, %v7944_v44 }
0x1c80   : > { %v7962_v27 = vsel %vm2577_vm1, %v7949_v47, 0.0  ;;  %v8964_v47 = vld [vmem:[%s14093_s16 + $0x80] sm:$0xff] }
0x1c81   : > { %7963 = vadd.xlane.f32.xlu1 %v7962_v27  ;;  %v8958_v27 = vld [vmem:[%s14095_s15 + $0x1] ss:$0 sm:$0xff] }
0x1cfa   : > { %v7952_v24 = vpop.xlane.xlu1 %7951 }
0x1cfb   : > { %v7965_v4 = vmul.f32 0.03125, %v7952_v24 }
0x1cfd   : > { %v7970_v5 = vadd.f32 1e-06, %v7965_v4 }
0x1cfe   : > { %v7955_v49 = vpop.xlane.xlu0 %7954 }
0x1cff   : > { %11154 = vrsqrt.f32 %v7970_v5  ;;  %v7966_v6 = vmul.f32 0.03125, %v7955_v49 }
0x1d01   : > { %v7971_v11 = vadd.f32 1e-06, %v7966_v6 }
0x1d02   : > { %v7958_v26 = vpop.xlane.xlu1 %7957 }
0x1d03   : > { %11156 = vrsqrt.f32 %v7971_v11  ;;  %v7967_v25 = vmul.f32 0.03125, %v7958_v26 }
0x1d05   : > { %v7972_v17 = vadd.f32 1e-06, %v7967_v25 }
0x1d06   : > { %v7961_v61 = vpop.xlane.xlu0 %7960 }
0x1d07   : > { %11158 = vrsqrt.f32 %v7972_v17  ;;  %v7968_v16 = vmul.f32 0.03125, %v7961_v61 }
0x1d09   : > { %v7973_v33 = vadd.f32 1e-06, %v7968_v16 }
0x1d0a   : > { %v7964_v41 = vpop.xlane.xlu1 %7963 }
0x1d0b   : > { %11160 = vrsqrt.f32 %v7973_v33  ;;  %v7969_v46 = vmul.f32 0.03125, %v7964_v41 }
0x1d0c   : > { %v11155_v13 = vpop.eup %11154 }
0x1d0d   : > { %v7980_v43 = vmul.f32 %v11155_v13, %v7940_v50  ;;  %v7974_v3 = vadd.f32 1e-06, %v7969_v46 }
0x1d0f   : > { %v7991_v9 = vmul.f32 %v8951_v58, %v7980_v43  ;;  %11162 = vrsqrt.f32 %v7974_v3 }
0x1d10   : > { %v11157_v15 = vpop.eup %11156 }
0x1d11   : > { %v8002_v38 = vadd.f32 %v8952_v52, %v7991_v9  ;;  %v7981_v22 = vmul.f32 %v11157_v15, %v13795_v1 }
0x1d13   : > { %10809 = vmatmul.mubr.msk.f32.vlgmr.msra.gmra.mxu0 %vm2577_vm1, %v8002_v38  ;;  %v7992_v36 = vmul.f32 %v8951_v58, %v7981_v22 }
0x1d14   : > { %v11159_v19 = vpop.eup %11158  ;;  %10811 = vmatprep.mubr.msk.f32.mxu0 %vm11295_vm0, %v14081_v31 }
0x1d15   : > { %v7982_v48 = vmul.f32 %v11159_v19, %v7942_v53  ;;  %v8003_v0 = vadd.f32 %v8952_v52, %v7992_v36  ;;  %v8976_v53 = vld [vmem:[%s14093_s16 + $0xe0] sm:$0xff] }
0x1d16   : > { %10830 = vmatpush3.msra.mxu1 %v8976_v53 }
0x1d17   : > { %10812 = vmatmul.mubr.msk.f32.gmra.mxu0 %vm2577_vm1, %v8003_v0  ;;  %v7993_v57 = vmul.f32 %v8951_v58, %v7982_v48  ;;  %10831 = vmatprep.subr.mxu1 %v14081_v31 }
0x1d18   : > { %v11161_v32 = vpop.eup %11160  ;;  %10814 = vmatprep.mubr.msk.f32.mxu0 %vm11295_vm0, %v14081_v31  ;;  %10832 = vmatpush3.msra.mxu1 %v8975_v34 }
0x1d19   : > { %v7983_v59 = vmul.f32 %v11161_v32, %v7943_v21  ;;  %v8004_v28 = vadd.f32 %v8952_v52, %v7993_v57  ;;  %10833 = vmatprep.subr.mxu1 %v14081_v31  ;;  %v8971_v21 = vld [vmem:[%s14093_s16 + $0xb8] sm:$0xff] }
0x1d1a   : > { %10834 = vmatpush3.msra.mxu1 %v8974_v10 }
0x1d1b   : > { %10815 = vmatmul.mubr.msk.f32.gmra.mxu0 %vm2577_vm1, %v8004_v28  ;;  %v7994_v50 = vmul.f32 %v8951_v58, %v7983_v59  ;;  %10835 = vmatprep.subr.mxu1 %v14081_v31 }
0x1d1c   : > { %v11163_v40 = vpop.eup %11162  ;;  %10817 = vmatprep.mubr.msk.f32.mxu0 %vm11295_vm0, %v14081_v31  ;;  %10836 = vmatpush3.msra.mxu1 %v8973_v8 }
0x1d1d   : > { %v7984_v7 = vmul.f32 %v11163_v40, %v7944_v44  ;;  %v8005_v23 = vadd.f32 %v8952_v52, %v7994_v50  ;;  %10837 = vmatprep.subr.mxu1 %v14081_v31  ;;  %v8966_v44 = vld [vmem:[%s14093_s16 + $0x90] sm:$0xff] }
0x1d1e   : > { %10838 = vmatpush3.msra.mxu1 %v8972_v29 }
0x1d1f   : > { %10818 = vmatmul.mubr.msk.f32.gmra.mxu0 %vm2577_vm1, %v8005_v23  ;;  %v7995_v1 = vmul.f32 %v8951_v58, %v7984_v7  ;;  %10839 = vmatprep.subr.mxu1 %v14081_v31 }
0x1d20   : > { %10820 = vmatprep.mubr.msk.f32.mxu0 %vm11295_vm0, %v14081_v31  ;;  %10840 = vmatpush3.msra.mxu1 %v8971_v21 }
0x1d21   : > { %v8006_v56 = vadd.f32 %v8952_v52, %v7995_v1  ;;  %10841 = vmatprep.subr.mxu1 %v14081_v31 }
0x1d22   : > { %10842 = vmatpush3.msra.mxu1 %v8970_v60 }
0x1d23   : > { %10821 = vmatmul.mubr.msk.f32.gmra.mxu0 %vm2577_vm1, %v8006_v56  ;;  %10843 = vmatprep.subr.mxu1 %v14081_v31 }
0x1d24   : > { %10880 = vmatprep.mubr.msk.f32.mxu0 %vm11295_vm0, %v14081_v31  ;;  %10844 = vmatpush3.msra.mxu1 %v8969_v51 }
0x1d25   : > { %10845 = vmatprep.subr.mxu1 %v14081_v31 }
0x1d26   : > { %10846 = vmatpush3.msra.mxu1 %v8968_v45 }
0x1d27   : > { %10847 = vmatprep.subr.mxu1 %v14081_v31 }
0x1d28   : > { %10848 = vmatpush3.msra.mxu1 %v8967_v35 }
0x1d29   : > { %10849 = vmatprep.subr.mxu1 %v14081_v31 }
0x1d2a   : > { %10850 = vmatpush3.msra.mxu1 %v8966_v44 }
0x1d2b   : > { %10851 = vmatprep.subr.mxu1 %v14081_v31 }
0x1d2c   : > { %10852 = vmatpush3.msra.mxu1 %v8965_v14 }
0x1d2d   : > { %10853 = vmatprep.subr.mxu1 %v14081_v31 }
0x1d2e   : > { %10854 = vmatpush3.msra.mxu1 %v8964_v47 }
0x1dd3   : > { %v8101_v37 = vpop.f32.mrf.mxu0 }
0x1dd4   : > { %v13865_v63 = vadd.f32 %v8958_v27, %v8101_v37 }
0x1dd5   : > { %v10810_v55 = vpop.f32.mrf.mxu0 }
0x1dd6   : > { %v13868_v39 = vmul.f32 0.70710677, %v13865_v63 }
0x1dd7   : > { %v8106_v24 = vpop.f32.mrf.mxu0 }
0x1dd8   : > { %v8135_v4 = vand.u32 2147483647, %v13868_v39  ;;  %v13871_v5 = vadd.f32 %v8958_v27, %v8106_v24  ;;  %vm8235_vm2 = vcmp.ge.f32.partialorder %v13868_v39, 0.0 }
0x1dd9   : > { %v10813_v49 = vpop.f32.mrf.mxu0 }
0x1dda   : > { %v8140_v6 = vmul.f32 0.3275911, %v8135_v4  ;;  %v13874_v11 = vmul.f32 0.70710677, %v13871_v5  ;;  %v8205_v38 = vmul.f32 %v8135_v4, %v8135_v4 }
0x1ddb   : > { %v8111_v26 = vpop.f32.mrf.mxu0 }
0x1ddc   : > { %v8145_v25 = vadd.f32 1.0, %v8140_v6  ;;  %v8136_v17 = vand.u32 2147483647, %v13874_v11  ;;  %v13877_v61 = vadd.f32 %v8958_v27, %v8111_v26  ;;  %v8210_v32 = vsub.f32 0.0, %v8205_v38 }
0x1ddd   : > { %v10816_v16 = vpop.f32.mrf.mxu0  ;;  %vm8236_vm8 = vcmp.ge.f32.partialorder %v13874_v11, 0.0 }
0x1dde   : > { %11164 = vrcp.f32 %v8145_v25  ;;  %v8141_v33 = vmul.f32 0.3275911, %v8136_v17  ;;  %v13880_v41 = vmul.f32 0.70710677, %v13877_v61  ;;  %v8206_v59 = vmul.f32 %v8136_v17, %v8136_v17 }
0x1ddf   : > { %v8116_v46 = vpop.f32.mrf.mxu0  ;;  %v8215_v1 = vmul.f32 1.442695, %v8210_v32 }
0x1de0   : > { %v8146_v13 = vadd.f32 1.0, %v8141_v33  ;;  %v13882_v58 = vadd.f32 %v8958_v27, %v8116_v46  ;;  %v8137_v43 = vand.u32 2147483647, %v13880_v41  ;;  %v8211_v56 = vsub.f32 0.0, %v8206_v59 }
0x1de1   : > { %v10819_v3 = vpop.f32.mrf.mxu0  ;;  %vm8237_vm9 = vcmp.ge.f32.partialorder %v13880_v41, 0.0 }
0x1de2   : > { %11166 = vrcp.f32 %v8146_v13  ;;  %v13886_v52 = vmul.f32 0.70710677, %v13882_v58  ;;  %v8142_v9 = vmul.f32 0.3275911, %v8137_v43  ;;  %v8207_v18 = vmul.f32 %v8137_v43, %v8137_v43 }
0x1de3   : > { %v8121_v15 = vpop.f32.mrf.mxu0  ;;  %v8217_v29 = vmul.f32 1.442695, %v8211_v56 }
0x1de4   : > { %v8138_v22 = vand.u32 2147483647, %v13886_v52  ;;  %v13889_v36 = vadd.f32 %v8958_v27, %v8121_v15  ;;  %v8147_v19 = vadd.f32 1.0, %v8142_v9  ;;  %v8212_v21 = vsub.f32 0.0, %v8207_v18 }
0x1de5   : > { %v10822_v48 = vpop.f32.mrf.mxu0  ;;  %vm8238_vm10 = vcmp.ge.f32.partialorder %v13886_v52, 0.0 }
0x1de6   : > { %v8143_v0 = vmul.f32 0.3275911, %v8138_v22  ;;  %v13892_v57 = vmul.f32 0.70710677, %v13889_v36  ;;  %11168 = vrcp.f32 %v8147_v19  ;;  %v8208_v34 = vmul.f32 %v8138_v22, %v8138_v22 }
0x1de7   : > { %v8219_v37 = vmul.f32 1.442695, %v8212_v21 }
0x1de8   : > { %v8148_v28 = vadd.f32 1.0, %v8143_v0  ;;  %v8139_v50 = vand.u32 2147483647, %v13892_v57  ;;  %v8213_v45 = vsub.f32 0.0, %v8208_v34  ;;  %vm8239_vm11 = vcmp.ge.f32.partialorder %v13892_v57, 0.0 }
0x1dea   : > { %11170 = vrcp.f32 %v8148_v28  ;;  %v8144_v40 = vmul.f32 0.3275911, %v8139_v50  ;;  %v8209_v35 = vmul.f32 %v8139_v50, %v8139_v50  ;;  %v8221_v6 = vmul.f32 1.442695, %v8213_v45 }
0x1deb   : > { %v11165_v7 = vpop.eup %11164 }
0x1dec   : > { %v8160_v23 = vmul.f32 1.0614054, %v11165_v7  ;;  %v8149_v30 = vadd.f32 1.0, %v8144_v40  ;;  %v8214_v26 = vsub.f32 0.0, %v8209_v35 }
0x1dee   : > { %v8165_v12 = vadd.f32 -1.4531521, %v8160_v23  ;;  %11172 = vrcp.f32 %v8149_v30  ;;  %v8223_v15 = vmul.f32 1.442695, %v8214_v26 }
0x1def   : > { %v11167_v53 = vpop.eup %11166  ;;  %11174 = vpow2.f32 %v8215_v1 }
0x1df0   : > { %v8170_v10 = vmul.f32 %v11165_v7, %v8165_v12  ;;  %v8161_v8 = vmul.f32 1.0614054, %v11167_v53  ;;  %11176 = vpow2.f32 %v8217_v29 }
0x1df1   : > { %11178 = vpow2.f32 %v8219_v37 }
0x1df2   : > { %v8175_v60 = vadd.f32 1.4214138, %v8170_v10  ;;  %v8166_v51 = vadd.f32 -1.4531521, %v8161_v8  ;;  %11180 = vpow2.f32 %v8221_v6 }
0x1df3   : > { %v11169_v44 = vpop.eup %11168  ;;  %11182 = vpow2.f32 %v8223_v15 }
0x1df4   : > { %v8180_v14 = vmul.f32 %v11165_v7, %v8175_v60  ;;  %v8171_v47 = vmul.f32 %v11167_v53, %v8166_v51  ;;  %v8162_v27 = vmul.f32 1.0614054, %v11169_v44 }
0x1df6   : > { %v8185_v55 = vadd.f32 -0.28449672, %v8180_v14  ;;  %v8176_v24 = vadd.f32 1.4214138, %v8171_v47  ;;  %v8167_v49 = vadd.f32 -1.4531521, %v8162_v27 }
0x1df7   : > { %v11171_v4 = vpop.eup %11170  ;;  %v8125_v14 = vmul.f32 0.5, %v13865_v63 }
0x1df8   : > { %v8190_v25 = vmul.f32 %v11165_v7, %v8185_v55  ;;  %v8181_v17 = vmul.f32 %v11167_v53, %v8176_v24  ;;  %v8163_v16 = vmul.f32 1.0614054, %v11171_v4  ;;  %v8172_v33 = vmul.f32 %v11169_v44, %v8167_v49 }
0x1dfa   : > { %v8195_v46 = vadd.f32 0.2548296, %v8190_v25  ;;  %v8186_v13 = vadd.f32 -0.28449672, %v8181_v17  ;;  %v8168_v43 = vadd.f32 -1.4531521, %v8163_v16 }
0x1dfb   : > { %v11173_v3 = vpop.eup %11172  ;;  %v8177_v9 = vadd.f32 1.4214138, %v8172_v33  ;;  %v8126_v16 = vmul.f32 0.5, %v13871_v5 }
0x1dfc   : > { %v8200_v38 = vmul.f32 %v11165_v7, %v8195_v46  ;;  %v8191_v22 = vmul.f32 %v11167_v53, %v8186_v13  ;;  %v8173_v19 = vmul.f32 %v11171_v4, %v8168_v43  ;;  %v8164_v48 = vmul.f32 1.0614054, %v11173_v3  ;;  %v11175_v0 = vpop.eup %11174 }
0x1dfd   : > { %v8182_v32 = vmul.f32 %v11169_v44, %v8177_v9  ;;  %v11177_v12 = vpop.eup %11176 }
0x1dfe   : > { %v8225_v59 = vmul.f32 %v11175_v0, %v8200_v38  ;;  %v8196_v28 = vadd.f32 0.2548296, %v8191_v22  ;;  %v8178_v50 = vadd.f32 1.4214138, %v8173_v19  ;;  %v8169_v40 = vadd.f32 -1.4531521, %v8164_v48 }
0x1dff   : > { %v8187_v23 = vadd.f32 -0.28449672, %v8182_v32 }
0x1e00   : > { %v8230_v1 = vsub.f32 1.0, %v8225_v59  ;;  %v8201_v56 = vmul.f32 %v11167_v53, %v8196_v28  ;;  %v8183_v30 = vmul.f32 %v11171_v4, %v8178_v50  ;;  %v8174_v18 = vmul.f32 %v11173_v3, %v8169_v40  ;;  %v11179_v53 = vpop.eup %11178 }
0x1e01   : > { %v8192_v34 = vmul.f32 %v11169_v44, %v8187_v23  ;;  %v11181_v26 = vpop.eup %11180  ;;  %v8128_v59 = vmul.f32 0.5, %v13882_v58  ;;  %v8129_v50 = vmul.f32 0.5, %v13889_v36 }
0x1e02   : > { %v8240_v10 = vsub.f32 0.0, %v8230_v1  ;;  %v8226_v8 = vmul.f32 %v11177_v12, %v8201_v56  ;;  %v8188_v7 = vadd.f32 -0.28449672, %v8183_v30  ;;  %v8179_v29 = vadd.f32 1.4214138, %v8174_v18  ;;  %v11183_v9 = vpop.eup %11182 }
0x1e03   : > { %v8197_v21 = vadd.f32 0.2548296, %v8192_v34 }
0x1e04   : > { %v8245_v60 = vsel %vm8235_vm2, %v8230_v1, %v8240_v10  ;;  %v8231_v51 = vsub.f32 1.0, %v8226_v8  ;;  %v8193_v45 = vmul.f32 %v11171_v4, %v8188_v7  ;;  %v8184_v35 = vmul.f32 %v11173_v3, %v8179_v29  ;;  %v8981_v8 = vld [vmem:[%s14097_s12 + $0x1] ss:$0 sm:$0xff] }
0x1e05   : > { %v8250_v47 = vadd.f32 1.0, %v8245_v60  ;;  %v8202_v27 = vmul.f32 %v11169_v44, %v8197_v21 }
0x1e06   : > { %v8241_v37 = vsub.f32 0.0, %v8231_v51  ;;  %v8198_v55 = vadd.f32 0.2548296, %v8193_v45  ;;  %v8189_v24 = vadd.f32 -0.28449672, %v8184_v35 }
0x1e07   : > { %v8255_v49 = vmul.f32 %v8250_v47, %v8125_v14  ;;  %v8227_v6 = vmul.f32 %v11179_v53, %v8202_v27 }
0x1e08   : > { %v8246_v25 = vsel %vm8236_vm8, %v8231_v51, %v8241_v37  ;;  %v8203_v39 = vmul.f32 %v11171_v4, %v8198_v55  ;;  %v8194_v17 = vmul.f32 %v11173_v3, %v8189_v24  ;;  %v8127_v4 = vmul.f32 0.5, %v13877_v61  ;;  %v8491_v24 = vld [vmem:[%s14048_s4 + $0x18] sm:$0xff] }
0x1e09   : > { %v8251_v33 = vadd.f32 1.0, %v8246_v25  ;;  %v8232_v46 = vsub.f32 1.0, %v8227_v6  ;;  %10856 = vmatmul.mubr.f32.vlgmr.msra.gmra.mxu1 %v8255_v49  ;;  %v8490_v49 = vld [vmem:[%s14048_s4 + $0x10] sm:$0xff]  ;;  %v8489_v6 = vld [vmem:[%s14048_s4 + $0x8] sm:$0xff] }
0x1e0a   : > { %v8228_v63 = vmul.f32 %v11181_v26, %v8203_v39  ;;  %v8199_v13 = vadd.f32 0.2548296, %v8194_v17  ;;  %10858 = vmatprep.mubr.msk.f32.mxu1 %vm11295_vm0, %v14081_v31  ;;  %v8488_v26 = vld [vmem:[%s14048_s4] sm:$0xff]  ;;  %s954_s4 = scalar_lea.vmem [#allocation2], %s8682_s1 }
0x1e0b   : > { %v8256_v44 = vmul.f32 %v8251_v33, %v8126_v16  ;;  %v8242_v43 = vsub.f32 0.0, %v8232_v46  ;;  %v8983_v33 = vld [vmem:[%s14106_s3] ss:$0 sm:$0xff]  ;;  %s8588_s5 = sshll.u32 %s954_s4, 4  ;;  %s8575_s3 = scalar_lea.sflag [#allocation3], %s952_s14  ;;  %s8589_s5 = int_to_ptr.vmem [resolvable:$true] %s8588_s5 }
0x1e0c   : > { %v8233_v11 = vsub.f32 1.0, %v8228_v63  ;;  %v8204_v15 = vmul.f32 %v11173_v3, %v8199_v13  ;;  %v8984_v63 = vld [vmem:[%s11452_s27] ss:$0 sm:$0xff]  ;;  %s11201_s7 = scalar_lea.vmem %s8589_s5, 128  ;;  %p11208_p0 = scmp.lt.s32.totalorder %s8589_s5, %s11206_s10 }
0x1e0d   : > { %v8247_v38 = vsel %vm8237_vm9, %v8232_v46, %v8242_v43  ;;  %10859 = vmatmul.mubr.f32.gmra.mxu1 %v8256_v44  ;;  %v8985_v43 = vld [vmem:[%s11462_s25] ss:$0 sm:$0xff]  ;;  %p11202_p11 = scmp.ne.s32.totalorder %s8589_s5, %s11201_s7  ;;  %p11209_p1 = scmp.lt.s32.totalorder %s11207_s0, %s11201_s7 }
0x1e0e   : > { %v8252_v5 = vadd.f32 1.0, %v8247_v38  ;;  %v8243_v22 = vsub.f32 0.0, %v8233_v11  ;;  %v8229_v19 = vmul.f32 %v11183_v9, %v8204_v15  ;;  %10861 = vmatprep.mubr.msk.f32.mxu1 %vm11295_vm0, %v14081_v31 }
0x1e0f   : > { %p11203_p12 = pnand %p11202_p11, %p11507_p5  ;;  %p11210_p2 = por %p11209_p1, %p11208_p0 }
0x1e10   : > { %v8257_v48 = vmul.f32 %v8252_v5, %v8127_v4  ;;  %v8248_v0 = vsel %vm8238_vm10, %v8233_v11, %v8243_v22  ;;  %v8234_v32 = vsub.f32 1.0, %v8229_v19 }
0x1e11   : > { %v8253_v41 = vadd.f32 1.0, %v8248_v0  ;;  %p11204_p13 = pneg %p11203_p12 }
0x1e12   : > { %v8244_v28 = vsub.f32 0.0, %v8234_v32  ;;  %10862 = vmatmul.mubr.f32.gmra.mxu1 %v8257_v48 }
0x1e13   : > { %v8258_v3 = vmul.f32 %v8253_v41, %v8128_v59  ;;  %10864 = vmatprep.mubr.msk.f32.mxu1 %vm11295_vm0, %v14081_v31  ;;  %p11211_p3 = pnand %p11210_p2, %p11204_p13 }
0x1e14   : > { %v8249_v61 = vsel %vm8239_vm11, %v8234_v32, %v8244_v28 }
0x1e15   : > { %v8254_v40 = vadd.f32 1.0, %v8249_v61 }
0x1e16   : > { %10865 = vmatmul.mubr.f32.gmra.mxu1 %v8258_v3 }
0x1e17   : > { %v8259_v52 = vmul.f32 %v8254_v40, %v8129_v50  ;;  %10867 = vmatprep.mubr.msk.f32.mxu1 %vm11295_vm0, %v14081_v31 }
0x1e1a   : > { %10868 = vmatmul.mubr.f32.gmra.mxu1 %v8259_v52 }
0x1ec9   : > { %v8343_v58 = vpop.f32.mrf.mxu1 }
0x1eca   : > { %v8367_v45 = vadd.f32 %v8343_v58, %v13769_v20 }
0x1ecb   : > { %v10857_v23 = vpop.f32.mrf.mxu1 }
0x1ecd   : > { %v8348_v1 = vpop.f32.mrf.mxu1 }
0x1ece   : > { %v8368_v60 = vadd.f32 %v8348_v1, %v13774_v54 }
0x1ecf   : > { %v10860_v56 = vpop.f32.mrf.mxu1 }
0x1ed2   : > { %v8353_v30 = vpop.f32.mrf.mxu1 }
0x1ed3   : > { %v8369_v29 = vadd.f32 %v8353_v30, %v13779_v2  ;;  %v8385_v2 = vld [vmem:[%s14105_s26] sm:$0xff] }
0x1ed4   : > { %v10863_v57 = vpop.f32.mrf.mxu1 }
0x1ed5   : > { %v8382_v35 = vadd.f32 %v8981_v8, %v8369_v29 }
0x1ed6   : > { %v8358_v18 = vpop.f32.mrf.mxu1 }
0x1ed7   : > { %v8370_v10 = vadd.f32 %v8358_v18, %v13784_v42  ;;  %v8381_v42 = vadd.f32 %v8981_v8, %v8368_v60 }
0x1ed8   : > { %v10866_v12 = vpop.f32.mrf.mxu1 }
0x1ed9   : > { %v8383_v51 = vadd.f32 %v8981_v8, %v8370_v10 }
0x1eda   : > { %v8363_v34 = vpop.f32.mrf.mxu1 }
0x1edb   : > { %v8371_v36 = vadd.f32 %v8363_v34, %v13789_v62  ;;  %v8380_v62 = vadd.f32 %v8981_v8, %v8367_v45 }
0x1edc   : > { %v10869_v7 = vpop.f32.mrf.mxu1 }
0x1edd   : > { %v8384_v21 = vadd.f32 %v8981_v8, %v8371_v36 }
0x1edf   : > { %10871 = vmatpush3.msra.mxu0 %v8384_v21 }
0x1ee0   : > { %10872 = vmatprep.subr.mxu0 %v14081_v31 }
0x1ee1   : > { %10873 = vmatpush3.msra.mxu0 %v8383_v51 }
0x1ee2   : > { %10874 = vmatprep.subr.mxu0 %v14081_v31 }
0x1ee3   : > { %10875 = vmatpush3.msra.mxu0 %v8382_v35 }
0x1ee4   : > { %10876 = vmatprep.subr.mxu0 %v14081_v31 }
0x1ee5   : > { %10877 = vmatpush3.msra.mxu0 %v8381_v42 }
0x1ee6   : > { %10878 = vmatprep.subr.mxu0 %v14081_v31 }
0x1ee7   : > { %10879 = vmatpush3.msra.mxu0 %v8380_v62 }
0x1ee8   : > { %10881 = vmatmul.mubr.msk.f32.vlgmr.msra.gmra.mxu0 %vm3024_vm4, %v8385_v2  ;;  %10883 = vmatprep.subr.mxu0 %v14081_v31 }
0x1ee9   : > { %10891 = vmatprep.mubr.msk.f32.mxu0 %vm11295_vm0, %v14081_v31  ;;  %10884 = vmatpush3.msra.mxu0 %v8491_v24  ;;  %vm8572_vm0 = vcmask 80896  }
0x1eea   : > { %10885 = vmatprep.subr.mxu0 %v14081_v31 }
0x1eeb   : > { %10886 = vmatpush3.msra.mxu0 %v8490_v49 }
0x1eec   : > { %10887 = vmatprep.subr.mxu0 %v14081_v31 }
0x1eed   : > { %10888 = vmatpush3.msra.mxu0 %v8489_v6 }
0x1eee   : > { %10889 = vmatprep.subr.mxu0 %v14081_v31 }
0x1eef   : > { %10890 = vmatpush3.msra.mxu0 %v8488_v26 }
0x1fa8   : > { %v8455_v20 = vpop.f32.mrf.mxu0 }
0x1fa9   : > { %v8461_v54 = vsel %vm2577_vm1, %v8455_v20, 0.0 }
0x1faa   : > { %8462 = vadd.xlane.f32.xlu0 %v8461_v54  ;;  %v10882_v14 = vpop.f32.mrf.mxu0 }
0x2033   : > { %v8463_v47 = vpop.xlane.xlu0 %8462 }
0x2034   : > { %v8464_v27 = vmul.f32 0.03125, %v8463_v47 }
0x2036   : > { %v8465_v53 = vsub.f32 %v8455_v20, %v8464_v27 }
0x2038   : > { %v8466_v37 = vmul.f32 %v8465_v53, %v8465_v53 }
0x203a   : > { %v8467_v55 = vsel %vm2577_vm1, %v8466_v37, 0.0 }
0x203b   : > { %8468 = vadd.xlane.f32.xlu1 %v8467_v55 }
0x20c4   : > { %v8469_v25 = vpop.xlane.xlu1 %8468 }
0x20c5   : > { %v8470_v39 = vmul.f32 0.03125, %v8469_v25 }
0x20c7   : > { %v8471_v17 = vadd.f32 1e-06, %v8470_v39 }
0x20c9   : > { %11184 = vrsqrt.f32 %v8471_v17 }
0x20d6   : > { %v11185_v16 = vpop.eup %11184 }
0x20d7   : > { %v8473_v46 = vmul.f32 %v11185_v16, %v8465_v53 }
0x20d9   : > { %v8480_v13 = vmul.f32 %v8983_v33, %v8473_v46 }
0x20db   : > { %v8487_v44 = vadd.f32 %v8984_v63, %v8480_v13 }
0x20dd   : > { %10892 = vmatmul.mubr.msk.f32.vlgmr.msra.gmra.mxu0 %vm2577_vm1, %v8487_v44 }
0x219d   : > { %v8568_v31 = vpop.f32.mrf.mxu0 }
0x219e   : > { %v8569_v9 = vadd.f32 %v8985_v43, %v8568_v31 }
0x219f   : > { %v10893_v11 = vpop.f32.mrf.mxu0 }
0x21a0   : > { %8573 = vst.msk [vmem:[%s954_s4] sm:$0xff] %vm8572_vm0, %v8569_v9 }
0x21a1   : > { %11214 = shalt.err (!%p11211_p3)
}
0x21a2   : > { %s11215_s4 = scalar_lea.hbm %s13944_s6, 128  ;;  %s11219_s2 = scalar_lea.hbm %s14107_s8, 256 }
0x21a3   : > { %p11216_p4 = scmp.ne.s32.totalorder %s13944_s6, %s11215_s4  ;;  %p11220_p9 = scmp.lt.s32.totalorder %s13944_s6, %s14107_s8 }
0x21a4   : > { %p11221_p10 = scmp.lt.s32.totalorder %s11219_s2, %s11215_s4 }
0x21a5   : > { %p11217_p7 = pnand %p11216_p4, %p11507_p5 }
0x21a6   : > { %p11222_p11 = por %p11221_p10, %p11220_p9 }
0x21a7   : > { %p11218_p8 = pneg %p11217_p7 }
0x21a9   : > { %p11223_p12 = pnand %p11222_p11, %p11218_p8 }
0x21ab   : > { %11226 = shalt.err (!%p11223_p12)
}
0x21ac   : > { %10905 = dma.vmem_to_hbm [thread:$0]  (%p11507_p5), %s8589_s5, 128, %s13944_s6, %s8575_s3  }
0x21ad PF: > { %p10911_p13 = scmp.ge.s32.totalorder %s11261_s28, 2  ;;  %s8600_s1 = sand.u32 1, %s11249_s22  }
0x21ae   : > { %s8601_s7 = scalar_lea.sflag [#allocation3], %s8600_s1 }
0x21af   : > { %p10908_p0 = pnand %p10911_p13, %p11511_p6 }
0x21b1   : > { %p10909_p1 = pneg %p10908_p0 }
0x21b3   : > { %11244 = dma.done.wait (%p10909_p1), %s8601_s7, 128  }
0x21b4   : > { %11246 = vsyncadd (%p10909_p1), %s8601_s7, 4294967168  ;;  %s14110_s28 = sld [smem:[#allocation29_spill]]  ;;  %s14113_s22 = smov %s11253_s23 }
0x21b5   : > { %s14111_s10 = sld [smem:[#allocation28_spill]] }
0x21b6   : > { %s14112_s26 = sld [smem:[#allocation30_spill]] }
0x21ba   : > { %p73_p2 = scmp.ge.s32.totalorder %s14110_s28, 4  }
0x21bb   : > { %s14114_s23 = smov %s14111_s10 }
0x21bc   :  { %75 = sbr.rel (!%p73_p2) target bundleno = 65 (0x41), region = 238 }
0x21c1   :  { %8606 = vsyncpa [#allocation3], 1 }
0x21c2   :  { %8608 = vsyncpa [#allocation3 + $0x1], 1 }

</bundles_post_ra>
